<compile_context>
chip_gen: v7x
topology: tpu7x:2x2x1
jax: 0.10.0
libtpu: 0.0.40
codegen_flags: <defaults>
</compile_context>

<pallas_src>
import jax
import jax.numpy as jnp
from jax.experimental import pallas as pl
from jax.experimental.pallas import tpu as pltpu

BN_EPS = 1e-5

KERNEL_SIZES = (5, 5, 3)          # conv kernel sizes
CHANNELS = (1, 8, 16, 32)         # conv channel progression
LC_OUT_CHANNELS = 32              # the `32` arg of LocallyConnected
LC_KERNEL = 16                    # the `16` arg of LocallyConnected
FC1_UNITS = 64


def _vmem_spec():
    return pl.BlockSpec(memory_space=pltpu.MemorySpace.VMEM)


# --------------------------------------------------------------------------------
# Fused Conv2d('same') + BatchNorm2d (batch statistics) + ReLU + MaxPool2d(2, 2)
# --------------------------------------------------------------------------------
def conv_block_kernel(q_ref, w_ref, g_ref, b_ref, o_ref):
    """q_ref : (4*M, K) im2col patches — the four 2x2-pool quadrants stacked along the
               row axis (quadrant-major; rows within a quadrant in (n, h, w) order),
               M = N*Ho*Wo.
       w_ref : (K, Cout) conv weight, K ordered as (kh, kw, Cin).
       g_ref / b_ref : (1, Cout) BatchNorm gamma / beta.
       o_ref : (M, Cout) pooled output.
       The conv bias is omitted on purpose: with batch-statistics BN it is cancelled
       exactly by the mean subtraction."""
    m = o_ref.shape[0]
    # Single MXU matmul for all four pooling quadrants (better MXU fill than 4 small ones).
    y = jnp.dot(q_ref[...], w_ref[...], preferred_element_type=jnp.float32)   # (4M, Cout)

    # BatchNorm2d batch statistics over all (N, H, W) positions, biased variance.
    count = float(y.shape[0])
    mean = y.sum(axis=0, keepdims=True) / count
    var = (y * y).sum(axis=0, keepdims=True) / count - mean * mean
    var = jnp.maximum(var, 0.0)                        # guard against fp cancellation
    scale = g_ref[...] * jax.lax.rsqrt(var + BN_EPS)
    shift = b_ref[...] - mean * scale

    # BN affine + ReLU on the full pre-pool map, then 2x2 max-pool = elementwise max
    # across the four stacked quadrants (static, sublane-aligned slices: m % 8 == 0).
    z = jnp.maximum(y * scale + shift, 0.0)
    o_ref[...] = jnp.maximum(jnp.maximum(z[0:m], z[m:2 * m]),
                             jnp.maximum(z[2 * m:3 * m], z[3 * m:4 * m]))


def conv_bn_relu_pool(x_nhwc, w_mat, gamma, beta, k):
    """One conv block.  Wrapper-side glue builds the quadrant-stacked im2col matrix
    (pure data movement, fused by XLA under the outer jit); the kernel does the rest.
    Assumes even H and W (true at every stage for 16x16 input)."""
    n, h, w, cin = x_nhwc.shape
    cout = w_mat.shape[1]
    pad = k // 2
    xp = jnp.pad(x_nhwc, ((0, 0), (pad, pad), (pad, pad), (0, 0)))
    cols = [xp[:, di:di + h, dj:dj + w, :] for di in range(k) for dj in range(k)]
    patches = jnp.concatenate(cols, axis=-1)                       # (n, h, w, k*k*cin)
    kk = k * k * cin
    hp, wp = h // 2, w // 2
    m = n * hp * wp
    quads = jnp.concatenate(
        [patches[:, a::2, b::2, :].reshape(m, kk) for a in (0, 1) for b in (0, 1)],
        axis=0)                                                    # (4M, K)
    # TODO(synk): if batch / resolution grows, add a grid over the 4M row axis (BN then
    # needs a two-pass or running-sum structure) and set vmem_limit_bytes explicitly.
    out = pl.pallas_call(
        conv_block_kernel,
        out_shape=jax.ShapeDtypeStruct((m, cout), jnp.float32),
        in_specs=[_vmem_spec()] * 4,
        out_specs=_vmem_spec(),
    )(quads, w_mat, gamma.reshape(1, cout), beta.reshape(1, cout))
    return out.reshape(n, hp, wp, cout)


# --------------------------------------------------------------------------------
# Fused LocallyConnected ('same', unshared weights) + flatten + fc1 + ReLU + fc2
# --------------------------------------------------------------------------------
def lc_mlp_kernel(p_ref, w_ref, lb_ref, w1_ref, b1_ref, w2_ref, b2_ref, o_ref):
    """p_ref : (P, N, K)    bf16 LC patches, one (N, K) block per output position.
       w_ref : (P, Cout, K) bf16 unshared LC weights, K lane-dense (no lane padding).
       lb_ref: (P, 1, Cout) f32 LC bias.
       w1_ref: (P*Cout, 64) f32 fc1 weight with rows pre-permuted to (position, channel)
               order so each position's block is a contiguous, sublane-aligned row slice.
       b1_ref: (1, 64), w2_ref: (64, n_classes), b2_ref: (1, n_classes).
       o_ref : (N, n_classes) f32 logits."""
    num_pos = p_ref.shape[0]
    cout = w_ref.shape[1]
    w1 = w1_ref[...]                       # (P*Cout, 64), loaded once
    h1 = b1_ref[...]                       # (1, 64); broadcasts up to (N, 64)
    for p in range(num_pos):               # static unroll, P = h'*w' is small
        # LC output for position p: (N, K) x (Cout, K)^T, bf16 operands, f32 accumulate.
        lc_p = jax.lax.dot_general(
            p_ref[p], w_ref[p],
            dimension_numbers=(((1,), (1,)), ((), ())),
            preferred_element_type=jnp.float32) + lb_ref[p]            # (N, Cout)
        # flatten + fc1, one position-block of fc1 rows at a time (no in-kernel transpose).
        h1 = h1 + jnp.dot(lc_p, w1[p * cout:(p + 1) * cout, :],
                          preferred_element_type=jnp.float32)
    h1 = jnp.maximum(h1, 0.0)                                          # ReLU(fc1)
    o_ref[...] = (jnp.dot(h1, w2_ref[...], preferred_element_type=jnp.float32)
                  + b2_ref[...])


def _lc_patches(f_nhwc, k):
    """Build (P, N, k*k*C) 'same'-padded patches for the locally-connected layer with
    one zeros tensor + P sub-window writes: the k x k window only overlaps the real
    h' x w' feature map in a small region, everything else is padding zeros."""
    n, hp, wp, c = f_nhwc.shape
    pt = (k - 1) // 2                      # asymmetric 'same' padding: (pt, k-1-pt)
    num_pos = hp * wp
    patches = jnp.zeros((num_pos, n, k, k, c), jnp.float32)
    for i in range(hp):
        for j in range(wp):
            p = i * wp + j
            r_lo, r_hi = max(0, i - pt), min(hp, i + k - pt)
            s_lo, s_hi = max(0, j - pt), min(wp, j + k - pt)
            patches = patches.at[
                p, :,
                r_lo - i + pt:r_hi - i + pt,
                s_lo - j + pt:s_hi - j + pt, :].set(f_nhwc[:, r_lo:r_hi, s_lo:s_hi, :])
    return patches.reshape(num_pos, n, k * k * c)


# --------------------------------------------------------------------------------
# Full forward (jitted once; all glue fuses, 4 Pallas custom calls total)
# --------------------------------------------------------------------------------
def _forward(params, x_nchw):
    x = jnp.transpose(x_nchw, (0, 2, 3, 1)).astype(jnp.float32)        # NCHW -> NHWC
    for i, k in enumerate(KERNEL_SIZES):
        x = conv_bn_relu_pool(x, params["conv_w"][i],
                              params["bn_g"][i], params["bn_b"][i], k)
    n = x.shape[0]
    n_classes = params["fc2_w"].shape[1]
    # LC patches: bf16 halves the only non-trivial activation stream into the kernel.
    patches = _lc_patches(x, LC_KERNEL).astype(jnp.bfloat16)           # (P, N, K)
    logits = pl.pallas_call(
        lc_mlp_kernel,
        out_shape=jax.ShapeDtypeStruct((n, n_classes), jnp.float32),
        in_specs=[_vmem_spec()] * 7,
        out_specs=_vmem_spec(),
    )(patches, params["lc_w_pck"], params["lc_b_pck"],
      params["fc1_w_perm"], params["fc1_b"], params["fc2_w"], params["fc2_b"])
    return logits


class LcClfDebugPallas:
    def __init__(self, input_shape, class_enums, key):
        h, w = input_shape
        self.class_names = list(class_enums)
        self.n_classes = len(class_enums)
        keys = iter(jax.random.split(key, 16))

        # Conv stacks (synthetic deterministic init).  Conv bias is not created: it is
        # a mathematical no-op in front of batch-statistics BatchNorm.
        conv_w, bn_g, bn_b = [], [], []
        for i, k in enumerate(KERNEL_SIZES):
            cin, cout = CHANNELS[i], CHANNELS[i + 1]
            fan_in = k * k * cin
            w4 = jax.random.normal(next(keys), (k, k, cin, cout), jnp.float32)
            conv_w.append((w4 / jnp.sqrt(fan_in)).reshape(fan_in, cout))
            bn_g.append(jnp.ones((cout,), jnp.float32))     # BatchNorm2d default init
            bn_b.append(jnp.zeros((cout,), jnp.float32))
            h //= 2
            w //= 2
        self.hp, self.wp = h, w

        # Locally connected layer (unshared weights per spatial position).
        num_pos = h * w
        kk_lc = LC_KERNEL * LC_KERNEL * CHANNELS[-1]
        lc_w = (jax.random.normal(next(keys), (num_pos, kk_lc, LC_OUT_CHANNELS),
                                  jnp.float32) / jnp.sqrt(kk_lc))
        lc_b = 0.01 * jax.random.normal(next(keys), (num_pos, LC_OUT_CHANNELS),
                                        jnp.float32)

        # MLP head: fc1 = Linear(h*w*32, 64), fc2 = Linear(64, n_classes).
        fc1_in = num_pos * LC_OUT_CHANNELS
        fc1_w = jax.random.normal(next(keys), (fc1_in, FC1_UNITS),
                                  jnp.float32) / jnp.sqrt(fc1_in)
        fc1_b = 0.01 * jax.random.normal(next(keys), (FC1_UNITS,), jnp.float32)
        fc2_w = jax.random.normal(next(keys), (FC1_UNITS, self.n_classes),
                                  jnp.float32) / 8.0
        fc2_b = 0.01 * jax.random.normal(next(keys), (self.n_classes,), jnp.float32)

        # Kernel-layout derivations (one-time, at init):
        #  * LC weight stored lane-dense as (P, Cout, K) in bf16 (K = 8192 on lanes).
        #  * fc1 rows permuted from torch's NCHW-flatten order (c*P + p) to the kernel's
        #    (p*Cout + c) order so per-position blocks are contiguous row slices.
        lc_w_pck = jnp.transpose(lc_w, (0, 2, 1)).astype(jnp.bfloat16)
        fc1_w_perm = (fc1_w.reshape(LC_OUT_CHANNELS, num_pos, FC1_UNITS)
                      .transpose(1, 0, 2).reshape(fc1_in, FC1_UNITS))

        self.params = dict(
            conv_w=conv_w, bn_g=bn_g, bn_b=bn_b,
            lc_w_pck=lc_w_pck,
            lc_b_pck=lc_b.reshape(num_pos, 1, LC_OUT_CHANNELS),
            fc1_w_perm=fc1_w_perm,
            fc1_b=fc1_b.reshape(1, FC1_UNITS),
            fc2_w=fc2_w,
            fc2_b=fc2_b.reshape(1, self.n_classes),
        )
        # Reference-layout copies kept for introspection / get_weights()-style access.
        self.lc_w, self.lc_b, self.fc1_w = lc_w, lc_b, fc1_w

        self._jit_forward = jax.jit(_forward)

    def __call__(self, x_nchw):
        return self._jit_forward(self.params, x_nchw)

    def predict_from_scores(self, scores):
        return jnp.argmax(scores, axis=1)

    def predict(self, x_nchw):
        return jnp.argmax(self(x_nchw), axis=1)

    def get_weights(self):
        return self.lc_w


if __name__ == "__main__":
    key = jax.random.PRNGKey(0)
    k_x, k_params = jax.random.split(key)

    # Small shapes consistent with the module: batch=2, 1 input channel, 16x16 image.
    N, C, H, W = 2, 1, 16, 16
    x = jax.random.normal(k_x, (N, C, H, W), dtype=jnp.float32)
    class_enums = ["A", "B", "C", "D", "E"]

    model = LcClfDebugPallas((H, W), class_enums, k_params)
    logits = jax.block_until_ready(model(x))
    preds = jax.block_until_ready(model.predict_from_scores(logits))

    assert logits.shape == (N, len(class_enums))
    assert logits.dtype == jnp.float32
    assert preds.shape == (N,)
    assert bool(jnp.all(jnp.isfinite(logits)))
    print("KERNEL_OK")
</pallas_src>

<mosaic_0001>
module attributes {stable_mosaic.version = 11 : i64} {
  func.func @conv_block_kernel(%arg0: memref<512x25xf32, #tpu.memory_space<vmem>>, %arg1: memref<25x8xf32, #tpu.memory_space<vmem>>, %arg2: memref<1x8xf32, #tpu.memory_space<vmem>>, %arg3: memref<1x8xf32, #tpu.memory_space<vmem>>, %arg4: memref<128x8xf32, #tpu.memory_space<vmem>>) attributes {dimension_semantics = [], scalar_prefetch = 0 : i64, scratch_operands = 0 : i64, tpu.core_type = #tpu.core_type<tc>} {
    %c0 = arith.constant 0 : index
    %c0_0 = arith.constant 0 : index
    %0 = vector.load %arg0[%c0, %c0_0] : memref<512x25xf32, #tpu.memory_space<vmem>>, vector<512x25xf32>
    %c0_1 = arith.constant 0 : index
    %c0_2 = arith.constant 0 : index
    %1 = vector.load %arg1[%c0_1, %c0_2] : memref<25x8xf32, #tpu.memory_space<vmem>>, vector<25x8xf32>
    %cst = arith.constant dense<0.000000e+00> : vector<512x8xf32>
    %2 = tpu.matmul %0, %1, %cst {dimension_numbers = #tpu.dot_dimension_numbers<[1], [0], [0], [1], [0, 0, 1, 1], [], []>} : vector<512x25xf32>, vector<25x8xf32>, vector<512x8xf32> -> vector<512x8xf32>
    %cst_3 = arith.constant dense<0.000000e+00> : vector<8xf32>
    %3 = vector.multi_reduction <add>, %2, %cst_3 [0] : vector<512x8xf32> to vector<8xf32>
    %4 = vector.shape_cast %3 : vector<8xf32> to vector<1x8xf32>
    %cst_4 = arith.constant 5.120000e+02 : f32
    %5 = vector.broadcast %cst_4 : f32 to vector<1x8xf32>
    %6 = arith.divf %4, %5 : vector<1x8xf32>
    %7 = arith.mulf %2, %2 : vector<512x8xf32>
    %cst_5 = arith.constant dense<0.000000e+00> : vector<8xf32>
    %8 = vector.multi_reduction <add>, %7, %cst_5 [0] : vector<512x8xf32> to vector<8xf32>
    %9 = vector.shape_cast %8 : vector<8xf32> to vector<1x8xf32>
    %cst_6 = arith.constant 5.120000e+02 : f32
    %10 = vector.broadcast %cst_6 : f32 to vector<1x8xf32>
    %11 = arith.divf %9, %10 : vector<1x8xf32>
    %12 = arith.mulf %6, %6 : vector<1x8xf32>
    %13 = arith.subf %11, %12 : vector<1x8xf32>
    %cst_7 = arith.constant 0.000000e+00 : f32
    %14 = vector.broadcast %cst_7 : f32 to vector<1x8xf32>
    %15 = arith.maximumf %13, %14 : vector<1x8xf32>
    %c0_8 = arith.constant 0 : index
    %c0_9 = arith.constant 0 : index
    %16 = vector.load %arg2[%c0_8, %c0_9] : memref<1x8xf32, #tpu.memory_space<vmem>>, vector<1x8xf32>
    %cst_10 = arith.constant 9.99999974E-6 : f32
    %17 = vector.broadcast %cst_10 : f32 to vector<1x8xf32>
    %18 = arith.addf %15, %17 : vector<1x8xf32>
    %19 = math.rsqrt %18 : vector<1x8xf32>
    %20 = arith.mulf %16, %19 : vector<1x8xf32>
    %c0_11 = arith.constant 0 : index
    %c0_12 = arith.constant 0 : index
    %21 = vector.load %arg3[%c0_11, %c0_12] : memref<1x8xf32, #tpu.memory_space<vmem>>, vector<1x8xf32>
    %22 = arith.mulf %6, %20 : vector<1x8xf32>
    %23 = arith.subf %21, %22 : vector<1x8xf32>
    %24 = vector.broadcast %20 : vector<1x8xf32> to vector<512x8xf32>
    %25 = arith.mulf %2, %24 : vector<512x8xf32>
    %26 = vector.broadcast %23 : vector<1x8xf32> to vector<512x8xf32>
    %27 = arith.addf %25, %26 : vector<512x8xf32>
    %cst_13 = arith.constant 0.000000e+00 : f32
    %28 = vector.broadcast %cst_13 : f32 to vector<512x8xf32>
    %29 = arith.maximumf %27, %28 : vector<512x8xf32>
    %30 = vector.extract_strided_slice %29 {offsets = [0, 0], sizes = [128, 8], strides = [1, 1]} : vector<512x8xf32> to vector<128x8xf32>
    %31 = vector.extract_strided_slice %29 {offsets = [128, 0], sizes = [128, 8], strides = [1, 1]} : vector<512x8xf32> to vector<128x8xf32>
    %32 = arith.maximumf %30, %31 : vector<128x8xf32>
    %33 = vector.extract_strided_slice %29 {offsets = [256, 0], sizes = [128, 8], strides = [1, 1]} : vector<512x8xf32> to vector<128x8xf32>
    %34 = vector.extract_strided_slice %29 {offsets = [384, 0], sizes = [128, 8], strides = [1, 1]} : vector<512x8xf32> to vector<128x8xf32>
    %35 = arith.maximumf %33, %34 : vector<128x8xf32>
    %36 = arith.maximumf %32, %35 : vector<128x8xf32>
    %c0_14 = arith.constant 0 : index
    %c0_15 = arith.constant 0 : index
    %37 = vector.load %arg4[%c0_14, %c0_15] : memref<128x8xf32, #tpu.memory_space<vmem>>, vector<128x8xf32>
    tpu.vector_store %arg4[%c0_14, %c0_15], %36 {strides = array<i32>} : memref<128x8xf32, #tpu.memory_space<vmem>>, vector<128x8xf32>,
    return
  }
}

module attributes {stable_mosaic.version = 11 : i64} {
  func.func @conv_block_kernel(%arg0: memref<128x200xf32, #tpu.memory_space<vmem>>, %arg1: memref<200x16xf32, #tpu.memory_space<vmem>>, %arg2: memref<1x16xf32, #tpu.memory_space<vmem>>, %arg3: memref<1x16xf32, #tpu.memory_space<vmem>>, %arg4: memref<32x16xf32, #tpu.memory_space<vmem>>) attributes {dimension_semantics = [], scalar_prefetch = 0 : i64, scratch_operands = 0 : i64, tpu.core_type = #tpu.core_type<tc>} {
    %c0 = arith.constant 0 : index
    %c0_0 = arith.constant 0 : index
    %0 = vector.load %arg0[%c0, %c0_0] : memref<128x200xf32, #tpu.memory_space<vmem>>, vector<128x200xf32>
    %c0_1 = arith.constant 0 : index
    %c0_2 = arith.constant 0 : index
    %1 = vector.load %arg1[%c0_1, %c0_2] : memref<200x16xf32, #tpu.memory_space<vmem>>, vector<200x16xf32>
    %cst = arith.constant dense<0.000000e+00> : vector<128x16xf32>
    %2 = tpu.matmul %0, %1, %cst {dimension_numbers = #tpu.dot_dimension_numbers<[1], [0], [0], [1], [0, 0, 1, 1], [], []>} : vector<128x200xf32>, vector<200x16xf32>, vector<128x16xf32> -> vector<128x16xf32>
    %cst_3 = arith.constant dense<0.000000e+00> : vector<16xf32>
    %3 = vector.multi_reduction <add>, %2, %cst_3 [0] : vector<128x16xf32> to vector<16xf32>
    %4 = vector.shape_cast %3 : vector<16xf32> to vector<1x16xf32>
    %cst_4 = arith.constant 1.280000e+02 : f32
    %5 = vector.broadcast %cst_4 : f32 to vector<1x16xf32>
    %6 = arith.divf %4, %5 : vector<1x16xf32>
    %7 = arith.mulf %2, %2 : vector<128x16xf32>
    %cst_5 = arith.constant dense<0.000000e+00> : vector<16xf32>
    %8 = vector.multi_reduction <add>, %7, %cst_5 [0] : vector<128x16xf32> to vector<16xf32>
    %9 = vector.shape_cast %8 : vector<16xf32> to vector<1x16xf32>
    %cst_6 = arith.constant 1.280000e+02 : f32
    %10 = vector.broadcast %cst_6 : f32 to vector<1x16xf32>
    %11 = arith.divf %9, %10 : vector<1x16xf32>
    %12 = arith.mulf %6, %6 : vector<1x16xf32>
    %13 = arith.subf %11, %12 : vector<1x16xf32>
    %cst_7 = arith.constant 0.000000e+00 : f32
    %14 = vector.broadcast %cst_7 : f32 to vector<1x16xf32>
    %15 = arith.maximumf %13, %14 : vector<1x16xf32>
    %c0_8 = arith.constant 0 : index
    %c0_9 = arith.constant 0 : index
    %16 = vector.load %arg2[%c0_8, %c0_9] : memref<1x16xf32, #tpu.memory_space<vmem>>, vector<1x16xf32>
    %cst_10 = arith.constant 9.99999974E-6 : f32
    %17 = vector.broadcast %cst_10 : f32 to vector<1x16xf32>
    %18 = arith.addf %15, %17 : vector<1x16xf32>
    %19 = math.rsqrt %18 : vector<1x16xf32>
    %20 = arith.mulf %16, %19 : vector<1x16xf32>
    %c0_11 = arith.constant 0 : index
    %c0_12 = arith.constant 0 : index
    %21 = vector.load %arg3[%c0_11, %c0_12] : memref<1x16xf32, #tpu.memory_space<vmem>>, vector<1x16xf32>
    %22 = arith.mulf %6, %20 : vector<1x16xf32>
    %23 = arith.subf %21, %22 : vector<1x16xf32>
    %24 = vector.broadcast %20 : vector<1x16xf32> to vector<128x16xf32>
    %25 = arith.mulf %2, %24 : vector<128x16xf32>
    %26 = vector.broadcast %23 : vector<1x16xf32> to vector<128x16xf32>
    %27 = arith.addf %25, %26 : vector<128x16xf32>
    %cst_13 = arith.constant 0.000000e+00 : f32
    %28 = vector.broadcast %cst_13 : f32 to vector<128x16xf32>
    %29 = arith.maximumf %27, %28 : vector<128x16xf32>
    %30 = vector.extract_strided_slice %29 {offsets = [0, 0], sizes = [32, 16], strides = [1, 1]} : vector<128x16xf32> to vector<32x16xf32>
    %31 = vector.extract_strided_slice %29 {offsets = [32, 0], sizes = [32, 16], strides = [1, 1]} : vector<128x16xf32> to vector<32x16xf32>
    %32 = arith.maximumf %30, %31 : vector<32x16xf32>
    %33 = vector.extract_strided_slice %29 {offsets = [64, 0], sizes = [32, 16], strides = [1, 1]} : vector<128x16xf32> to vector<32x16xf32>
    %34 = vector.extract_strided_slice %29 {offsets = [96, 0], sizes = [32, 16], strides = [1, 1]} : vector<128x16xf32> to vector<32x16xf32>
    %35 = arith.maximumf %33, %34 : vector<32x16xf32>
    %36 = arith.maximumf %32, %35 : vector<32x16xf32>
    %c0_14 = arith.constant 0 : index
    %c0_15 = arith.constant 0 : index
    %37 = vector.load %arg4[%c0_14, %c0_15] : memref<32x16xf32, #tpu.memory_space<vmem>>, vector<32x16xf32>
    tpu.vector_store %arg4[%c0_14, %c0_15], %36 {strides = array<i32>} : memref<32x16xf32, #tpu.memory_space<vmem>>, vector<32x16xf32>,
    return
  }
}

module attributes {stable_mosaic.version = 11 : i64} {
  func.func @conv_block_kernel(%arg0: memref<32x144xf32, #tpu.memory_space<vmem>>, %arg1: memref<144x32xf32, #tpu.memory_space<vmem>>, %arg2: memref<1x32xf32, #tpu.memory_space<vmem>>, %arg3: memref<1x32xf32, #tpu.memory_space<vmem>>, %arg4: memref<8x32xf32, #tpu.memory_space<vmem>>) attributes {dimension_semantics = [], scalar_prefetch = 0 : i64, scratch_operands = 0 : i64, tpu.core_type = #tpu.core_type<tc>} {
    %c0 = arith.constant 0 : index
    %c0_0 = arith.constant 0 : index
    %0 = vector.load %arg0[%c0, %c0_0] : memref<32x144xf32, #tpu.memory_space<vmem>>, vector<32x144xf32>
    %c0_1 = arith.constant 0 : index
    %c0_2 = arith.constant 0 : index
    %1 = vector.load %arg1[%c0_1, %c0_2] : memref<144x32xf32, #tpu.memory_space<vmem>>, vector<144x32xf32>
    %cst = arith.constant dense<0.000000e+00> : vector<32x32xf32>
    %2 = tpu.matmul %0, %1, %cst {dimension_numbers = #tpu.dot_dimension_numbers<[1], [0], [0], [1], [0, 0, 1, 1], [], []>} : vector<32x144xf32>, vector<144x32xf32>, vector<32x32xf32> -> vector<32x32xf32>
    %cst_3 = arith.constant dense<0.000000e+00> : vector<32xf32>
    %3 = vector.multi_reduction <add>, %2, %cst_3 [0] : vector<32x32xf32> to vector<32xf32>
    %4 = vector.shape_cast %3 : vector<32xf32> to vector<1x32xf32>
    %cst_4 = arith.constant 3.200000e+01 : f32
    %5 = vector.broadcast %cst_4 : f32 to vector<1x32xf32>
    %6 = arith.divf %4, %5 : vector<1x32xf32>
    %7 = arith.mulf %2, %2 : vector<32x32xf32>
    %cst_5 = arith.constant dense<0.000000e+00> : vector<32xf32>
    %8 = vector.multi_reduction <add>, %7, %cst_5 [0] : vector<32x32xf32> to vector<32xf32>
    %9 = vector.shape_cast %8 : vector<32xf32> to vector<1x32xf32>
    %cst_6 = arith.constant 3.200000e+01 : f32
    %10 = vector.broadcast %cst_6 : f32 to vector<1x32xf32>
    %11 = arith.divf %9, %10 : vector<1x32xf32>
    %12 = arith.mulf %6, %6 : vector<1x32xf32>
    %13 = arith.subf %11, %12 : vector<1x32xf32>
    %cst_7 = arith.constant 0.000000e+00 : f32
    %14 = vector.broadcast %cst_7 : f32 to vector<1x32xf32>
    %15 = arith.maximumf %13, %14 : vector<1x32xf32>
    %c0_8 = arith.constant 0 : index
    %c0_9 = arith.constant 0 : index
    %16 = vector.load %arg2[%c0_8, %c0_9] : memref<1x32xf32, #tpu.memory_space<vmem>>, vector<1x32xf32>
    %cst_10 = arith.constant 9.99999974E-6 : f32
    %17 = vector.broadcast %cst_10 : f32 to vector<1x32xf32>
    %18 = arith.addf %15, %17 : vector<1x32xf32>
    %19 = math.rsqrt %18 : vector<1x32xf32>
    %20 = arith.mulf %16, %19 : vector<1x32xf32>
    %c0_11 = arith.constant 0 : index
    %c0_12 = arith.constant 0 : index
    %21 = vector.load %arg3[%c0_11, %c0_12] : memref<1x32xf32, #tpu.memory_space<vmem>>, vector<1x32xf32>
    %22 = arith.mulf %6, %20 : vector<1x32xf32>
    %23 = arith.subf %21, %22 : vector<1x32xf32>
    %24 = vector.broadcast %20 : vector<1x32xf32> to vector<32x32xf32>
    %25 = arith.mulf %2, %24 : vector<32x32xf32>
    %26 = vector.broadcast %23 : vector<1x32xf32> to vector<32x32xf32>
    %27 = arith.addf %25, %26 : vector<32x32xf32>
    %cst_13 = arith.constant 0.000000e+00 : f32
    %28 = vector.broadcast %cst_13 : f32 to vector<32x32xf32>
    %29 = arith.maximumf %27, %28 : vector<32x32xf32>
    %30 = vector.extract_strided_slice %29 {offsets = [0, 0], sizes = [8, 32], strides = [1, 1]} : vector<32x32xf32> to vector<8x32xf32>
    %31 = vector.extract_strided_slice %29 {offsets = [8, 0], sizes = [8, 32], strides = [1, 1]} : vector<32x32xf32> to vector<8x32xf32>
    %32 = arith.maximumf %30, %31 : vector<8x32xf32>
    %33 = vector.extract_strided_slice %29 {offsets = [16, 0], sizes = [8, 32], strides = [1, 1]} : vector<32x32xf32> to vector<8x32xf32>
    %34 = vector.extract_strided_slice %29 {offsets = [24, 0], sizes = [8, 32], strides = [1, 1]} : vector<32x32xf32> to vector<8x32xf32>
    %35 = arith.maximumf %33, %34 : vector<8x32xf32>
    %36 = arith.maximumf %32, %35 : vector<8x32xf32>
    %c0_14 = arith.constant 0 : index
    %c0_15 = arith.constant 0 : index
    %37 = vector.load %arg4[%c0_14, %c0_15] : memref<8x32xf32, #tpu.memory_space<vmem>>, vector<8x32xf32>
    tpu.vector_store %arg4[%c0_14, %c0_15], %36 {strides = array<i32>} : memref<8x32xf32, #tpu.memory_space<vmem>>, vector<8x32xf32>,
    return
  }
}

module attributes {stable_mosaic.version = 11 : i64} {
  func.func @lc_mlp_kernel(%arg0: memref<4x2x8192xbf16, #tpu.memory_space<vmem>>, %arg1: memref<4x32x8192xbf16, #tpu.memory_space<vmem>>, %arg2: memref<4x1x32xf32, #tpu.memory_space<vmem>>, %arg3: memref<128x64xf32, #tpu.memory_space<vmem>>, %arg4: memref<1x64xf32, #tpu.memory_space<vmem>>, %arg5: memref<64x5xf32, #tpu.memory_space<vmem>>, %arg6: memref<1x5xf32, #tpu.memory_space<vmem>>, %arg7: memref<2x5xf32, #tpu.memory_space<vmem>>) attributes {dimension_semantics = [], scalar_prefetch = 0 : i64, scratch_operands = 0 : i64, tpu.core_type = #tpu.core_type<tc>} {
    %c0 = arith.constant 0 : index
    %c0_0 = arith.constant 0 : index
    %0 = vector.load %arg3[%c0, %c0_0] : memref<128x64xf32, #tpu.memory_space<vmem>>, vector<128x64xf32>
    %c0_1 = arith.constant 0 : index
    %c0_2 = arith.constant 0 : index
    %1 = vector.load %arg4[%c0_1, %c0_2] : memref<1x64xf32, #tpu.memory_space<vmem>>, vector<1x64xf32>
    %c0_3 = arith.constant 0 : index
    %c0_4 = arith.constant 0 : index
    %c0_5 = arith.constant 0 : index
    %2 = vector.load %arg0[%c0_3, %c0_4, %c0_5] : memref<4x2x8192xbf16, #tpu.memory_space<vmem>>, vector<1x2x8192xbf16>
    %3 = vector.shape_cast %2 : vector<1x2x8192xbf16> to vector<2x8192xbf16>
    %c0_6 = arith.constant 0 : index
    %c0_7 = arith.constant 0 : index
    %c0_8 = arith.constant 0 : index
    %4 = vector.load %arg1[%c0_6, %c0_7, %c0_8] : memref<4x32x8192xbf16, #tpu.memory_space<vmem>>, vector<1x32x8192xbf16>
    %5 = vector.shape_cast %4 : vector<1x32x8192xbf16> to vector<32x8192xbf16>
    %cst = arith.constant dense<0.000000e+00> : vector<2x32xf32>
    %6 = tpu.matmul %3, %5, %cst {dimension_numbers = #tpu.dot_dimension_numbers<[1], [1], [0], [0], [0, 0, 1, 0], [], []>} : vector<2x8192xbf16>, vector<32x8192xbf16>, vector<2x32xf32> -> vector<2x32xf32>
    %c0_9 = arith.constant 0 : index
    %c0_10 = arith.constant 0 : index
    %c0_11 = arith.constant 0 : index
    %7 = vector.load %arg2[%c0_9, %c0_10, %c0_11] : memref<4x1x32xf32, #tpu.memory_space<vmem>>, vector<1x1x32xf32>
    %8 = vector.shape_cast %7 : vector<1x1x32xf32> to vector<1x32xf32>
    %9 = vector.broadcast %8 : vector<1x32xf32> to vector<2x32xf32>
    %10 = arith.addf %6, %9 : vector<2x32xf32>
    %11 = vector.extract_strided_slice %0 {offsets = [0, 0], sizes = [32, 64], strides = [1, 1]} : vector<128x64xf32> to vector<32x64xf32>
    %cst_12 = arith.constant dense<0.000000e+00> : vector<2x64xf32>
    %12 = tpu.matmul %10, %11, %cst_12 {dimension_numbers = #tpu.dot_dimension_numbers<[1], [0], [0], [1], [0, 0, 1, 1], [], []>} : vector<2x32xf32>, vector<32x64xf32>, vector<2x64xf32> -> vector<2x64xf32>
    %13 = vector.broadcast %1 : vector<1x64xf32> to vector<2x64xf32>
    %14 = arith.addf %13, %12 : vector<2x64xf32>
    %c1 = arith.constant 1 : index
    %c0_13 = arith.constant 0 : index
    %c0_14 = arith.constant 0 : index
    %15 = vector.load %arg0[%c1, %c0_13, %c0_14] : memref<4x2x8192xbf16, #tpu.memory_space<vmem>>, vector<1x2x8192xbf16>
    %16 = vector.shape_cast %15 : vector<1x2x8192xbf16> to vector<2x8192xbf16>
    %c1_15 = arith.constant 1 : index
    %c0_16 = arith.constant 0 : index
    %c0_17 = arith.constant 0 : index
    %17 = vector.load %arg1[%c1_15, %c0_16, %c0_17] : memref<4x32x8192xbf16, #tpu.memory_space<vmem>>, vector<1x32x8192xbf16>
    %18 = vector.shape_cast %17 : vector<1x32x8192xbf16> to vector<32x8192xbf16>
    %cst_18 = arith.constant dense<0.000000e+00> : vector<2x32xf32>
    %19 = tpu.matmul %16, %18, %cst_18 {dimension_numbers = #tpu.dot_dimension_numbers<[1], [1], [0], [0], [0, 0, 1, 0], [], []>} : vector<2x8192xbf16>, vector<32x8192xbf16>, vector<2x32xf32> -> vector<2x32xf32>
    %c1_19 = arith.constant 1 : index
    %c0_20 = arith.constant 0 : index
    %c0_21 = arith.constant 0 : index
    %20 = vector.load %arg2[%c1_19, %c0_20, %c0_21] : memref<4x1x32xf32, #tpu.memory_space<vmem>>, vector<1x1x32xf32>
    %21 = vector.shape_cast %20 : vector<1x1x32xf32> to vector<1x32xf32>
    %22 = vector.broadcast %21 : vector<1x32xf32> to vector<2x32xf32>
    %23 = arith.addf %19, %22 : vector<2x32xf32>
    %24 = vector.extract_strided_slice %0 {offsets = [32, 0], sizes = [32, 64], strides = [1, 1]} : vector<128x64xf32> to vector<32x64xf32>
    %cst_22 = arith.constant dense<0.000000e+00> : vector<2x64xf32>
    %25 = tpu.matmul %23, %24, %cst_22 {dimension_numbers = #tpu.dot_dimension_numbers<[1], [0], [0], [1], [0, 0, 1, 1], [], []>} : vector<2x32xf32>, vector<32x64xf32>, vector<2x64xf32> -> vector<2x64xf32>
    %26 = arith.addf %14, %25 : vector<2x64xf32>
    %c2 = arith.constant 2 : index
    %c0_23 = arith.constant 0 : index
    %c0_24 = arith.constant 0 : index
    %27 = vector.load %arg0[%c2, %c0_23, %c0_24] : memref<4x2x8192xbf16, #tpu.memory_space<vmem>>, vector<1x2x8192xbf16>
    %28 = vector.shape_cast %27 : vector<1x2x8192xbf16> to vector<2x8192xbf16>
    %c2_25 = arith.constant 2 : index
    %c0_26 = arith.constant 0 : index
    %c0_27 = arith.constant 0 : index
    %29 = vector.load %arg1[%c2_25, %c0_26, %c0_27] : memref<4x32x8192xbf16, #tpu.memory_space<vmem>>, vector<1x32x8192xbf16>
    %30 = vector.shape_cast %29 : vector<1x32x8192xbf16> to vector<32x8192xbf16>
    %cst_28 = arith.constant dense<0.000000e+00> : vector<2x32xf32>
    %31 = tpu.matmul %28, %30, %cst_28 {dimension_numbers = #tpu.dot_dimension_numbers<[1], [1], [0], [0], [0, 0, 1, 0], [], []>} : vector<2x8192xbf16>, vector<32x8192xbf16>, vector<2x32xf32> -> vector<2x32xf32>
    %c2_29 = arith.constant 2 : index
    %c0_30 = arith.constant 0 : index
    %c0_31 = arith.constant 0 : index
    %32 = vector.load %arg2[%c2_29, %c0_30, %c0_31] : memref<4x1x32xf32, #tpu.memory_space<vmem>>, vector<1x1x32xf32>
    %33 = vector.shape_cast %32 : vector<1x1x32xf32> to vector<1x32xf32>
    %34 = vector.broadcast %33 : vector<1x32xf32> to vector<2x32xf32>
    %35 = arith.addf %31, %34 : vector<2x32xf32>
    %36 = vector.extract_strided_slice %0 {offsets = [64, 0], sizes = [32, 64], strides = [1, 1]} : vector<128x64xf32> to vector<32x64xf32>
    %cst_32 = arith.constant dense<0.000000e+00> : vector<2x64xf32>
    %37 = tpu.matmul %35, %36, %cst_32 {dimension_numbers = #tpu.dot_dimension_numbers<[1], [0], [0], [1], [0, 0, 1, 1], [], []>} : vector<2x32xf32>, vector<32x64xf32>, vector<2x64xf32> -> vector<2x64xf32>
    %38 = arith.addf %26, %37 : vector<2x64xf32>
    %c3 = arith.constant 3 : index
    %c0_33 = arith.constant 0 : index
    %c0_34 = arith.constant 0 : index
    %39 = vector.load %arg0[%c3, %c0_33, %c0_34] : memref<4x2x8192xbf16, #tpu.memory_space<vmem>>, vector<1x2x8192xbf16>
    %40 = vector.shape_cast %39 : vector<1x2x8192xbf16> to vector<2x8192xbf16>
    %c3_35 = arith.constant 3 : index
    %c0_36 = arith.constant 0 : index
    %c0_37 = arith.constant 0 : index
    %41 = vector.load %arg1[%c3_35, %c0_36, %c0_37] : memref<4x32x8192xbf16, #tpu.memory_space<vmem>>, vector<1x32x8192xbf16>
    %42 = vector.shape_cast %41 : vector<1x32x8192xbf16> to vector<32x8192xbf16>
    %cst_38 = arith.constant dense<0.000000e+00> : vector<2x32xf32>
    %43 = tpu.matmul %40, %42, %cst_38 {dimension_numbers = #tpu.dot_dimension_numbers<[1], [1], [0], [0], [0, 0, 1, 0], [], []>} : vector<2x8192xbf16>, vector<32x8192xbf16>, vector<2x32xf32> -> vector<2x32xf32>
    %c3_39 = arith.constant 3 : index
    %c0_40 = arith.constant 0 : index
    %c0_41 = arith.constant 0 : index
    %44 = vector.load %arg2[%c3_39, %c0_40, %c0_41] : memref<4x1x32xf32, #tpu.memory_space<vmem>>, vector<1x1x32xf32>
    %45 = vector.shape_cast %44 : vector<1x1x32xf32> to vector<1x32xf32>
    %46 = vector.broadcast %45 : vector<1x32xf32> to vector<2x32xf32>
    %47 = arith.addf %43, %46 : vector<2x32xf32>
    %48 = vector.extract_strided_slice %0 {offsets = [96, 0], sizes = [32, 64], strides = [1, 1]} : vector<128x64xf32> to vector<32x64xf32>
    %cst_42 = arith.constant dense<0.000000e+00> : vector<2x64xf32>
    %49 = tpu.matmul %47, %48, %cst_42 {dimension_numbers = #tpu.dot_dimension_numbers<[1], [0], [0], [1], [0, 0, 1, 1], [], []>} : vector<2x32xf32>, vector<32x64xf32>, vector<2x64xf32> -> vector<2x64xf32>
    %50 = arith.addf %38, %49 : vector<2x64xf32>
    %cst_43 = arith.constant 0.000000e+00 : f32
    %51 = vector.broadcast %cst_43 : f32 to vector<2x64xf32>
    %52 = arith.maximumf %50, %51 : vector<2x64xf32>
    %c0_44 = arith.constant 0 : index
    %c0_45 = arith.constant 0 : index
    %53 = vector.load %arg5[%c0_44, %c0_45] : memref<64x5xf32, #tpu.memory_space<vmem>>, vector<64x5xf32>
    %cst_46 = arith.constant dense<0.000000e+00> : vector<2x5xf32>
    %54 = tpu.matmul %52, %53, %cst_46 {dimension_numbers = #tpu.dot_dimension_numbers<[1], [0], [0], [1], [0, 0, 1, 1], [], []>} : vector<2x64xf32>, vector<64x5xf32>, vector<2x5xf32> -> vector<2x5xf32>
    %c0_47 = arith.constant 0 : index
    %c0_48 = arith.constant 0 : index
    %55 = vector.load %arg6[%c0_47, %c0_48] : memref<1x5xf32, #tpu.memory_space<vmem>>, vector<1x5xf32>
    %56 = vector.broadcast %55 : vector<1x5xf32> to vector<2x5xf32>
    %57 = arith.addf %54, %56 : vector<2x5xf32>
    %c0_49 = arith.constant 0 : index
    %c0_50 = arith.constant 0 : index
    %58 = vector.load %arg7[%c0_49, %c0_50] : memref<2x5xf32, #tpu.memory_space<vmem>>, vector<2x5xf32>
    tpu.vector_store %arg7[%c0_49, %c0_50], %57 {strides = array<i32>} : memref<2x5xf32, #tpu.memory_space<vmem>>, vector<2x5xf32>,
    return
  }
}

</mosaic_0001>

<bundles_post_ra>
// kernel: _forward.4
= control target key start
LH: loop header
LB: loop body
LE: loop exit
PB: predicated region body
PF: predicated region fallthrough
CT: control target
= control target key end

     0   :  { %vm278_vm0 = vcmask 1040384   ;;  %vm85_vm1 = vcmask 203776   ;;  %vm1537_vm2 = vmmov 1   ;;  %vm667_vm4 = vcmask 64512   ;;  %s2977_s1 = inlined_call_operand.vmem [shape: f32[25,8], index: 1, kind: input, shape index: {}]   ;;  %s2978_s0 = inlined_call_operand.vmem [shape: f32[512,25], index: 0, kind: input, shape index: {}]   ;;  %s2979_s2 = inlined_call_operand.vmem [shape: f32[1,8], index: 2, kind: input, shape index: {}]   ;;  %s2980_s3 = inlined_call_operand.vmem [shape: f32[1,8], index: 3, kind: input, shape index: {}]   ;;  %s2981_s4 = inlined_call_operand.vmem [shape: f32[128,8], index: 4, kind: output, shape index: {}]  }
   0x1   :  { %v81_v0 = vld [vmem:[%s2977_s1] sm:$0xff]  ;;  %v82_v1 = vld [vmem:[%s2977_s1 + $0x8] sm:$0xff]  ;;  %v83_v2 = vld [vmem:[%s2977_s1 + $0x10] sm:$0xff] }
   0x2   :  { %v1520_v3 = vpack.c.bf16 %v82_v1, %v81_v0  ;;  %v84_v4 = vld [vmem:[%s2977_s1 + $0x18] sm:$0x1]  ;;  %v17_v5 = vld [vmem:[%s2978_s0] sm:$0xff]  ;;  %vm1525_vm3 = vmpackc.low %vm278_vm0, %vm1537_vm2 }
   0x3   :  { %v1524_v6 = vpack.c.bf16 %v84_v4, %v83_v2  ;;  %1424 = vmatprep.mubr.msk.f32.mxu0 %vm85_vm1, %v17_v5  ;;  %v18_v7 = vld [vmem:[%s2978_s0 + $0x8] sm:$0xff]  ;;  %v19_v8 = vld [vmem:[%s2978_s0 + $0x10] sm:$0xff]  ;;  %v20_v9 = vld [vmem:[%s2978_s0 + $0x18] sm:$0xff] }
   0x4   :  { %1521 = vmatprep.subr.bf16.mxu0 %v1520_v3  ;;  %1530 = vmatprep.subr.bf16.mxu1 %v1520_v3  ;;  %v49_v10 = vld [vmem:[%s2978_s0 + $0x100] sm:$0xff]  ;;  %v50_v11 = vld [vmem:[%s2978_s0 + $0x108] sm:$0xff]  ;;  %v51_v13 = vld [vmem:[%s2978_s0 + $0x110] sm:$0xff] }
   0x5   :  { %1523 = vmatpush3.bf16.msra.mxu0 %v1520_v3  ;;  %1532 = vmatpush3.bf16.msra.mxu1 %v1520_v3  ;;  %v21_v12 = vld [vmem:[%s2978_s0 + $0x20] sm:$0xff]  ;;  %v52_v14 = vld [vmem:[%s2978_s0 + $0x118] sm:$0xff]  ;;  %v22_v15 = vld [vmem:[%s2978_s0 + $0x28] sm:$0xff] }
   0x6   :  { %1526 = vmatprep.subr.msk.bf16.mxu0 %vm1525_vm3, %v1524_v6  ;;  %1531 = vmatprep.subr.msk.bf16.mxu1 %vm1525_vm3, %v1524_v6  ;;  %v53_v16 = vld [vmem:[%s2978_s0 + $0x120] sm:$0xff]  ;;  %v23_v17 = vld [vmem:[%s2978_s0 + $0x30] sm:$0xff]  ;;  %v54_v18 = vld [vmem:[%s2978_s0 + $0x128] sm:$0xff] }
   0x7   :  { %1472 = vmatprep.mubr.msk.f32.mxu1 %vm85_vm1, %v49_v10  ;;  %v24_v19 = vld [vmem:[%s2978_s0 + $0x38] sm:$0xff]  ;;  %v55_v20 = vld [vmem:[%s2978_s0 + $0x130] sm:$0xff]  ;;  %v25_v21 = vld [vmem:[%s2978_s0 + $0x40] sm:$0xff] }
   0x8   :  { %v56_v22 = vld [vmem:[%s2978_s0 + $0x138] sm:$0xff]  ;;  %v26_v23 = vld [vmem:[%s2978_s0 + $0x48] sm:$0xff]  ;;  %v57_v24 = vld [vmem:[%s2978_s0 + $0x140] sm:$0xff] }
   0x9   :  { %1529 = vmatpush3.bf16.msk.msra.mxu0 %vm1525_vm3, %v1524_v6  ;;  %1533 = vmatpush3.bf16.msk.msra.mxu1 %vm1525_vm3, %v1524_v6  ;;  %v27_v25 = vld [vmem:[%s2978_s0 + $0x50] sm:$0xff]  ;;  %v58_v26 = vld [vmem:[%s2978_s0 + $0x148] sm:$0xff]  ;;  %v28_v27 = vld [vmem:[%s2978_s0 + $0x58] sm:$0xff] }
   0xa   :  { %v59_v28 = vld [vmem:[%s2978_s0 + $0x150] sm:$0xff]  ;;  %v29_v29 = vld [vmem:[%s2978_s0 + $0x60] sm:$0xff]  ;;  %v60_v30 = vld [vmem:[%s2978_s0 + $0x158] sm:$0xff] }
   0xb   :  { %v30_v31 = vld [vmem:[%s2978_s0 + $0x68] sm:$0xff]  ;;  %v61_v32 = vld [vmem:[%s2978_s0 + $0x160] sm:$0xff]  ;;  %v31_v33 = vld [vmem:[%s2978_s0 + $0x70] sm:$0xff] }
   0xc   :  { %1425 = vmatmul.mubr.msk.f32.vlgmr.msra.gmra.mrb[0].mxu0 %vm85_vm1, %v18_v7  ;;  %1473 = vmatmul.mubr.msk.f32.vlgmr.msra.gmra.mrb[0].mxu1 %vm85_vm1, %v50_v11  ;;  %v62_v34 = vld [vmem:[%s2978_s0 + $0x168] sm:$0xff]  ;;  %v32_v35 = vld [vmem:[%s2978_s0 + $0x78] sm:$0xff]  ;;  %v63_v36 = vld [vmem:[%s2978_s0 + $0x170] sm:$0xff] }
   0xd   :  { %1427 = vmatprep.mubr.msk.f32.mxu0 %vm85_vm1, %v19_v8  ;;  %1475 = vmatprep.mubr.msk.f32.mxu1 %vm85_vm1, %v51_v13  ;;  %v33_v37 = vld [vmem:[%s2978_s0 + $0x80] sm:$0xff]  ;;  %v64_v38 = vld [vmem:[%s2978_s0 + $0x178] sm:$0xff]  ;;  %v34_v39 = vld [vmem:[%s2978_s0 + $0x88] sm:$0xff] }
   0xe   :  { %v65_v40 = vld [vmem:[%s2978_s0 + $0x180] sm:$0xff]  ;;  %v35_v41 = vld [vmem:[%s2978_s0 + $0x90] sm:$0xff]  ;;  %v66_v42 = vld [vmem:[%s2978_s0 + $0x188] sm:$0xff] }
   0xf   :  { %v36_v43 = vld [vmem:[%s2978_s0 + $0x98] sm:$0xff]  ;;  %v67_v44 = vld [vmem:[%s2978_s0 + $0x190] sm:$0xff]  ;;  %v37_v45 = vld [vmem:[%s2978_s0 + $0xa0] sm:$0xff] }
  0x10   :  { %1428 = vmatmul.mubr.msk.f32.gmra.mrb[2].mxu0 %vm85_vm1, %v20_v9  ;;  %1476 = vmatmul.mubr.msk.f32.gmra.mrb[2].mxu1 %vm85_vm1, %v52_v14  ;;  %v68_v46 = vld [vmem:[%s2978_s0 + $0x198] sm:$0xff]  ;;  %v38_v47 = vld [vmem:[%s2978_s0 + $0xa8] sm:$0xff]  ;;  %v69_v48 = vld [vmem:[%s2978_s0 + $0x1a0] sm:$0xff] }
  0x11   :  { %1430 = vmatprep.mubr.msk.f32.mxu0 %vm85_vm1, %v21_v12  ;;  %1478 = vmatprep.mubr.msk.f32.mxu1 %vm85_vm1, %v53_v16  ;;  %v39_v49 = vld [vmem:[%s2978_s0 + $0xb0] sm:$0xff]  ;;  %v70_v50 = vld [vmem:[%s2978_s0 + $0x1a8] sm:$0xff]  ;;  %v40_v51 = vld [vmem:[%s2978_s0 + $0xb8] sm:$0xff] }
  0x12   :  { %v71_v52 = vld [vmem:[%s2978_s0 + $0x1b0] sm:$0xff]  ;;  %v41_v53 = vld [vmem:[%s2978_s0 + $0xc0] sm:$0xff]  ;;  %v72_v54 = vld [vmem:[%s2978_s0 + $0x1b8] sm:$0xff] }
  0x13   :  { %v42_v55 = vld [vmem:[%s2978_s0 + $0xc8] sm:$0xff]  ;;  %v73_v56 = vld [vmem:[%s2978_s0 + $0x1c0] sm:$0xff]  ;;  %v43_v57 = vld [vmem:[%s2978_s0 + $0xd0] sm:$0xff] }
  0x14   :  { %1431 = vmatmul.mubr.msk.f32.gmra.mrb[4].mxu0 %vm85_vm1, %v22_v15  ;;  %1479 = vmatmul.mubr.msk.f32.gmra.mrb[4].mxu1 %vm85_vm1, %v54_v18  ;;  %v74_v58 = vld [vmem:[%s2978_s0 + $0x1c8] sm:$0xff]  ;;  %v44_v59 = vld [vmem:[%s2978_s0 + $0xd8] sm:$0xff]  ;;  %v75_v60 = vld [vmem:[%s2978_s0 + $0x1d0] sm:$0xff] }
  0x15   :  { %1433 = vmatprep.mubr.msk.f32.mxu0 %vm85_vm1, %v23_v17  ;;  %1481 = vmatprep.mubr.msk.f32.mxu1 %vm85_vm1, %v55_v20  ;;  %v45_v61 = vld [vmem:[%s2978_s0 + $0xe0] sm:$0xff]  ;;  %v76_v62 = vld [vmem:[%s2978_s0 + $0x1d8] sm:$0xff]  ;;  %v46_v63 = vld [vmem:[%s2978_s0 + $0xe8] sm:$0xff] }
  0x16   :  { %v77_v0 = vld [vmem:[%s2978_s0 + $0x1e0] sm:$0xff]  ;;  %v47_v1 = vld [vmem:[%s2978_s0 + $0xf0] sm:$0xff]  ;;  %v78_v2 = vld [vmem:[%s2978_s0 + $0x1e8] sm:$0xff] }
  0x17   :  { %v48_v3 = vld [vmem:[%s2978_s0 + $0xf8] sm:$0xff]  ;;  %v79_v4 = vld [vmem:[%s2978_s0 + $0x1f0] sm:$0xff] }
  0x18   :  { %1434 = vmatmul.mubr.msk.f32.gmra.mrb[6].mxu0 %vm85_vm1, %v24_v19  ;;  %1482 = vmatmul.mubr.msk.f32.gmra.mrb[6].mxu1 %vm85_vm1, %v56_v22  ;;  %v80_v5 = vld [vmem:[%s2978_s0 + $0x1f8] sm:$0xff] }
  0x19   :  { %1436 = vmatprep.mubr.msk.f32.mxu0 %vm85_vm1, %v25_v21  ;;  %1484 = vmatprep.mubr.msk.f32.mxu1 %vm85_vm1, %v57_v24 }
  0x1c   :  { %1437 = vmatmul.mubr.msk.f32.gmra.mrb[8].mxu0 %vm85_vm1, %v26_v23  ;;  %1485 = vmatmul.mubr.msk.f32.gmra.mrb[8].mxu1 %vm85_vm1, %v58_v26 }
  0x1d   :  { %1439 = vmatprep.mubr.msk.f32.mxu0 %vm85_vm1, %v27_v25  ;;  %1487 = vmatprep.mubr.msk.f32.mxu1 %vm85_vm1, %v59_v28 }
  0x20   :  { %1440 = vmatmul.mubr.msk.f32.gmra.mrb[10].mxu0 %vm85_vm1, %v28_v27  ;;  %1488 = vmatmul.mubr.msk.f32.gmra.mrb[10].mxu1 %vm85_vm1, %v60_v30 }
  0x21   :  { %1442 = vmatprep.mubr.msk.f32.mxu0 %vm85_vm1, %v29_v29  ;;  %1490 = vmatprep.mubr.msk.f32.mxu1 %vm85_vm1, %v61_v32 }
  0x24   :  { %1443 = vmatmul.mubr.msk.f32.gmra.mrb[12].mxu0 %vm85_vm1, %v30_v31  ;;  %1491 = vmatmul.mubr.msk.f32.gmra.mrb[12].mxu1 %vm85_vm1, %v62_v34 }
  0x25   :  { %1445 = vmatprep.mubr.msk.f32.mxu0 %vm85_vm1, %v31_v33  ;;  %1493 = vmatprep.mubr.msk.f32.mxu1 %vm85_vm1, %v63_v36 }
  0x28   :  { %1446 = vmatmul.mubr.msk.f32.gmra.mrb[14].mxu0 %vm85_vm1, %v32_v35  ;;  %1494 = vmatmul.mubr.msk.f32.gmra.mrb[14].mxu1 %vm85_vm1, %v64_v38 }
  0x29   :  { %1448 = vmatprep.mubr.msk.f32.mxu0 %vm85_vm1, %v33_v37  ;;  %1496 = vmatprep.mubr.msk.f32.mxu1 %vm85_vm1, %v65_v40 }
  0x2c   :  { %1449 = vmatmul.mubr.msk.f32.gmra.mrb[16].mxu0 %vm85_vm1, %v34_v39  ;;  %1497 = vmatmul.mubr.msk.f32.gmra.mrb[16].mxu1 %vm85_vm1, %v66_v42 }
  0x2d   :  { %1451 = vmatprep.mubr.msk.f32.mxu0 %vm85_vm1, %v35_v41  ;;  %1499 = vmatprep.mubr.msk.f32.mxu1 %vm85_vm1, %v67_v44 }
  0x30   :  { %1452 = vmatmul.mubr.msk.f32.gmra.mrb[18].mxu0 %vm85_vm1, %v36_v43  ;;  %1500 = vmatmul.mubr.msk.f32.gmra.mrb[18].mxu1 %vm85_vm1, %v68_v46 }
  0x31   :  { %1454 = vmatprep.mubr.msk.f32.mxu0 %vm85_vm1, %v37_v45  ;;  %1502 = vmatprep.mubr.msk.f32.mxu1 %vm85_vm1, %v69_v48 }
  0x34   :  { %1455 = vmatmul.mubr.msk.f32.gmra.mrb[20].mxu0 %vm85_vm1, %v38_v47  ;;  %1503 = vmatmul.mubr.msk.f32.gmra.mrb[20].mxu1 %vm85_vm1, %v70_v50 }
  0x35   :  { %1457 = vmatprep.mubr.msk.f32.mxu0 %vm85_vm1, %v39_v49  ;;  %1505 = vmatprep.mubr.msk.f32.mxu1 %vm85_vm1, %v71_v52 }
  0x38   :  { %1458 = vmatmul.mubr.msk.f32.gmra.mrb[22].mxu0 %vm85_vm1, %v40_v51  ;;  %1506 = vmatmul.mubr.msk.f32.gmra.mrb[22].mxu1 %vm85_vm1, %v72_v54 }
  0x39   :  { %1460 = vmatprep.mubr.msk.f32.mxu0 %vm85_vm1, %v41_v53  ;;  %1508 = vmatprep.mubr.msk.f32.mxu1 %vm85_vm1, %v73_v56 }
  0x3c   :  { %1461 = vmatmul.mubr.msk.f32.gmra.mrb[24].mxu0 %vm85_vm1, %v42_v55  ;;  %1509 = vmatmul.mubr.msk.f32.gmra.mrb[24].mxu1 %vm85_vm1, %v74_v58 }
  0x3d   :  { %1463 = vmatprep.mubr.msk.f32.mxu0 %vm85_vm1, %v43_v57  ;;  %1511 = vmatprep.mubr.msk.f32.mxu1 %vm85_vm1, %v75_v60 }
  0x40   :  { %1464 = vmatmul.mubr.msk.f32.gmra.mrb[26].mxu0 %vm85_vm1, %v44_v59  ;;  %1512 = vmatmul.mubr.msk.f32.gmra.mrb[26].mxu1 %vm85_vm1, %v76_v62 }
  0x41   :  { %1466 = vmatprep.mubr.msk.f32.mxu0 %vm85_vm1, %v45_v61  ;;  %1514 = vmatprep.mubr.msk.f32.mxu1 %vm85_vm1, %v77_v0 }
  0x44   :  { %1467 = vmatmul.mubr.msk.f32.gmra.mrb[28].mxu0 %vm85_vm1, %v46_v63  ;;  %1515 = vmatmul.mubr.msk.f32.gmra.mrb[28].mxu1 %vm85_vm1, %v78_v2 }
  0x45   :  { %1469 = vmatprep.mubr.msk.f32.mxu0 %vm85_vm1, %v47_v1  ;;  %1517 = vmatprep.mubr.msk.f32.mxu1 %vm85_vm1, %v79_v4 }
  0x48   :  { %1470 = vmatmul.mubr.msk.f32.gmra.mrb[30].mxu0 %vm85_vm1, %v48_v3  ;;  %1518 = vmatmul.mubr.msk.f32.gmra.mrb[30].mxu1 %vm85_vm1, %v80_v5 }
  0xdf   :  { %v1831_v6 = vpop.f32.mrb[0].mxu0  ;;  %v1844_v14 = vpop.f32.mrb[0].mxu1 }
  0xe0   :  { %v669_v7 = vsel %vm667_vm4, %v1831_v6, 0.0  ;;  %v804_v8 = vmul.f32 %v1831_v6, %v1831_v6  ;;  %v1837_v9 = vpop.f32.mrb[1].mxu0  ;;  %v1849_v17 = vpop.f32.mrb[1].mxu1 }
  0xe1   :  { %v668_v10 = vsel %vm667_vm4, %v1837_v9, 0.0  ;;  %v803_v11 = vmul.f32 %v1837_v9, %v1837_v9  ;;  %3019 = vst [vmem:[#allocation2_spill] sm:$0xff] %v1849_v17 }
  0xe2   :  { %v868_v12 = vsel %vm667_vm4, %v804_v8, 0.0  ;;  %v670_v13 = vadd.f32 %v669_v7, %v668_v10 }
  0xe3   :  { %v867_v15 = vsel %vm667_vm4, %v803_v11, 0.0  ;;  %v1847_v16 = vpop.f32.mrb[2].mxu0  ;;  %v1859_v24 = vpop.f32.mrb[2].mxu1 }
  0xe4   :  { %v869_v18 = vadd.f32 %v868_v12, %v867_v15  ;;  %v1851_v19 = vpop.f32.mrb[3].mxu0  ;;  %v806_v20 = vmul.f32 %v1847_v16, %v1847_v16  ;;  %v673_v25 = vsel %vm667_vm4, %v1847_v16, 0.0  ;;  %v1866_v28 = vpop.f32.mrb[3].mxu1 }
  0xe5   :  { %v671_v21 = vsel %vm667_vm4, %v1851_v19, 0.0  ;;  %v805_v22 = vmul.f32 %v1851_v19, %v1851_v19 }
  0xe6   :  { %v672_v23 = vadd.f32 %v671_v21, %v670_v13  ;;  %v872_v32 = vsel %vm667_vm4, %v806_v20, 0.0 }
  0xe7   :  { %v870_v26 = vsel %vm667_vm4, %v805_v22, 0.0  ;;  %v1864_v27 = vpop.f32.mrb[4].mxu0  ;;  %v1877_v38 = vpop.f32.mrb[4].mxu1 }
  0xe8   :  { %v871_v29 = vadd.f32 %v870_v26, %v869_v18  ;;  %v1868_v30 = vpop.f32.mrb[5].mxu0  ;;  %v674_v31 = vadd.f32 %v673_v25, %v672_v23  ;;  %v808_v33 = vmul.f32 %v1864_v27, %v1864_v27  ;;  %v677_v39 = vsel %vm667_vm4, %v1864_v27, 0.0  ;;  %v1884_v42 = vpop.f32.mrb[5].mxu1 }
  0xe9   :  { %v675_v34 = vsel %vm667_vm4, %v1868_v30, 0.0  ;;  %v807_v35 = vmul.f32 %v1868_v30, %v1868_v30 }
  0xea   :  { %v676_v36 = vadd.f32 %v675_v34, %v674_v31  ;;  %v873_v37 = vadd.f32 %v872_v32, %v871_v29  ;;  %v876_v46 = vsel %vm667_vm4, %v808_v33, 0.0 }
  0xeb   :  { %v874_v40 = vsel %vm667_vm4, %v807_v35, 0.0  ;;  %v1882_v41 = vpop.f32.mrb[6].mxu0  ;;  %v1895_v52 = vpop.f32.mrb[6].mxu1 }
  0xec   :  { %v875_v43 = vadd.f32 %v874_v40, %v873_v37  ;;  %v1886_v44 = vpop.f32.mrb[7].mxu0  ;;  %v678_v45 = vadd.f32 %v677_v39, %v676_v36  ;;  %v810_v47 = vmul.f32 %v1882_v41, %v1882_v41  ;;  %v681_v53 = vsel %vm667_vm4, %v1882_v41, 0.0  ;;  %v1902_v56 = vpop.f32.mrb[7].mxu1 }
  0xed   :  { %v679_v48 = vsel %vm667_vm4, %v1886_v44, 0.0  ;;  %v809_v49 = vmul.f32 %v1886_v44, %v1886_v44 }
  0xee   :  { %v680_v50 = vadd.f32 %v679_v48, %v678_v45  ;;  %v877_v51 = vadd.f32 %v876_v46, %v875_v43  ;;  %v880_v60 = vsel %vm667_vm4, %v810_v47, 0.0 }
  0xef   :  { %v878_v54 = vsel %vm667_vm4, %v809_v49, 0.0  ;;  %v1900_v55 = vpop.f32.mrb[8].mxu0  ;;  %v1913_v2 = vpop.f32.mrb[8].mxu1 }
  0xf0   :  { %v879_v57 = vadd.f32 %v878_v54, %v877_v51  ;;  %v1904_v58 = vpop.f32.mrb[9].mxu0  ;;  %v682_v59 = vadd.f32 %v681_v53, %v680_v50  ;;  %v812_v61 = vmul.f32 %v1900_v55, %v1900_v55  ;;  %v685_v3 = vsel %vm667_vm4, %v1900_v55, 0.0  ;;  %v1920_v7 = vpop.f32.mrb[9].mxu1 }
  0xf1   :  { %v683_v62 = vsel %vm667_vm4, %v1904_v58, 0.0  ;;  %v811_v63 = vmul.f32 %v1904_v58, %v1904_v58 }
  0xf2   :  { %v684_v0 = vadd.f32 %v683_v62, %v682_v59  ;;  %v881_v1 = vadd.f32 %v880_v60, %v879_v57  ;;  %v884_v12 = vsel %vm667_vm4, %v812_v61, 0.0 }
  0xf3   :  { %v882_v4 = vsel %vm667_vm4, %v811_v63, 0.0  ;;  %v1918_v5 = vpop.f32.mrb[10].mxu0  ;;  %v1931_v22 = vpop.f32.mrb[10].mxu1 }
  0xf4   :  { %v883_v8 = vadd.f32 %v882_v4, %v881_v1  ;;  %v1922_v10 = vpop.f32.mrb[11].mxu0  ;;  %v686_v11 = vadd.f32 %v685_v3, %v684_v0  ;;  %v814_v13 = vmul.f32 %v1918_v5, %v1918_v5  ;;  %v689_v23 = vsel %vm667_vm4, %v1918_v5, 0.0  ;;  %v1938_v29 = vpop.f32.mrb[11].mxu1 }
  0xf5   :  { %v687_v15 = vsel %vm667_vm4, %v1922_v10, 0.0  ;;  %v813_v18 = vmul.f32 %v1922_v10, %v1922_v10 }
  0xf6   :  { %v688_v20 = vadd.f32 %v687_v15, %v686_v11  ;;  %v885_v21 = vadd.f32 %v884_v12, %v883_v8  ;;  %v888_v34 = vsel %vm667_vm4, %v814_v13, 0.0 }
  0xf7   :  { %v886_v25 = vsel %vm667_vm4, %v813_v18, 0.0  ;;  %v1936_v26 = vpop.f32.mrb[12].mxu0  ;;  %v1949_v43 = vpop.f32.mrb[12].mxu1 }
  0xf8   :  { %v887_v31 = vadd.f32 %v886_v25, %v885_v21  ;;  %v1940_v32 = vpop.f32.mrb[13].mxu0  ;;  %v690_v33 = vadd.f32 %v689_v23, %v688_v20  ;;  %v816_v35 = vmul.f32 %v1936_v26, %v1936_v26  ;;  %v693_v45 = vsel %vm667_vm4, %v1936_v26, 0.0  ;;  %v1956_v48 = vpop.f32.mrb[13].mxu1 }
  0xf9   :  { %v691_v36 = vsel %vm667_vm4, %v1940_v32, 0.0  ;;  %v815_v37 = vmul.f32 %v1940_v32, %v1940_v32 }
  0xfa   :  { %v692_v39 = vadd.f32 %v691_v36, %v690_v33  ;;  %v889_v40 = vadd.f32 %v888_v34, %v887_v31  ;;  %v892_v53 = vsel %vm667_vm4, %v816_v35, 0.0 }
  0xfb   :  { %v890_v46 = vsel %vm667_vm4, %v815_v37, 0.0  ;;  %v1954_v47 = vpop.f32.mrb[14].mxu0  ;;  %v1967_v62 = vpop.f32.mrb[14].mxu1 }
  0xfc   :  { %3020 = vst [vmem:[#allocation3_spill] sm:$0xff] %v1954_v47  ;;  %v891_v49 = vadd.f32 %v890_v46, %v889_v40  ;;  %v1958_v50 = vpop.f32.mrb[15].mxu0  ;;  %v694_v51 = vadd.f32 %v693_v45, %v692_v39  ;;  %v818_v54 = vmul.f32 %v1954_v47, %v1954_v47  ;;  %v697_v63 = vsel %vm667_vm4, %v1954_v47, 0.0  ;;  %v1974_v3 = vpop.f32.mrb[15].mxu1 }
  0xfd   :  { %v695_v57 = vsel %vm667_vm4, %v1958_v50, 0.0  ;;  %v817_v59 = vmul.f32 %v1958_v50, %v1958_v50 }
  0xfe   :  { %v696_v60 = vadd.f32 %v695_v57, %v694_v51  ;;  %v893_v61 = vadd.f32 %v892_v53, %v891_v49  ;;  %v896_v12 = vsel %vm667_vm4, %v818_v54, 0.0 }
  0xff   :  { %v894_v0 = vsel %vm667_vm4, %v817_v59, 0.0  ;;  %v1972_v1 = vpop.f32.mrb[16].mxu0  ;;  %v1985_v23 = vpop.f32.mrb[16].mxu1 }
 0x100   :  { %3021 = vst [vmem:[#allocation4_spill] sm:$0xff] %v1972_v1  ;;  %v895_v4 = vadd.f32 %v894_v0, %v893_v61  ;;  %v1976_v8 = vpop.f32.mrb[17].mxu0  ;;  %v698_v11 = vadd.f32 %v697_v63, %v696_v60  ;;  %v820_v13 = vmul.f32 %v1972_v1, %v1972_v1  ;;  %v701_v25 = vsel %vm667_vm4, %v1972_v1, 0.0  ;;  %v1992_v34 = vpop.f32.mrb[17].mxu1 }
 0x101   :  { %3022 = vst [vmem:[#allocation5_spill] sm:$0xff] %v1976_v8  ;;  %v699_v15 = vsel %vm667_vm4, %v1976_v8, 0.0  ;;  %v819_v18 = vmul.f32 %v1976_v8, %v1976_v8 }
 0x102   :  { %v700_v20 = vadd.f32 %v699_v15, %v698_v11  ;;  %v897_v21 = vadd.f32 %v896_v12, %v895_v4  ;;  %v900_v39 = vsel %vm667_vm4, %v820_v13, 0.0 }
 0x103   :  { %v898_v31 = vsel %vm667_vm4, %v819_v18, 0.0  ;;  %v1990_v33 = vpop.f32.mrb[18].mxu0  ;;  %v2003_v53 = vpop.f32.mrb[18].mxu1 }
 0x104   :  { %3023 = vst [vmem:[#allocation6_spill] sm:$0xff] %v1990_v33  ;;  %v899_v35 = vadd.f32 %v898_v31, %v897_v21  ;;  %v1994_v36 = vpop.f32.mrb[19].mxu0  ;;  %v702_v37 = vadd.f32 %v701_v25, %v700_v20  ;;  %v822_v40 = vmul.f32 %v1990_v33, %v1990_v33  ;;  %v705_v54 = vsel %vm667_vm4, %v1990_v33, 0.0  ;;  %v2010_v60 = vpop.f32.mrb[19].mxu1 }
 0x105   :  { %3024 = vst [vmem:[#allocation7_spill] sm:$0xff] %v1994_v36  ;;  %v703_v45 = vsel %vm667_vm4, %v1994_v36, 0.0  ;;  %v821_v46 = vmul.f32 %v1994_v36, %v1994_v36 }
 0x106   :  { %v704_v49 = vadd.f32 %v703_v45, %v702_v37  ;;  %v901_v51 = vadd.f32 %v900_v39, %v899_v35  ;;  %v904_v4 = vsel %vm667_vm4, %v822_v40, 0.0 }
 0x107   :  { %v902_v57 = vsel %vm667_vm4, %v821_v46, 0.0  ;;  %v2008_v59 = vpop.f32.mrb[20].mxu0  ;;  %v2021_v20 = vpop.f32.mrb[20].mxu1 }
 0x108   :  { %3025 = vst [vmem:[#allocation8_spill] sm:$0xff] %v2008_v59  ;;  %v903_v61 = vadd.f32 %v902_v57, %v901_v51  ;;  %v2012_v63 = vpop.f32.mrb[21].mxu0  ;;  %v706_v0 = vadd.f32 %v705_v54, %v704_v49  ;;  %v824_v11 = vmul.f32 %v2008_v59, %v2008_v59  ;;  %v709_v21 = vsel %vm667_vm4, %v2008_v59, 0.0  ;;  %v2028_v35 = vpop.f32.mrb[21].mxu1 }
 0x109   :  { %3026 = vst [vmem:[#allocation9_spill] sm:$0xff] %v2012_v63  ;;  %v707_v12 = vsel %vm667_vm4, %v2012_v63, 0.0  ;;  %v823_v13 = vmul.f32 %v2012_v63, %v2012_v63 }
 0x10a   :  { %v708_v15 = vadd.f32 %v707_v12, %v706_v0  ;;  %v905_v18 = vadd.f32 %v904_v4, %v903_v61  ;;  %v908_v45 = vsel %vm667_vm4, %v824_v11, 0.0 }
 0x10b   :  { %v906_v25 = vsel %vm667_vm4, %v823_v13, 0.0  ;;  %v2026_v31 = vpop.f32.mrb[22].mxu0  ;;  %v2039_v61 = vpop.f32.mrb[22].mxu1 }
 0x10c   :  { %3027 = vst [vmem:[#allocation10_spill] sm:$0xff] %v2026_v31  ;;  %v907_v37 = vadd.f32 %v906_v25, %v905_v18  ;;  %v2030_v39 = vpop.f32.mrb[23].mxu0  ;;  %v710_v40 = vadd.f32 %v709_v21, %v708_v15  ;;  %v826_v46 = vmul.f32 %v2026_v31, %v2026_v31  ;;  %v713_v0 = vsel %vm667_vm4, %v2026_v31, 0.0  ;;  %v2046_v11 = vpop.f32.mrb[23].mxu1 }
 0x10d   :  { %3028 = vst [vmem:[#allocation11_spill] sm:$0xff] %v2030_v39  ;;  %v711_v49 = vsel %vm667_vm4, %v2030_v39, 0.0  ;;  %v825_v51 = vmul.f32 %v2030_v39, %v2030_v39 }
 0x10e   :  { %v712_v54 = vadd.f32 %v711_v49, %v710_v40  ;;  %v909_v57 = vadd.f32 %v908_v45, %v907_v37  ;;  %v912_v21 = vsel %vm667_vm4, %v826_v46, 0.0 }
 0x10f   :  { %v910_v4 = vsel %vm667_vm4, %v825_v51, 0.0  ;;  %v2044_v12 = vpop.f32.mrb[24].mxu0  ;;  %v2057_v51 = vpop.f32.mrb[24].mxu1 }
 0x110   :  { %3029 = vst [vmem:[#allocation12_spill] sm:$0xff] %v2044_v12  ;;  %v911_v13 = vadd.f32 %v910_v4, %v909_v57  ;;  %v2048_v15 = vpop.f32.mrb[25].mxu0  ;;  %v714_v18 = vadd.f32 %v713_v0, %v712_v54  ;;  %v828_v25 = vmul.f32 %v2044_v12, %v2044_v12  ;;  %3031 = vst [vmem:[#allocation14_spill] sm:$0xff] %v2057_v51  ;;  %v717_v57 = vsel %vm667_vm4, %v2044_v12, 0.0  ;;  %v2064_v46 = vpop.f32.mrb[25].mxu1 }
 0x111   :  { %3030 = vst [vmem:[#allocation13_spill] sm:$0xff] %v2048_v15  ;;  %v715_v37 = vsel %vm667_vm4, %v2048_v15, 0.0  ;;  %v827_v40 = vmul.f32 %v2048_v15, %v2048_v15 }
 0x112   :  { %v716_v45 = vadd.f32 %v715_v37, %v714_v18  ;;  %v913_v49 = vadd.f32 %v912_v21, %v911_v13  ;;  %v916_v59 = vsel %vm667_vm4, %v828_v25, 0.0 }
 0x113   :  { %v914_v54 = vsel %vm667_vm4, %v827_v40, 0.0  ;;  %v2062_v0 = vpop.f32.mrb[26].mxu0  ;;  %v2075_v12 = vpop.f32.mrb[26].mxu1 }
 0x114   :  { %3032 = vst [vmem:[#allocation15_spill] sm:$0xff] %v2062_v0  ;;  %v915_v4 = vadd.f32 %v914_v54, %v913_v49  ;;  %v2066_v31 = vpop.f32.mrb[27].mxu0  ;;  %v718_v39 = vadd.f32 %v717_v57, %v716_v45  ;;  %v830_v13 = vmul.f32 %v2062_v0, %v2062_v0  ;;  %3034 = vst [vmem:[#allocation17_spill] sm:$0xff] %v2075_v12  ;;  %v721_v49 = vsel %vm667_vm4, %v2062_v0, 0.0  ;;  %v2082_v25 = vpop.f32.mrb[27].mxu1 }
 0x115   :  { %3033 = vst [vmem:[#allocation16_spill] sm:$0xff] %v2066_v31  ;;  %v719_v18 = vsel %vm667_vm4, %v2066_v31, 0.0  ;;  %v829_v21 = vmul.f32 %v2066_v31, %v2066_v31  ;;  %3036 = vst [vmem:[#allocation19_spill] sm:$0xff] %v2082_v25 }
 0x116   :  { %v720_v37 = vadd.f32 %v719_v18, %v718_v39  ;;  %v917_v40 = vadd.f32 %v916_v59, %v915_v4  ;;  %v920_v33 = vsel %vm667_vm4, %v830_v13, 0.0 }
 0x117   :  { %v918_v45 = vsel %vm667_vm4, %v829_v21, 0.0  ;;  %v2080_v57 = vpop.f32.mrb[28].mxu0  ;;  %v2093_v0 = vpop.f32.mrb[28].mxu1 }
 0x118   :  { %3035 = vst [vmem:[#allocation18_spill] sm:$0xff] %v2080_v57  ;;  %v919_v54 = vadd.f32 %v918_v45, %v917_v40  ;;  %v2084_v15 = vpop.f32.mrb[29].mxu0  ;;  %v722_v63 = vadd.f32 %v721_v49, %v720_v37  ;;  %v832_v59 = vmul.f32 %v2080_v57, %v2080_v57  ;;  %3038 = vst [vmem:[#allocation21_spill] sm:$0xff] %v2093_v0  ;;  %v725_v40 = vsel %vm667_vm4, %v2080_v57, 0.0  ;;  %v2100_v13 = vpop.f32.mrb[29].mxu1 }
 0x119   :  { %3037 = vst [vmem:[#allocation20_spill] sm:$0xff] %v2084_v15  ;;  %v723_v39 = vsel %vm667_vm4, %v2084_v15, 0.0  ;;  %v831_v4 = vmul.f32 %v2084_v15, %v2084_v15  ;;  %3040 = vst [vmem:[#allocation23_spill] sm:$0xff] %v2100_v13  ;;  %v835_v15 = vmul.f32 %v1849_v17, %v1849_v17 }
 0x11a   :  { %v724_v18 = vadd.f32 %v723_v39, %v722_v63  ;;  %v921_v21 = vadd.f32 %v920_v33, %v919_v54  ;;  %v924_v33 = vsel %vm667_vm4, %v832_v59, 0.0  ;;  %v731_v59 = vsel %vm667_vm4, %v1849_v17, 0.0 }
 0x11b   :  { %v922_v37 = vsel %vm667_vm4, %v831_v4, 0.0  ;;  %v2098_v49 = vpop.f32.mrb[30].mxu0  ;;  %v735_v17 = vsel %vm667_vm4, %v1866_v28, 0.0 }
 0x11c   :  { %3039 = vst [vmem:[#allocation22_spill] sm:$0xff] %v2098_v49  ;;  %v923_v45 = vadd.f32 %v922_v37, %v921_v21  ;;  %v2102_v31 = vpop.f32.mrb[31].mxu0  ;;  %v726_v36 = vadd.f32 %v725_v40, %v724_v18  ;;  %v834_v63 = vmul.f32 %v2098_v49, %v2098_v49  ;;  %v2113_v21 = vpop.f32.mrb[30].mxu1  ;;  %v729_v18 = vsel %vm667_vm4, %v2098_v49, 0.0 }
 0x11d   :  { %v727_v54 = vsel %vm667_vm4, %v2102_v31, 0.0  ;;  %v833_v39 = vmul.f32 %v2102_v31, %v2102_v31  ;;  %3041 = vst [vmem:[#allocation24_spill] sm:$0xff] %v2113_v21  ;;  %v2120_v37 = vpop.f32.mrb[31].mxu1 }
 0x11e   :  { %v728_v4 = vadd.f32 %v727_v54, %v726_v36  ;;  %v925_v57 = vadd.f32 %v924_v33, %v923_v45  ;;  %3042 = vst [vmem:[#allocation25_spill] sm:$0xff] %v2120_v37  ;;  %v928_v47 = vsel %vm667_vm4, %v834_v63, 0.0  ;;  %v836_v36 = vmul.f32 %v1844_v14, %v1844_v14 }
 0x11f   :  { %v926_v40 = vsel %vm667_vm4, %v833_v39, 0.0  ;;  %v930_v45 = vsel %vm667_vm4, %v835_v15, 0.0  ;;  %v837_v33 = vmul.f32 %v1866_v28, %v1866_v28  ;;  %v733_v39 = vsel %vm667_vm4, %v1844_v14, 0.0 }
 0x120   :  { %v730_v1 = vadd.f32 %v729_v18, %v728_v4  ;;  %v927_v8 = vadd.f32 %v926_v40, %v925_v57  ;;  %v932_v63 = vsel %vm667_vm4, %v836_v36, 0.0  ;;  %v838_v18 = vmul.f32 %v1859_v24, %v1859_v24 }
 0x121   :  { %v934_v15 = vsel %vm667_vm4, %v837_v33, 0.0  ;;  %v839_v40 = vmul.f32 %v1884_v42, %v1884_v42 }
 0x122   :  { %v929_v54 = vadd.f32 %v928_v47, %v927_v8  ;;  %v732_v49 = vadd.f32 %v731_v59, %v730_v1  ;;  %v737_v8 = vsel %vm667_vm4, %v1859_v24, 0.0  ;;  %v739_v59 = vsel %vm667_vm4, %v1884_v42, 0.0 }
 0x123   :  { %v936_v36 = vsel %vm667_vm4, %v838_v18, 0.0  ;;  %v938_v33 = vsel %vm667_vm4, %v839_v40, 0.0 }
 0x124   :  { %v931_v4 = vadd.f32 %v930_v45, %v929_v54  ;;  %v734_v57 = vadd.f32 %v733_v39, %v732_v49  ;;  %v840_v54 = vmul.f32 %v1877_v38, %v1877_v38  ;;  %v841_v39 = vmul.f32 %v1902_v56, %v1902_v56 }
 0x126   :  { %v736_v47 = vadd.f32 %v735_v17, %v734_v57  ;;  %v933_v1 = vadd.f32 %v932_v63, %v931_v4  ;;  %v741_v57 = vsel %vm667_vm4, %v1877_v38, 0.0  ;;  %v743_v63 = vsel %vm667_vm4, %v1902_v56, 0.0 }
 0x127   :  { %v940_v18 = vsel %vm667_vm4, %v840_v54, 0.0  ;;  %v942_v40 = vsel %vm667_vm4, %v841_v39, 0.0 }
 0x128   :  { %v935_v45 = vadd.f32 %v934_v15, %v933_v1  ;;  %v738_v49 = vadd.f32 %v737_v8, %v736_v47  ;;  %v842_v1 = vmul.f32 %v1895_v52, %v1895_v52  ;;  %v843_v8 = vmul.f32 %v1920_v7, %v1920_v7 }
 0x12a   :  { %v740_v17 = vadd.f32 %v739_v59, %v738_v49  ;;  %v937_v4 = vadd.f32 %v936_v36, %v935_v45  ;;  %v745_v49 = vsel %vm667_vm4, %v1895_v52, 0.0  ;;  %v747_v36 = vsel %vm667_vm4, %v1920_v7, 0.0 }
 0x12b   :  { %v944_v54 = vsel %vm667_vm4, %v842_v1, 0.0  ;;  %v946_v39 = vsel %vm667_vm4, %v843_v8, 0.0 }
 0x12c   :  { %v939_v15 = vadd.f32 %v938_v33, %v937_v4  ;;  %v742_v47 = vadd.f32 %v741_v57, %v740_v17  ;;  %v844_v4 = vmul.f32 %v1913_v2, %v1913_v2  ;;  %v845_v57 = vmul.f32 %v1938_v29, %v1938_v29 }
 0x12e   :  { %v744_v59 = vadd.f32 %v743_v63, %v742_v47  ;;  %v941_v45 = vadd.f32 %v940_v18, %v939_v15  ;;  %v749_v47 = vsel %vm667_vm4, %v1913_v2, 0.0  ;;  %v751_v18 = vsel %vm667_vm4, %v1938_v29, 0.0 }
 0x12f   :  { %v948_v1 = vsel %vm667_vm4, %v844_v4, 0.0  ;;  %v950_v8 = vsel %vm667_vm4, %v845_v57, 0.0 }
 0x130   :  { %v943_v33 = vadd.f32 %v942_v40, %v941_v45  ;;  %v746_v17 = vadd.f32 %v745_v49, %v744_v59  ;;  %v846_v45 = vmul.f32 %v1931_v22, %v1931_v22  ;;  %v847_v49 = vmul.f32 %v1956_v48, %v1956_v48 }
 0x132   :  { %v748_v63 = vadd.f32 %v747_v36, %v746_v17  ;;  %v945_v15 = vadd.f32 %v944_v54, %v943_v33  ;;  %v753_v17 = vsel %vm667_vm4, %v1931_v22, 0.0  ;;  %v755_v54 = vsel %vm667_vm4, %v1956_v48, 0.0 }
 0x133   :  { %v952_v4 = vsel %vm667_vm4, %v846_v45, 0.0  ;;  %v954_v57 = vsel %vm667_vm4, %v847_v49, 0.0 }
 0x134   :  { %v947_v40 = vadd.f32 %v946_v39, %v945_v15  ;;  %v750_v59 = vadd.f32 %v749_v47, %v748_v63  ;;  %v848_v15 = vmul.f32 %v1949_v43, %v1949_v43  ;;  %v849_v47 = vmul.f32 %v1974_v3, %v1974_v3 }
 0x136   :  { %v752_v36 = vadd.f32 %v751_v18, %v750_v59  ;;  %v949_v33 = vadd.f32 %v948_v1, %v947_v40  ;;  %v757_v59 = vsel %vm667_vm4, %v1949_v43, 0.0  ;;  %v759_v1 = vsel %vm667_vm4, %v1974_v3, 0.0 }
 0x137   :  { %v956_v45 = vsel %vm667_vm4, %v848_v15, 0.0  ;;  %v958_v49 = vsel %vm667_vm4, %v849_v47, 0.0 }
 0x138   :  { %v951_v39 = vadd.f32 %v950_v8, %v949_v33  ;;  %v754_v63 = vadd.f32 %v753_v17, %v752_v36  ;;  %v850_v33 = vmul.f32 %v1967_v62, %v1967_v62  ;;  %v851_v17 = vmul.f32 %v1992_v34, %v1992_v34 }
 0x13a   :  { %v756_v18 = vadd.f32 %v755_v54, %v754_v63  ;;  %v953_v40 = vadd.f32 %v952_v4, %v951_v39  ;;  %v761_v63 = vsel %vm667_vm4, %v1967_v62, 0.0  ;;  %v763_v4 = vsel %vm667_vm4, %v1992_v34, 0.0 }
 0x13b   :  { %v960_v15 = vsel %vm667_vm4, %v850_v33, 0.0  ;;  %v962_v47 = vsel %vm667_vm4, %v851_v17, 0.0 }
 0x13c   :  { %v955_v8 = vadd.f32 %v954_v57, %v953_v40  ;;  %v758_v36 = vadd.f32 %v757_v59, %v756_v18  ;;  %v852_v40 = vmul.f32 %v1985_v23, %v1985_v23  ;;  %v853_v59 = vmul.f32 %v2010_v60, %v2010_v60 }
 0x13e   :  { %v760_v54 = vadd.f32 %v759_v1, %v758_v36  ;;  %v957_v39 = vadd.f32 %v956_v45, %v955_v8  ;;  %v765_v36 = vsel %vm667_vm4, %v1985_v23, 0.0  ;;  %v767_v45 = vsel %vm667_vm4, %v2010_v60, 0.0 }
 0x13f   :  { %v964_v33 = vsel %vm667_vm4, %v852_v40, 0.0  ;;  %v966_v17 = vsel %vm667_vm4, %v853_v59, 0.0 }
 0x140   :  { %v959_v57 = vadd.f32 %v958_v49, %v957_v39  ;;  %v762_v18 = vadd.f32 %v761_v63, %v760_v54  ;;  %v854_v39 = vmul.f32 %v2003_v53, %v2003_v53  ;;  %v855_v63 = vmul.f32 %v2028_v35, %v2028_v35 }
 0x142   :  { %v764_v1 = vadd.f32 %v763_v4, %v762_v18  ;;  %v961_v8 = vadd.f32 %v960_v15, %v959_v57  ;;  %v769_v18 = vsel %vm667_vm4, %v2003_v53, 0.0  ;;  %v771_v15 = vsel %vm667_vm4, %v2028_v35, 0.0 }
 0x143   :  { %v968_v40 = vsel %vm667_vm4, %v854_v39, 0.0  ;;  %v970_v59 = vsel %vm667_vm4, %v855_v63, 0.0 }
 0x144   :  { %v963_v49 = vadd.f32 %v962_v47, %v961_v8  ;;  %v766_v54 = vadd.f32 %v765_v36, %v764_v1  ;;  %v856_v8 = vmul.f32 %v2021_v20, %v2021_v20  ;;  %v857_v36 = vmul.f32 %v2046_v11, %v2046_v11 }
 0x146   :  { %v768_v4 = vadd.f32 %v767_v45, %v766_v54  ;;  %v965_v57 = vadd.f32 %v964_v33, %v963_v49  ;;  %v773_v54 = vsel %vm667_vm4, %v2021_v20, 0.0  ;;  %v775_v33 = vsel %vm667_vm4, %v2046_v11, 0.0 }
 0x147   :  { %v972_v39 = vsel %vm667_vm4, %v856_v8, 0.0  ;;  %v974_v63 = vsel %vm667_vm4, %v857_v36, 0.0 }
 0x148   :  { %v967_v47 = vadd.f32 %v966_v17, %v965_v57  ;;  %v770_v1 = vadd.f32 %v769_v18, %v768_v4  ;;  %v858_v57 = vmul.f32 %v2039_v61, %v2039_v61  ;;  %v859_v18 = vmul.f32 %v2064_v46, %v2064_v46 }
 0x14a   :  { %v772_v45 = vadd.f32 %v771_v15, %v770_v1  ;;  %v969_v49 = vadd.f32 %v968_v40, %v967_v47  ;;  %v777_v1 = vsel %vm667_vm4, %v2039_v61, 0.0  ;;  %v779_v40 = vsel %vm667_vm4, %v2064_v46, 0.0 }
 0x14b   :  { %v976_v8 = vsel %vm667_vm4, %v858_v57, 0.0  ;;  %v978_v36 = vsel %vm667_vm4, %v859_v18, 0.0 }
 0x14c   :  { %v971_v17 = vadd.f32 %v970_v59, %v969_v49  ;;  %v774_v4 = vadd.f32 %v773_v54, %v772_v45  ;;  %v860_v49 = vmul.f32 %v2057_v51, %v2057_v51  ;;  %v861_v54 = vmul.f32 %v2082_v25, %v2082_v25 }
 0x14e   :  { %v776_v15 = vadd.f32 %v775_v33, %v774_v4  ;;  %v973_v47 = vadd.f32 %v972_v39, %v971_v17  ;;  %v781_v4 = vsel %vm667_vm4, %v2057_v51, 0.0  ;;  %v783_v39 = vsel %vm667_vm4, %v2082_v25, 0.0 }
 0x14f   :  { %v980_v57 = vsel %vm667_vm4, %v860_v49, 0.0  ;;  %v982_v18 = vsel %vm667_vm4, %v861_v54, 0.0 }
 0x150   :  { %v975_v59 = vadd.f32 %v974_v63, %v973_v47  ;;  %v778_v45 = vadd.f32 %v777_v1, %v776_v15  ;;  %v862_v47 = vmul.f32 %v2075_v12, %v2075_v12  ;;  %v863_v1 = vmul.f32 %v2100_v13, %v2100_v13 }
 0x152   :  { %v780_v33 = vadd.f32 %v779_v40, %v778_v45  ;;  %v977_v17 = vadd.f32 %v976_v8, %v975_v59  ;;  %v785_v45 = vsel %vm667_vm4, %v2075_v12, 0.0  ;;  %v787_v8 = vsel %vm667_vm4, %v2100_v13, 0.0 }
 0x153   :  { %v984_v49 = vsel %vm667_vm4, %v862_v47, 0.0  ;;  %v986_v54 = vsel %vm667_vm4, %v863_v1, 0.0 }
 0x154   :  { %v979_v63 = vadd.f32 %v978_v36, %v977_v17  ;;  %v782_v15 = vadd.f32 %v781_v4, %v780_v33  ;;  %v864_v17 = vmul.f32 %v2093_v0, %v2093_v0  ;;  %v865_v4 = vmul.f32 %v2120_v37, %v2120_v37 }
 0x156   :  { %v784_v40 = vadd.f32 %v783_v39, %v782_v15  ;;  %v981_v59 = vadd.f32 %v980_v57, %v979_v63  ;;  %v789_v15 = vsel %vm667_vm4, %v2093_v0, 0.0  ;;  %v791_v57 = vsel %vm667_vm4, %v2120_v37, 0.0 }
 0x157   :  { %v988_v47 = vsel %vm667_vm4, %v864_v17, 0.0  ;;  %v990_v1 = vsel %vm667_vm4, %v865_v4, 0.0 }
 0x158   :  { %v983_v36 = vadd.f32 %v982_v18, %v981_v59  ;;  %v786_v33 = vadd.f32 %v785_v45, %v784_v40  ;;  %v866_v59 = vmul.f32 %v2113_v21, %v2113_v21 }
 0x15a   :  { %v788_v39 = vadd.f32 %v787_v8, %v786_v33  ;;  %v985_v63 = vadd.f32 %v984_v49, %v983_v36  ;;  %v793_v8 = vsel %vm667_vm4, %v2113_v21, 0.0  ;;  %v992_v49 = vsel %vm667_vm4, %v866_v59, 0.0 }
 0x15b   :  { %v1012_v59 = vlaneseq }
 0x15c   :  { %v987_v18 = vadd.f32 %v986_v54, %v985_v63  ;;  %v790_v40 = vadd.f32 %v789_v15, %v788_v39 }
 0x15e   :  { %v792_v45 = vadd.f32 %v791_v57, %v790_v40  ;;  %v989_v13 = vadd.f32 %v988_v47, %v987_v18 }
 0x160   :  { %v794_v36 = vadd.f32 %v793_v8, %v792_v45  ;;  %v991_v33 = vadd.f32 %v990_v1, %v989_v13  ;;  %v2279_v8 = vshrl.u32 %v1012_v59, 7  ;;  %v3050_v59 = vld [vmem:[#allocation11_spill] sm:$0xff] }
 0x162   :  { %v795_v0 = vrot.slane %v794_v36, 4  ;;  %v993_v37 = vadd.f32 %v992_v49, %v991_v33  ;;  %v3058_v33 = vld [vmem:[#allocation20_spill] sm:$0xff] }
 0x164   :  { %v796_v54 = vadd.f32 %v795_v0, %v794_v36  ;;  %v994_v39 = vrot.slane %v993_v37, 4  ;;  %v1004_v0 = vld [vmem:[%s2979_s2] sm:$0x1] }
 0x166   :  { %v797_v63 = vrot.slane %v796_v54, 2  ;;  %v995_v17 = vadd.f32 %v994_v39, %v993_v37  ;;  %v3006_v37 = vsub.s32 0, %v2279_v8 }
 0x168   :  { %v798_v15 = vadd.f32 %v797_v63, %v796_v54  ;;  %v996_v12 = vrot.slane %v995_v17, 2 }
 0x16a   :  { %v799_v25 = vrot.slane %v798_v15, 1  ;;  %v997_v51 = vadd.f32 %v996_v12, %v995_v17 }
 0x16c   :  { %v800_v4 = vadd.f32 %v799_v25, %v798_v15  ;;  %v998_v57 = vrot.slane %v997_v51, 1  ;;  %v3043_v15 = vld [vmem:[#allocation3_spill] sm:$0xff] }
 0x16e   :  { %v802_v18 = vmul.f32 0.001953125, %v800_v4  ;;  %v999_v40 = vadd.f32 %v998_v57, %v997_v51  ;;  %v2288_v51 = vld [vmem:[%s2980_s3] sm:$0x1]  ;;  %v3044_v4 = vld [vmem:[#allocation5_spill] sm:$0xff]  ;;  %v3045_v57 = vld [vmem:[#allocation4_spill] sm:$0xff] }
 0x170   :  { %v1000_v47 = vmul.f32 0.001953125, %v999_v40  ;;  %v1001_v21 = vmul.f32 %v802_v18, %v802_v18  ;;  %v3047_v40 = vld [vmem:[#allocation6_spill] sm:$0xff] }
 0x172   :  { %v1002_v45 = vsub.f32 %v1000_v47, %v1001_v21  ;;  %v3048_v47 = vld [vmem:[#allocation9_spill] sm:$0xff] }
 0x174   :  { %v1003_v13 = vmax.f32 %v1002_v45, 0.0 }
 0x176   :  { %v1005_v1 = vadd.f32 1e-05, %v1003_v13  ;;  %v3049_v13 = vld [vmem:[#allocation8_spill] sm:$0xff] }
 0x178   :  { %1535 = vrsqrt.f32 %v1005_v1 }
 0x182   :  { %v1536_v12 = vpop.eup %1535 }
 0x183   :  { %v1007_v25 = vmul.f32 %v1536_v12, %v1004_v0  ;;  %v3051_v12 = vld [vmem:[#allocation10_spill] sm:$0xff] }
 0x185   :  { %v2290_v21 = vmul.f32 %v1007_v25, %v802_v18  ;;  %v2294_v36 = vrot.slane %v1007_v25, %v3006_v37  ;;  %v3046_v18 = vld [vmem:[#allocation7_spill] sm:$0xff]  ;;  %v3059_v37 = vld [vmem:[#allocation18_spill] sm:$0xff] }
 0x187   :  { %v2300_v49 = vmul.f32 %v2294_v36, %v1837_v9  ;;  %v2304_v54 = vmul.f32 %v1831_v6, %v2294_v36  ;;  %v2308_v39 = vmul.f32 %v2294_v36, %v1851_v19  ;;  %v2312_v63 = vmul.f32 %v1847_v16, %v2294_v36 }
 0x188   :  { %v2316_v17 = vmul.f32 %v2294_v36, %v1868_v30  ;;  %v2320_v9 = vmul.f32 %v1864_v27, %v2294_v36  ;;  %v2324_v6 = vmul.f32 %v2294_v36, %v1886_v44  ;;  %v2328_v19 = vmul.f32 %v1882_v41, %v2294_v36 }
 0x189   :  { %v2332_v16 = vmul.f32 %v2294_v36, %v1904_v58  ;;  %v2336_v30 = vmul.f32 %v1900_v55, %v2294_v36  ;;  %v2340_v27 = vmul.f32 %v2294_v36, %v1922_v10  ;;  %v2344_v44 = vmul.f32 %v1918_v5, %v2294_v36 }
 0x18a   :  { %v2348_v41 = vmul.f32 %v2294_v36, %v1940_v32  ;;  %v2352_v58 = vmul.f32 %v1936_v26, %v2294_v36  ;;  %v2356_v55 = vmul.f32 %v2294_v36, %v1958_v50  ;;  %v2360_v10 = vmul.f32 %v3043_v15, %v2294_v36  ;;  %v3052_v15 = vld [vmem:[#allocation13_spill] sm:$0xff] }
 0x18b   :  { %v2364_v5 = vmul.f32 %v2294_v36, %v3044_v4  ;;  %v2368_v32 = vmul.f32 %v3045_v57, %v2294_v36  ;;  %v2372_v26 = vmul.f32 %v2294_v36, %v3046_v18  ;;  %v2376_v50 = vmul.f32 %v3047_v40, %v2294_v36  ;;  %v3053_v57 = vld [vmem:[#allocation12_spill] sm:$0xff] }
 0x18c   :  { %v2380_v45 = vmul.f32 %v2294_v36, %v3048_v47  ;;  %v2384_v1 = vmul.f32 %v3049_v13, %v2294_v36  ;;  %v2388_v0 = vmul.f32 %v2294_v36, %v3050_v59  ;;  %v2392_v25 = vmul.f32 %v3051_v12, %v2294_v36  ;;  %v3055_v40 = vld [vmem:[#allocation16_spill] sm:$0xff]  ;;  %v3057_v13 = vld [vmem:[#allocation15_spill] sm:$0xff] }
 0x18d   :  { %v2396_v4 = vmul.f32 %v2294_v36, %v3052_v15  ;;  %v2400_v18 = vmul.f32 %v3053_v57, %v2294_v36  ;;  %v2404_v47 = vmul.f32 %v2294_v36, %v3055_v40  ;;  %v2408_v59 = vmul.f32 %v3057_v13, %v2294_v36 }
 0x18e   :  { %v2412_v12 = vmul.f32 %v2294_v36, %v3058_v33  ;;  %v2416_v15 = vmul.f32 %v3059_v37, %v2294_v36  ;;  %v2420_v57 = vmul.f32 %v2294_v36, %v2102_v31  ;;  %v2432_v33 = vmul.f32 %v1844_v14, %v2294_v36 }
 0x18f   :  { %3054 = vst [vmem:[#allocation3_spill] sm:$0xff] %v2400_v18  ;;  %3056 = vst [vmem:[#allocation5_spill] sm:$0xff] %v2404_v47  ;;  %v3060_v18 = vld [vmem:[#allocation22_spill] sm:$0xff]  ;;  %v2436_v37 = vmul.f32 %v2294_v36, %v1866_v28  ;;  %v2440_v31 = vmul.f32 %v1859_v24, %v2294_v36  ;;  %v2452_v14 = vmul.f32 %v2294_v36, %v1902_v56 }
 0x190   :  { %v2424_v40 = vmul.f32 %v3060_v18, %v2294_v36  ;;  %v3061_v47 = vld [vmem:[#allocation2_spill] sm:$0xff]  ;;  %v2444_v18 = vmul.f32 %v2294_v36, %v1884_v42  ;;  %v2456_v28 = vmul.f32 %v1895_v52, %v2294_v36  ;;  %v2460_v24 = vmul.f32 %v2294_v36, %v1920_v7 }
 0x191   :  { %v2428_v13 = vmul.f32 %v2294_v36, %v3061_v47  ;;  %v2448_v47 = vmul.f32 %v1877_v38, %v2294_v36  ;;  %v2464_v42 = vmul.f32 %v1913_v2, %v2294_v36  ;;  %v2468_v38 = vmul.f32 %v2294_v36, %v1938_v29 }
 0x192   :  { %v2472_v56 = vmul.f32 %v1931_v22, %v2294_v36  ;;  %v2476_v52 = vmul.f32 %v2294_v36, %v1956_v48  ;;  %v2480_v7 = vmul.f32 %v1949_v43, %v2294_v36  ;;  %v2484_v2 = vmul.f32 %v2294_v36, %v1974_v3 }
 0x193   :  { %v2488_v29 = vmul.f32 %v1967_v62, %v2294_v36  ;;  %v2492_v22 = vmul.f32 %v2294_v36, %v1992_v34  ;;  %v2496_v48 = vmul.f32 %v1985_v23, %v2294_v36  ;;  %v2500_v43 = vmul.f32 %v2294_v36, %v2010_v60 }
 0x194   :  { %v2504_v3 = vmul.f32 %v2003_v53, %v2294_v36  ;;  %v2508_v62 = vmul.f32 %v2294_v36, %v2028_v35  ;;  %v2512_v34 = vmul.f32 %v2021_v20, %v2294_v36  ;;  %v2516_v23 = vmul.f32 %v2294_v36, %v2046_v11 }
 0x195   :  { %v2520_v60 = vmul.f32 %v2039_v61, %v2294_v36  ;;  %v2524_v53 = vmul.f32 %v2294_v36, %v2064_v46 }
 0x196   :  { %3062 = vst [vmem:[#allocation4_spill] sm:$0xff] %v2504_v3  ;;  %3063 = vst [vmem:[#allocation7_spill] sm:$0xff] %v2508_v62  ;;  %v3068_v3 = vld [vmem:[#allocation14_spill] sm:$0xff]  ;;  %v3070_v62 = vld [vmem:[#allocation19_spill] sm:$0xff] }
 0x197   :  { %3064 = vst [vmem:[#allocation6_spill] sm:$0xff] %v2512_v34  ;;  %3065 = vst [vmem:[#allocation9_spill] sm:$0xff] %v2516_v23  ;;  %v2528_v35 = vmul.f32 %v3068_v3, %v2294_v36  ;;  %v2532_v20 = vmul.f32 %v2294_v36, %v3070_v62  ;;  %v3072_v34 = vld [vmem:[#allocation17_spill] sm:$0xff]  ;;  %v3074_v23 = vld [vmem:[#allocation23_spill] sm:$0xff] }
 0x198   :  { %3066 = vst [vmem:[#allocation8_spill] sm:$0xff] %v2520_v60  ;;  %3067 = vst [vmem:[#allocation11_spill] sm:$0xff] %v2524_v53  ;;  %v2536_v11 = vmul.f32 %v3072_v34, %v2294_v36  ;;  %v2540_v61 = vmul.f32 %v2294_v36, %v3074_v23  ;;  %v3075_v60 = vld [vmem:[#allocation21_spill] sm:$0xff]  ;;  %v3079_v34 = vsub.f32 %v2288_v51, %v2290_v21 }
 0x199   :  { %3069 = vst [vmem:[#allocation10_spill] sm:$0xff] %v2528_v35  ;;  %3071 = vst [vmem:[#allocation13_spill] sm:$0xff] %v2532_v20  ;;  %v2544_v46 = vmul.f32 %v3075_v60, %v2294_v36  ;;  %v3076_v53 = vld [vmem:[#allocation25_spill] sm:$0xff]  ;;  %v3077_v35 = vld [vmem:[#allocation24_spill] sm:$0xff]  ;;  %v3078_v20 = vsub.s32 0, %v2279_v8 }
 0x19a   :  { %3073 = vst [vmem:[#allocation12_spill] sm:$0xff] %v2536_v11  ;;  %v2548_v3 = vmul.f32 %v2294_v36, %v3076_v53  ;;  %v2552_v62 = vmul.f32 %v3077_v35, %v2294_v36 }
 0x19b   :  { %v2559_v11 = vrot.slane %v3079_v34, %v3078_v20 }
 0x19d   :  { %v2563_v23 = vadd.f32 %v2559_v11, %v2300_v49  ;;  %v2567_v60 = vadd.f32 %v2559_v11, %v2304_v54  ;;  %v2571_v53 = vadd.f32 %v2559_v11, %v2308_v39  ;;  %v2575_v8 = vadd.f32 %v2559_v11, %v2312_v63  ;;  %v3097_v34 = vld [vmem:[#allocation4_spill] sm:$0xff] }
 0x19e   :  { %v2579_v51 = vadd.f32 %v2559_v11, %v2316_v17  ;;  %v2583_v21 = vadd.f32 %v2559_v11, %v2320_v9  ;;  %v2587_v36 = vadd.f32 %v2559_v11, %v2324_v6  ;;  %v2591_v49 = vadd.f32 %v2559_v11, %v2328_v19 }
 0x19f   :  { %v2595_v54 = vadd.f32 %v2559_v11, %v2332_v16  ;;  %v2599_v39 = vadd.f32 %v2559_v11, %v2336_v30  ;;  %v2603_v63 = vadd.f32 %v2559_v11, %v2340_v27  ;;  %v2607_v17 = vadd.f32 %v2559_v11, %v2344_v44 }
 0x1a0   :  { %3080 = vst [vmem:[#allocation16_spill] sm:$0xff] %v2579_v51  ;;  %3081 = vst [vmem:[#allocation15_spill] sm:$0xff] %v2583_v21  ;;  %v2611_v9 = vadd.f32 %v2559_v11, %v2348_v41  ;;  %v2615_v6 = vadd.f32 %v2559_v11, %v2352_v58  ;;  %v2619_v19 = vadd.f32 %v2559_v11, %v2356_v55 }
 0x1a1   :  { %3082 = vst [vmem:[#allocation20_spill] sm:$0xff] %v2587_v36  ;;  %3083 = vst [vmem:[#allocation18_spill] sm:$0xff] %v2591_v49  ;;  %v2623_v16 = vadd.f32 %v2559_v11, %v2360_v10  ;;  %v2627_v30 = vadd.f32 %v2559_v11, %v2364_v5  ;;  %v2631_v27 = vadd.f32 %v2559_v11, %v2368_v32 }
 0x1a2   :  { %3084 = vst [vmem:[#allocation22_spill] sm:$0xff] %v2595_v54  ;;  %3085 = vst [vmem:[#allocation2_spill] sm:$0xff] %v2599_v39  ;;  %v2635_v44 = vadd.f32 %v2559_v11, %v2372_v26  ;;  %v2639_v41 = vadd.f32 %v2559_v11, %v2376_v50  ;;  %v2643_v58 = vadd.f32 %v2559_v11, %v2380_v45  ;;  %v3092_v26 = vld [vmem:[#allocation3_spill] sm:$0xff]  ;;  %v3093_v45 = vld [vmem:[#allocation5_spill] sm:$0xff] }
 0x1a3   :  { %3086 = vst [vmem:[#allocation14_spill] sm:$0xff] %v2603_v63  ;;  %3087 = vst [vmem:[#allocation19_spill] sm:$0xff] %v2607_v17  ;;  %v2647_v55 = vadd.f32 %v2559_v11, %v2384_v1  ;;  %v2651_v10 = vadd.f32 %v2559_v11, %v2388_v0  ;;  %v2655_v5 = vadd.f32 %v2559_v11, %v2392_v25 }
 0x1a4   :  { %3088 = vst [vmem:[#allocation17_spill] sm:$0xff] %v2611_v9  ;;  %3089 = vst [vmem:[#allocation23_spill] sm:$0xff] %v2615_v6  ;;  %v2659_v32 = vadd.f32 %v2559_v11, %v2396_v4  ;;  %v2663_v50 = vadd.f32 %v2559_v11, %v3092_v26  ;;  %v2667_v1 = vadd.f32 %v2559_v11, %v3093_v45  ;;  %v3099_v26 = vld [vmem:[#allocation7_spill] sm:$0xff]  ;;  %v3101_v45 = vld [vmem:[#allocation6_spill] sm:$0xff] }
 0x1a5   :  { %3090 = vst [vmem:[#allocation21_spill] sm:$0xff] %v2619_v19  ;;  %3091 = vst [vmem:[#allocation25_spill] sm:$0xff] %v2623_v16  ;;  %v2671_v0 = vadd.f32 %v2559_v11, %v2408_v59  ;;  %v2675_v25 = vadd.f32 %v2559_v11, %v2412_v12  ;;  %v2679_v4 = vadd.f32 %v2559_v11, %v2416_v15 }
 0x1a6   :  { %v2683_v35 = vadd.f32 %v2559_v11, %v2420_v57  ;;  %v2687_v20 = vadd.f32 %v2559_v11, %v2424_v40  ;;  %v2691_v59 = vadd.f32 %v2559_v11, %v2428_v13  ;;  %v2695_v12 = vadd.f32 %v2559_v11, %v2432_v33 }
 0x1a7   :  { %v2699_v15 = vadd.f32 %v2559_v11, %v2436_v37  ;;  %v2703_v57 = vadd.f32 %v2559_v11, %v2440_v31  ;;  %v2707_v40 = vadd.f32 %v2559_v11, %v2444_v18  ;;  %v2711_v13 = vadd.f32 %v2559_v11, %v2448_v47 }
 0x1a8   :  { %v2715_v33 = vadd.f32 %v2559_v11, %v2452_v14  ;;  %v2719_v37 = vadd.f32 %v2559_v11, %v2456_v28  ;;  %v2723_v31 = vadd.f32 %v2559_v11, %v2460_v24  ;;  %v2727_v18 = vadd.f32 %v2559_v11, %v2464_v42 }
 0x1a9   :  { %v2731_v47 = vadd.f32 %v2559_v11, %v2468_v38  ;;  %v2735_v14 = vadd.f32 %v2559_v11, %v2472_v56  ;;  %v2739_v28 = vadd.f32 %v2559_v11, %v2476_v52  ;;  %v2743_v24 = vadd.f32 %v2559_v11, %v2480_v7 }
 0x1aa   :  { %v2747_v42 = vadd.f32 %v2559_v11, %v2484_v2  ;;  %v2751_v38 = vadd.f32 %v2559_v11, %v2488_v29  ;;  %v2755_v56 = vadd.f32 %v2559_v11, %v2492_v22  ;;  %v2759_v52 = vadd.f32 %v2559_v11, %v2496_v48 }
 0x1ab   :  { %v2763_v7 = vadd.f32 %v2559_v11, %v2500_v43  ;;  %v2767_v2 = vadd.f32 %v2559_v11, %v3097_v34  ;;  %v2771_v29 = vadd.f32 %v2559_v11, %v3099_v26  ;;  %v2775_v22 = vadd.f32 %v2559_v11, %v3101_v45 }
 0x1ac   :  { %3094 = vst [vmem:[#allocation24_spill] sm:$0xff] %v2755_v56  ;;  %3095 = vst [vmem:[#allocation3_spill] sm:$0xff] %v2759_v52  ;;  %v3103_v56 = vld [vmem:[#allocation9_spill] sm:$0xff]  ;;  %v3104_v52 = vld [vmem:[#allocation8_spill] sm:$0xff] }
 0x1ad   :  { %3096 = vst [vmem:[#allocation5_spill] sm:$0xff] %v2763_v7  ;;  %3098 = vst [vmem:[#allocation4_spill] sm:$0xff] %v2767_v2  ;;  %v2779_v48 = vadd.f32 %v2559_v11, %v3103_v56  ;;  %v2783_v43 = vadd.f32 %v2559_v11, %v3104_v52  ;;  %v3105_v7 = vld [vmem:[#allocation11_spill] sm:$0xff]  ;;  %v3106_v2 = vld [vmem:[#allocation10_spill] sm:$0xff]  ;;  %v2803_v52 = vadd.f32 %v2559_v11, %v2540_v61  ;;  %v1174_v61 = vmax.f32 %v2655_v5, 0.0 }
 0x1ae   :  { %3100 = vst [vmem:[#allocation7_spill] sm:$0xff] %v2771_v29  ;;  %3102 = vst [vmem:[#allocation6_spill] sm:$0xff] %v2775_v22  ;;  %v2787_v34 = vadd.f32 %v2559_v11, %v3105_v7  ;;  %v2791_v26 = vadd.f32 %v2559_v11, %v3106_v2  ;;  %v3107_v29 = vld [vmem:[#allocation13_spill] sm:$0xff]  ;;  %v3109_v22 = vld [vmem:[#allocation12_spill] sm:$0xff]  ;;  %v2807_v7 = vadd.f32 %v2559_v11, %v2544_v46  ;;  %v1176_v46 = vmax.f32 %v2663_v50, 0.0 }
 0x1af   :  { %v2795_v45 = vadd.f32 %v2559_v11, %v3107_v29  ;;  %v2799_v56 = vadd.f32 %v2559_v11, %v3109_v22  ;;  %3111 = vst [vmem:[#allocation11_spill] sm:$0xff] %v2803_v52  ;;  %v2811_v2 = vadd.f32 %v2559_v11, %v2548_v3  ;;  %v2815_v29 = vadd.f32 %v2559_v11, %v2552_v62 }
 0x1b0   :  { %3112 = vst [vmem:[#allocation10_spill] sm:$0xff] %v2807_v7  ;;  %v1167_v7 = vmax.f32 %v2627_v30, 0.0  ;;  %v1168_v3 = vmax.f32 %v2631_v27, 0.0  ;;  %v1170_v11 = vmax.f32 %v2639_v41, 0.0  ;;  %v1171_v62 = vmax.f32 %v2643_v58, 0.0 }
 0x1b1   :  { %3108 = vst [vmem:[#allocation9_spill] sm:$0xff] %v2795_v45  ;;  %3110 = vst [vmem:[#allocation8_spill] sm:$0xff] %v2799_v56  ;;  %v1172_v22 = vmax.f32 %v2647_v55, 0.0  ;;  %v1173_v56 = vmax.f32 %v2651_v10, 0.0  ;;  %v1175_v52 = vmax.f32 %v2659_v32, 0.0  ;;  %v1177_v30 = vmax.f32 %v2667_v1, 0.0 }
 0x1b2   :  { %3113 = vst [vmem:[#allocation13_spill] sm:$0xff] %v2811_v2  ;;  %v1169_v2 = vmax.f32 %v2635_v44, 0.0  ;;  %v1178_v27 = vmax.f32 %v2671_v0, 0.0  ;;  %v1179_v44 = vmax.f32 %v2675_v25, 0.0  ;;  %v1180_v41 = vmax.f32 %v2679_v4, 0.0 }
 0x1b3   :  { %v1181_v58 = vmax.f32 %v2683_v35, 0.0  ;;  %v1182_v55 = vmax.f32 %v2687_v20, 0.0  ;;  %v1183_v10 = vmax.f32 %v2691_v59, 0.0  ;;  %v1184_v5 = vmax.f32 %v2695_v12, 0.0  ;;  %v3114_v45 = vld [vmem:[#allocation24_spill] sm:$0xff]  ;;  %v3115_v16 = vld [vmem:[#allocation3_spill] sm:$0xff] }
 0x1b4   :  { %v1185_v32 = vmax.f32 %v2699_v15, 0.0  ;;  %v1186_v50 = vmax.f32 %v2703_v57, 0.0  ;;  %v1187_v1 = vmax.f32 %v2707_v40, 0.0  ;;  %v1188_v0 = vmax.f32 %v2711_v13, 0.0  ;;  %v3116_v19 = vld [vmem:[#allocation5_spill] sm:$0xff]  ;;  %v3117_v6 = vld [vmem:[#allocation4_spill] sm:$0xff] }
 0x1b5   :  { %v1189_v25 = vmax.f32 %v2715_v33, 0.0  ;;  %v1190_v4 = vmax.f32 %v2719_v37, 0.0  ;;  %v1191_v35 = vmax.f32 %v2723_v31, 0.0  ;;  %v1192_v20 = vmax.f32 %v2727_v18, 0.0  ;;  %v3118_v9 = vld [vmem:[#allocation7_spill] sm:$0xff]  ;;  %v3119_v17 = vld [vmem:[#allocation6_spill] sm:$0xff] }
 0x1b6   :  { %v1193_v59 = vmax.f32 %v2731_v47, 0.0  ;;  %v1194_v12 = vmax.f32 %v2735_v14, 0.0  ;;  %v1195_v15 = vmax.f32 %v2739_v28, 0.0  ;;  %v1196_v57 = vmax.f32 %v2743_v24, 0.0  ;;  %v3122_v54 = vld [vmem:[#allocation11_spill] sm:$0xff] }
 0x1b7   :  { %v1197_v40 = vmax.f32 %v2747_v42, 0.0  ;;  %v1198_v13 = vmax.f32 %v2751_v38, 0.0  ;;  %v1199_v33 = vmax.f32 %v3114_v45, 0.0  ;;  %v1200_v37 = vmax.f32 %v3115_v16, 0.0  ;;  %v3123_v49 = vld [vmem:[#allocation10_spill] sm:$0xff] }
 0x1b8   :  { %v1201_v31 = vmax.f32 %v3116_v19, 0.0  ;;  %v1202_v18 = vmax.f32 %v3117_v6, 0.0  ;;  %v1203_v47 = vmax.f32 %v3118_v9, 0.0  ;;  %v1204_v14 = vmax.f32 %v3119_v17, 0.0  ;;  %v3120_v63 = vld [vmem:[#allocation9_spill] sm:$0xff]  ;;  %v3121_v39 = vld [vmem:[#allocation8_spill] sm:$0xff] }
 0x1b9   :  { %v1205_v28 = vmax.f32 %v2779_v48, 0.0  ;;  %v1206_v24 = vmax.f32 %v2783_v43, 0.0  ;;  %v1207_v42 = vmax.f32 %v2787_v34, 0.0  ;;  %v1208_v38 = vmax.f32 %v2791_v26, 0.0  ;;  %v3124_v36 = vld [vmem:[#allocation13_spill] sm:$0xff] }
 0x1ba   :  { %v1209_v45 = vmax.f32 %v3120_v63, 0.0  ;;  %v1210_v16 = vmax.f32 %v3121_v39, 0.0  ;;  %v1211_v19 = vmax.f32 %v3122_v54, 0.0  ;;  %v1212_v6 = vmax.f32 %v3123_v49, 0.0  ;;  %v3129_v54 = vld [vmem:[#allocation16_spill] sm:$0xff] }
 0x1bb   :  { %v1213_v9 = vmax.f32 %v3124_v36, 0.0  ;;  %v1214_v17 = vmax.f32 %v2815_v29, 0.0  ;;  %v3125_v48 = vmax.f32 %v2563_v23, 0.0  ;;  %v3126_v43 = vmax.f32 %v2567_v60, 0.0  ;;  %v3131_v29 = vld [vmem:[#allocation15_spill] sm:$0xff] }
 0x1bc   :  { %v3127_v26 = vmax.f32 %v2571_v53, 0.0  ;;  %v3128_v63 = vmax.f32 %v2575_v8, 0.0  ;;  %v3130_v49 = vmax.f32 %v3129_v54, 0.0  ;;  %v3132_v23 = vmax.f32 %v3131_v29, 0.0 }
 0x1bd   :  { %v1215_v21 = vmax.f32 %v3125_v48, %v1167_v7  ;;  %v1216_v34 = vmax.f32 %v3126_v43, %v1168_v3  ;;  %v3133_v48 = vld [vmem:[#allocation20_spill] sm:$0xff]  ;;  %v3135_v43 = vld [vmem:[#allocation18_spill] sm:$0xff] }
 0x1be   :  { %v1217_v51 = vmax.f32 %v3127_v26, %v1169_v2  ;;  %v1218_v39 = vmax.f32 %v3128_v63, %v1170_v11  ;;  %v1219_v36 = vmax.f32 %v3130_v49, %v1171_v62  ;;  %v1220_v7 = vmax.f32 %v3132_v23, %v1172_v22  ;;  %v3137_v26 = vld [vmem:[#allocation22_spill] sm:$0xff]  ;;  %v3143_v23 = vld [vmem:[#allocation19_spill] sm:$0xff] }
 0x1bf   :  { %v3134_v60 = vmax.f32 %v3133_v48, 0.0  ;;  %v3136_v53 = vmax.f32 %v3135_v43, 0.0  ;;  %v3138_v8 = vmax.f32 %v3137_v26, 0.0  ;;  %v3139_v63 = vld [vmem:[#allocation2_spill] sm:$0xff]  ;;  %v3144_v48 = vmax.f32 %v3143_v23, 0.0 }
 0x1c0   :  { %v3140_v54 = vmax.f32 %v3139_v63, 0.0  ;;  %v3141_v62 = vld [vmem:[#allocation14_spill] sm:$0xff]  ;;  %v1232_v23 = vmax.f32 %v1184_v5, %v1200_v37 }
 0x1c1   :  { %v1221_v3 = vmax.f32 %v3134_v60, %v1173_v56  ;;  %v1222_v2 = vmax.f32 %v3136_v53, %v1174_v61  ;;  %v1223_v11 = vmax.f32 %v3138_v8, %v1175_v52  ;;  %v3142_v29 = vmax.f32 %v3141_v62, 0.0  ;;  %v3145_v60 = vld [vmem:[#allocation17_spill] sm:$0xff]  ;;  %v3147_v61 = vld [vmem:[#allocation23_spill] sm:$0xff] }
 0x1c2   :  { %v1224_v49 = vmax.f32 %v3140_v54, %v1176_v46  ;;  %v1226_v56 = vmax.f32 %v3144_v48, %v1178_v27  ;;  %v3146_v43 = vmax.f32 %v3145_v60, 0.0  ;;  %v3148_v26 = vmax.f32 %v3147_v61, 0.0  ;;  %v3149_v52 = vld [vmem:[#allocation21_spill] sm:$0xff] }
 0x1c3   :  { %v1225_v22 = vmax.f32 %v3142_v29, %v1177_v30  ;;  %v3150_v63 = vmax.f32 %v3149_v52, 0.0  ;;  %v3151_v54 = vld [vmem:[#allocation25_spill] sm:$0xff]  ;;  %v1231_v30 = vmax.f32 %v1183_v10, %v1199_v33  ;;  %v1233_v27 = vmax.f32 %v1185_v32, %v1201_v31 }
 0x1c4   :  { %v1227_v53 = vmax.f32 %v3146_v43, %v1179_v44  ;;  %v1228_v8 = vmax.f32 %v3148_v26, %v1180_v41  ;;  %v3152_v62 = vmax.f32 %v3151_v54, 0.0  ;;  %v1234_v48 = vmax.f32 %v1186_v50, %v1202_v18 }
 0x1c5   :  { %v1229_v46 = vmax.f32 %v3150_v63, %v1181_v58  ;;  %v1235_v60 = vmax.f32 %v1187_v1, %v1203_v47  ;;  %v1236_v43 = vmax.f32 %v1188_v0, %v1204_v14  ;;  %v1237_v44 = vmax.f32 %v1189_v25, %v1205_v28 }
 0x1c6   :  { %v1230_v29 = vmax.f32 %v3152_v62, %v1182_v55  ;;  %v1238_v61 = vmax.f32 %v1190_v4, %v1206_v24  ;;  %v1239_v26 = vmax.f32 %v1191_v35, %v1207_v42  ;;  %v1240_v41 = vmax.f32 %v1192_v20, %v1208_v38 }
 0x1c7   :  { %v1241_v52 = vmax.f32 %v1193_v59, %v1209_v45  ;;  %v1242_v58 = vmax.f32 %v1194_v12, %v1210_v16  ;;  %v1243_v63 = vmax.f32 %v1195_v15, %v1211_v19  ;;  %v1244_v54 = vmax.f32 %v1196_v57, %v1212_v6 }
 0x1c8   :  { %v1245_v55 = vmax.f32 %v1197_v40, %v1213_v9  ;;  %v1246_v62 = vmax.f32 %v1198_v13, %v1214_v17  ;;  %v1247_v10 = vmax.f32 %v1215_v21, %v1231_v30  ;;  %v1248_v33 = vmax.f32 %v1216_v34, %v1232_v23 }
 0x1c9   :  { %v1249_v5 = vmax.f32 %v1217_v51, %v1233_v27  ;;  %v1250_v37 = vmax.f32 %v1218_v39, %v1234_v48  ;;  %v1251_v31 = vmax.f32 %v1219_v36, %v1235_v60  ;;  %v1252_v32 = vmax.f32 %v1220_v7, %v1236_v43 }
 0x1ca   :  { %v1253_v18 = vmax.f32 %v1221_v3, %v1237_v44  ;;  %v1254_v50 = vmax.f32 %v1222_v2, %v1238_v61  ;;  %v1255_v1 = vmax.f32 %v1223_v11, %v1239_v26  ;;  %v1256_v0 = vmax.f32 %v1224_v49, %v1240_v41  ;;  %1263 = vst.msk [vmem:[%s2981_s4] sm:$0xff] %vm667_vm4, %v1247_v10 }
 0x1cb   :  { %v1257_v25 = vmax.f32 %v1225_v22, %v1241_v52  ;;  %v1258_v4 = vmax.f32 %v1226_v56, %v1242_v58  ;;  %1264 = vst.msk [vmem:[%s2981_s4 + $0x8] sm:$0xff] %vm667_vm4, %v1248_v33  ;;  %1265 = vst.msk [vmem:[%s2981_s4 + $0x10] sm:$0xff] %vm667_vm4, %v1249_v5  ;;  %v1259_v51 = vmax.f32 %v1227_v53, %v1243_v63 }
 0x1cc   :  { %1266 = vst.msk [vmem:[%s2981_s4 + $0x18] sm:$0xff] %vm667_vm4, %v1250_v37  ;;  %v1260_v21 = vmax.f32 %v1228_v8, %v1244_v54  ;;  %v1261_v35 = vmax.f32 %v1229_v46, %v1245_v55  ;;  %v1262_v20 = vmax.f32 %v1230_v29, %v1246_v62  ;;  %1267 = vst.msk [vmem:[%s2981_s4 + $0x20] sm:$0xff] %vm667_vm4, %v1251_v31 }
 0x1cd   :  { %1268 = vst.msk [vmem:[%s2981_s4 + $0x28] sm:$0xff] %vm667_vm4, %v1252_v32  ;;  %1269 = vst.msk [vmem:[%s2981_s4 + $0x30] sm:$0xff] %vm667_vm4, %v1253_v18 }
 0x1ce   :  { %1270 = vst.msk [vmem:[%s2981_s4 + $0x38] sm:$0xff] %vm667_vm4, %v1254_v50  ;;  %1271 = vst.msk [vmem:[%s2981_s4 + $0x40] sm:$0xff] %vm667_vm4, %v1255_v1 }
 0x1cf   :  { %1272 = vst.msk [vmem:[%s2981_s4 + $0x48] sm:$0xff] %vm667_vm4, %v1256_v0  ;;  %1273 = vst.msk [vmem:[%s2981_s4 + $0x50] sm:$0xff] %vm667_vm4, %v1257_v25 }
 0x1d0   :  { %1274 = vst.msk [vmem:[%s2981_s4 + $0x58] sm:$0xff] %vm667_vm4, %v1258_v4  ;;  %1275 = vst.msk [vmem:[%s2981_s4 + $0x60] sm:$0xff] %vm667_vm4, %v1259_v51 }
 0x1d1   :  { %1276 = vst.msk [vmem:[%s2981_s4 + $0x68] sm:$0xff] %vm667_vm4, %v1260_v21  ;;  %1277 = vst.msk [vmem:[%s2981_s4 + $0x70] sm:$0xff] %vm667_vm4, %v1261_v35 }
 0x1d2   :  { %1278 = vst.msk [vmem:[%s2981_s4 + $0x78] sm:$0xff] %vm667_vm4, %v1262_v20 }

// kernel: _forward.5
= control target key start
LH: loop header
LB: loop body
LE: loop exit
PB: predicated region body
PF: predicated region fallthrough
CT: control target
= control target key end

     0   :  { %v534_v0 = vmov 0.0|0.0   ;;  %vm74_vm0 = vcmask 588800   ;;  %v535_v39 = vmov 0.0   ;;  %vm268_vm1 = vcmask 130048   ;;  %s922_s1 = inlined_call_operand.vmem [shape: f32[200,16], index: 1, kind: input, shape index: {}]   ;;  %s923_s0 = inlined_call_operand.vmem [shape: f32[128,200], index: 0, kind: input, shape index: {}]   ;;  %s924_s2 = inlined_call_operand.vmem [shape: f32[1,16], index: 2, kind: input, shape index: {}]   ;;  %s925_s3 = inlined_call_operand.vmem [shape: f32[1,16], index: 3, kind: input, shape index: {}]   ;;  %s926_s4 = inlined_call_operand.vmem [shape: f32[32,16], index: 4, kind: output, shape index: {}]  }
   0x1   :  { %468 = vmatprep.subr.bf16.mxu0 %v534_v0  ;;  %v49_v1 = vld [vmem:[%s922_s1] sm:$0xff]  ;;  %v50_v2 = vld [vmem:[%s922_s1 + $0x8] sm:$0xff]  ;;  %v51_v3 = vld [vmem:[%s922_s1 + $0x10] sm:$0xff]  ;;  %504 = vmatprep.subr.bf16.mxu1 %v534_v0 }
   0x2   :  { %v469_v4 = vpack.c.bf16 %v50_v2, %v49_v1  ;;  %v52_v5 = vld [vmem:[%s922_s1 + $0x18] sm:$0xff]  ;;  %v53_v7 = vld [vmem:[%s922_s1 + $0x20] sm:$0xff]  ;;  %v54_v8 = vld [vmem:[%s922_s1 + $0x28] sm:$0xff] }
   0x3   :  { %v472_v6 = vpack.c.bf16 %v52_v5, %v51_v3  ;;  %v475_v9 = vpack.c.bf16 %v54_v8, %v53_v7  ;;  %v55_v10 = vld [vmem:[%s922_s1 + $0x30] sm:$0xff]  ;;  %v56_v11 = vld [vmem:[%s922_s1 + $0x38] sm:$0xff]  ;;  %v18_v12 = vld [vmem:[%s923_s0 + $0x8] sm:$0xff] }
   0x4   :  { %470 = vmatpush1.bf16.msra.mxu0 %v469_v4  ;;  %517 = vmatpush1.bf16.msra.mxu1 %v469_v4  ;;  %v478_v13 = vpack.c.bf16 %v56_v11, %v55_v10  ;;  %v34_v14 = vld [vmem:[%s923_s0 + $0x88] sm:$0xff]  ;;  %v57_v15 = vld [vmem:[%s922_s1 + $0x40] sm:$0xff]  ;;  %v59_v18 = vld [vmem:[%s922_s1 + $0x50] sm:$0xff] }
   0x5   :  { %471 = vmatprep.subr.bf16.mxu0 %v534_v0  ;;  %505 = vmatprep.subr.bf16.mxu1 %v534_v0  ;;  %v58_v16 = vld [vmem:[%s922_s1 + $0x48] sm:$0xff]  ;;  %v60_v19 = vld [vmem:[%s922_s1 + $0x58] sm:$0xff]  ;;  %v61_v21 = vld [vmem:[%s922_s1 + $0x60] sm:$0xff] }
   0x6   :  { %452 = vmatprep.mubr.msk.f32.mxu0 %vm74_vm0, %v18_v12  ;;  %460 = vmatprep.mubr.msk.f32.mxu1 %vm74_vm0, %v34_v14  ;;  %v481_v17 = vpack.c.bf16 %v58_v16, %v57_v15  ;;  %v484_v20 = vpack.c.bf16 %v60_v19, %v59_v18  ;;  %v62_v22 = vld [vmem:[%s922_s1 + $0x68] sm:$0xff]  ;;  %v63_v24 = vld [vmem:[%s922_s1 + $0x70] sm:$0xff]  ;;  %v64_v25 = vld [vmem:[%s922_s1 + $0x78] sm:$0xff] }
   0x7   :  { %v487_v23 = vpack.c.bf16 %v62_v22, %v61_v21  ;;  %v490_v26 = vpack.c.bf16 %v64_v25, %v63_v24  ;;  %v65_v27 = vld [vmem:[%s922_s1 + $0x80] sm:$0xff]  ;;  %v66_v28 = vld [vmem:[%s922_s1 + $0x88] sm:$0xff]  ;;  %v67_v30 = vld [vmem:[%s922_s1 + $0x90] sm:$0xff] }
   0x8   :  { %473 = vmatpush1.bf16.msra.mxu0 %v472_v6  ;;  %518 = vmatpush1.bf16.msra.mxu1 %v472_v6  ;;  %v493_v29 = vpack.c.bf16 %v66_v28, %v65_v27  ;;  %v68_v31 = vld [vmem:[%s922_s1 + $0x98] sm:$0xff]  ;;  %v69_v33 = vld [vmem:[%s922_s1 + $0xa0] sm:$0xff]  ;;  %v70_v34 = vld [vmem:[%s922_s1 + $0xa8] sm:$0xff] }
   0x9   :  { %474 = vmatprep.subr.bf16.mxu0 %v534_v0  ;;  %506 = vmatprep.subr.bf16.mxu1 %v534_v0  ;;  %v496_v32 = vpack.c.bf16 %v68_v31, %v67_v30  ;;  %v499_v35 = vpack.c.bf16 %v70_v34, %v69_v33  ;;  %v71_v36 = vld [vmem:[%s922_s1 + $0xb0] sm:$0xff]  ;;  %v72_v37 = vld [vmem:[%s922_s1 + $0xb8] sm:$0xff]  ;;  %v73_v40 = vld [vmem:[%s922_s1 + $0xc0] sm:$0xff] }
   0xa   :  { %v502_v38 = vpack.c.bf16 %v72_v37, %v71_v36  ;;  %v17_v41 = vld [vmem:[%s923_s0] sm:$0xff]  ;;  %v20_v43 = vld [vmem:[%s923_s0 + $0x18] sm:$0xff]  ;;  %v19_v45 = vld [vmem:[%s923_s0 + $0x10] sm:$0xff] }
   0xb   :  { %v33_v42 = vld [vmem:[%s923_s0 + $0x80] sm:$0xff]  ;;  %v36_v44 = vld [vmem:[%s923_s0 + $0x98] sm:$0xff]  ;;  %v35_v46 = vld [vmem:[%s923_s0 + $0x90] sm:$0xff] }
   0xc   :  { %476 = vmatpush1.bf16.msra.mxu0 %v475_v9  ;;  %519 = vmatpush1.bf16.msra.mxu1 %v475_v9  ;;  %v22_v47 = vld [vmem:[%s923_s0 + $0x28] sm:$0xff]  ;;  %v21_v49 = vld [vmem:[%s923_s0 + $0x20] sm:$0xff]  ;;  %v24_v51 = vld [vmem:[%s923_s0 + $0x38] sm:$0xff] }
   0xd   :  { %477 = vmatprep.subr.bf16.mxu0 %v534_v0  ;;  %507 = vmatprep.subr.bf16.mxu1 %v534_v0  ;;  %v38_v48 = vld [vmem:[%s923_s0 + $0xa8] sm:$0xff]  ;;  %v37_v50 = vld [vmem:[%s923_s0 + $0xa0] sm:$0xff]  ;;  %v40_v52 = vld [vmem:[%s923_s0 + $0xb8] sm:$0xff] }
   0xe   :  { %v23_v53 = vld [vmem:[%s923_s0 + $0x30] sm:$0xff]  ;;  %v26_v55 = vld [vmem:[%s923_s0 + $0x48] sm:$0xff]  ;;  %v25_v57 = vld [vmem:[%s923_s0 + $0x40] sm:$0xff] }
   0xf   :  { %v39_v54 = vld [vmem:[%s923_s0 + $0xb0] sm:$0xff]  ;;  %v42_v56 = vld [vmem:[%s923_s0 + $0xc8] sm:$0xff]  ;;  %v41_v58 = vld [vmem:[%s923_s0 + $0xc0] sm:$0xff] }
  0x10   :  { %479 = vmatpush1.bf16.msra.mxu0 %v478_v13  ;;  %520 = vmatpush1.bf16.msra.mxu1 %v478_v13  ;;  %v28_v59 = vld [vmem:[%s923_s0 + $0x58] sm:$0xff]  ;;  %v27_v61 = vld [vmem:[%s923_s0 + $0x50] sm:$0xff]  ;;  %v30_v63 = vld [vmem:[%s923_s0 + $0x68] sm:$0xff] }
  0x11   :  { %480 = vmatprep.subr.bf16.mxu0 %v534_v0  ;;  %508 = vmatprep.subr.bf16.mxu1 %v534_v0  ;;  %v44_v60 = vld [vmem:[%s923_s0 + $0xd8] sm:$0xff]  ;;  %v43_v62 = vld [vmem:[%s923_s0 + $0xd0] sm:$0xff]  ;;  %v29_v1 = vld [vmem:[%s923_s0 + $0x60] sm:$0xff] }
  0x12   :  { %v45_v2 = vld [vmem:[%s923_s0 + $0xe0] sm:$0xff]  ;;  %v32_v3 = vld [vmem:[%s923_s0 + $0x78] sm:$0xff]  ;;  %v31_v5 = vld [vmem:[%s923_s0 + $0x70] sm:$0xff] }
  0x13   :  { %v48_v4 = vld [vmem:[%s923_s0 + $0xf8] sm:$0xff]  ;;  %v47_v6 = vld [vmem:[%s923_s0 + $0xf0] sm:$0xff] }
  0x14   :  { %482 = vmatpush1.bf16.msra.mxu0 %v481_v17  ;;  %521 = vmatpush1.bf16.msra.mxu1 %v481_v17 }
  0x15   :  { %483 = vmatprep.subr.bf16.mxu0 %v534_v0  ;;  %509 = vmatprep.subr.bf16.mxu1 %v534_v0 }
  0x18   :  { %485 = vmatpush1.bf16.msra.mxu0 %v484_v20  ;;  %522 = vmatpush1.bf16.msra.mxu1 %v484_v20 }
  0x19   :  { %486 = vmatprep.subr.bf16.mxu0 %v534_v0  ;;  %510 = vmatprep.subr.bf16.mxu1 %v534_v0 }
  0x1c   :  { %488 = vmatpush1.bf16.msra.mxu0 %v487_v23  ;;  %523 = vmatpush1.bf16.msra.mxu1 %v487_v23 }
  0x1d   :  { %489 = vmatprep.subr.bf16.mxu0 %v534_v0  ;;  %511 = vmatprep.subr.bf16.mxu1 %v534_v0 }
  0x20   :  { %491 = vmatpush1.bf16.msra.mxu0 %v490_v26  ;;  %524 = vmatpush1.bf16.msra.mxu1 %v490_v26 }
  0x21   :  { %492 = vmatprep.subr.bf16.mxu0 %v534_v0  ;;  %512 = vmatprep.subr.bf16.mxu1 %v534_v0 }
  0x24   :  { %494 = vmatpush1.bf16.msra.mxu0 %v493_v29  ;;  %525 = vmatpush1.bf16.msra.mxu1 %v493_v29 }
  0x25   :  { %495 = vmatprep.subr.bf16.mxu0 %v534_v0  ;;  %513 = vmatprep.subr.bf16.mxu1 %v534_v0 }
  0x28   :  { %497 = vmatpush1.bf16.msra.mxu0 %v496_v32  ;;  %526 = vmatpush1.bf16.msra.mxu1 %v496_v32 }
  0x29   :  { %498 = vmatprep.subr.bf16.mxu0 %v534_v0  ;;  %514 = vmatprep.subr.bf16.mxu1 %v534_v0 }
  0x2c   :  { %500 = vmatpush1.bf16.msra.mxu0 %v499_v35  ;;  %527 = vmatpush1.bf16.msra.mxu1 %v499_v35 }
  0x2d   :  { %501 = vmatprep.subr.bf16.mxu0 %v534_v0  ;;  %515 = vmatprep.subr.bf16.mxu1 %v534_v0  ;;  %v46_v0 = vld [vmem:[%s923_s0 + $0xe8] sm:$0xff] }
  0x30   :  { %503 = vmatpush1.bf16.msra.mxu0 %v502_v38  ;;  %528 = vmatpush1.bf16.msra.mxu1 %v502_v38 }
  0x31   :  { %171 = vmatprep.subr.mxu0 %v535_v39  ;;  %516 = vmatprep.subr.mxu1 %v535_v39 }
  0x34   :  { %172 = vmatpush1.msra.mxu0 %v73_v40  ;;  %529 = vmatpush1.msra.mxu1 %v73_v40 }
  0x35   :  { %188 = vmatmul.mubr.f32.vlgmr.msra.gmra.mrb[0].mxu0 %v17_v41  ;;  %228 = vmatmul.mubr.f32.vlgmr.msra.gmra.mrb[0].mxu1 %v33_v42 }
  0x36   :  { %453 = vmatprep.mubr.msk.f32.mxu0 %vm74_vm0, %v20_v43  ;;  %461 = vmatprep.mubr.msk.f32.mxu1 %vm74_vm0, %v36_v44 }
  0x39   :  { %193 = vmatmul.mubr.f32.gmra.mrb[2].mxu0 %v19_v45  ;;  %233 = vmatmul.mubr.f32.gmra.mrb[2].mxu1 %v35_v46 }
  0x3a   :  { %454 = vmatprep.mubr.msk.f32.mxu0 %vm74_vm0, %v22_v47  ;;  %462 = vmatprep.mubr.msk.f32.mxu1 %vm74_vm0, %v38_v48 }
  0x3d   :  { %198 = vmatmul.mubr.f32.gmra.mrb[4].mxu0 %v21_v49  ;;  %238 = vmatmul.mubr.f32.gmra.mrb[4].mxu1 %v37_v50 }
  0x3e   :  { %455 = vmatprep.mubr.msk.f32.mxu0 %vm74_vm0, %v24_v51  ;;  %463 = vmatprep.mubr.msk.f32.mxu1 %vm74_vm0, %v40_v52 }
  0x41   :  { %203 = vmatmul.mubr.f32.gmra.mrb[6].mxu0 %v23_v53  ;;  %243 = vmatmul.mubr.f32.gmra.mrb[6].mxu1 %v39_v54 }
  0x42   :  { %456 = vmatprep.mubr.msk.f32.mxu0 %vm74_vm0, %v26_v55  ;;  %464 = vmatprep.mubr.msk.f32.mxu1 %vm74_vm0, %v42_v56 }
  0x45   :  { %208 = vmatmul.mubr.f32.gmra.mrb[8].mxu0 %v25_v57  ;;  %248 = vmatmul.mubr.f32.gmra.mrb[8].mxu1 %v41_v58 }
  0x46   :  { %457 = vmatprep.mubr.msk.f32.mxu0 %vm74_vm0, %v28_v59  ;;  %465 = vmatprep.mubr.msk.f32.mxu1 %vm74_vm0, %v44_v60 }
  0x49   :  { %213 = vmatmul.mubr.f32.gmra.mrb[10].mxu0 %v27_v61  ;;  %253 = vmatmul.mubr.f32.gmra.mrb[10].mxu1 %v43_v62 }
  0x4a   :  { %458 = vmatprep.mubr.msk.f32.mxu0 %vm74_vm0, %v30_v63  ;;  %466 = vmatprep.mubr.msk.f32.mxu1 %vm74_vm0, %v46_v0 }
  0x4d   :  { %218 = vmatmul.mubr.f32.gmra.mrb[12].mxu0 %v29_v1  ;;  %258 = vmatmul.mubr.f32.gmra.mrb[12].mxu1 %v45_v2 }
  0x4e   :  { %459 = vmatprep.mubr.msk.f32.mxu0 %vm74_vm0, %v32_v3  ;;  %467 = vmatprep.mubr.msk.f32.mxu1 %vm74_vm0, %v48_v4 }
  0x51   :  { %223 = vmatmul.mubr.f32.gmra.mrb[14].mxu0 %v31_v5  ;;  %263 = vmatmul.mubr.f32.gmra.mrb[14].mxu1 %v47_v6 }
 0x108   :  { %v772_v7 = vpop.f32.mrb[0].mxu0  ;;  %v774_v8 = vpop.f32.mrb[0].mxu1 }
 0x109   :  { %v191_v9 = vpop.f32.mrb[1].mxu0  ;;  %v231_v10 = vpop.f32.mrb[1].mxu1  ;;  %v308_v11 = vmul.f32 %v772_v7, %v772_v7  ;;  %v269_v14 = vsel %vm268_vm1, %v772_v7, 0.0  ;;  %v316_v6 = vmul.f32 %v774_v8, %v774_v8 }
 0x10b   :  { %v324_v20 = vsel %vm268_vm1, %v308_v11, 0.0 }
 0x10c   :  { %v778_v12 = vpop.f32.mrb[2].mxu0  ;;  %v780_v13 = vpop.f32.mrb[2].mxu1 }
 0x10d   :  { %v270_v15 = vsel %vm268_vm1, %v778_v12, 0.0  ;;  %v309_v16 = vmul.f32 %v778_v12, %v778_v12  ;;  %v196_v17 = vpop.f32.mrb[3].mxu0  ;;  %v236_v18 = vpop.f32.mrb[3].mxu1 }
 0x10e   :  { %v271_v19 = vadd.f32 %v270_v15, %v269_v14  ;;  %v317_v17 = vmul.f32 %v780_v13, %v780_v13 }
 0x10f   :  { %v325_v21 = vsel %vm268_vm1, %v309_v16, 0.0  ;;  %v284_v16 = vsel %vm268_vm1, %v774_v8, 0.0 }
 0x110   :  { %v326_v22 = vadd.f32 %v325_v21, %v324_v20  ;;  %v790_v23 = vpop.f32.mrb[4].mxu0  ;;  %v792_v24 = vpop.f32.mrb[4].mxu1  ;;  %v339_v21 = vsel %vm268_vm1, %v316_v6, 0.0 }
 0x111   :  { %v272_v25 = vsel %vm268_vm1, %v790_v23, 0.0  ;;  %v310_v26 = vmul.f32 %v790_v23, %v790_v23  ;;  %v201_v27 = vpop.f32.mrb[5].mxu0  ;;  %v241_v28 = vpop.f32.mrb[5].mxu1 }
 0x112   :  { %v273_v29 = vadd.f32 %v272_v25, %v271_v19  ;;  %v318_v25 = vmul.f32 %v792_v24, %v792_v24  ;;  %v341_v28 = vsel %vm268_vm1, %v317_v17, 0.0 }
 0x113   :  { %v327_v30 = vsel %vm268_vm1, %v310_v26, 0.0 }
 0x114   :  { %v328_v31 = vadd.f32 %v327_v30, %v326_v22  ;;  %v799_v32 = vpop.f32.mrb[6].mxu0  ;;  %v801_v33 = vpop.f32.mrb[6].mxu1  ;;  %v286_v22 = vsel %vm268_vm1, %v780_v13, 0.0 }
 0x115   :  { %v274_v34 = vsel %vm268_vm1, %v799_v32, 0.0  ;;  %v311_v35 = vmul.f32 %v799_v32, %v799_v32  ;;  %v206_v36 = vpop.f32.mrb[7].mxu0  ;;  %v246_v37 = vpop.f32.mrb[7].mxu1  ;;  %v319_v30 = vmul.f32 %v801_v33, %v801_v33 }
 0x116   :  { %v275_v38 = vadd.f32 %v274_v34, %v273_v29  ;;  %v288_v29 = vsel %vm268_vm1, %v792_v24, 0.0  ;;  %v290_v36 = vsel %vm268_vm1, %v801_v33, 0.0 }
 0x117   :  { %v329_v39 = vsel %vm268_vm1, %v311_v35, 0.0  ;;  %v343_v35 = vsel %vm268_vm1, %v318_v25, 0.0 }
 0x118   :  { %v330_v40 = vadd.f32 %v329_v39, %v328_v31  ;;  %v808_v41 = vpop.f32.mrb[8].mxu0  ;;  %v810_v42 = vpop.f32.mrb[8].mxu1 }
 0x119   :  { %v276_v43 = vsel %vm268_vm1, %v808_v41, 0.0  ;;  %v312_v44 = vmul.f32 %v808_v41, %v808_v41  ;;  %v211_v45 = vpop.f32.mrb[9].mxu0  ;;  %v251_v46 = vpop.f32.mrb[9].mxu1  ;;  %v320_v37 = vmul.f32 %v810_v42, %v810_v42 }
 0x11a   :  { %v277_v47 = vadd.f32 %v276_v43, %v275_v38  ;;  %v292_v43 = vsel %vm268_vm1, %v810_v42, 0.0 }
 0x11b   :  { %v331_v48 = vsel %vm268_vm1, %v312_v44, 0.0 }
 0x11c   :  { %v332_v49 = vadd.f32 %v331_v48, %v330_v40  ;;  %v817_v50 = vpop.f32.mrb[10].mxu0  ;;  %v819_v51 = vpop.f32.mrb[10].mxu1  ;;  %v345_v40 = vsel %vm268_vm1, %v319_v30, 0.0 }
 0x11d   :  { %v278_v52 = vsel %vm268_vm1, %v817_v50, 0.0  ;;  %v313_v53 = vmul.f32 %v817_v50, %v817_v50  ;;  %v216_v54 = vpop.f32.mrb[11].mxu0  ;;  %v256_v55 = vpop.f32.mrb[11].mxu1  ;;  %v321_v44 = vmul.f32 %v819_v51, %v819_v51  ;;  %v294_v48 = vsel %vm268_vm1, %v819_v51, 0.0 }
 0x11e   :  { %v279_v56 = vadd.f32 %v278_v52, %v277_v47  ;;  %v347_v47 = vsel %vm268_vm1, %v320_v37, 0.0  ;;  %v369_v37 = vld [vmem:[%s925_s3] sm:$0x1] }
 0x11f   :  { %v333_v57 = vsel %vm268_vm1, %v313_v53, 0.0  ;;  %v349_v55 = vsel %vm268_vm1, %v321_v44, 0.0 }
 0x120   :  { %v334_v58 = vadd.f32 %v333_v57, %v332_v49  ;;  %v826_v59 = vpop.f32.mrb[12].mxu0  ;;  %v828_v60 = vpop.f32.mrb[12].mxu1 }
 0x121   :  { %v280_v61 = vsel %vm268_vm1, %v826_v59, 0.0  ;;  %v314_v62 = vmul.f32 %v826_v59, %v826_v59  ;;  %v221_v63 = vpop.f32.mrb[13].mxu0  ;;  %v261_v0 = vpop.f32.mrb[13].mxu1  ;;  %v322_v49 = vmul.f32 %v828_v60, %v828_v60 }
 0x122   :  { %v281_v1 = vadd.f32 %v280_v61, %v279_v56  ;;  %v296_v56 = vsel %vm268_vm1, %v828_v60, 0.0 }
 0x123   :  { %v335_v2 = vsel %vm268_vm1, %v314_v62, 0.0  ;;  %v351_v62 = vsel %vm268_vm1, %v322_v49, 0.0 }
 0x124   :  { %v336_v3 = vadd.f32 %v335_v2, %v334_v58  ;;  %v835_v4 = vpop.f32.mrb[14].mxu0  ;;  %v837_v5 = vpop.f32.mrb[14].mxu1 }
 0x125   :  { %v282_v9 = vsel %vm268_vm1, %v835_v4, 0.0  ;;  %v315_v10 = vmul.f32 %v835_v4, %v835_v4  ;;  %v226_v11 = vpop.f32.mrb[15].mxu0  ;;  %v266_v14 = vpop.f32.mrb[15].mxu1  ;;  %v323_v52 = vmul.f32 %v837_v5, %v837_v5  ;;  %v298_v57 = vsel %vm268_vm1, %v837_v5, 0.0 }
 0x126   :  { %v283_v15 = vadd.f32 %v282_v9, %v281_v1 }
 0x127   :  { %v337_v18 = vsel %vm268_vm1, %v315_v10, 0.0  ;;  %v353_v63 = vsel %vm268_vm1, %v323_v52, 0.0 }
 0x128   :  { %v285_v19 = vadd.f32 %v284_v16, %v283_v15  ;;  %v338_v20 = vadd.f32 %v337_v18, %v336_v3 }
 0x12a   :  { %v287_v26 = vadd.f32 %v286_v22, %v285_v19  ;;  %v340_v27 = vadd.f32 %v339_v21, %v338_v20 }
 0x12c   :  { %v342_v31 = vadd.f32 %v341_v28, %v340_v27  ;;  %v289_v34 = vadd.f32 %v288_v29, %v287_v26  ;;  %v373_v29 = vlaneseq }
 0x12e   :  { %v291_v38 = vadd.f32 %v290_v36, %v289_v34  ;;  %v344_v39 = vadd.f32 %v343_v35, %v342_v31  ;;  %v374_v30 = vshrl.u32 %v373_v29, 7  ;;  %v365_v31 = vld [vmem:[%s924_s2] sm:$0x1] }
 0x130   :  { %v293_v45 = vadd.f32 %v292_v43, %v291_v38  ;;  %v346_v46 = vadd.f32 %v345_v40, %v344_v39  ;;  %v375_v34 = vsub.s32 0, %v374_v30 }
 0x132   :  { %v348_v53 = vadd.f32 %v347_v47, %v346_v46  ;;  %v295_v54 = vadd.f32 %v294_v48, %v293_v45 }
 0x134   :  { %v350_v58 = vadd.f32 %v349_v55, %v348_v53  ;;  %v297_v61 = vadd.f32 %v296_v56, %v295_v54 }
 0x136   :  { %v352_v0 = vadd.f32 %v351_v62, %v350_v58  ;;  %v299_v1 = vadd.f32 %v298_v57, %v297_v61 }
 0x138   :  { %v300_v2 = vrot.slane %v299_v1, 4  ;;  %v354_v3 = vadd.f32 %v353_v63, %v352_v0 }
 0x13a   :  { %v301_v6 = vadd.f32 %v300_v2, %v299_v1  ;;  %v355_v9 = vrot.slane %v354_v3, 4 }
 0x13c   :  { %v302_v10 = vrot.slane %v301_v6, 2  ;;  %v356_v11 = vadd.f32 %v355_v9, %v354_v3 }
 0x13e   :  { %v303_v14 = vadd.f32 %v302_v10, %v301_v6  ;;  %v357_v15 = vrot.slane %v356_v11, 2 }
 0x140   :  { %v304_v16 = vrot.slane %v303_v14, 1  ;;  %v358_v17 = vadd.f32 %v357_v15, %v356_v11 }
 0x142   :  { %v305_v18 = vadd.f32 %v304_v16, %v303_v14  ;;  %v359_v19 = vrot.slane %v358_v17, 1 }
 0x144   :  { %v307_v20 = vmul.f32 0.0078125, %v305_v18  ;;  %v360_v21 = vadd.f32 %v359_v19, %v358_v17 }
 0x146   :  { %v361_v22 = vmul.f32 0.0078125, %v360_v21  ;;  %v362_v25 = vmul.f32 %v307_v20, %v307_v20 }
 0x148   :  { %v363_v26 = vsub.f32 %v361_v22, %v362_v25 }
 0x14a   :  { %v364_v27 = vmax.f32 %v363_v26, 0.0 }
 0x14c   :  { %v366_v28 = vadd.f32 1e-05, %v364_v27 }
 0x14e   :  { %532 = vrsqrt.f32 %v366_v28 }
 0x158   :  { %v533_v35 = vpop.eup %532 }
 0x159   :  { %v368_v36 = vmul.f32 %v533_v35, %v365_v31 }
 0x15b   :  { %v370_v38 = vmul.f32 %v368_v36, %v307_v20  ;;  %v376_v39 = vrot.slane %v368_v36, %v375_v34 }
 0x15d   :  { %v371_v40 = vsub.f32 %v369_v37, %v370_v38  ;;  %v378_v43 = vmul.f32 %v376_v39, %v772_v7  ;;  %v379_v44 = vmul.f32 %v376_v39, %v778_v12  ;;  %v380_v45 = vmul.f32 %v376_v39, %v790_v23 }
 0x15e   :  { %v381_v46 = vmul.f32 %v376_v39, %v799_v32  ;;  %v382_v47 = vmul.f32 %v376_v39, %v808_v41  ;;  %v383_v48 = vmul.f32 %v376_v39, %v817_v50  ;;  %v384_v49 = vmul.f32 %v376_v39, %v826_v59 }
 0x15f   :  { %v385_v52 = vmul.f32 %v376_v39, %v835_v4  ;;  %v386_v53 = vmul.f32 %v376_v39, %v774_v8  ;;  %v387_v54 = vmul.f32 %v376_v39, %v780_v13  ;;  %v388_v7 = vmul.f32 %v376_v39, %v792_v24 }
 0x160   :  { %v389_v12 = vmul.f32 %v376_v39, %v801_v33  ;;  %v390_v23 = vmul.f32 %v376_v39, %v810_v42  ;;  %v391_v32 = vmul.f32 %v376_v39, %v819_v51  ;;  %v392_v41 = vmul.f32 %v376_v39, %v828_v60 }
 0x161   :  { %v393_v50 = vmul.f32 %v376_v39, %v837_v5  ;;  %v398_v55 = vrot.slane %v371_v40, %v375_v34 }
 0x163   :  { %v400_v59 = vadd.f32 %v398_v55, %v378_v43  ;;  %v401_v56 = vadd.f32 %v398_v55, %v379_v44  ;;  %v402_v4 = vadd.f32 %v398_v55, %v380_v45  ;;  %v403_v57 = vadd.f32 %v398_v55, %v381_v46 }
 0x164   :  { %v404_v8 = vadd.f32 %v398_v55, %v382_v47  ;;  %v405_v58 = vadd.f32 %v398_v55, %v383_v48  ;;  %v406_v13 = vadd.f32 %v398_v55, %v384_v49  ;;  %v407_v61 = vadd.f32 %v398_v55, %v385_v52 }
 0x165   :  { %v408_v24 = vadd.f32 %v398_v55, %v386_v53  ;;  %v409_v62 = vadd.f32 %v398_v55, %v387_v54  ;;  %v410_v33 = vadd.f32 %v398_v55, %v388_v7  ;;  %v411_v63 = vadd.f32 %v398_v55, %v389_v12 }
 0x166   :  { %v412_v42 = vadd.f32 %v398_v55, %v390_v23  ;;  %v413_v0 = vadd.f32 %v398_v55, %v391_v32  ;;  %v414_v51 = vadd.f32 %v398_v55, %v392_v41  ;;  %v415_v1 = vadd.f32 %v398_v55, %v393_v50 }
 0x167   :  { %v416_v60 = vmax.f32 %v400_v59, 0.0  ;;  %v417_v2 = vmax.f32 %v401_v56, 0.0  ;;  %v418_v5 = vmax.f32 %v402_v4, 0.0  ;;  %v419_v3 = vmax.f32 %v403_v57, 0.0 }
 0x168   :  { %v420_v6 = vmax.f32 %v404_v8, 0.0  ;;  %v421_v9 = vmax.f32 %v405_v58, 0.0  ;;  %v422_v10 = vmax.f32 %v406_v13, 0.0  ;;  %v423_v11 = vmax.f32 %v407_v61, 0.0 }
 0x169   :  { %v424_v14 = vmax.f32 %v408_v24, 0.0  ;;  %v425_v15 = vmax.f32 %v409_v62, 0.0  ;;  %v426_v16 = vmax.f32 %v410_v33, 0.0  ;;  %v427_v17 = vmax.f32 %v411_v63, 0.0 }
 0x16a   :  { %v428_v18 = vmax.f32 %v412_v42, 0.0  ;;  %v429_v19 = vmax.f32 %v413_v0, 0.0  ;;  %v430_v20 = vmax.f32 %v414_v51, 0.0  ;;  %v431_v21 = vmax.f32 %v415_v1, 0.0 }
 0x16b   :  { %v432_v22 = vmax.f32 %v416_v60, %v420_v6  ;;  %v433_v25 = vmax.f32 %v417_v2, %v421_v9  ;;  %v434_v26 = vmax.f32 %v418_v5, %v422_v10  ;;  %v435_v27 = vmax.f32 %v419_v3, %v423_v11 }
 0x16c   :  { %v436_v28 = vmax.f32 %v424_v14, %v428_v18  ;;  %v437_v29 = vmax.f32 %v425_v15, %v429_v19  ;;  %v438_v30 = vmax.f32 %v426_v16, %v430_v20  ;;  %v439_v31 = vmax.f32 %v427_v17, %v431_v21 }
 0x16e   :  { %v440_v34 = vmax.f32 %v432_v22, %v436_v28  ;;  %v441_v35 = vmax.f32 %v433_v25, %v437_v29  ;;  %v442_v36 = vmax.f32 %v434_v26, %v438_v30  ;;  %v443_v37 = vmax.f32 %v435_v27, %v439_v31 }
 0x170   :  { %444 = vst.msk [vmem:[%s926_s4] sm:$0xff] %vm268_vm1, %v440_v34  ;;  %445 = vst.msk [vmem:[%s926_s4 + $0x8] sm:$0xff] %vm268_vm1, %v441_v35 }
 0x171   :  { %446 = vst.msk [vmem:[%s926_s4 + $0x10] sm:$0xff] %vm268_vm1, %v442_v36  ;;  %447 = vst.msk [vmem:[%s926_s4 + $0x18] sm:$0xff] %vm268_vm1, %v443_v37 }

// kernel: _forward.6
= control target key start
LH: loop header
LB: loop body
LE: loop exit
PB: predicated region body
PF: predicated region fallthrough
CT: control target
= control target key end

     0   :  { %v269_v0 = vmov 0.0|0.0   ;;  %vm43_vm0 = vcmask 130048   ;;  %vm141_vm1 = vcmask 261120   ;;  %s413_s1 = inlined_call_operand.vmem [shape: f32[144,32], index: 1, kind: input, shape index: {}]   ;;  %s414_s0 = inlined_call_operand.vmem [shape: f32[32,144], index: 0, kind: input, shape index: {}]   ;;  %s415_s2 = inlined_call_operand.vmem [shape: f32[1,32], index: 2, kind: input, shape index: {}]   ;;  %s416_s3 = inlined_call_operand.vmem [shape: f32[1,32], index: 3, kind: input, shape index: {}]   ;;  %s417_s4 = inlined_call_operand.vmem [shape: f32[8,32], index: 4, kind: output, shape index: {}]  }
   0x1   :  { %221 = vmatprep.subr.bf16.mxu0 %v269_v0  ;;  %v25_v1 = vld [vmem:[%s413_s1] sm:$0xff]  ;;  %v26_v2 = vld [vmem:[%s413_s1 + $0x8] sm:$0xff]  ;;  %248 = vmatprep.subr.bf16.mxu1 %v269_v0  ;;  %v27_v3 = vld [vmem:[%s413_s1 + $0x10] sm:$0xff] }
   0x2   :  { %v222_v4 = vpack.c.bf16 %v26_v2, %v25_v1  ;;  %v28_v5 = vld [vmem:[%s413_s1 + $0x18] sm:$0xff]  ;;  %v29_v7 = vld [vmem:[%s413_s1 + $0x20] sm:$0xff]  ;;  %v30_v8 = vld [vmem:[%s413_s1 + $0x28] sm:$0xff] }
   0x3   :  { %v225_v6 = vpack.c.bf16 %v28_v5, %v27_v3  ;;  %v18_v9 = vld [vmem:[%s414_s0 + $0x8] sm:$0xff]  ;;  %v228_v11 = vpack.c.bf16 %v30_v8, %v29_v7  ;;  %v31_v12 = vld [vmem:[%s413_s1 + $0x30] sm:$0xff]  ;;  %v32_v13 = vld [vmem:[%s413_s1 + $0x38] sm:$0xff] }
   0x4   :  { %223 = vmatpush1.bf16.msra.mxu0 %v222_v4  ;;  %257 = vmatpush1.bf16.msra.mxu1 %v222_v4  ;;  %v22_v10 = vld [vmem:[%s414_s0 + $0x28] sm:$0xff]  ;;  %v231_v14 = vpack.c.bf16 %v32_v13, %v31_v12  ;;  %v33_v15 = vld [vmem:[%s413_s1 + $0x40] sm:$0xff]  ;;  %v35_v18 = vld [vmem:[%s413_s1 + $0x50] sm:$0xff] }
   0x5   :  { %224 = vmatprep.subr.bf16.mxu0 %v269_v0  ;;  %249 = vmatprep.subr.bf16.mxu1 %v269_v0  ;;  %v34_v16 = vld [vmem:[%s413_s1 + $0x48] sm:$0xff]  ;;  %v36_v19 = vld [vmem:[%s413_s1 + $0x58] sm:$0xff]  ;;  %v37_v21 = vld [vmem:[%s413_s1 + $0x60] sm:$0xff] }
   0x6   :  { %217 = vmatprep.mubr.msk.f32.mxu0 %vm43_vm0, %v18_v9  ;;  %219 = vmatprep.mubr.msk.f32.mxu1 %vm43_vm0, %v22_v10  ;;  %v234_v17 = vpack.c.bf16 %v34_v16, %v33_v15  ;;  %v237_v20 = vpack.c.bf16 %v36_v19, %v35_v18  ;;  %v38_v22 = vld [vmem:[%s413_s1 + $0x68] sm:$0xff]  ;;  %v39_v24 = vld [vmem:[%s413_s1 + $0x70] sm:$0xff]  ;;  %v40_v25 = vld [vmem:[%s413_s1 + $0x78] sm:$0xff]  ;;  %v186_v16 = vlaneseq }
   0x7   :  { %v240_v23 = vpack.c.bf16 %v38_v22, %v37_v21  ;;  %v243_v26 = vpack.c.bf16 %v40_v25, %v39_v24  ;;  %v41_v27 = vld [vmem:[%s413_s1 + $0x80] sm:$0xff]  ;;  %v42_v28 = vld [vmem:[%s413_s1 + $0x88] sm:$0xff]  ;;  %v20_v32 = vld [vmem:[%s414_s0 + $0x18] sm:$0xff] }
   0x8   :  { %226 = vmatpush1.bf16.msra.mxu0 %v225_v6  ;;  %258 = vmatpush1.bf16.msra.mxu1 %v225_v6  ;;  %v246_v29 = vpack.c.bf16 %v42_v28, %v41_v27  ;;  %v17_v30 = vld [vmem:[%s414_s0] sm:$0xff]  ;;  %v24_v33 = vld [vmem:[%s414_s0 + $0x38] sm:$0xff]  ;;  %v19_v34 = vld [vmem:[%s414_s0 + $0x10] sm:$0xff] }
   0x9   :  { %227 = vmatprep.subr.bf16.mxu0 %v269_v0  ;;  %250 = vmatprep.subr.bf16.mxu1 %v269_v0  ;;  %v21_v31 = vld [vmem:[%s414_s0 + $0x20] sm:$0xff]  ;;  %v23_v35 = vld [vmem:[%s414_s0 + $0x30] sm:$0xff] }
   0xa   :  { %v178_v18 = vld [vmem:[%s415_s2] sm:$0x1] }
   0xb   :  { %v182_v22 = vld [vmem:[%s416_s3] sm:$0x1] }
   0xc   :  { %229 = vmatpush1.bf16.msra.mxu0 %v228_v11  ;;  %259 = vmatpush1.bf16.msra.mxu1 %v228_v11 }
   0xd   :  { %230 = vmatprep.subr.bf16.mxu0 %v269_v0  ;;  %251 = vmatprep.subr.bf16.mxu1 %v269_v0 }
  0x10   :  { %232 = vmatpush1.bf16.msra.mxu0 %v231_v14  ;;  %260 = vmatpush1.bf16.msra.mxu1 %v231_v14 }
  0x11   :  { %233 = vmatprep.subr.bf16.mxu0 %v269_v0  ;;  %252 = vmatprep.subr.bf16.mxu1 %v269_v0 }
  0x14   :  { %235 = vmatpush1.bf16.msra.mxu0 %v234_v17  ;;  %261 = vmatpush1.bf16.msra.mxu1 %v234_v17  ;;  %v187_v17 = vshrl.u32 %v186_v16, 7 }
  0x15   :  { %236 = vmatprep.subr.bf16.mxu0 %v269_v0  ;;  %253 = vmatprep.subr.bf16.mxu1 %v269_v0 }
  0x16   :  { %v188_v19 = vsub.s32 0, %v187_v17 }
  0x18   :  { %238 = vmatpush1.bf16.msra.mxu0 %v237_v20  ;;  %262 = vmatpush1.bf16.msra.mxu1 %v237_v20 }
  0x19   :  { %239 = vmatprep.subr.bf16.mxu0 %v269_v0  ;;  %254 = vmatprep.subr.bf16.mxu1 %v269_v0 }
  0x1c   :  { %241 = vmatpush1.bf16.msra.mxu0 %v240_v23  ;;  %263 = vmatpush1.bf16.msra.mxu1 %v240_v23 }
  0x1d   :  { %242 = vmatprep.subr.bf16.mxu0 %v269_v0  ;;  %255 = vmatprep.subr.bf16.mxu1 %v269_v0 }
  0x20   :  { %244 = vmatpush1.bf16.msra.mxu0 %v243_v26  ;;  %264 = vmatpush1.bf16.msra.mxu1 %v243_v26 }
  0x21   :  { %245 = vmatprep.subr.bf16.mxu0 %v269_v0  ;;  %256 = vmatprep.subr.bf16.mxu1 %v269_v0 }
  0x24   :  { %247 = vmatpush1.bf16.msra.mxu0 %v246_v29  ;;  %265 = vmatpush1.bf16.msra.mxu1 %v246_v29 }
  0x27   :  { %121 = vmatmul.mubr.f32.vlgmr.msra.gmra.mrb[0].mxu0 %v17_v30  ;;  %131 = vmatmul.mubr.f32.vlgmr.msra.gmra.mrb[0].mxu1 %v21_v31 }
  0x28   :  { %218 = vmatprep.mubr.msk.f32.mxu0 %vm43_vm0, %v20_v32  ;;  %220 = vmatprep.mubr.msk.f32.mxu1 %vm43_vm0, %v24_v33 }
  0x2b   :  { %126 = vmatmul.mubr.f32.gmra.mrb[2].mxu0 %v19_v34  ;;  %136 = vmatmul.mubr.f32.gmra.mrb[2].mxu1 %v23_v35 }
  0xfa   :  { %v122_v36 = vpop.f32.mrb[0].mxu0  ;;  %v132_v37 = vpop.f32.mrb[0].mxu1 }
  0xfb   :  { %v124_v38 = vpop.f32.mrb[1].mxu0  ;;  %v134_v39 = vpop.f32.mrb[1].mxu1  ;;  %v157_v40 = vmul.f32 %v122_v36, %v122_v36  ;;  %v142_v41 = vsel %vm141_vm1, %v122_v36, 0.0  ;;  %v159_v44 = vmul.f32 %v132_v37, %v132_v37  ;;  %v145_v52 = vsel %vm141_vm1, %v132_v37, 0.0 }
  0xfd   :  { %v161_v51 = vsel %vm141_vm1, %v157_v40, 0.0  ;;  %v164_v57 = vsel %vm141_vm1, %v159_v44, 0.0 }
  0xfe   :  { %v127_v42 = vpop.f32.mrb[2].mxu0  ;;  %v137_v43 = vpop.f32.mrb[2].mxu1 }
  0xff   :  { %v143_v45 = vsel %vm141_vm1, %v127_v42, 0.0  ;;  %v158_v46 = vmul.f32 %v127_v42, %v127_v42  ;;  %v129_v47 = vpop.f32.mrb[3].mxu0  ;;  %v160_v48 = vmul.f32 %v137_v43, %v137_v43  ;;  %v139_v49 = vpop.f32.mrb[3].mxu1  ;;  %v147_v54 = vsel %vm141_vm1, %v137_v43, 0.0 }
 0x100   :  { %v144_v50 = vadd.f32 %v143_v45, %v142_v41 }
 0x101   :  { %v162_v53 = vsel %vm141_vm1, %v158_v46, 0.0  ;;  %v166_v58 = vsel %vm141_vm1, %v160_v48, 0.0 }
 0x102   :  { %v163_v55 = vadd.f32 %v162_v53, %v161_v51  ;;  %v146_v56 = vadd.f32 %v145_v52, %v144_v50 }
 0x104   :  { %v148_v59 = vadd.f32 %v147_v54, %v146_v56  ;;  %v165_v60 = vadd.f32 %v164_v57, %v163_v55 }
 0x106   :  { %v149_v61 = vrot.slane %v148_v59, 4  ;;  %v167_v62 = vadd.f32 %v166_v58, %v165_v60 }
 0x108   :  { %v150_v63 = vadd.f32 %v149_v61, %v148_v59  ;;  %v168_v0 = vrot.slane %v167_v62, 4 }
 0x10a   :  { %v151_v1 = vrot.slane %v150_v63, 2  ;;  %v169_v2 = vadd.f32 %v168_v0, %v167_v62 }
 0x10c   :  { %v152_v3 = vadd.f32 %v151_v1, %v150_v63  ;;  %v170_v4 = vrot.slane %v169_v2, 2 }
 0x10e   :  { %v153_v5 = vrot.slane %v152_v3, 1  ;;  %v171_v6 = vadd.f32 %v170_v4, %v169_v2 }
 0x110   :  { %v154_v7 = vadd.f32 %v153_v5, %v152_v3  ;;  %v172_v8 = vrot.slane %v171_v6, 1 }
 0x112   :  { %v156_v9 = vmul.f32 0.03125, %v154_v7  ;;  %v173_v10 = vadd.f32 %v172_v8, %v171_v6 }
 0x114   :  { %v174_v11 = vmul.f32 0.03125, %v173_v10  ;;  %v175_v12 = vmul.f32 %v156_v9, %v156_v9 }
 0x116   :  { %v176_v13 = vsub.f32 %v174_v11, %v175_v12 }
 0x118   :  { %v177_v14 = vmax.f32 %v176_v13, 0.0 }
 0x11a   :  { %v179_v15 = vadd.f32 1e-05, %v177_v14 }
 0x11c   :  { %267 = vrsqrt.f32 %v179_v15 }
 0x126   :  { %v268_v20 = vpop.eup %267 }
 0x127   :  { %v181_v21 = vmul.f32 %v268_v20, %v178_v18 }
 0x129   :  { %v183_v23 = vmul.f32 %v181_v21, %v156_v9  ;;  %v189_v24 = vrot.slane %v181_v21, %v188_v19 }
 0x12b   :  { %v184_v25 = vsub.f32 %v182_v22, %v183_v23  ;;  %v191_v26 = vmul.f32 %v189_v24, %v122_v36  ;;  %v192_v27 = vmul.f32 %v189_v24, %v127_v42  ;;  %v193_v28 = vmul.f32 %v189_v24, %v132_v37 }
 0x12c   :  { %v194_v29 = vmul.f32 %v189_v24, %v137_v43 }
 0x12d   :  { %v199_v30 = vrot.slane %v184_v25, %v188_v19 }
 0x12f   :  { %v201_v31 = vadd.f32 %v199_v30, %v191_v26  ;;  %v202_v32 = vadd.f32 %v199_v30, %v192_v27  ;;  %v203_v33 = vadd.f32 %v199_v30, %v193_v28  ;;  %v204_v34 = vadd.f32 %v199_v30, %v194_v29 }
 0x131   :  { %v205_v35 = vmax.f32 %v201_v31, 0.0  ;;  %v206_v38 = vmax.f32 %v202_v32, 0.0  ;;  %v207_v39 = vmax.f32 %v203_v33, 0.0  ;;  %v208_v40 = vmax.f32 %v204_v34, 0.0 }
 0x133   :  { %v209_v41 = vmax.f32 %v205_v35, %v206_v38  ;;  %v210_v44 = vmax.f32 %v207_v39, %v208_v40 }
 0x135   :  { %v211_v45 = vmax.f32 %v209_v41, %v210_v44 }
 0x137   :  { %212 = vst.msk [vmem:[%s417_s4] sm:$0xff] %vm141_vm1, %v211_v45 }

// kernel: _forward.7
= control target key start
LH: loop header
LB: loop body
LE: loop exit
PB: predicated region body
PF: predicated region fallthrough
CT: control target
= control target key end

     0   :  { %v200_v3 = vlaneseq  ;;  %v12200_v7 = vmov 1966171168   ;;  %s14267_s0 = inlined_call_operand.vmem [shape: bf16[4,2,8192], index: 0, kind: input, shape index: {}]   ;;  %s14268_s1 = inlined_call_operand.vmem [shape: bf16[4,32,8192], index: 1, kind: input, shape index: {}]   ;;  %s14269_s2 = inlined_call_operand.vmem [shape: f32[4,1,32], index: 2, kind: input, shape index: {}]   ;;  %s14270_s3 = inlined_call_operand.vmem [shape: f32[128,64], index: 3, kind: input, shape index: {}]   ;;  %s14271_s4 = inlined_call_operand.vmem [shape: f32[1,64], index: 4, kind: input, shape index: {}]   ;;  %s14272_s5 = inlined_call_operand.vmem [shape: f32[64,5], index: 5, kind: input, shape index: {}]   ;;  %s14273_s6 = inlined_call_operand.vmem [shape: f32[1,5], index: 6, kind: input, shape index: {}]   ;;  %s14274_s7 = inlined_call_operand.hbm [shape: f32[2,5], index: 7, kind: output, shape index: {}]  }
   0x1   :  { %v53_v0 = vld [vmem:[%s14268_s1] sm:$0xff]  ;;  %v198_v8 = vunpack.c.l.s4 %v12200_v7  ;;  %v54_v14 = vld [vmem:[%s14268_s1 + $0x8] sm:$0xff] }
   0x2   :  { %v85_v1 = vld [vmem:[%s14268_s1 + $0x100] sm:$0xff]  ;;  %v201_v10 = vshrl.u32 %v200_v3, 7  ;;  %v86_v15 = vld [vmem:[%s14268_s1 + $0x108] sm:$0xff] }
   0x3   :  { %v117_v2 = vld [vmem:[%s14268_s1 + $0x200] sm:$0xff]  ;;  %v10573_v4 = vcombine.high %v53_v0, %v85_v1  ;;  %v10572_v5 = vcombine.low %v53_v0, %v85_v1  ;;  %v199_v11 = vunpack.c.0.s8 %v198_v8  ;;  %v10575_v19 = vcombine.high %v54_v14, %v86_v15 }
   0x4   :  { %v149_v6 = vld [vmem:[%s14268_s1 + $0x300] sm:$0xff] }
   0x5   :  { %v10637_v9 = vcombine.high %v117_v2, %v149_v6  ;;  %1292 = vmatprep.subr.bf16.mxu0 %v10573_v4  ;;  %v45_v12 = vld [vmem:[%s14267_s0] sm:$0xff]  ;;  %v12260_v13 = vsub.s32 %v199_v11, %v201_v10  ;;  %v10636_v17 = vcombine.low %v117_v2, %v149_v6 }
   0x6   :  { %1293 = vmatpush1.bf16.xpose.msra.mxu0 %v10572_v5 }
   0x7   :  { %1294 = vmatprep.subr.bf16.mxu0 %v10637_v9  ;;  %v203_v16 = vrot.slane %v45_v12, %v12260_v13 }
   0x9   :  { %v211_v18 = vcombine.high %v203_v16, %v203_v16 }
   0xb   :  { %v233_v20 = vrot.slane %v211_v18, %v12260_v13 }
   0xd   :  { %1324 = vmatprep.mubr.bf16.mxu0 %v233_v20 }
   0xe   :  { %1295 = vmatpush1.bf16.xpose.msra.mxu0 %v10636_v17 }
   0xf   :  { %1332 = vmatprep.subr.bf16.mxu0 %v10575_v19 }
  0x10   :  { %12 = vsyncpa [#allocation3], 0  ;;  %v118_v21 = vld [vmem:[%s14268_s1 + $0x208] sm:$0xff]  ;;  %v219_v23 = vrot.slane %v203_v16, %v12260_v13  ;;  %v243_v24 = vcombine.high %v233_v20, %v233_v20  ;;  %v10574_v25 = vcombine.low %v54_v14, %v86_v15  ;;  %v196_v27 = vcombine.high %v45_v12, %v45_v12  ;;  %v55_v28 = vld [vmem:[%s14268_s1 + $0x10] sm:$0xff]  ;;  %s12204_s16 = smov [#allocation2]  }
  0x11   :  { %v150_v22 = vld [vmem:[%s14268_s1 + $0x308] sm:$0xff]  ;;  %v87_v29 = vld [vmem:[%s14268_s1 + $0x110] sm:$0xff]  ;;  %v56_v40 = vld [vmem:[%s14268_s1 + $0x18] sm:$0xff]  ;;  %vm12202_vm0 = vmmov 0   ;;  %vm2572_vm1 = vcmask 261120   ;;  %vm10481_vm2 = vcmask 523264  }
  0x12   :  { %v10639_v26 = vcombine.high %v118_v21, %v150_v22  ;;  %v10638_v30 = vcombine.low %v118_v21, %v150_v22  ;;  %v210_v31 = vrot.slane %v196_v27, %v12260_v13  ;;  %v10577_v32 = vcombine.high %v55_v28, %v87_v29  ;;  %v119_v34 = vld [vmem:[%s14268_s1 + $0x210] sm:$0xff]  ;;  %v88_v41 = vld [vmem:[%s14268_s1 + $0x118] sm:$0xff]  ;;  %v46_v50 = vld [vmem:[%s14267_s0 + $0x8] sm:$0xff] }
  0x13   :  { %v151_v35 = vld [vmem:[%s14268_s1 + $0x310] sm:$0xff]  ;;  %v241_v36 = vcombine.high %v219_v23, %v219_v23  ;;  %v10576_v37 = vcombine.low %v55_v28, %v87_v29  ;;  %v10579_v43 = vcombine.high %v56_v40, %v88_v41  ;;  %v120_v44 = vld [vmem:[%s14268_s1 + $0x218] sm:$0xff]  ;;  %v10578_v47 = vcombine.low %v56_v40, %v88_v41  ;;  %v57_v51 = vld [vmem:[%s14268_s1 + $0x20] sm:$0xff] }
  0x14   :  { %v212_v33 = vcombine.high %v210_v31, %v210_v31  ;;  %v10641_v39 = vcombine.high %v119_v34, %v151_v35  ;;  %v10640_v42 = vcombine.low %v119_v34, %v151_v35  ;;  %v152_v45 = vld [vmem:[%s14268_s1 + $0x318] sm:$0xff]  ;;  %v226_v46 = vrot.slane %v210_v31, %v12260_v13  ;;  %v89_v52 = vld [vmem:[%s14268_s1 + $0x120] sm:$0xff]  ;;  %v58_v63 = vld [vmem:[%s14268_s1 + $0x28] sm:$0xff] }
  0x15   :  { %1325 = vmatmul.mubr.bf16.vlgmr.msra.gmra.mrb[0].mxu0 %v219_v23  ;;  %v10643_v49 = vcombine.high %v120_v44, %v152_v45  ;;  %v10642_v53 = vcombine.low %v120_v44, %v152_v45  ;;  %v252_v54 = vrot.slane %v46_v50, %v12260_v13  ;;  %v10581_v55 = vcombine.high %v57_v51, %v89_v52  ;;  %v121_v57 = vld [vmem:[%s14268_s1 + $0x220] sm:$0xff]  ;;  %v90_v0 = vld [vmem:[%s14268_s1 + $0x128] sm:$0xff]  ;;  %v59_v15 = vld [vmem:[%s14268_s1 + $0x30] sm:$0xff] }
  0x16   :  { %1333 = vmatpush1.bf16.xpose.msra.mxu0 %v10574_v25  ;;  %1364 = vmatprep.mubr.bf16.mxu0 %v243_v24  ;;  %v240_v38 = vrot.slane %v212_v33, %v12260_v13  ;;  %v153_v58 = vld [vmem:[%s14268_s1 + $0x320] sm:$0xff]  ;;  %v242_v59 = vcombine.high %v226_v46, %v226_v46  ;;  %v10580_v60 = vcombine.low %v57_v51, %v89_v52  ;;  %v122_v3 = vld [vmem:[%s14268_s1 + $0x228] sm:$0xff]  ;;  %v91_v16 = vld [vmem:[%s14268_s1 + $0x130] sm:$0xff]  ;;  %vm10555_vm3 = vcmask 33792  }
  0x17   :  { %1334 = vmatprep.subr.bf16.mxu0 %v10639_v26  ;;  %v260_v56 = vcombine.high %v252_v54, %v252_v54  ;;  %v10645_v62 = vcombine.high %v121_v57, %v153_v58  ;;  %v10644_v1 = vcombine.low %v121_v57, %v153_v58  ;;  %v10583_v2 = vcombine.high %v58_v63, %v90_v0  ;;  %v154_v4 = vld [vmem:[%s14268_s1 + $0x328] sm:$0xff]  ;;  %v10710_v10 = vld [vmem:[%s14268_s1 + $0x400] sm:$0xff]  ;;  %v123_v25 = vld [vmem:[%s14268_s1 + $0x230] sm:$0xff] }
  0x18   :  { %v244_v48 = vcombine.high %v240_v38, %v240_v38  ;;  %v268_v5 = vrot.slane %v252_v54, %v12260_v13  ;;  %v10582_v6 = vcombine.low %v58_v63, %v90_v0  ;;  %v10647_v8 = vcombine.high %v122_v3, %v154_v4  ;;  %v10742_v11 = vld [vmem:[%s14268_s1 + $0x500] sm:$0xff]  ;;  %v155_v26 = vld [vmem:[%s14268_s1 + $0x330] sm:$0xff]  ;;  %v10711_v33 = vld [vmem:[%s14268_s1 + $0x408] sm:$0xff] }
  0x19   :  { %v282_v61 = vrot.slane %v260_v56, %v12260_v13  ;;  %v245_v9 = vcombine.high %v46_v50, %v46_v50  ;;  %v10841_v12 = vcombine.high %v10710_v10, %v10742_v11  ;;  %v10840_v14 = vcombine.low %v10710_v10, %v10742_v11  ;;  %v10774_v21 = vld [vmem:[%s14268_s1 + $0x600] sm:$0xff]  ;;  %v10743_v34 = vld [vmem:[%s14268_s1 + $0x508] sm:$0xff]  ;;  %v10744_v56 = vld [vmem:[%s14268_s1 + $0x510] sm:$0xff] }
  0x1a   :  { %v10646_v17 = vcombine.low %v122_v3, %v154_v4  ;;  %v10585_v19 = vcombine.high %v59_v15, %v91_v16  ;;  %v10806_v22 = vld [vmem:[%s14268_s1 + $0x700] sm:$0xff]  ;;  %v290_v27 = vcombine.high %v268_v5, %v268_v5  ;;  %v10584_v28 = vcombine.low %v59_v15, %v91_v16  ;;  %v10775_v45 = vld [vmem:[%s14268_s1 + $0x608] sm:$0xff]  ;;  %v12403_v57 = vld [vmem:[%s14267_s0 + $0x10] sm:$0xff] }
  0x1b   :  { %v292_v7 = vcombine.high %v282_v61, %v282_v61  ;;  %3903 = vmatprep.subr.bf16.mxu1 %v10841_v12  ;;  %v259_v18 = vrot.slane %v245_v9, %v12260_v13  ;;  %v10905_v23 = vcombine.high %v10774_v21, %v10806_v22  ;;  %v10904_v24 = vcombine.low %v10774_v21, %v10806_v22  ;;  %v12363_v31 = vld [vmem:[%s14267_s0 + $0x40] sm:$0xff]  ;;  %v10776_v3 = vld [vmem:[%s14268_s1 + $0x610] sm:$0xff]  ;;  %v10713_v16 = vld [vmem:[%s14268_s1 + $0x418] sm:$0xff] }
  0x1c   :  { %3904 = vmatpush1.bf16.xpose.msra.mxu1 %v10840_v14  ;;  %v10842_v41 = vcombine.low %v10711_v33, %v10743_v34  ;;  %v301_v0 = vrot.slane %v12403_v57, %v12260_v13  ;;  %v10808_v4 = vld [vmem:[%s14268_s1 + $0x710] sm:$0xff]  ;;  %v2807_v9 = vcombine.high %v12363_v31, %v12363_v31  ;;  %v94_v21 = vld [vmem:[%s14268_s1 + $0x148] sm:$0xff] }
  0x1d   :  { %v261_v20 = vcombine.high %v259_v18, %v259_v18  ;;  %3905 = vmatprep.subr.bf16.mxu1 %v10905_v23  ;;  %v275_v50 = vrot.slane %v259_v18, %v12260_v13  ;;  %v10908_v10 = vcombine.low %v10776_v3, %v10808_v4 }
  0x1e   :  { %1335 = vmatpush1.bf16.xpose.msra.mxu0 %v10638_v30  ;;  %v10649_v30 = vcombine.high %v123_v25, %v155_v26  ;;  %v2821_v15 = vrot.slane %v2807_v9, %v12260_v13  ;;  %v10779_v9 = vld [vmem:[%s14268_s1 + $0x628] sm:$0xff] }
  0x1f   :  { %1372 = vmatprep.subr.bf16.mxu0 %v10577_v32  ;;  %v289_v29 = vrot.slane %v261_v20, %v12260_v13  ;;  %v2814_v32 = vrot.slane %v12363_v31, %v12260_v13  ;;  %v62_v20 = vld [vmem:[%s14268_s1 + $0x48] sm:$0xff] }
  0x20   :  { %v2823_v18 = vcombine.high %v2821_v15, %v2821_v15  ;;  %v2837_v22 = vrot.slane %v2821_v15, %v12260_v13  ;;  %v158_v31 = vld [vmem:[%s14268_s1 + $0x348] sm:$0xff] }
  0x21   :  { %v2822_v35 = vcombine.high %v2814_v32, %v2814_v32 }
  0x22   :  { %v2851_v23 = vrot.slane %v2823_v18, %v12260_v13 }
  0x23   :  { %v2844_v40 = vrot.slane %v2822_v35, %v12260_v13 }
  0x24   :  { %3906 = vmatpush1.bf16.xpose.msra.mxu1 %v10904_v24 }
  0x25   :  { %1365 = vmatmul.mubr.bf16.vlgmr.msra.gmra.mrb[0].mxu0 %v241_v36  ;;  %v10843_v36 = vcombine.high %v10711_v33, %v10743_v34  ;;  %v2854_v44 = vcombine.high %v2844_v40, %v2844_v40  ;;  %3935 = vmatprep.mubr.bf16.mxu1 %v2844_v40  ;;  %v10590_v34 = vcombine.low %v62_v20, %v94_v21  ;;  %v10746_v40 = vld [vmem:[%s14268_s1 + $0x520] sm:$0xff] }
  0x26   :  { %1373 = vmatpush1.bf16.xpose.msra.mxu0 %v10576_v37  ;;  %1404 = vmatprep.mubr.bf16.mxu0 %v240_v38  ;;  %v60_v37 = vld [vmem:[%s14268_s1 + $0x38] sm:$0xff] }
  0x27   :  { %1374 = vmatprep.subr.bf16.mxu0 %v10641_v39  ;;  %v92_v38 = vld [vmem:[%s14268_s1 + $0x138] sm:$0xff]  ;;  %v2830_v39 = vrot.slane %v2814_v32, %v12260_v13  ;;  %3943 = vmatprep.subr.bf16.mxu1 %v10843_v36  ;;  %v317_v32 = vrot.slane %v301_v0, %v12260_v13 }
  0x28   :  { %v10586_v52 = vcombine.low %v60_v37, %v92_v38 }
  0x2b   :  { %3936 = vmatmul.mubr.bf16.vlgmr.msra.gmra.mrb[0].mxu1 %v2830_v39 }
  0x2c   :  { %3944 = vmatpush1.bf16.xpose.msra.mxu1 %v10842_v41  ;;  %3975 = vmatprep.mubr.bf16.mxu1 %v2854_v44  ;;  %v2853_v44 = vcombine.high %v2837_v22, %v2837_v22 }
  0x2e   :  { %1375 = vmatpush1.bf16.xpose.msra.mxu0 %v10640_v42  ;;  %v10648_v42 = vcombine.low %v123_v25, %v155_v26  ;;  %v10591_v26 = vcombine.high %v62_v20, %v94_v21  ;;  %v10716_v21 = vld [vmem:[%s14268_s1 + $0x430] sm:$0xff] }
  0x2f   :  { %1412 = vmatprep.subr.bf16.mxu0 %v10579_v43  ;;  %v10587_v43 = vcombine.high %v60_v37, %v92_v38  ;;  %v294_v37 = vcombine.high %v12403_v57, %v12403_v57  ;;  %v2855_v38 = vcombine.high %v2851_v23, %v2851_v23 }
  0x35   :  { %1405 = vmatmul.mubr.bf16.vlgmr.msra.gmra.mrb[0].mxu0 %v226_v46  ;;  %v10807_v46 = vld [vmem:[%s14268_s1 + $0x708] sm:$0xff] }
  0x36   :  { %1413 = vmatpush1.bf16.xpose.msra.mxu0 %v10578_v47  ;;  %1444 = vmatprep.mubr.bf16.mxu0 %v244_v48  ;;  %v10907_v47 = vcombine.high %v10775_v45, %v10807_v46  ;;  %v124_v48 = vld [vmem:[%s14268_s1 + $0x238] sm:$0xff]  ;;  %v10906_v51 = vcombine.low %v10775_v45, %v10807_v46 }
  0x37   :  { %1414 = vmatprep.subr.bf16.mxu0 %v10643_v49  ;;  %v156_v49 = vld [vmem:[%s14268_s1 + $0x338] sm:$0xff] }
  0x38   :  { %3945 = vmatprep.subr.bf16.mxu1 %v10907_v47  ;;  %v10651_v54 = vcombine.high %v124_v48, %v156_v49  ;;  %v10650_v63 = vcombine.low %v124_v48, %v156_v49  ;;  %v308_v47 = vrot.slane %v294_v37, %v12260_v13  ;;  %v161_v37 = vld [vmem:[%s14268_s1 + $0x360] sm:$0xff] }
  0x39   :  { %3946 = vmatpush1.bf16.xpose.msra.mxu1 %v10906_v51  ;;  %v10810_v51 = vld [vmem:[%s14268_s1 + $0x720] sm:$0xff] }
  0x3a   :  { %v310_v49 = vcombine.high %v308_v47, %v308_v47  ;;  %v324_v15 = vrot.slane %v308_v47, %v12260_v13 }
  0x3e   :  { %1415 = vmatpush1.bf16.xpose.msra.mxu0 %v10642_v53  ;;  %v293_v53 = vcombine.high %v289_v29, %v289_v29 }
  0x3f   :  { %1452 = vmatprep.subr.bf16.mxu0 %v10581_v55  ;;  %v10712_v55 = vld [vmem:[%s14268_s1 + $0x410] sm:$0xff] }
  0x40   :  { %v10845_v58 = vcombine.high %v10712_v55, %v10744_v56 }
  0x42   :  { %3983 = vmatprep.subr.bf16.mxu1 %v10845_v58  ;;  %v338_v58 = vrot.slane %v310_v49, %v12260_v13  ;;  %v66_v49 = vld [vmem:[%s14268_s1 + $0x68] sm:$0xff] }
  0x44   :  { %v342_v18 = vcombine.high %v338_v58, %v338_v58 }
  0x45   :  { %1445 = vmatmul.mubr.bf16.vlgmr.msra.gmra.mrb[0].mxu0 %v242_v59  ;;  %v61_v59 = vld [vmem:[%s14268_s1 + $0x40] sm:$0xff] }
  0x46   :  { %1453 = vmatpush1.bf16.xpose.msra.mxu0 %v10580_v60  ;;  %1484 = vmatprep.mubr.bf16.mxu0 %v282_v61  ;;  %v93_v60 = vld [vmem:[%s14268_s1 + $0x140] sm:$0xff]  ;;  %v2852_v61 = vcombine.high %v2830_v39, %v2830_v39 }
  0x47   :  { %1454 = vmatprep.subr.bf16.mxu0 %v10645_v62  ;;  %v10844_v62 = vcombine.low %v10712_v55, %v10744_v56  ;;  %v10588_v11 = vcombine.low %v61_v59, %v93_v60  ;;  %v10714_v39 = vld [vmem:[%s14268_s1 + $0x420] sm:$0xff]  ;;  %v339_v55 = vcombine.high %v317_v32, %v317_v32 }
  0x48   :  { %3976 = vmatmul.mubr.bf16.vlgmr.msra.gmra.mrb[0].mxu1 %v2852_v61  ;;  %v10849_v41 = vcombine.high %v10714_v39, %v10746_v40  ;;  %v10848_v45 = vcombine.low %v10714_v39, %v10746_v40 }
  0x49   :  { %3984 = vmatpush1.bf16.xpose.msra.mxu1 %v10844_v62  ;;  %4015 = vmatprep.mubr.bf16.mxu1 %v2851_v23  ;;  %v10715_v62 = vld [vmem:[%s14268_s1 + $0x428] sm:$0xff]  ;;  %v12527_v23 = vld [vmem:[%s14267_s0 + $0x18] sm:$0xff] }
  0x4e   :  { %1455 = vmatpush1.bf16.xpose.msra.mxu0 %v10644_v1  ;;  %v10589_v1 = vcombine.high %v61_v59, %v93_v60  ;;  %v12487_v60 = vld [vmem:[%s14267_s0 + $0x48] sm:$0xff] }
  0x4f   :  { %1492 = vmatprep.subr.bf16.mxu0 %v10583_v2  ;;  %v309_v2 = vcombine.high %v301_v0, %v301_v0  ;;  %v2863_v61 = vrot.slane %v12487_v60, %v12260_v13 }
  0x51   :  { %v331_v12 = vrot.slane %v309_v2, %v12260_v13  ;;  %v2871_v0 = vcombine.high %v2863_v61, %v2863_v61  ;;  %v64_v2 = vld [vmem:[%s14268_s1 + $0x58] sm:$0xff] }
  0x53   :  { %v341_v35 = vcombine.high %v331_v12, %v331_v12 }
  0x55   :  { %1485 = vmatmul.mubr.bf16.vlgmr.msra.gmra.mrb[0].mxu0 %v268_v5  ;;  %v10909_v5 = vcombine.high %v10776_v3, %v10808_v4  ;;  %v96_v3 = vld [vmem:[%s14268_s1 + $0x158] sm:$0xff]  ;;  %v2879_v4 = vrot.slane %v2863_v61, %v12260_v13 }
  0x56   :  { %1493 = vmatpush1.bf16.xpose.msra.mxu0 %v10582_v6  ;;  %1524 = vmatprep.mubr.bf16.mxu0 %v292_v7  ;;  %v125_v6 = vld [vmem:[%s14268_s1 + $0x240] sm:$0xff] }
  0x57   :  { %1494 = vmatprep.subr.bf16.mxu0 %v10647_v8  ;;  %v157_v7 = vld [vmem:[%s14268_s1 + $0x340] sm:$0xff]  ;;  %v291_v8 = vcombine.high %v275_v50, %v275_v50  ;;  %3985 = vmatprep.subr.bf16.mxu1 %v10909_v5  ;;  %v2893_v5 = vrot.slane %v2871_v0, %v12260_v13 }
  0x58   :  { %v10653_v14 = vcombine.high %v125_v6, %v157_v7  ;;  %3986 = vmatpush1.bf16.xpose.msra.mxu1 %v10908_v10  ;;  %v10652_v25 = vcombine.low %v125_v6, %v157_v7  ;;  %v10811_v10 = vld [vmem:[%s14268_s1 + $0x728] sm:$0xff] }
  0x59   :  { %v2903_v20 = vcombine.high %v2893_v5, %v2893_v5 }
  0x5e   :  { %1495 = vmatpush1.bf16.xpose.msra.mxu0 %v10646_v17  ;;  %v10745_v17 = vld [vmem:[%s14268_s1 + $0x518] sm:$0xff] }
  0x5f   :  { %1532 = vmatprep.subr.bf16.mxu0 %v10585_v19  ;;  %v10847_v19 = vcombine.high %v10713_v16, %v10745_v17  ;;  %v10846_v24 = vcombine.low %v10713_v16, %v10745_v17  ;;  %4016 = vmatmul.mubr.bf16.vlgmr.msra.gmra.mrb[0].mxu1 %v2837_v22  ;;  %v10914_v16 = vcombine.low %v10779_v9, %v10811_v10  ;;  %v10748_v22 = vld [vmem:[%s14268_s1 + $0x530] sm:$0xff] }
  0x60   :  { %4055 = vmatprep.mubr.bf16.mxu1 %v2855_v38  ;;  %v10594_v17 = vcombine.low %v64_v2, %v96_v3  ;;  %v340_v38 = vcombine.high %v324_v15, %v324_v15 }
  0x61   :  { %4023 = vmatprep.subr.bf16.mxu1 %v10847_v19 }
  0x62   :  { %4024 = vmatpush1.bf16.xpose.msra.mxu1 %v10846_v24  ;;  %v10853_v24 = vcombine.high %v10716_v21, %v10748_v22 }
  0x65   :  { %1525 = vmatmul.mubr.bf16.vlgmr.msra.gmra.mrb[0].mxu0 %v290_v27  ;;  %v10777_v27 = vld [vmem:[%s14268_s1 + $0x618] sm:$0xff] }
  0x66   :  { %1533 = vmatpush1.bf16.xpose.msra.mxu0 %v10584_v28  ;;  %1564 = vmatprep.mubr.bf16.mxu0 %v289_v29  ;;  %v10809_v28 = vld [vmem:[%s14268_s1 + $0x718] sm:$0xff] }
  0x67   :  { %1534 = vmatprep.subr.bf16.mxu0 %v10649_v30  ;;  %v10911_v29 = vcombine.high %v10777_v27, %v10809_v28  ;;  %v126_v30 = vld [vmem:[%s14268_s1 + $0x248] sm:$0xff]  ;;  %v10910_v33 = vcombine.low %v10777_v27, %v10809_v28  ;;  %v2901_v27 = vcombine.high %v2879_v4, %v2879_v4  ;;  %v10852_v28 = vcombine.low %v10716_v21, %v10748_v22 }
  0x68   :  { %v10655_v36 = vcombine.high %v126_v30, %v158_v31  ;;  %v10654_v46 = vcombine.low %v126_v30, %v158_v31  ;;  %v350_v30 = vrot.slane %v12527_v23, %v12260_v13 }
  0x69   :  { %4025 = vmatprep.subr.bf16.mxu1 %v10911_v29 }
  0x6a   :  { %4026 = vmatpush1.bf16.xpose.msra.mxu1 %v10910_v33  ;;  %v10780_v33 = vld [vmem:[%s14268_s1 + $0x630] sm:$0xff]  ;;  %v366_v61 = vrot.slane %v350_v30, %v12260_v13 }
  0x6b   :  { %4063 = vmatprep.subr.bf16.mxu1 %v10849_v41 }
  0x6c   :  { %v388_v21 = vcombine.high %v366_v61, %v366_v61 }
  0x6e   :  { %1535 = vmatpush1.bf16.xpose.msra.mxu0 %v10648_v42  ;;  %v63_v42 = vld [vmem:[%s14268_s1 + $0x50] sm:$0xff] }
  0x6f   :  { %1572 = vmatprep.subr.bf16.mxu0 %v10587_v43  ;;  %v95_v43 = vld [vmem:[%s14268_s1 + $0x150] sm:$0xff] }
  0x70   :  { %v10593_v48 = vcombine.high %v63_v42, %v95_v43  ;;  %v10592_v57 = vcombine.low %v63_v42, %v95_v43  ;;  %v2856_v43 = vcombine.high %v12487_v60, %v12487_v60  ;;  %v162_v60 = vld [vmem:[%s14268_s1 + $0x368] sm:$0xff] }
  0x71   :  { %4056 = vmatmul.mubr.bf16.vlgmr.msra.gmra.mrb[0].mxu1 %v2853_v44 }
  0x72   :  { %4064 = vmatpush1.bf16.xpose.msra.mxu1 %v10848_v45  ;;  %4095 = vmatprep.mubr.bf16.mxu1 %v2893_v5  ;;  %v2870_v44 = vrot.slane %v2856_v43, %v12260_v13  ;;  %v10717_v45 = vld [vmem:[%s14268_s1 + $0x438] sm:$0xff]  ;;  %v10750_v5 = vld [vmem:[%s14268_s1 + $0x540] sm:$0xff] }
  0x73   :  { %v164_v43 = vld [vmem:[%s14268_s1 + $0x378] sm:$0xff] }
  0x74   :  { %v2872_v47 = vcombine.high %v2870_v44, %v2870_v44 }
  0x75   :  { %1565 = vmatmul.mubr.bf16.vlgmr.msra.gmra.mrb[0].mxu0 %v275_v50  ;;  %v10778_v50 = vld [vmem:[%s14268_s1 + $0x620] sm:$0xff] }
  0x76   :  { %1573 = vmatpush1.bf16.xpose.msra.mxu0 %v10586_v52  ;;  %1604 = vmatprep.mubr.bf16.mxu0 %v293_v53  ;;  %v10913_v52 = vcombine.high %v10778_v50, %v10810_v51  ;;  %v127_v53 = vld [vmem:[%s14268_s1 + $0x250] sm:$0xff]  ;;  %v10912_v56 = vcombine.low %v10778_v50, %v10810_v51  ;;  %v98_v50 = vld [vmem:[%s14268_s1 + $0x168] sm:$0xff]  ;;  %v2886_v51 = vrot.slane %v2870_v44, %v12260_v13 }
  0x77   :  { %1574 = vmatprep.subr.bf16.mxu0 %v10651_v54  ;;  %v159_v54 = vld [vmem:[%s14268_s1 + $0x350] sm:$0xff] }
  0x78   :  { %4065 = vmatprep.subr.bf16.mxu1 %v10913_v52  ;;  %v10657_v59 = vcombine.high %v127_v53, %v159_v54  ;;  %v10656_v7 = vcombine.low %v127_v53, %v159_v54  ;;  %v2900_v52 = vrot.slane %v2872_v47, %v12260_v13 }
  0x7a   :  { %4066 = vmatpush1.bf16.xpose.msra.mxu1 %v10912_v56  ;;  %v10781_v56 = vld [vmem:[%s14268_s1 + $0x638] sm:$0xff] }
  0x7e   :  { %1575 = vmatpush1.bf16.xpose.msra.mxu0 %v10650_v63  ;;  %v10747_v63 = vld [vmem:[%s14268_s1 + $0x528] sm:$0xff] }
  0x7f   :  { %1612 = vmatprep.subr.bf16.mxu0 %v10589_v1  ;;  %v10851_v1 = vcombine.high %v10715_v62, %v10747_v63  ;;  %v10850_v6 = vcombine.low %v10715_v62, %v10747_v63  ;;  %v10598_v63 = vcombine.low %v66_v49, %v98_v50 }
  0x81   :  { %4103 = vmatprep.subr.bf16.mxu1 %v10851_v1  ;;  %4096 = vmatmul.mubr.bf16.vlgmr.msra.gmra.mrb[0].mxu1 %v2879_v4  ;;  %v10718_v4 = vld [vmem:[%s14268_s1 + $0x440] sm:$0xff] }
  0x82   :  { %4104 = vmatpush1.bf16.xpose.msra.mxu1 %v10850_v6  ;;  %4135 = vmatprep.mubr.bf16.mxu1 %v2903_v20  ;;  %v10857_v6 = vcombine.high %v10718_v4, %v10750_v5  ;;  %v163_v20 = vld [vmem:[%s14268_s1 + $0x370] sm:$0xff] }
  0x85   :  { %1605 = vmatmul.mubr.bf16.vlgmr.msra.gmra.mrb[0].mxu0 %v291_v8  ;;  %v10595_v8 = vcombine.high %v64_v2, %v96_v3  ;;  %v343_v2 = vcombine.high %v12527_v23, %v12527_v23  ;;  %v2904_v3 = vcombine.high %v2900_v52, %v2900_v52 }
  0x86   :  { %1613 = vmatpush1.bf16.xpose.msra.mxu0 %v10588_v11  ;;  %1644 = vmatprep.mubr.bf16.mxu0 %v331_v12  ;;  %v10915_v11 = vcombine.high %v10779_v9, %v10811_v10  ;;  %v128_v12 = vld [vmem:[%s14268_s1 + $0x258] sm:$0xff]  ;;  %v2902_v9 = vcombine.high %v2886_v51, %v2886_v51  ;;  %v10856_v10 = vcombine.low %v10718_v4, %v10750_v5 }
  0x87   :  { %1614 = vmatprep.subr.bf16.mxu0 %v10653_v14  ;;  %v160_v14 = vld [vmem:[%s14268_s1 + $0x358] sm:$0xff] }
  0x88   :  { %4105 = vmatprep.subr.bf16.mxu1 %v10915_v11  ;;  %v10659_v19 = vcombine.high %v128_v12, %v160_v14  ;;  %v10658_v29 = vcombine.low %v128_v12, %v160_v14  ;;  %v357_v12 = vrot.slane %v343_v2, %v12260_v13  ;;  %v165_v2 = vld [vmem:[%s14268_s1 + $0x380] sm:$0xff] }
  0x8a   :  { %4106 = vmatpush1.bf16.xpose.msra.mxu1 %v10914_v16  ;;  %v10782_v16 = vld [vmem:[%s14268_s1 + $0x640] sm:$0xff]  ;;  %v373_v44 = vrot.slane %v357_v12, %v12260_v13 }
  0x8b   :  { %4143 = vmatprep.subr.bf16.mxu1 %v10853_v24 }
  0x8e   :  { %1615 = vmatpush1.bf16.xpose.msra.mxu0 %v10652_v25  ;;  %v65_v25 = vld [vmem:[%s14268_s1 + $0x60] sm:$0xff] }
  0x8f   :  { %1652 = vmatprep.subr.bf16.mxu0 %v10591_v26  ;;  %v97_v26 = vld [vmem:[%s14268_s1 + $0x160] sm:$0xff] }
  0x90   :  { %v10597_v31 = vcombine.high %v65_v25, %v97_v26  ;;  %v10596_v40 = vcombine.low %v65_v25, %v97_v26  ;;  %v12611_v26 = vld [vmem:[%s14267_s0 + $0x50] sm:$0xff] }
  0x91   :  { %4136 = vmatmul.mubr.bf16.vlgmr.msra.gmra.mrb[0].mxu1 %v2901_v27  ;;  %v2912_v27 = vrot.slane %v12611_v26, %v12260_v13 }
  0x92   :  { %4144 = vmatpush1.bf16.xpose.msra.mxu1 %v10852_v28  ;;  %4175 = vmatprep.mubr.bf16.mxu1 %v2900_v52  ;;  %v10719_v28 = vld [vmem:[%s14268_s1 + $0x448] sm:$0xff]  ;;  %v12651_v52 = vld [vmem:[%s14267_s0 + $0x20] sm:$0xff] }
  0x95   :  { %1645 = vmatmul.mubr.bf16.vlgmr.msra.gmra.mrb[0].mxu0 %v317_v32  ;;  %v358_v32 = vcombine.high %v350_v30, %v350_v30  ;;  %v2920_v30 = vcombine.high %v2912_v27, %v2912_v27 }
  0x96   :  { %1653 = vmatpush1.bf16.xpose.msra.mxu0 %v10590_v34  ;;  %1684 = vmatprep.mubr.bf16.mxu0 %v341_v35  ;;  %v10812_v34 = vld [vmem:[%s14268_s1 + $0x730] sm:$0xff] }
  0x97   :  { %1654 = vmatprep.subr.bf16.mxu0 %v10655_v36  ;;  %v10917_v35 = vcombine.high %v10780_v33, %v10812_v34  ;;  %v129_v36 = vld [vmem:[%s14268_s1 + $0x260] sm:$0xff]  ;;  %v10916_v39 = vcombine.low %v10780_v33, %v10812_v34  ;;  %v380_v41 = vrot.slane %v358_v32, %v12260_v13  ;;  %v68_v32 = vld [vmem:[%s14268_s1 + $0x78] sm:$0xff]  ;;  %v2928_v34 = vrot.slane %v2912_v27, %v12260_v13 }
  0x98   :  { %v10661_v42 = vcombine.high %v129_v36, %v161_v37  ;;  %v10660_v54 = vcombine.low %v129_v36, %v161_v37  ;;  %v100_v33 = vld [vmem:[%s14268_s1 + $0x178] sm:$0xff] }
  0x99   :  { %4145 = vmatprep.subr.bf16.mxu1 %v10917_v35  ;;  %v390_v0 = vcombine.high %v380_v41, %v380_v41  ;;  %v2942_v35 = vrot.slane %v2920_v30, %v12260_v13 }
  0x9a   :  { %4146 = vmatpush1.bf16.xpose.msra.mxu1 %v10916_v39  ;;  %v10783_v39 = vld [vmem:[%s14268_s1 + $0x648] sm:$0xff] }
  0x9e   :  { %1655 = vmatpush1.bf16.xpose.msra.mxu0 %v10654_v46  ;;  %v10749_v46 = vld [vmem:[%s14268_s1 + $0x538] sm:$0xff] }
  0x9f   :  { %1692 = vmatprep.subr.bf16.mxu0 %v10593_v48  ;;  %v10855_v48 = vcombine.high %v10717_v45, %v10749_v46  ;;  %v10854_v53 = vcombine.low %v10717_v45, %v10749_v46  ;;  %v10602_v46 = vcombine.low %v68_v32, %v100_v33 }
  0xa1   :  { %4183 = vmatprep.subr.bf16.mxu1 %v10855_v48  ;;  %4176 = vmatmul.mubr.bf16.vlgmr.msra.gmra.mrb[0].mxu1 %v2886_v51  ;;  %v10752_v51 = vld [vmem:[%s14268_s1 + $0x550] sm:$0xff] }
  0xa2   :  { %4184 = vmatpush1.bf16.xpose.msra.mxu1 %v10854_v53  ;;  %4215 = vmatprep.mubr.bf16.mxu1 %v2904_v3  ;;  %v389_v3 = vcombine.high %v373_v44, %v373_v44 }
  0xa5   :  { %1685 = vmatmul.mubr.bf16.vlgmr.msra.gmra.mrb[0].mxu0 %v339_v55  ;;  %v10599_v55 = vcombine.high %v66_v49, %v98_v50  ;;  %v2952_v49 = vcombine.high %v2942_v35, %v2942_v35  ;;  %v10720_v50 = vld [vmem:[%s14268_s1 + $0x450] sm:$0xff] }
  0xa6   :  { %1693 = vmatpush1.bf16.xpose.msra.mxu0 %v10592_v57  ;;  %1724 = vmatprep.mubr.bf16.mxu0 %v338_v58  ;;  %v10813_v57 = vld [vmem:[%s14268_s1 + $0x738] sm:$0xff]  ;;  %v10861_v53 = vcombine.high %v10720_v50, %v10752_v51 }
  0xa7   :  { %1694 = vmatprep.subr.bf16.mxu0 %v10657_v59  ;;  %v10919_v58 = vcombine.high %v10781_v56, %v10813_v57  ;;  %v130_v59 = vld [vmem:[%s14268_s1 + $0x268] sm:$0xff]  ;;  %v10918_v62 = vcombine.low %v10781_v56, %v10813_v57  ;;  %v2950_v56 = vcombine.high %v2928_v34, %v2928_v34  ;;  %v10860_v57 = vcombine.low %v10720_v50, %v10752_v51 }
  0xa8   :  { %v10663_v1 = vcombine.high %v130_v59, %v162_v60  ;;  %v10662_v11 = vcombine.low %v130_v59, %v162_v60  ;;  %v399_v59 = vrot.slane %v12651_v52, %v12260_v13 }
  0xa9   :  { %4185 = vmatprep.subr.bf16.mxu1 %v10919_v58 }
  0xaa   :  { %4186 = vmatpush1.bf16.xpose.msra.mxu1 %v10918_v62  ;;  %v10784_v62 = vld [vmem:[%s14268_s1 + $0x650] sm:$0xff]  ;;  %v415_v27 = vrot.slane %v399_v59, %v12260_v13 }
  0xab   :  { %4223 = vmatprep.subr.bf16.mxu1 %v10857_v6 }
  0xac   :  { %v437_v50 = vcombine.high %v415_v27, %v415_v27 }
  0xae   :  { %1695 = vmatpush1.bf16.xpose.msra.mxu0 %v10656_v7  ;;  %v67_v7 = vld [vmem:[%s14268_s1 + $0x70] sm:$0xff] }
  0xaf   :  { %1732 = vmatprep.subr.bf16.mxu0 %v10595_v8  ;;  %v99_v8 = vld [vmem:[%s14268_s1 + $0x170] sm:$0xff] }
  0xb0   :  { %v10601_v14 = vcombine.high %v67_v7, %v99_v8  ;;  %v10600_v23 = vcombine.low %v67_v7, %v99_v8  ;;  %v2905_v8 = vcombine.high %v12611_v26, %v12611_v26  ;;  %v166_v26 = vld [vmem:[%s14268_s1 + $0x388] sm:$0xff] }
  0xb1   :  { %4216 = vmatmul.mubr.bf16.vlgmr.msra.gmra.mrb[0].mxu1 %v2902_v9 }
  0xb2   :  { %4224 = vmatpush1.bf16.xpose.msra.mxu1 %v10856_v10  ;;  %4255 = vmatprep.mubr.bf16.mxu1 %v2942_v35  ;;  %v2919_v9 = vrot.slane %v2905_v8, %v12260_v13  ;;  %v10721_v10 = vld [vmem:[%s14268_s1 + $0x458] sm:$0xff]  ;;  %v10754_v35 = vld [vmem:[%s14268_s1 + $0x560] sm:$0xff] }
  0xb3   :  { %v168_v8 = vld [vmem:[%s14268_s1 + $0x398] sm:$0xff] }
  0xb5   :  { %1725 = vmatmul.mubr.bf16.vlgmr.msra.gmra.mrb[0].mxu0 %v324_v15  ;;  %v359_v15 = vcombine.high %v357_v12, %v357_v12  ;;  %v2921_v12 = vcombine.high %v2919_v9, %v2919_v9 }
  0xb6   :  { %1733 = vmatpush1.bf16.xpose.msra.mxu0 %v10594_v17  ;;  %1764 = vmatprep.mubr.bf16.mxu0 %v342_v18  ;;  %v10814_v17 = vld [vmem:[%s14268_s1 + $0x740] sm:$0xff] }
  0xb7   :  { %1734 = vmatprep.subr.bf16.mxu0 %v10659_v19  ;;  %v10921_v18 = vcombine.high %v10782_v16, %v10814_v17  ;;  %v131_v19 = vld [vmem:[%s14268_s1 + $0x270] sm:$0xff]  ;;  %v10920_v22 = vcombine.low %v10782_v16, %v10814_v17  ;;  %v387_v24 = vrot.slane %v359_v15, %v12260_v13  ;;  %v70_v15 = vld [vmem:[%s14268_s1 + $0x88] sm:$0xff]  ;;  %v2935_v17 = vrot.slane %v2919_v9, %v12260_v13 }
  0xb8   :  { %v10665_v25 = vcombine.high %v131_v19, %v163_v20  ;;  %v10664_v37 = vcombine.low %v131_v19, %v163_v20  ;;  %v102_v16 = vld [vmem:[%s14268_s1 + $0x188] sm:$0xff] }
  0xb9   :  { %4225 = vmatprep.subr.bf16.mxu1 %v10921_v18  ;;  %v391_v47 = vcombine.high %v387_v24, %v387_v24  ;;  %v2949_v18 = vrot.slane %v2921_v12, %v12260_v13 }
  0xba   :  { %4226 = vmatpush1.bf16.xpose.msra.mxu1 %v10920_v22  ;;  %v10785_v22 = vld [vmem:[%s14268_s1 + $0x658] sm:$0xff] }
  0xbe   :  { %1735 = vmatpush1.bf16.xpose.msra.mxu0 %v10658_v29  ;;  %v10751_v29 = vld [vmem:[%s14268_s1 + $0x548] sm:$0xff] }
  0xbf   :  { %1772 = vmatprep.subr.bf16.mxu0 %v10597_v31  ;;  %v10859_v31 = vcombine.high %v10719_v28, %v10751_v29  ;;  %v10858_v36 = vcombine.low %v10719_v28, %v10751_v29  ;;  %v10606_v29 = vcombine.low %v70_v15, %v102_v16 }
  0xc1   :  { %4263 = vmatprep.subr.bf16.mxu1 %v10859_v31  ;;  %4256 = vmatmul.mubr.bf16.vlgmr.msra.gmra.mrb[0].mxu1 %v2928_v34  ;;  %v10722_v34 = vld [vmem:[%s14268_s1 + $0x460] sm:$0xff] }
  0xc2   :  { %4264 = vmatpush1.bf16.xpose.msra.mxu1 %v10858_v36  ;;  %4295 = vmatprep.mubr.bf16.mxu1 %v2952_v49  ;;  %v10865_v36 = vcombine.high %v10722_v34, %v10754_v35  ;;  %v167_v49 = vld [vmem:[%s14268_s1 + $0x390] sm:$0xff] }
  0xc5   :  { %1765 = vmatmul.mubr.bf16.vlgmr.msra.gmra.mrb[0].mxu0 %v340_v38  ;;  %v10603_v38 = vcombine.high %v68_v32, %v100_v33  ;;  %v392_v32 = vcombine.high %v12651_v52, %v12651_v52  ;;  %v2953_v33 = vcombine.high %v2949_v18, %v2949_v18 }
  0xc6   :  { %1773 = vmatpush1.bf16.xpose.msra.mxu0 %v10596_v40  ;;  %1804 = vmatprep.mubr.bf16.mxu0 %v380_v41  ;;  %v10815_v40 = vld [vmem:[%s14268_s1 + $0x748] sm:$0xff] }
  0xc7   :  { %1774 = vmatprep.subr.bf16.mxu0 %v10661_v42  ;;  %v10923_v41 = vcombine.high %v10783_v39, %v10815_v40  ;;  %v132_v42 = vld [vmem:[%s14268_s1 + $0x278] sm:$0xff]  ;;  %v10922_v45 = vcombine.low %v10783_v39, %v10815_v40  ;;  %v2951_v39 = vcombine.high %v2935_v17, %v2935_v17  ;;  %v10864_v40 = vcombine.low %v10722_v34, %v10754_v35 }
  0xc8   :  { %v10667_v48 = vcombine.high %v132_v42, %v164_v43  ;;  %v10666_v58 = vcombine.low %v132_v42, %v164_v43  ;;  %v406_v42 = vrot.slane %v392_v32, %v12260_v13  ;;  %v169_v32 = vld [vmem:[%s14268_s1 + $0x3a0] sm:$0xff] }
  0xc9   :  { %4265 = vmatprep.subr.bf16.mxu1 %v10923_v41 }
  0xca   :  { %4266 = vmatpush1.bf16.xpose.msra.mxu1 %v10922_v45  ;;  %v10786_v45 = vld [vmem:[%s14268_s1 + $0x660] sm:$0xff]  ;;  %v422_v9 = vrot.slane %v406_v42, %v12260_v13 }
  0xcb   :  { %4303 = vmatprep.subr.bf16.mxu1 %v10861_v53 }
  0xce   :  { %1775 = vmatpush1.bf16.xpose.msra.mxu0 %v10660_v54  ;;  %v69_v54 = vld [vmem:[%s14268_s1 + $0x80] sm:$0xff] }
  0xcf   :  { %1812 = vmatprep.subr.bf16.mxu0 %v10599_v55  ;;  %v101_v55 = vld [vmem:[%s14268_s1 + $0x180] sm:$0xff] }
  0xd0   :  { %v10605_v60 = vcombine.high %v69_v54, %v101_v55  ;;  %v10604_v5 = vcombine.low %v69_v54, %v101_v55  ;;  %v12735_v55 = vld [vmem:[%s14267_s0 + $0x58] sm:$0xff] }
  0xd1   :  { %4296 = vmatmul.mubr.bf16.vlgmr.msra.gmra.mrb[0].mxu1 %v2950_v56  ;;  %v2961_v56 = vrot.slane %v12735_v55, %v12260_v13 }
  0xd2   :  { %4304 = vmatpush1.bf16.xpose.msra.mxu1 %v10860_v57  ;;  %4335 = vmatprep.mubr.bf16.mxu1 %v2949_v18  ;;  %v10723_v57 = vld [vmem:[%s14268_s1 + $0x468] sm:$0xff] }
  0xd3   :  { %v12775_v18 = vld [vmem:[%s14267_s0 + $0x28] sm:$0xff] }
  0xd5   :  { %1805 = vmatmul.mubr.bf16.vlgmr.msra.gmra.mrb[0].mxu0 %v366_v61  ;;  %v407_v61 = vcombine.high %v399_v59, %v399_v59  ;;  %v2969_v59 = vcombine.high %v2961_v56, %v2961_v56 }
  0xd6   :  { %1813 = vmatpush1.bf16.xpose.msra.mxu0 %v10598_v63  ;;  %1844 = vmatprep.mubr.bf16.mxu0 %v390_v0  ;;  %v10816_v63 = vld [vmem:[%s14268_s1 + $0x750] sm:$0xff] }
  0xd7   :  { %1814 = vmatprep.subr.bf16.mxu0 %v10663_v1  ;;  %v10925_v0 = vcombine.high %v10784_v62, %v10816_v63  ;;  %v133_v1 = vld [vmem:[%s14268_s1 + $0x280] sm:$0xff]  ;;  %v10924_v4 = vcombine.low %v10784_v62, %v10816_v63  ;;  %v429_v6 = vrot.slane %v407_v61, %v12260_v13  ;;  %v72_v61 = vld [vmem:[%s14268_s1 + $0x98] sm:$0xff]  ;;  %v2977_v63 = vrot.slane %v2961_v56, %v12260_v13 }
  0xd8   :  { %v10669_v7 = vcombine.high %v133_v1, %v165_v2  ;;  %v10668_v20 = vcombine.low %v133_v1, %v165_v2  ;;  %v104_v62 = vld [vmem:[%s14268_s1 + $0x198] sm:$0xff] }
  0xd9   :  { %4305 = vmatprep.subr.bf16.mxu1 %v10925_v0  ;;  %v439_v30 = vcombine.high %v429_v6, %v429_v6  ;;  %v2991_v0 = vrot.slane %v2969_v59, %v12260_v13 }
  0xda   :  { %4306 = vmatpush1.bf16.xpose.msra.mxu1 %v10924_v4  ;;  %v10787_v4 = vld [vmem:[%s14268_s1 + $0x668] sm:$0xff] }
  0xde   :  { %1815 = vmatpush1.bf16.xpose.msra.mxu0 %v10662_v11  ;;  %v10753_v11 = vld [vmem:[%s14268_s1 + $0x558] sm:$0xff] }
  0xdf   :  { %1852 = vmatprep.subr.bf16.mxu0 %v10601_v14  ;;  %v10863_v14 = vcombine.high %v10721_v10, %v10753_v11  ;;  %v10862_v19 = vcombine.low %v10721_v10, %v10753_v11  ;;  %v10610_v11 = vcombine.low %v72_v61, %v104_v62 }
  0xe1   :  { %4343 = vmatprep.subr.bf16.mxu1 %v10863_v14  ;;  %4336 = vmatmul.mubr.bf16.vlgmr.msra.gmra.mrb[0].mxu1 %v2935_v17  ;;  %v10756_v17 = vld [vmem:[%s14268_s1 + $0x570] sm:$0xff] }
  0xe2   :  { %4344 = vmatpush1.bf16.xpose.msra.mxu1 %v10862_v19  ;;  %4375 = vmatprep.mubr.bf16.mxu1 %v2953_v33  ;;  %v438_v33 = vcombine.high %v422_v9, %v422_v9 }
  0xe5   :  { %1845 = vmatmul.mubr.bf16.vlgmr.msra.gmra.mrb[0].mxu0 %v388_v21  ;;  %v10607_v21 = vcombine.high %v70_v15, %v102_v16  ;;  %v3001_v15 = vcombine.high %v2991_v0, %v2991_v0  ;;  %v10724_v16 = vld [vmem:[%s14268_s1 + $0x470] sm:$0xff] }
  0xe6   :  { %1853 = vmatpush1.bf16.xpose.msra.mxu0 %v10600_v23  ;;  %1884 = vmatprep.mubr.bf16.mxu0 %v387_v24  ;;  %v10817_v23 = vld [vmem:[%s14268_s1 + $0x758] sm:$0xff]  ;;  %v10869_v19 = vcombine.high %v10724_v16, %v10756_v17 }
  0xe7   :  { %1854 = vmatprep.subr.bf16.mxu0 %v10665_v25  ;;  %v10927_v24 = vcombine.high %v10785_v22, %v10817_v23  ;;  %v134_v25 = vld [vmem:[%s14268_s1 + $0x288] sm:$0xff]  ;;  %v10926_v28 = vcombine.low %v10785_v22, %v10817_v23  ;;  %v2999_v22 = vcombine.high %v2977_v63, %v2977_v63  ;;  %v10868_v23 = vcombine.low %v10724_v16, %v10756_v17 }
  0xe8   :  { %v10671_v31 = vcombine.high %v134_v25, %v166_v26  ;;  %v10670_v41 = vcombine.low %v134_v25, %v166_v26  ;;  %v448_v25 = vrot.slane %v12775_v18, %v12260_v13 }
  0xe9   :  { %4345 = vmatprep.subr.bf16.mxu1 %v10927_v24 }
  0xea   :  { %4346 = vmatpush1.bf16.xpose.msra.mxu1 %v10926_v28  ;;  %v10788_v28 = vld [vmem:[%s14268_s1 + $0x670] sm:$0xff]  ;;  %v464_v56 = vrot.slane %v448_v25, %v12260_v13 }
  0xeb   :  { %4383 = vmatprep.subr.bf16.mxu1 %v10865_v36 }
  0xec   :  { %v486_v16 = vcombine.high %v464_v56, %v464_v56 }
  0xee   :  { %1855 = vmatpush1.bf16.xpose.msra.mxu0 %v10664_v37  ;;  %v71_v37 = vld [vmem:[%s14268_s1 + $0x90] sm:$0xff] }
  0xef   :  { %1892 = vmatprep.subr.bf16.mxu0 %v10603_v38  ;;  %v103_v38 = vld [vmem:[%s14268_s1 + $0x190] sm:$0xff] }
  0xf0   :  { %v10609_v43 = vcombine.high %v71_v37, %v103_v38  ;;  %v10608_v52 = vcombine.low %v71_v37, %v103_v38  ;;  %v2954_v38 = vcombine.high %v12735_v55, %v12735_v55  ;;  %v170_v55 = vld [vmem:[%s14268_s1 + $0x3a8] sm:$0xff] }
  0xf1   :  { %4376 = vmatmul.mubr.bf16.vlgmr.msra.gmra.mrb[0].mxu1 %v2951_v39 }
  0xf2   :  { %4384 = vmatpush1.bf16.xpose.msra.mxu1 %v10864_v40  ;;  %4415 = vmatprep.mubr.bf16.mxu1 %v2991_v0  ;;  %v2968_v39 = vrot.slane %v2954_v38, %v12260_v13  ;;  %v10725_v40 = vld [vmem:[%s14268_s1 + $0x478] sm:$0xff]  ;;  %v10758_v0 = vld [vmem:[%s14268_s1 + $0x580] sm:$0xff] }
  0xf3   :  { %v172_v38 = vld [vmem:[%s14268_s1 + $0x3b8] sm:$0xff] }
  0xf5   :  { %1885 = vmatmul.mubr.bf16.vlgmr.msra.gmra.mrb[0].mxu0 %v373_v44  ;;  %v408_v44 = vcombine.high %v406_v42, %v406_v42  ;;  %v2970_v42 = vcombine.high %v2968_v39, %v2968_v39 }
  0xf6   :  { %1893 = vmatpush1.bf16.xpose.msra.mxu0 %v10602_v46  ;;  %1924 = vmatprep.mubr.bf16.mxu0 %v391_v47  ;;  %v10818_v46 = vld [vmem:[%s14268_s1 + $0x760] sm:$0xff] }
  0xf7   :  { %1894 = vmatprep.subr.bf16.mxu0 %v10667_v48  ;;  %v10929_v47 = vcombine.high %v10786_v45, %v10818_v46  ;;  %v135_v48 = vld [vmem:[%s14268_s1 + $0x290] sm:$0xff]  ;;  %v10928_v51 = vcombine.low %v10786_v45, %v10818_v46  ;;  %v436_v53 = vrot.slane %v408_v44, %v12260_v13  ;;  %v74_v44 = vld [vmem:[%s14268_s1 + $0xa8] sm:$0xff]  ;;  %v2984_v46 = vrot.slane %v2968_v39, %v12260_v13 }
  0xf8   :  { %v10673_v54 = vcombine.high %v135_v48, %v167_v49  ;;  %v10672_v2 = vcombine.low %v135_v48, %v167_v49  ;;  %v106_v45 = vld [vmem:[%s14268_s1 + $0x1a8] sm:$0xff] }
  0xf9   :  { %4385 = vmatprep.subr.bf16.mxu1 %v10929_v47  ;;  %v440_v12 = vcombine.high %v436_v53, %v436_v53  ;;  %v2998_v47 = vrot.slane %v2970_v42, %v12260_v13 }
  0xfa   :  { %4386 = vmatpush1.bf16.xpose.msra.mxu1 %v10928_v51  ;;  %v10789_v51 = vld [vmem:[%s14268_s1 + $0x678] sm:$0xff] }
  0xfe   :  { %1895 = vmatpush1.bf16.xpose.msra.mxu0 %v10666_v58  ;;  %v10755_v58 = vld [vmem:[%s14268_s1 + $0x568] sm:$0xff] }
  0xff   :  { %1932 = vmatprep.subr.bf16.mxu0 %v10605_v60  ;;  %v10867_v60 = vcombine.high %v10723_v57, %v10755_v58  ;;  %v10866_v1 = vcombine.low %v10723_v57, %v10755_v58  ;;  %v10614_v58 = vcombine.low %v74_v44, %v106_v45 }
 0x101   :  { %4423 = vmatprep.subr.bf16.mxu1 %v10867_v60  ;;  %4416 = vmatmul.mubr.bf16.vlgmr.msra.gmra.mrb[0].mxu1 %v2977_v63  ;;  %v10726_v63 = vld [vmem:[%s14268_s1 + $0x480] sm:$0xff] }
 0x102   :  { %4424 = vmatpush1.bf16.xpose.msra.mxu1 %v10866_v1  ;;  %4455 = vmatprep.mubr.bf16.mxu1 %v3001_v15  ;;  %v10873_v1 = vcombine.high %v10726_v63, %v10758_v0  ;;  %v171_v15 = vld [vmem:[%s14268_s1 + $0x3b0] sm:$0xff] }
 0x105   :  { %1925 = vmatmul.mubr.bf16.vlgmr.msra.gmra.mrb[0].mxu0 %v389_v3  ;;  %v10611_v3 = vcombine.high %v72_v61, %v104_v62  ;;  %v441_v61 = vcombine.high %v12775_v18, %v12775_v18  ;;  %v3002_v62 = vcombine.high %v2998_v47, %v2998_v47 }
 0x106   :  { %1933 = vmatpush1.bf16.xpose.msra.mxu0 %v10604_v5  ;;  %1964 = vmatprep.mubr.bf16.mxu0 %v429_v6  ;;  %v10819_v5 = vld [vmem:[%s14268_s1 + $0x768] sm:$0xff] }
 0x107   :  { %1934 = vmatprep.subr.bf16.mxu0 %v10669_v7  ;;  %v10931_v6 = vcombine.high %v10787_v4, %v10819_v5  ;;  %v136_v7 = vld [vmem:[%s14268_s1 + $0x298] sm:$0xff]  ;;  %v10930_v10 = vcombine.low %v10787_v4, %v10819_v5  ;;  %v3000_v4 = vcombine.high %v2984_v46, %v2984_v46  ;;  %v10872_v5 = vcombine.low %v10726_v63, %v10758_v0 }
 0x108   :  { %v10675_v14 = vcombine.high %v136_v7, %v168_v8  ;;  %v10674_v24 = vcombine.low %v136_v7, %v168_v8  ;;  %v455_v7 = vrot.slane %v441_v61, %v12260_v13  ;;  %v173_v61 = vld [vmem:[%s14268_s1 + $0x3c0] sm:$0xff] }
 0x109   :  { %4425 = vmatprep.subr.bf16.mxu1 %v10931_v6 }
 0x10a   :  { %4426 = vmatpush1.bf16.xpose.msra.mxu1 %v10930_v10  ;;  %v10790_v10 = vld [vmem:[%s14268_s1 + $0x680] sm:$0xff]  ;;  %v471_v39 = vrot.slane %v455_v7, %v12260_v13 }
 0x10b   :  { %4463 = vmatprep.subr.bf16.mxu1 %v10869_v19 }
 0x10e   :  { %1935 = vmatpush1.bf16.xpose.msra.mxu0 %v10668_v20  ;;  %v73_v20 = vld [vmem:[%s14268_s1 + $0xa0] sm:$0xff] }
 0x10f   :  { %1972 = vmatprep.subr.bf16.mxu0 %v10607_v21  ;;  %v105_v21 = vld [vmem:[%s14268_s1 + $0x1a0] sm:$0xff] }
 0x110   :  { %v10613_v26 = vcombine.high %v73_v20, %v105_v21  ;;  %v10612_v35 = vcombine.low %v73_v20, %v105_v21  ;;  %v12859_v21 = vld [vmem:[%s14267_s0 + $0x60] sm:$0xff] }
 0x111   :  { %4456 = vmatmul.mubr.bf16.vlgmr.msra.gmra.mrb[0].mxu1 %v2999_v22  ;;  %v3010_v22 = vrot.slane %v12859_v21, %v12260_v13 }
 0x112   :  { %4464 = vmatpush1.bf16.xpose.msra.mxu1 %v10868_v23  ;;  %4495 = vmatprep.mubr.bf16.mxu1 %v2998_v47  ;;  %v10727_v23 = vld [vmem:[%s14268_s1 + $0x488] sm:$0xff]  ;;  %v12899_v47 = vld [vmem:[%s14267_s0 + $0x30] sm:$0xff] }
 0x115   :  { %1965 = vmatmul.mubr.bf16.vlgmr.msra.gmra.mrb[0].mxu0 %v415_v27  ;;  %v456_v27 = vcombine.high %v448_v25, %v448_v25  ;;  %v3018_v25 = vcombine.high %v3010_v22, %v3010_v22 }
 0x116   :  { %1973 = vmatpush1.bf16.xpose.msra.mxu0 %v10606_v29  ;;  %2004 = vmatprep.mubr.bf16.mxu0 %v439_v30  ;;  %v10820_v29 = vld [vmem:[%s14268_s1 + $0x770] sm:$0xff] }
 0x117   :  { %1974 = vmatprep.subr.bf16.mxu0 %v10671_v31  ;;  %v10933_v30 = vcombine.high %v10788_v28, %v10820_v29  ;;  %v137_v31 = vld [vmem:[%s14268_s1 + $0x2a0] sm:$0xff]  ;;  %v10932_v34 = vcombine.low %v10788_v28, %v10820_v29  ;;  %v478_v36 = vrot.slane %v456_v27, %v12260_v13  ;;  %v76_v27 = vld [vmem:[%s14268_s1 + $0xb8] sm:$0xff]  ;;  %v3026_v29 = vrot.slane %v3010_v22, %v12260_v13  ;;  %v142_v22 = vld [vmem:[%s14268_s1 + $0x2c8] sm:$0xff] }
 0x118   :  { %v10677_v37 = vcombine.high %v137_v31, %v169_v32  ;;  %v10676_v49 = vcombine.low %v137_v31, %v169_v32  ;;  %v108_v28 = vld [vmem:[%s14268_s1 + $0x1b8] sm:$0xff] }
 0x119   :  { %4465 = vmatprep.subr.bf16.mxu1 %v10933_v30  ;;  %v488_v59 = vcombine.high %v478_v36, %v478_v36  ;;  %v3040_v30 = vrot.slane %v3018_v25, %v12260_v13  ;;  %v10762_v25 = vld [vmem:[%s14268_s1 + $0x5a0] sm:$0xff] }
 0x11a   :  { %4466 = vmatpush1.bf16.xpose.msra.mxu1 %v10932_v34  ;;  %v10791_v34 = vld [vmem:[%s14268_s1 + $0x688] sm:$0xff] }
 0x11e   :  { %1975 = vmatpush1.bf16.xpose.msra.mxu0 %v10670_v41  ;;  %v10757_v41 = vld [vmem:[%s14268_s1 + $0x578] sm:$0xff] }
 0x11f   :  { %2012 = vmatprep.subr.bf16.mxu0 %v10609_v43  ;;  %v10871_v43 = vcombine.high %v10725_v40, %v10757_v41  ;;  %v10870_v48 = vcombine.low %v10725_v40, %v10757_v41  ;;  %v10618_v41 = vcombine.low %v76_v27, %v108_v28 }
 0x121   :  { %4503 = vmatprep.subr.bf16.mxu1 %v10871_v43  ;;  %4496 = vmatmul.mubr.bf16.vlgmr.msra.gmra.mrb[0].mxu1 %v2984_v46  ;;  %v10760_v46 = vld [vmem:[%s14268_s1 + $0x590] sm:$0xff] }
 0x122   :  { %4504 = vmatpush1.bf16.xpose.msra.mxu1 %v10870_v48  ;;  %4535 = vmatprep.mubr.bf16.mxu1 %v3002_v62  ;;  %v487_v62 = vcombine.high %v471_v39, %v471_v39 }
 0x125   :  { %2005 = vmatmul.mubr.bf16.vlgmr.msra.gmra.mrb[0].mxu0 %v437_v50  ;;  %v10615_v50 = vcombine.high %v74_v44, %v106_v45  ;;  %v3050_v44 = vcombine.high %v3040_v30, %v3040_v30  ;;  %v10728_v45 = vld [vmem:[%s14268_s1 + $0x490] sm:$0xff] }
 0x126   :  { %2013 = vmatpush1.bf16.xpose.msra.mxu0 %v10608_v52  ;;  %2044 = vmatprep.mubr.bf16.mxu0 %v436_v53  ;;  %v10821_v52 = vld [vmem:[%s14268_s1 + $0x778] sm:$0xff]  ;;  %v10877_v48 = vcombine.high %v10728_v45, %v10760_v46 }
 0x127   :  { %2014 = vmatprep.subr.bf16.mxu0 %v10673_v54  ;;  %v10935_v53 = vcombine.high %v10789_v51, %v10821_v52  ;;  %v138_v54 = vld [vmem:[%s14268_s1 + $0x2a8] sm:$0xff]  ;;  %v10934_v57 = vcombine.low %v10789_v51, %v10821_v52  ;;  %v3048_v51 = vcombine.high %v3026_v29, %v3026_v29  ;;  %v10876_v52 = vcombine.low %v10728_v45, %v10760_v46 }
 0x128   :  { %v10679_v60 = vcombine.high %v138_v54, %v170_v55  ;;  %v10678_v6 = vcombine.low %v138_v54, %v170_v55  ;;  %v497_v54 = vrot.slane %v12899_v47, %v12260_v13 }
 0x129   :  { %4505 = vmatprep.subr.bf16.mxu1 %v10935_v53 }
 0x12a   :  { %4506 = vmatpush1.bf16.xpose.msra.mxu1 %v10934_v57  ;;  %v10792_v57 = vld [vmem:[%s14268_s1 + $0x690] sm:$0xff] }
 0x12b   :  { %4543 = vmatprep.subr.bf16.mxu1 %v10873_v1 }
 0x12e   :  { %2015 = vmatpush1.bf16.xpose.msra.mxu0 %v10672_v2  ;;  %v75_v2 = vld [vmem:[%s14268_s1 + $0xb0] sm:$0xff] }
 0x12f   :  { %2052 = vmatprep.subr.bf16.mxu0 %v10611_v3  ;;  %v107_v3 = vld [vmem:[%s14268_s1 + $0x1b0] sm:$0xff] }
 0x130   :  { %v10617_v8 = vcombine.high %v75_v2, %v107_v3  ;;  %v10616_v18 = vcombine.low %v75_v2, %v107_v3  ;;  %v3003_v3 = vcombine.high %v12859_v21, %v12859_v21  ;;  %v12948_v21 = vld [vmem:[%s14267_s0 + $0x68] sm:$0xff] }
 0x131   :  { %4536 = vmatmul.mubr.bf16.vlgmr.msra.gmra.mrb[0].mxu1 %v3000_v4 }
 0x132   :  { %4544 = vmatpush1.bf16.xpose.msra.mxu1 %v10872_v5  ;;  %4575 = vmatprep.mubr.bf16.mxu1 %v3040_v30  ;;  %v3017_v4 = vrot.slane %v3003_v3, %v12260_v13  ;;  %v10729_v5 = vld [vmem:[%s14268_s1 + $0x498] sm:$0xff]  ;;  %v3052_v3 = vcombine.high %v12948_v21, %v12948_v21 }
 0x135   :  { %2045 = vmatmul.mubr.bf16.vlgmr.msra.gmra.mrb[0].mxu0 %v422_v9  ;;  %v457_v9 = vcombine.high %v455_v7, %v455_v7 }
 0x136   :  { %2053 = vmatpush1.bf16.xpose.msra.mxu0 %v10610_v11  ;;  %2084 = vmatprep.mubr.bf16.mxu0 %v440_v12  ;;  %v10822_v11 = vld [vmem:[%s14268_s1 + $0x780] sm:$0xff] }
 0x137   :  { %2054 = vmatprep.subr.bf16.mxu0 %v10675_v14  ;;  %v10937_v12 = vcombine.high %v10790_v10, %v10822_v11  ;;  %v139_v14 = vld [vmem:[%s14268_s1 + $0x2b0] sm:$0xff]  ;;  %v10936_v17 = vcombine.low %v10790_v10, %v10822_v11  ;;  %v485_v19 = vrot.slane %v457_v9, %v12260_v13  ;;  %v10793_v9 = vld [vmem:[%s14268_s1 + $0x698] sm:$0xff]  ;;  %v78_v11 = vld [vmem:[%s14268_s1 + $0xc8] sm:$0xff] }
 0x138   :  { %v10681_v20 = vcombine.high %v139_v14, %v171_v15  ;;  %v10680_v32 = vcombine.low %v139_v14, %v171_v15  ;;  %v10825_v10 = vld [vmem:[%s14268_s1 + $0x798] sm:$0xff]  ;;  %v3033_v14 = vrot.slane %v3017_v4, %v12260_v13 }
 0x139   :  { %4545 = vmatprep.subr.bf16.mxu1 %v10937_v12  ;;  %v489_v42 = vcombine.high %v485_v19, %v485_v19  ;;  %v110_v12 = vld [vmem:[%s14268_s1 + $0x1c8] sm:$0xff] }
 0x13a   :  { %4546 = vmatpush1.bf16.xpose.msra.mxu1 %v10936_v17 }
 0x13e   :  { %2055 = vmatpush1.bf16.xpose.msra.mxu0 %v10674_v24  ;;  %v10759_v24 = vld [vmem:[%s14268_s1 + $0x588] sm:$0xff] }
 0x13f   :  { %2092 = vmatprep.subr.bf16.mxu0 %v10613_v26  ;;  %v10875_v26 = vcombine.high %v10727_v23, %v10759_v24  ;;  %v10874_v31 = vcombine.low %v10727_v23, %v10759_v24  ;;  %v174_v23 = vld [vmem:[%s14268_s1 + $0x3c8] sm:$0xff]  ;;  %v10730_v24 = vld [vmem:[%s14268_s1 + $0x4a0] sm:$0xff] }
 0x141   :  { %4583 = vmatprep.subr.bf16.mxu1 %v10875_v26  ;;  %4576 = vmatmul.mubr.bf16.vlgmr.msra.gmra.mrb[0].mxu1 %v3026_v29  ;;  %v513_v26 = vrot.slane %v497_v54, %v12260_v13  ;;  %v10622_v29 = vcombine.low %v78_v11, %v110_v12 }
 0x142   :  { %4584 = vmatpush1.bf16.xpose.msra.mxu1 %v10874_v31  ;;  %4615 = vmatprep.mubr.bf16.mxu1 %v3050_v44  ;;  %v10687_v31 = vcombine.high %v142_v22, %v174_v23 }
 0x145   :  { %2085 = vmatmul.mubr.bf16.vlgmr.msra.gmra.mrb[0].mxu0 %v438_v33  ;;  %v10619_v33 = vcombine.high %v76_v27, %v108_v28  ;;  %v10942_v27 = vcombine.low %v10793_v9, %v10825_v10  ;;  %v3059_v28 = vrot.slane %v12948_v21, %v12260_v13  ;;  %v113_v21 = vld [vmem:[%s14268_s1 + $0x1e0] sm:$0xff] }
 0x146   :  { %2093 = vmatpush1.bf16.xpose.msra.mxu0 %v10612_v35  ;;  %2124 = vmatprep.mubr.bf16.mxu0 %v478_v36  ;;  %v10823_v35 = vld [vmem:[%s14268_s1 + $0x788] sm:$0xff] }
 0x147   :  { %2094 = vmatprep.subr.bf16.mxu0 %v10677_v37  ;;  %v10939_v36 = vcombine.high %v10791_v34, %v10823_v35  ;;  %v140_v37 = vld [vmem:[%s14268_s1 + $0x2b8] sm:$0xff]  ;;  %v10938_v40 = vcombine.low %v10791_v34, %v10823_v35  ;;  %v490_v34 = vcombine.high %v12899_v47, %v12899_v47  ;;  %v10794_v35 = vld [vmem:[%s14268_s1 + $0x6a0] sm:$0xff]  ;;  %v143_v47 = vld [vmem:[%s14268_s1 + $0x2d0] sm:$0xff] }
 0x148   :  { %v10683_v43 = vcombine.high %v140_v37, %v172_v38  ;;  %v10682_v53 = vcombine.low %v140_v37, %v172_v38  ;;  %v79_v37 = vld [vmem:[%s14268_s1 + $0xd0] sm:$0xff] }
 0x149   :  { %4585 = vmatprep.subr.bf16.mxu1 %v10939_v36  ;;  %v10826_v36 = vld [vmem:[%s14268_s1 + $0x7a0] sm:$0xff]  ;;  %v111_v38 = vld [vmem:[%s14268_s1 + $0x1d0] sm:$0xff] }
 0x14a   :  { %4586 = vmatpush1.bf16.xpose.msra.mxu1 %v10938_v40  ;;  %v10880_v40 = vcombine.low %v10730_v24, %v10762_v25  ;;  %v10945_v44 = vcombine.high %v10794_v35, %v10826_v36  ;;  %v10625_v45 = vcombine.high %v79_v37, %v111_v38 }
 0x14b   :  { %4623 = vmatprep.subr.bf16.mxu1 %v10877_v48  ;;  %v175_v48 = vld [vmem:[%s14268_s1 + $0x3d0] sm:$0xff] }
 0x14e   :  { %2095 = vmatpush1.bf16.xpose.msra.mxu0 %v10676_v49  ;;  %v77_v49 = vld [vmem:[%s14268_s1 + $0xc0] sm:$0xff] }
 0x14f   :  { %2132 = vmatprep.subr.bf16.mxu0 %v10615_v50  ;;  %v109_v50 = vld [vmem:[%s14268_s1 + $0x1c0] sm:$0xff] }
 0x150   :  { %v10621_v55 = vcombine.high %v77_v49, %v109_v50  ;;  %v10620_v0 = vcombine.low %v77_v49, %v109_v50  ;;  %v10731_v49 = vld [vmem:[%s14268_s1 + $0x4a8] sm:$0xff] }
 0x151   :  { %4616 = vmatmul.mubr.bf16.vlgmr.msra.gmra.mrb[0].mxu1 %v3048_v51  ;;  %v10763_v50 = vld [vmem:[%s14268_s1 + $0x5a8] sm:$0xff]  ;;  %v535_v51 = vcombine.high %v513_v26, %v513_v26 }
 0x152   :  { %4624 = vmatpush1.bf16.xpose.msra.mxu1 %v10876_v52  ;;  %v10944_v52 = vcombine.low %v10794_v35, %v10826_v36 }
 0x155   :  { %2125 = vmatmul.mubr.bf16.vlgmr.msra.gmra.mrb[0].mxu0 %v464_v56  ;;  %v505_v56 = vcombine.high %v497_v54, %v497_v54 }
 0x156   :  { %2133 = vmatpush1.bf16.xpose.msra.mxu0 %v10614_v58  ;;  %2164 = vmatprep.mubr.bf16.mxu0 %v488_v59  ;;  %v10824_v58 = vld [vmem:[%s14268_s1 + $0x790] sm:$0xff] }
 0x157   :  { %2134 = vmatprep.subr.bf16.mxu0 %v10679_v60  ;;  %v10941_v59 = vcombine.high %v10792_v57, %v10824_v58  ;;  %v141_v60 = vld [vmem:[%s14268_s1 + $0x2c0] sm:$0xff]  ;;  %v10940_v63 = vcombine.low %v10792_v57, %v10824_v58  ;;  %v527_v1 = vrot.slane %v505_v56, %v12260_v13  ;;  %v10883_v56 = vcombine.high %v10731_v49, %v10763_v50  ;;  %v10795_v57 = vld [vmem:[%s14268_s1 + $0x6a8] sm:$0xff] }
 0x158   :  { %v10685_v2 = vcombine.high %v141_v60, %v173_v61  ;;  %v10684_v17 = vcombine.low %v141_v60, %v173_v61  ;;  %v10827_v58 = vld [vmem:[%s14268_s1 + $0x7a8] sm:$0xff]  ;;  %v112_v60 = vld [vmem:[%s14268_s1 + $0x1d8] sm:$0xff]  ;;  %v3075_v61 = vrot.slane %v3059_v28, %v12260_v13 }
 0x159   :  { %4625 = vmatprep.subr.bf16.mxu1 %v10941_v59  ;;  %v537_v30 = vcombine.high %v527_v1, %v527_v1  ;;  %v80_v59 = vld [vmem:[%s14268_s1 + $0xd8] sm:$0xff] }
 0x15a   :  { %4626 = vmatpush1.bf16.xpose.msra.mxu1 %v10940_v63 }
 0x15e   :  { %2135 = vmatpush1.bf16.xpose.msra.mxu0 %v10678_v6  ;;  %v10761_v6 = vld [vmem:[%s14268_s1 + $0x598] sm:$0xff] }
 0x15f   :  { %2172 = vmatprep.subr.bf16.mxu0 %v10617_v8  ;;  %v10879_v7 = vcombine.high %v10729_v5, %v10761_v6  ;;  %v3019_v8 = vcombine.high %v3017_v4, %v3017_v4  ;;  %v144_v4 = vld [vmem:[%s14268_s1 + $0x2d8] sm:$0xff] }
 0x161   :  { %4663 = vmatprep.subr.bf16.mxu1 %v10879_v7  ;;  %v3047_v15 = vrot.slane %v3019_v8, %v12260_v13  ;;  %v10764_v7 = vld [vmem:[%s14268_s1 + $0x5b0] sm:$0xff] }
 0x163   :  { %4655 = vmatprep.mubr.bf16.mxu1 %v3047_v15 }
 0x164   :  { %4656 = vmatmul.mubr.bf16.vlgmr.msra.gmra.mrb[0].mxu1 %v3033_v14 }
 0x165   :  { %2165 = vmatmul.mubr.bf16.vlgmr.msra.gmra.mrb[0].mxu0 %v486_v16  ;;  %v10878_v16 = vcombine.low %v10729_v5, %v10761_v6  ;;  %v176_v5 = vld [vmem:[%s14268_s1 + $0x3d8] sm:$0xff]  ;;  %v10732_v6 = vld [vmem:[%s14268_s1 + $0x4b0] sm:$0xff] }
 0x166   :  { %2173 = vmatpush1.bf16.xpose.msra.mxu0 %v10616_v18  ;;  %2204 = vmatprep.mubr.bf16.mxu0 %v485_v19  ;;  %v10943_v18 = vcombine.high %v10793_v9, %v10825_v10  ;;  %v10623_v19 = vcombine.high %v78_v11, %v110_v12  ;;  %v10946_v9 = vcombine.low %v10795_v57, %v10827_v58 }
 0x167   :  { %2174 = vmatprep.subr.bf16.mxu0 %v10681_v20  ;;  %v3051_v20 = vcombine.high %v3047_v15, %v3047_v15  ;;  %4664 = vmatpush1.bf16.xpose.msra.mxu1 %v10878_v16  ;;  %v3066_v10 = vrot.slane %v3052_v3, %v12260_v13  ;;  %v10626_v11 = vcombine.low %v80_v59, %v112_v60  ;;  %v115_v3 = vld [vmem:[%s14268_s1 + $0x1f0] sm:$0xff] }
 0x168   :  { %4665 = vmatprep.subr.bf16.mxu1 %v10943_v18  ;;  %v10885_v15 = vcombine.high %v10732_v6, %v10764_v7  ;;  %v10796_v18 = vld [vmem:[%s14268_s1 + $0x6b0] sm:$0xff] }
 0x169   :  { %4695 = vmatprep.mubr.bf16.mxu1 %v3051_v20  ;;  %v3068_v16 = vcombine.high %v3066_v10, %v3066_v10  ;;  %v81_v20 = vld [vmem:[%s14268_s1 + $0xe0] sm:$0xff] }
 0x16a   :  { %v10628_v36 = vcombine.low %v81_v20, %v113_v21 }
 0x16e   :  { %2175 = vmatpush1.bf16.xpose.msra.mxu0 %v10680_v32  ;;  %v10881_v32 = vcombine.high %v10730_v24, %v10762_v25  ;;  %v3096_v24 = vrot.slane %v3068_v16, %v12260_v13  ;;  %v10690_v25 = vcombine.low %v144_v4, %v176_v5  ;;  %v10767_v16 = vld [vmem:[%s14268_s1 + $0x5c8] sm:$0xff] }
 0x16f   :  { %2212 = vmatprep.subr.bf16.mxu0 %v10619_v33  ;;  %4666 = vmatpush1.bf16.xpose.msra.mxu1 %v10942_v27  ;;  %v3067_v33 = vcombine.high %v3059_v28, %v3059_v28  ;;  %v10629_v28 = vcombine.high %v81_v20, %v113_v21 }
 0x170   :  { %4703 = vmatprep.subr.bf16.mxu1 %v10881_v32  ;;  %v10733_v32 = vld [vmem:[%s14268_s1 + $0x4b8] sm:$0xff] }
 0x175   :  { %2205 = vmatmul.mubr.bf16.vlgmr.msra.gmra.mrb[0].mxu0 %v471_v39  ;;  %v3049_v39 = vcombine.high %v3033_v14, %v3033_v14  ;;  %v10691_v14 = vcombine.high %v144_v4, %v176_v5 }
 0x176   :  { %2213 = vmatpush1.bf16.xpose.msra.mxu0 %v10618_v41  ;;  %2244 = vmatprep.mubr.bf16.mxu0 %v489_v42  ;;  %v3089_v41 = vrot.slane %v3067_v33, %v12260_v13  ;;  %v10686_v42 = vcombine.low %v142_v22, %v174_v23  ;;  %v3097_v22 = vcombine.high %v3075_v61, %v3075_v61  ;;  %v10765_v33 = vld [vmem:[%s14268_s1 + $0x5b8] sm:$0xff] }
 0x177   :  { %2214 = vmatprep.subr.bf16.mxu0 %v10683_v43  ;;  %v504_v43 = vrot.slane %v490_v34, %v12260_v13  ;;  %4696 = vmatmul.mubr.bf16.vlgmr.msra.gmra.mrb[0].mxu1 %v3049_v39  ;;  %v10884_v23 = vcombine.low %v10732_v6, %v10764_v7  ;;  %v10887_v39 = vcombine.high %v10733_v32, %v10765_v33 }
 0x178   :  { %4704 = vmatpush1.bf16.xpose.msra.mxu1 %v10880_v40  ;;  %4735 = vmatprep.mubr.bf16.mxu1 %v3089_v41  ;;  %v3099_v63 = vcombine.high %v3089_v41, %v3089_v41  ;;  %v10797_v40 = vld [vmem:[%s14268_s1 + $0x6b8] sm:$0xff] }
 0x179   :  { %v506_v46 = vcombine.high %v504_v43, %v504_v43  ;;  %4705 = vmatprep.subr.bf16.mxu1 %v10945_v44  ;;  %v520_v8 = vrot.slane %v504_v43, %v12260_v13  ;;  %v10829_v41 = vld [vmem:[%s14268_s1 + $0x7b8] sm:$0xff]  ;;  %v114_v43 = vld [vmem:[%s14268_s1 + $0x1e8] sm:$0xff]  ;;  %v3082_v44 = vrot.slane %v3066_v10, %v12260_v13 }
 0x17b   :  { %v534_v54 = vrot.slane %v506_v46, %v12260_v13  ;;  %v536_v34 = vcombine.high %v520_v8, %v520_v8  ;;  %v3100_v46 = vcombine.high %v3096_v24, %v3096_v24  ;;  %v3098_v4 = vcombine.high %v3082_v44, %v3082_v44 }
 0x17d   :  { %v538_v12 = vcombine.high %v534_v54, %v534_v54 }
 0x17e   :  { %2215 = vmatpush1.bf16.xpose.msra.mxu0 %v10682_v53  ;;  %v10624_v53 = vcombine.low %v79_v37, %v111_v38 }
 0x17f   :  { %2252 = vmatprep.subr.bf16.mxu0 %v10621_v55  ;;  %v10689_v55 = vcombine.high %v143_v47, %v175_v48 }
 0x180   :  { %4706 = vmatpush1.bf16.xpose.msra.mxu1 %v10944_v52  ;;  %v178_v52 = vld [vmem:[%s14268_s1 + $0x3e8] sm:$0xff] }
 0x181   :  { %4743 = vmatprep.subr.bf16.mxu1 %v10883_v56  ;;  %v10950_v56 = vcombine.low %v10797_v40, %v10829_v41 }
 0x185   :  { %2245 = vmatmul.mubr.bf16.vlgmr.msra.gmra.mrb[0].mxu0 %v487_v62  ;;  %v10882_v62 = vcombine.low %v10731_v49, %v10763_v50  ;;  %v13072_v50 = vld [vmem:[%s14267_s0 + $0x70] sm:$0xff] }
 0x186   :  { %2253 = vmatpush1.bf16.xpose.msra.mxu0 %v10620_v0  ;;  %2284 = vmatprep.mubr.bf16.mxu0 %v527_v1  ;;  %v10688_v0 = vcombine.low %v143_v47, %v175_v48  ;;  %v10947_v1 = vcombine.high %v10795_v57, %v10827_v58  ;;  %v10951_v48 = vcombine.high %v10797_v40, %v10829_v41 }
 0x187   :  { %2254 = vmatprep.subr.bf16.mxu0 %v10685_v2  ;;  %v10627_v2 = vcombine.high %v80_v59, %v112_v60  ;;  %4736 = vmatmul.mubr.bf16.vlgmr.msra.gmra.mrb[0].mxu1 %v3075_v61  ;;  %v3108_v57 = vrot.slane %v13072_v50, %v12260_v13 }
 0x188   :  { %4744 = vmatpush1.bf16.xpose.msra.mxu1 %v10882_v62  ;;  %4775 = vmatprep.mubr.bf16.mxu1 %v3099_v63 }
 0x189   :  { %4745 = vmatprep.subr.bf16.mxu1 %v10947_v1  ;;  %v3116_v62 = vcombine.high %v3108_v57, %v3108_v57  ;;  %v10830_v1 = vld [vmem:[%s14268_s1 + $0x7c0] sm:$0xff] }
 0x18b   :  { %v3138_v6 = vrot.slane %v3116_v62, %v12260_v13  ;;  %v30_v62 = vld [vmem:[%s14270_s3 + $0x10] sm:$0xff] }
 0x18e   :  { %2255 = vmatpush1.bf16.xpose.msra.mxu0 %v10684_v17  ;;  %v13026_v17 = vld [vmem:[%s14267_s0 + $0x38] sm:$0xff] }
 0x18f   :  { %2292 = vmatprep.subr.bf16.mxu0 %v10623_v19  ;;  %v10828_v19 = vld [vmem:[%s14268_s1 + $0x7b0] sm:$0xff]  ;;  %v539_v63 = vcombine.high %v13026_v17, %v13026_v17 }
 0x190   :  { %4746 = vmatpush1.bf16.xpose.msra.mxu1 %v10946_v9  ;;  %v10949_v27 = vcombine.high %v10796_v18, %v10828_v19  ;;  %v10948_v35 = vcombine.low %v10796_v18, %v10828_v19 }
 0x191   :  { %4783 = vmatprep.subr.bf16.mxu1 %v10885_v15  ;;  %v10735_v15 = vld [vmem:[%s14268_s1 + $0x4c8] sm:$0xff] }
 0x195   :  { %2285 = vmatmul.mubr.bf16.vlgmr.msra.gmra.mrb[0].mxu0 %v513_v26  ;;  %v546_v26 = vrot.slane %v13026_v17, %v12260_v13 }
 0x196   :  { %2293 = vmatpush1.bf16.xpose.msra.mxu0 %v10622_v29  ;;  %2324 = vmatprep.mubr.bf16.mxu0 %v537_v30  ;;  %v145_v30 = vld [vmem:[%s14268_s1 + $0x2e0] sm:$0xff] }
 0x197   :  { %2294 = vmatprep.subr.bf16.mxu0 %v10687_v31  ;;  %4776 = vmatmul.mubr.bf16.vlgmr.msra.gmra.mrb[0].mxu1 %v3097_v22  ;;  %v554_v29 = vcombine.high %v546_v26, %v546_v26  ;;  %v177_v31 = vld [vmem:[%s14268_s1 + $0x3e0] sm:$0xff]  ;;  %v10891_v22 = vcombine.high %v10735_v15, %v10767_v16 }
 0x198   :  { %4784 = vmatpush1.bf16.xpose.msra.mxu1 %v10884_v23  ;;  %4815 = vmatprep.mubr.bf16.mxu1 %v3096_v24  ;;  %v10693_v38 = vcombine.high %v145_v30, %v177_v31  ;;  %v10692_v47 = vcombine.low %v145_v30, %v177_v31  ;;  %v10799_v23 = vld [vmem:[%s14268_s1 + $0x6c8] sm:$0xff] }
 0x199   :  { %4785 = vmatprep.subr.bf16.mxu1 %v10949_v27  ;;  %v576_v37 = vrot.slane %v554_v29, %v12260_v13  ;;  %v10831_v24 = vld [vmem:[%s14268_s1 + $0x7c8] sm:$0xff]  ;;  %v3124_v27 = vrot.slane %v3108_v57, %v12260_v13  ;;  %v3148_v29 = vcombine.high %v3138_v6, %v3138_v6 }
 0x19a   :  { %v10955_v31 = vcombine.high %v10799_v23, %v10831_v24  ;;  %v29_v57 = vld [vmem:[%s14270_s3 + $0x8] sm:$0xff] }
 0x19b   :  { %v586_v59 = vcombine.high %v576_v37, %v576_v37 }
 0x19e   :  { %2295 = vmatpush1.bf16.xpose.msra.mxu0 %v10686_v42  ;;  %v82_v42 = vld [vmem:[%s14268_s1 + $0xe8] sm:$0xff] }
 0x19f   :  { %2332 = vmatprep.subr.bf16.mxu0 %v10625_v45  ;;  %v10886_v45 = vcombine.low %v10733_v32, %v10765_v33  ;;  %v10631_v49 = vcombine.high %v82_v42, %v114_v43  ;;  %v10630_v58 = vcombine.low %v82_v42, %v114_v43  ;;  %v3101_v33 = vcombine.high %v13072_v50, %v13072_v50 }
 0x1a0   :  { %4786 = vmatpush1.bf16.xpose.msra.mxu1 %v10948_v35  ;;  %v180_v35 = vld [vmem:[%s14268_s1 + $0x3f8] sm:$0xff] }
 0x1a1   :  { %4823 = vmatprep.subr.bf16.mxu1 %v10887_v39  ;;  %v10954_v39 = vcombine.low %v10799_v23, %v10831_v24  ;;  %v3115_v40 = vrot.slane %v3101_v33, %v12260_v13  ;;  %v10772_v33 = vld [vmem:[%s14268_s1 + $0x5f0] sm:$0xff] }
 0x1a5   :  { %2325 = vmatmul.mubr.bf16.vlgmr.msra.gmra.mrb[0].mxu0 %v535_v51  ;;  %v146_v51 = vld [vmem:[%s14268_s1 + $0x2e8] sm:$0xff] }
 0x1a6   :  { %2333 = vmatpush1.bf16.xpose.msra.mxu0 %v10624_v53  ;;  %2364 = vmatprep.mubr.bf16.mxu0 %v534_v54  ;;  %v10734_v53 = vld [vmem:[%s14268_s1 + $0x4c0] sm:$0xff]  ;;  %v10695_v60 = vcombine.high %v146_v51, %v178_v52  ;;  %v10694_v7 = vcombine.low %v146_v51, %v178_v52 }
 0x1a7   :  { %2334 = vmatprep.subr.bf16.mxu0 %v10689_v55  ;;  %4816 = vmatmul.mubr.bf16.vlgmr.msra.gmra.mrb[0].mxu1 %v3082_v44  ;;  %v10766_v54 = vld [vmem:[%s14268_s1 + $0x5c0] sm:$0xff]  ;;  %v562_v55 = vrot.slane %v546_v26, %v12260_v13  ;;  %v116_v26 = vld [vmem:[%s14268_s1 + $0x1f8] sm:$0xff] }
 0x1a8   :  { %4824 = vmatpush1.bf16.xpose.msra.mxu1 %v10886_v45  ;;  %4855 = vmatprep.mubr.bf16.mxu1 %v3100_v46  ;;  %v10889_v61 = vcombine.high %v10734_v53, %v10766_v54  ;;  %v10888_v5 = vcombine.low %v10734_v53, %v10766_v54  ;;  %v3117_v45 = vcombine.high %v3115_v40, %v3115_v40  ;;  %v10800_v46 = vld [vmem:[%s14268_s1 + $0x6d0] sm:$0xff]  ;;  %v10737_v53 = vld [vmem:[%s14268_s1 + $0x4d8] sm:$0xff] }
 0x1a9   :  { %4825 = vmatprep.subr.bf16.mxu1 %v10951_v48  ;;  %v584_v17 = vcombine.high %v562_v55, %v562_v55  ;;  %v3146_v48 = vcombine.high %v3124_v27, %v3124_v27  ;;  %v10769_v54 = vld [vmem:[%s14268_s1 + $0x5d8] sm:$0xff] }
 0x1aa   :  { %v3145_v50 = vrot.slane %v3117_v45, %v12260_v13  ;;  %v10773_v45 = vld [vmem:[%s14268_s1 + $0x5f8] sm:$0xff] }
 0x1ae   :  { %2335 = vmatpush1.bf16.xpose.msra.mxu0 %v10688_v0  ;;  %v10798_v0 = vld [vmem:[%s14268_s1 + $0x6c0] sm:$0xff] }
 0x1af   :  { %2372 = vmatprep.subr.bf16.mxu0 %v10627_v2  ;;  %v83_v2 = vld [vmem:[%s14268_s1 + $0xf0] sm:$0xff]  ;;  %v10953_v9 = vcombine.high %v10798_v0, %v10830_v1  ;;  %v10952_v18 = vcombine.low %v10798_v0, %v10830_v1  ;;  %v10801_v1 = vld [vmem:[%s14268_s1 + $0x6d8] sm:$0xff] }
 0x1b0   :  { %4826 = vmatpush1.bf16.xpose.msra.mxu1 %v10950_v56  ;;  %v10633_v10 = vcombine.high %v83_v2, %v115_v3  ;;  %v10632_v19 = vcombine.low %v83_v2, %v115_v3  ;;  %v28_v56 = vld [vmem:[%s14270_s3] sm:$0xff]  ;;  %v10833_v2 = vld [vmem:[%s14268_s1 + $0x7d8] sm:$0xff]  ;;  %v3131_v3 = vrot.slane %v3115_v40, %v12260_v13 }
 0x1b1   :  { %4863 = vmatprep.subr.bf16.mxu1 %v10889_v61  ;;  %v11598_v61 = vpack.c.bf16 %v29_v57, %v28_v56  ;;  %v11009_v56 = vld [vmem:[%s14268_s1 + $0x900] sm:$0xff] }
 0x1b5   :  { %2365 = vmatmul.mubr.bf16.vlgmr.msra.gmra.mrb[0].mxu0 %v520_v8  ;;  %v553_v8 = vrot.slane %v539_v63, %v12260_v13  ;;  %v31_v63 = vld [vmem:[%s14270_s3 + $0x18] sm:$0xff] }
 0x1b6   :  { %2373 = vmatpush1.bf16.xpose.msra.mxu0 %v10626_v11  ;;  %2404 = vmatprep.mubr.bf16.mxu0 %v538_v12  ;;  %v147_v12 = vld [vmem:[%s14268_s1 + $0x2f0] sm:$0xff]  ;;  %v11601_v0 = vpack.c.bf16 %v31_v63, %v30_v62  ;;  %v10969_v62 = vld [vmem:[%s14267_s0 + $0x80] sm:$0xff] }
 0x1b7   :  { %2374 = vmatprep.subr.bf16.mxu0 %v10691_v14  ;;  %4856 = vmatmul.mubr.bf16.vlgmr.msra.gmra.mrb[0].mxu1 %v3098_v4  ;;  %v555_v11 = vcombine.high %v553_v8, %v553_v8  ;;  %v179_v14 = vld [vmem:[%s14268_s1 + $0x3f0] sm:$0xff]  ;;  %v10894_v4 = vcombine.low %v10737_v53, %v10769_v54  ;;  %v5418_v63 = vrot.slane %v10969_v62, %v12260_v13 }
 0x1b8   :  { %4864 = vmatpush1.bf16.xpose.msra.mxu1 %v10888_v5  ;;  %4895 = vmatprep.mubr.bf16.mxu1 %v3138_v6  ;;  %v10697_v21 = vcombine.high %v147_v12, %v179_v14  ;;  %v10696_v30 = vcombine.low %v147_v12, %v179_v14  ;;  %v3149_v5 = vcombine.high %v3145_v50, %v3145_v50 }
 0x1b9   :  { %4865 = vmatprep.subr.bf16.mxu1 %v10953_v9  ;;  %v583_v20 = vrot.slane %v555_v11, %v12260_v13  ;;  %v10959_v6 = vcombine.high %v10801_v1, %v10833_v2  ;;  %v10770_v9 = vld [vmem:[%s14268_s1 + $0x5e0] sm:$0xff] }
 0x1bb   :  { %v587_v42 = vcombine.high %v583_v20, %v583_v20 }
 0x1be   :  { %2375 = vmatpush1.bf16.xpose.msra.mxu0 %v10690_v25  ;;  %v84_v25 = vld [vmem:[%s14268_s1 + $0xf8] sm:$0xff] }
 0x1bf   :  { %2412 = vmatprep.subr.bf16.mxu0 %v10629_v28  ;;  %v10890_v28 = vcombine.low %v10735_v15, %v10767_v16  ;;  %v10635_v32 = vcombine.high %v84_v25, %v116_v26  ;;  %v10634_v41 = vcombine.low %v84_v25, %v116_v26  ;;  %v10802_v15 = vld [vmem:[%s14268_s1 + $0x6e0] sm:$0xff]  ;;  %v10803_v25 = vld [vmem:[%s14268_s1 + $0x6e8] sm:$0xff] }
 0x1c0   :  { %4866 = vmatpush1.bf16.xpose.msra.mxu1 %v10952_v18  ;;  %v10834_v16 = vld [vmem:[%s14268_s1 + $0x7e0] sm:$0xff]  ;;  %v10835_v26 = vld [vmem:[%s14268_s1 + $0x7e8] sm:$0xff] }
 0x1c1   :  { %4903 = vmatprep.subr.bf16.mxu1 %v10891_v22  ;;  %v10771_v22 = vld [vmem:[%s14268_s1 + $0x5e8] sm:$0xff]  ;;  %v10960_v23 = vcombine.low %v10802_v15, %v10834_v16 }
 0x1c5   :  { %2405 = vmatmul.mubr.bf16.vlgmr.msra.gmra.mrb[0].mxu0 %v536_v34  ;;  %v148_v34 = vld [vmem:[%s14268_s1 + $0x2f8] sm:$0xff] }
 0x1c6   :  { %2413 = vmatpush1.bf16.xpose.msra.mxu0 %v10628_v36  ;;  %2444 = vmatprep.mubr.bf16.mxu0 %v576_v37  ;;  %v10736_v36 = vld [vmem:[%s14268_s1 + $0x4d0] sm:$0xff]  ;;  %v10699_v43 = vcombine.high %v148_v34, %v180_v35  ;;  %v10698_v51 = vcombine.low %v148_v34, %v180_v35  ;;  %v10962_v34 = vcombine.low %v10803_v25, %v10835_v26 }
 0x1c7   :  { %2414 = vmatprep.subr.bf16.mxu0 %v10693_v38  ;;  %4896 = vmatmul.mubr.bf16.vlgmr.msra.gmra.mrb[0].mxu1 %v3124_v27  ;;  %v10768_v37 = vld [vmem:[%s14268_s1 + $0x5d0] sm:$0xff]  ;;  %v569_v38 = vrot.slane %v553_v8, %v12260_v13  ;;  %v10738_v8 = vld [vmem:[%s14268_s1 + $0x4e0] sm:$0xff] }
 0x1c8   :  { %4904 = vmatpush1.bf16.xpose.msra.mxu1 %v10890_v28  ;;  %4935 = vmatprep.mubr.bf16.mxu1 %v3148_v29  ;;  %v10893_v44 = vcombine.high %v10736_v36, %v10768_v37  ;;  %v10897_v12 = vcombine.high %v10738_v8, %v10770_v9  ;;  %v10896_v18 = vcombine.low %v10738_v8, %v10770_v9 }
 0x1c9   :  { %4905 = vmatprep.subr.bf16.mxu1 %v10955_v31 }
 0x1ce   :  { %2415 = vmatpush1.bf16.xpose.msra.mxu0 %v10692_v47  ;;  %v10832_v47 = vld [vmem:[%s14268_s1 + $0x7d0] sm:$0xff] }
 0x1cf   :  { %2452 = vmatprep.subr.bf16.mxu0 %v10631_v49  ;;  %v10892_v49 = vcombine.low %v10736_v36, %v10768_v37  ;;  %v10957_v52 = vcombine.high %v10800_v46, %v10832_v47 }
 0x1d0   :  { %4906 = vmatpush1.bf16.xpose.msra.mxu1 %v10954_v39  ;;  %v10836_v39 = vld [vmem:[%s14268_s1 + $0x7f0] sm:$0xff] }
 0x1d1   :  { %4943 = vmatprep.subr.bf16.mxu1 %v10893_v44  ;;  %v10741_v44 = vld [vmem:[%s14268_s1 + $0x4f8] sm:$0xff] }
 0x1d5   :  { %2445 = vmatmul.mubr.bf16.vlgmr.msra.gmra.mrb[0].mxu0 %v562_v55  ;;  %v12201_v55 = vmov 0.0|0.0  }
 0x1d6   :  { %2453 = vmatpush1.bf16.xpose.msra.mxu0 %v10630_v58  ;;  %2484 = vmatprep.mubr.bf16.mxu0 %v586_v59  ;;  %v585_v58 = vcombine.high %v569_v38, %v569_v38  ;;  %v10956_v59 = vcombine.low %v10800_v46, %v10832_v47  ;;  %v10903_v47 = vcombine.high %v10741_v44, %v10773_v45 }
 0x1d7   :  { %2454 = vmatprep.subr.bf16.mxu0 %v10695_v60  ;;  %4936 = vmatmul.mubr.bf16.vlgmr.msra.gmra.mrb[0].mxu1 %v3146_v48  ;;  %v10895_v60 = vcombine.high %v10737_v53, %v10769_v54  ;;  %v10805_v48 = vld [vmem:[%s14268_s1 + $0x6f8] sm:$0xff]  ;;  %v10977_v54 = vld [vmem:[%s14268_s1 + $0x800] sm:$0xff] }
 0x1d8   :  { %4944 = vmatpush1.bf16.xpose.msra.mxu1 %v10892_v49  ;;  %4975 = vmatprep.mubr.bf16.mxu1 %v3145_v50  ;;  %v10837_v49 = vld [vmem:[%s14268_s1 + $0x7f8] sm:$0xff] }
 0x1d9   :  { %4945 = vmatprep.subr.bf16.mxu1 %v10957_v52  ;;  %v10967_v52 = vcombine.high %v10805_v48, %v10837_v49  ;;  %v10966_v53 = vcombine.low %v10805_v48, %v10837_v49 }
 0x1de   :  { %2455 = vmatpush1.bf16.xpose.msra.mxu0 %v10694_v7  ;;  %v10709_v7 = vld [vmem:[%s14267_s0 + $0x78] sm:$0xff] }
 0x1df   :  { %2492 = vmatprep.subr.bf16.mxu0 %v10633_v10  ;;  %v10958_v10 = vcombine.low %v10801_v1, %v10833_v2  ;;  %v3157_v11 = vrot.slane %v10709_v7, %v12260_v13  ;;  %v3150_v31 = vcombine.high %v10709_v7, %v10709_v7  ;;  %v10571_v1 = vld [vmem:[%s14269_s2] ss:$0 sm:$0xff] }
 0x1e0   :  { %4946 = vmatpush1.bf16.xpose.msra.mxu1 %v10956_v59  ;;  %v11107_v59 = vcombine.low %v10977_v54, %v11009_v56  ;;  %v11041_v2 = vld [vmem:[%s14268_s1 + $0xa00] sm:$0xff] }
 0x1e1   :  { %4983 = vmatprep.subr.bf16.mxu1 %v10895_v60  ;;  %v3165_v14 = vcombine.high %v3157_v11, %v3157_v11  ;;  %v3173_v27 = vrot.slane %v3157_v11, %v12260_v13  ;;  %v3164_v35 = vrot.slane %v3150_v31, %v12260_v13  ;;  %v10978_v11 = vld [vmem:[%s14268_s1 + $0x808] sm:$0xff] }
 0x1e3   :  { %v3166_v37 = vcombine.high %v3164_v35, %v3164_v35  ;;  %v3195_v40 = vcombine.high %v3173_v27, %v3173_v27  ;;  %v3180_v50 = vrot.slane %v3164_v35, %v12260_v13  ;;  %v10980_v35 = vld [vmem:[%s14268_s1 + $0x818] sm:$0xff] }
 0x1e5   :  { %2485 = vmatmul.mubr.bf16.vlgmr.msra.gmra.mrb[0].mxu0 %v584_v17  ;;  %v3147_v17 = vcombine.high %v3131_v3, %v3131_v3  ;;  %v3196_v60 = vcombine.high %v3180_v50, %v3180_v50 }
 0x1e6   :  { %2493 = vmatpush1.bf16.xpose.msra.mxu0 %v10632_v19  ;;  %2524 = vmatprep.mubr.bf16.mxu0 %v583_v20  ;;  %v3187_v19 = vrot.slane %v3165_v14, %v12260_v13  ;;  %v10961_v20 = vcombine.high %v10802_v15, %v10834_v16  ;;  %v11042_v16 = vld [vmem:[%s14268_s1 + $0xa08] sm:$0xff] }
 0x1e7   :  { %2494 = vmatprep.subr.bf16.mxu0 %v10697_v21  ;;  %4976 = vmatmul.mubr.bf16.vlgmr.msra.gmra.mrb[0].mxu1 %v3131_v3  ;;  %v10739_v21 = vld [vmem:[%s14268_s1 + $0x4e8] sm:$0xff]  ;;  %v11073_v3 = vld [vmem:[%s14268_s1 + $0xb00] sm:$0xff] }
 0x1e8   :  { %4984 = vmatpush1.bf16.xpose.msra.mxu1 %v10894_v4  ;;  %5015 = vmatprep.mubr.bf16.mxu1 %v3149_v5  ;;  %v10899_v24 = vcombine.high %v10739_v21, %v10771_v22  ;;  %v10898_v28 = vcombine.low %v10739_v21, %v10771_v22  ;;  %v3197_v29 = vcombine.high %v3187_v19, %v3187_v19 }
 0x1e9   :  { %4985 = vmatprep.subr.bf16.mxu1 %v10959_v6  ;;  %v11172_v8 = vcombine.high %v11041_v2, %v11073_v3  ;;  %v11171_v14 = vcombine.low %v11041_v2, %v11073_v3  ;;  %v5411_v22 = vcombine.high %v10969_v62, %v10969_v62 }
 0x1ee   :  { %2495 = vmatpush1.bf16.xpose.msra.mxu0 %v10696_v30  ;;  %v10963_v30 = vcombine.high %v10803_v25, %v10835_v26  ;;  %v5425_v26 = vrot.slane %v5411_v22, %v12260_v13 }
 0x1ef   :  { %2532 = vmatprep.subr.bf16.mxu0 %v10635_v32  ;;  %v10740_v32 = vld [vmem:[%s14268_s1 + $0x4f0] sm:$0xff] }
 0x1f0   :  { %4986 = vmatpush1.bf16.xpose.msra.mxu1 %v10958_v10  ;;  %v10901_v36 = vcombine.high %v10740_v32, %v10772_v33 }
 0x1f1   :  { %5023 = vmatprep.subr.bf16.mxu1 %v10897_v12  ;;  %v11010_v12 = vld [vmem:[%s14268_s1 + $0x908] sm:$0xff] }
 0x1f2   :  { %v11110_v15 = vcombine.high %v10978_v11, %v11010_v12 }
 0x1f5   :  { %2525 = vmatmul.mubr.bf16.vlgmr.msra.gmra.mrb[0].mxu0 %v569_v38  ;;  %v10804_v38 = vld [vmem:[%s14268_s1 + $0x6f0] sm:$0xff] }
 0x1f6   :  { %2533 = vmatpush1.bf16.xpose.msra.mxu0 %v10634_v41  ;;  %2564 = vmatprep.mubr.bf16.mxu0 %v587_v42  ;;  %v10900_v41 = vcombine.low %v10740_v32, %v10772_v33  ;;  %v3194_v42 = vrot.slane %v3166_v37, %v12260_v13  ;;  %v10964_v46 = vcombine.low %v10804_v38, %v10836_v39 }
 0x1f7   :  { %2534 = vmatprep.subr.bf16.mxu0 %v10699_v43  ;;  %5016 = vmatmul.mubr.bf16.vlgmr.msra.gmra.mrb[0].mxu1 %v3147_v17  ;;  %v10965_v43 = vcombine.high %v10804_v38, %v10836_v39  ;;  %v11074_v17 = vld [vmem:[%s14268_s1 + $0xb08] sm:$0xff]  ;;  %v11044_v39 = vld [vmem:[%s14268_s1 + $0xa18] sm:$0xff] }
 0x1f8   :  { %5024 = vmatpush1.bf16.xpose.msra.mxu1 %v10896_v18  ;;  %5055 = vmatprep.mubr.bf16.mxu1 %v3187_v19  ;;  %v3198_v57 = vcombine.high %v3194_v42, %v3194_v42  ;;  %v5434_v18 = vrot.slane %v5418_v63, %v12260_v13  ;;  %v11109_v19 = vcombine.low %v10978_v11, %v11010_v12  ;;  %v11015_v11 = vld [vmem:[%s14268_s1 + $0x930] sm:$0xff]  ;;  %v10839_v12 = vld [vmem:[%s14269_s2 + $0x1] ss:$0 sm:$0xff] }
 0x1f9   :  { %5025 = vmatprep.subr.bf16.mxu1 %v10961_v20  ;;  %v11174_v21 = vcombine.high %v11042_v16, %v11074_v17  ;;  %v11173_v25 = vcombine.low %v11042_v16, %v11074_v17  ;;  %v35_v16 = vld [vmem:[%s14270_s3 + $0x38] sm:$0xff] }
 0x1fa   :  { %v5456_v31 = vcombine.high %v5434_v18, %v5434_v18 }
 0x1fe   :  { %2535 = vmatpush1.bf16.xpose.msra.mxu0 %v10698_v51  ;;  %v10902_v51 = vcombine.low %v10741_v44, %v10773_v45  ;;  %v10970_v45 = vld [vmem:[%s14267_s0 + $0x88] sm:$0xff] }
 0x1ff   :  { %11597 = vmatprep.subr.bf16.mxu0 %v12201_v55  ;;  %v5467_v49 = vrot.slane %v10970_v45, %v12260_v13 }
 0x200   :  { %5026 = vmatpush1.bf16.xpose.msra.mxu1 %v10960_v23  ;;  %v10979_v23 = vld [vmem:[%s14268_s1 + $0x810] sm:$0xff] }
 0x201   :  { %5063 = vmatprep.subr.bf16.mxu1 %v10899_v24  ;;  %v11011_v24 = vld [vmem:[%s14268_s1 + $0x910] sm:$0xff]  ;;  %v5483_v2 = vrot.slane %v5467_v49, %v12260_v13 }
 0x202   :  { %v11111_v32 = vcombine.low %v10979_v23, %v11011_v24 }
 0x205   :  { %2565 = vmatmul.mubr.bf16.vlgmr.msra.gmra.mrb[0].mxu0 %v585_v58  ;;  %v11108_v58 = vcombine.high %v10977_v54, %v11009_v56 }
 0x206   :  { %11599 = vmatpush3.bf16.msra.mxu0 %v11598_v61  ;;  %v12203_v61 = vmov 0.0  }
 0x207   :  { %11600 = vmatprep.subr.bf16.mxu0 %v12201_v55  ;;  %5056 = vmatmul.mubr.bf16.vlgmr.msra.gmra.mrb[0].mxu1 %v3173_v27  ;;  %v11112_v27 = vcombine.high %v10979_v23, %v11011_v24 }
 0x208   :  { %5064 = vmatpush1.bf16.xpose.msra.mxu1 %v10898_v28  ;;  %5095 = vmatprep.mubr.bf16.mxu1 %v3197_v29  ;;  %v5427_v28 = vcombine.high %v5425_v26, %v5425_v26  ;;  %v11043_v29 = vld [vmem:[%s14268_s1 + $0xa10] sm:$0xff] }
 0x209   :  { %5065 = vmatprep.subr.bf16.mxu1 %v10963_v30  ;;  %11542 = vmatprep.mubr.msk.f32.mxu0 %vm12202_vm0, %v12203_v61  ;;  %v11075_v30 = vld [vmem:[%s14268_s1 + $0xb10] sm:$0xff] }
 0x20a   :  { %11602 = vmatpush3.bf16.msra.mxu0 %v11601_v0  ;;  %v5426_v0 = vcombine.high %v5418_v63, %v5418_v63  ;;  %v5455_v33 = vrot.slane %v5427_v28, %v12260_v13  ;;  %v11175_v37 = vcombine.low %v11043_v29, %v11075_v30  ;;  %v5505_v28 = vcombine.high %v5483_v2, %v5483_v2 }
 0x20b   :  { %6507 = vmatprep.subr.bf16.mxu0 %v11108_v58 }
 0x20c   :  { %v5448_v5 = vrot.slane %v5426_v0, %v12260_v13  ;;  %v11046_v0 = vld [vmem:[%s14268_s1 + $0xa28] sm:$0xff] }
 0x20e   :  { %v5458_v20 = vcombine.high %v5448_v5, %v5448_v5 }
 0x210   :  { %5066 = vmatpush1.bf16.xpose.msra.mxu1 %v10962_v34  ;;  %v11176_v34 = vcombine.high %v11043_v29, %v11075_v30 }
 0x211   :  { %5103 = vmatprep.subr.bf16.mxu1 %v10901_v36  ;;  %v11012_v36 = vld [vmem:[%s14268_s1 + $0x918] sm:$0xff] }
 0x212   :  { %v11114_v38 = vcombine.high %v10980_v35, %v11012_v36 }
 0x217   :  { %5096 = vmatmul.mubr.bf16.vlgmr.msra.gmra.mrb[0].mxu1 %v3195_v40  ;;  %v11076_v40 = vld [vmem:[%s14268_s1 + $0xb18] sm:$0xff] }
 0x218   :  { %5104 = vmatpush1.bf16.xpose.msra.mxu1 %v10900_v41  ;;  %5135 = vmatprep.mubr.bf16.mxu1 %v3194_v42  ;;  %v5441_v41 = vrot.slane %v5425_v26, %v12260_v13  ;;  %v11113_v42 = vcombine.low %v10980_v35, %v11012_v36  ;;  %v11178_v44 = vcombine.high %v11044_v39, %v11076_v40  ;;  %v11047_v26 = vld [vmem:[%s14268_s1 + $0xa30] sm:$0xff]  ;;  %v11048_v36 = vld [vmem:[%s14268_s1 + $0xa38] sm:$0xff] }
 0x219   :  { %5105 = vmatprep.subr.bf16.mxu1 %v10965_v43  ;;  %v5459_v43 = vcombine.high %v5455_v33, %v5455_v33  ;;  %v11177_v48 = vcombine.low %v11044_v39, %v11076_v40 }
 0x21a   :  { %v5457_v54 = vcombine.high %v5441_v41, %v5441_v41 }
 0x220   :  { %5106 = vmatpush1.bf16.xpose.msra.mxu1 %v10964_v46  ;;  %v10981_v46 = vld [vmem:[%s14268_s1 + $0x820] sm:$0xff] }
 0x221   :  { %5143 = vmatprep.subr.bf16.mxu1 %v10903_v47  ;;  %v11013_v47 = vld [vmem:[%s14268_s1 + $0x920] sm:$0xff] }
 0x222   :  { %v11115_v56 = vcombine.low %v10981_v46, %v11013_v47 }
 0x227   :  { %5136 = vmatmul.mubr.bf16.vlgmr.msra.gmra.mrb[0].mxu1 %v3180_v50  ;;  %v11116_v50 = vcombine.high %v10981_v46, %v11013_v47 }
 0x228   :  { %5144 = vmatpush1.bf16.xpose.msra.mxu1 %v10902_v51  ;;  %5175 = vmatprep.mubr.bf16.mxu1 %v3198_v57  ;;  %v5475_v51 = vcombine.high %v5467_v49, %v5467_v49  ;;  %v11049_v49 = vld [vmem:[%s14268_s1 + $0xa40] sm:$0xff] }
 0x229   :  { %5145 = vmatprep.subr.bf16.mxu1 %v10967_v52  ;;  %v11045_v52 = vld [vmem:[%s14268_s1 + $0xa20] sm:$0xff] }
 0x22a   :  { %v5497_v57 = vrot.slane %v5475_v51, %v12260_v13 }
 0x230   :  { %5146 = vmatpush1.bf16.xpose.msra.mxu1 %v10966_v53  ;;  %v11077_v53 = vld [vmem:[%s14268_s1 + $0xb20] sm:$0xff] }
 0x231   :  { %11603 = vmatprep.subr.bf16.mxu1 %v12201_v55  ;;  %v11180_v58 = vcombine.high %v11045_v52, %v11077_v53  ;;  %v11179_v62 = vcombine.low %v11045_v52, %v11077_v53 }
 0x237   :  { %5176 = vmatmul.mubr.bf16.vlgmr.msra.gmra.mrb[0].mxu1 %v3196_v60  ;;  %v11014_v60 = vld [vmem:[%s14268_s1 + $0x928] sm:$0xff] }
 0x238   :  { %11553 = vmatprep.mubr.msk.f32.mxu1 %vm12202_vm0, %v12203_v61 }
 0x2d8   :  { %v2566_v4 = vpop.f32.mrb[0].mxu0 }
 0x2d9   :  { %v11633_v6 = vadd.f32 %v10571_v1, %v2566_v4  ;;  %v2568_v7 = vpop.f32.mrb[1].mxu0  ;;  %v11078_v1 = vld [vmem:[%s14268_s1 + $0xb28] sm:$0xff]  ;;  %v5507_v4 = vcombine.high %v5497_v57, %v5497_v57 }
 0x2da   :  { %v2569_v9 = vpop.f32.mrb[2].mxu0  ;;  %v33_v7 = vld [vmem:[%s14270_s3 + $0x28] sm:$0xff]  ;;  %v11181_v17 = vcombine.low %v11046_v0, %v11078_v1 }
 0x2db   :  { %v2570_v10 = vpop.f32.mrb[3].mxu0  ;;  %11543 = vmatmul.mubr.msk.f32.vlgmr.msra.gmra.mrb[4].mxu0 %vm2572_vm1, %v11633_v6  ;;  %v32_v6 = vld [vmem:[%s14270_s3 + $0x20] sm:$0xff] }
 0x2dc   :  { %6508 = vmatpush1.bf16.xpose.msra.mxu0 %v11107_v59  ;;  %6539 = vmatprep.mubr.bf16.mxu0 %v5448_v5  ;;  %v10982_v59 = vld [vmem:[%s14268_s1 + $0x828] sm:$0xff]  ;;  %v11182_v5 = vcombine.high %v11046_v0, %v11078_v1  ;;  %v11604_v9 = vpack.c.bf16 %v33_v7, %v32_v6  ;;  %v10983_v10 = vld [vmem:[%s14268_s1 + $0x830] sm:$0xff] }
 0x2dd   :  { %6509 = vmatprep.subr.bf16.mxu0 %v11172_v8  ;;  %v11118_v63 = vcombine.high %v10982_v59, %v11014_v60  ;;  %v11117_v3 = vcombine.low %v10982_v59, %v11014_v60  ;;  %v5460_v8 = vcombine.high %v10970_v45, %v10970_v45  ;;  %v11119_v29 = vcombine.low %v10983_v10, %v11015_v11  ;;  %v11050_v60 = vld [vmem:[%s14268_s1 + $0xa48] sm:$0xff] }
 0x2de   :  { %11605 = vmatpush3.bf16.msra.mxu1 %v11604_v9 }
 0x2df   :  { %11606 = vmatprep.subr.bf16.mxu1 %v12201_v55 }
 0x2e4   :  { %6510 = vmatpush1.bf16.xpose.msra.mxu0 %v11171_v14 }
 0x2e5   :  { %6547 = vmatprep.subr.bf16.mxu0 %v11110_v15  ;;  %v34_v15 = vld [vmem:[%s14270_s3 + $0x30] sm:$0xff] }
 0x2eb   :  { %6540 = vmatmul.mubr.bf16.vlgmr.msra.gmra.mrb[8].mxu0 %v5434_v18  ;;  %v5474_v18 = vrot.slane %v5460_v8, %v12260_v13 }
 0x2ec   :  { %6548 = vmatpush1.bf16.xpose.msra.mxu0 %v11109_v19  ;;  %6579 = vmatprep.mubr.bf16.mxu0 %v5458_v20  ;;  %v11607_v20 = vpack.c.bf16 %v35_v16, %v34_v15 }
 0x2ed   :  { %6549 = vmatprep.subr.bf16.mxu0 %v11174_v21  ;;  %v11120_v21 = vcombine.high %v10983_v10, %v11015_v11  ;;  %v11051_v10 = vld [vmem:[%s14268_s1 + $0xa50] sm:$0xff] }
 0x2ee   :  { %11608 = vmatpush3.bf16.msra.mxu1 %v11607_v20  ;;  %v11083_v11 = vld [vmem:[%s14268_s1 + $0xb50] sm:$0xff] }
 0x2ef   :  { %11609 = vmatprep.subr.bf16.mxu1 %v12201_v55  ;;  %v11192_v16 = vcombine.high %v11051_v10, %v11083_v11 }
 0x2f4   :  { %6550 = vmatpush1.bf16.xpose.msra.mxu0 %v11173_v25  ;;  %v5476_v25 = vcombine.high %v5474_v18, %v5474_v18 }
 0x2f5   :  { %6587 = vmatprep.subr.bf16.mxu0 %v11112_v27  ;;  %v11079_v27 = vld [vmem:[%s14268_s1 + $0xb30] sm:$0xff] }
 0x2f6   :  { %v5504_v30 = vrot.slane %v5476_v25, %v12260_v13 }
 0x2f8   :  { %v5508_v40 = vcombine.high %v5504_v30, %v5504_v30 }
 0x2fb   :  { %6580 = vmatmul.mubr.bf16.vlgmr.msra.gmra.mrb[8].mxu0 %v5456_v31  ;;  %v11184_v31 = vcombine.high %v11047_v26, %v11079_v27 }
 0x2fc   :  { %6588 = vmatpush1.bf16.xpose.msra.mxu0 %v11111_v32  ;;  %6619 = vmatprep.mubr.bf16.mxu0 %v5455_v33  ;;  %v10984_v32 = vld [vmem:[%s14268_s1 + $0x838] sm:$0xff] }
 0x2fd   :  { %6589 = vmatprep.subr.bf16.mxu0 %v11176_v34  ;;  %v11016_v33 = vld [vmem:[%s14268_s1 + $0x938] sm:$0xff]  ;;  %v11183_v34 = vcombine.low %v11047_v26, %v11079_v27 }
 0x2fe   :  { %v11122_v35 = vcombine.high %v10984_v32, %v11016_v33  ;;  %v11121_v39 = vcombine.low %v10984_v32, %v11016_v33  ;;  %v10972_v27 = vld [vmem:[%s14267_s0 + $0x98] sm:$0xff] }
 0x304   :  { %6590 = vmatpush1.bf16.xpose.msra.mxu0 %v11175_v37  ;;  %v11080_v37 = vld [vmem:[%s14268_s1 + $0xb38] sm:$0xff] }
 0x305   :  { %6627 = vmatprep.subr.bf16.mxu0 %v11114_v38  ;;  %v5490_v38 = vrot.slane %v5474_v18, %v12260_v13  ;;  %v11185_v45 = vcombine.low %v11048_v36, %v11080_v37  ;;  %v11020_v18 = vld [vmem:[%s14268_s1 + $0x958] sm:$0xff] }
 0x307   :  { %v5506_v51 = vcombine.high %v5490_v38, %v5490_v38 }
 0x30a   :  { %v5177_v14 = vpop.f32.mrb[0].mxu1 }
 0x30b   :  { %6620 = vmatmul.mubr.bf16.vlgmr.msra.gmra.mrb[8].mxu0 %v5441_v41  ;;  %v5179_v19 = vpop.f32.mrb[1].mxu1  ;;  %v11636_v22 = vadd.f32 %v10839_v12, %v5177_v14  ;;  %v11186_v41 = vcombine.high %v11048_v36, %v11080_v37 }
 0x30c   :  { %6628 = vmatpush1.bf16.xpose.msra.mxu0 %v11113_v42  ;;  %6659 = vmatprep.mubr.bf16.mxu0 %v5459_v43  ;;  %v5180_v23 = vpop.f32.mrb[2].mxu1  ;;  %v10971_v42 = vld [vmem:[%s14267_s0 + $0x90] sm:$0xff]  ;;  %v10985_v43 = vld [vmem:[%s14268_s1 + $0x840] sm:$0xff]  ;;  %v11191_v19 = vcombine.low %v11051_v10, %v11083_v11 }
 0x30d   :  { %6629 = vmatprep.subr.bf16.mxu0 %v11178_v44  ;;  %v5181_v24 = vpop.f32.mrb[3].mxu1  ;;  %11554 = vmatmul.mubr.msk.f32.vlgmr.msra.gmra.mrb[4].mxu1 %vm2572_vm1, %v11636_v22  ;;  %v11017_v44 = vld [vmem:[%s14268_s1 + $0x940] sm:$0xff]  ;;  %v5516_v46 = vrot.slane %v10971_v42, %v12260_v13  ;;  %v11084_v22 = vld [vmem:[%s14268_s1 + $0xb58] sm:$0xff] }
 0x30e   :  { %11564 = vmatprep.mubr.msk.f32.mxu1 %vm12202_vm0, %v12203_v61  ;;  %v11124_v47 = vcombine.high %v10985_v43, %v11017_v44  ;;  %v11123_v52 = vcombine.low %v10985_v43, %v11017_v44  ;;  %v11054_v44 = vld [vmem:[%s14268_s1 + $0xa68] sm:$0xff] }
 0x314   :  { %6630 = vmatpush1.bf16.xpose.msra.mxu0 %v11177_v48  ;;  %v5524_v48 = vcombine.high %v5516_v46, %v5516_v46 }
 0x315   :  { %6667 = vmatprep.subr.bf16.mxu0 %v11116_v50  ;;  %v11081_v50 = vld [vmem:[%s14268_s1 + $0xb40] sm:$0xff] }
 0x316   :  { %v5546_v53 = vrot.slane %v5524_v48, %v12260_v13 }
 0x318   :  { %v5556_v1 = vcombine.high %v5546_v53, %v5546_v53 }
 0x31b   :  { %6660 = vmatmul.mubr.bf16.vlgmr.msra.gmra.mrb[8].mxu0 %v5457_v54  ;;  %v11188_v54 = vcombine.high %v11049_v49, %v11081_v50 }
 0x31c   :  { %6668 = vmatpush1.bf16.xpose.msra.mxu0 %v11115_v56  ;;  %6699 = vmatprep.mubr.bf16.mxu0 %v5497_v57  ;;  %v10986_v56 = vld [vmem:[%s14268_s1 + $0x848] sm:$0xff] }
 0x31d   :  { %6669 = vmatprep.subr.bf16.mxu0 %v11180_v58  ;;  %v11018_v57 = vld [vmem:[%s14268_s1 + $0x948] sm:$0xff]  ;;  %v11187_v58 = vcombine.low %v11049_v49, %v11081_v50  ;;  %v5558_v50 = vcombine.high %v10972_v27, %v10972_v27 }
 0x31e   :  { %v11126_v59 = vcombine.high %v10986_v56, %v11018_v57  ;;  %v11125_v0 = vcombine.low %v10986_v56, %v11018_v57 }
 0x31f   :  { %v5572_v57 = vrot.slane %v5558_v50, %v12260_v13  ;;  %v10996_v50 = vld [vmem:[%s14268_s1 + $0x898] sm:$0xff] }
 0x324   :  { %6670 = vmatpush1.bf16.xpose.msra.mxu0 %v11179_v62  ;;  %v11082_v62 = vld [vmem:[%s14268_s1 + $0xb48] sm:$0xff] }
 0x325   :  { %6707 = vmatprep.subr.bf16.mxu0 %v11118_v63  ;;  %v5532_v63 = vrot.slane %v5516_v46, %v12260_v13  ;;  %v11189_v6 = vcombine.low %v11050_v60, %v11082_v62 }
 0x327   :  { %v5554_v12 = vcombine.high %v5532_v63, %v5532_v63 }
 0x32b   :  { %6700 = vmatmul.mubr.bf16.vlgmr.msra.gmra.mrb[8].mxu0 %v5483_v2  ;;  %v11190_v2 = vcombine.high %v11050_v60, %v11082_v62  ;;  %v11055_v60 = vld [vmem:[%s14268_s1 + $0xa70] sm:$0xff] }
 0x32c   :  { %6708 = vmatpush1.bf16.xpose.msra.mxu0 %v11117_v3  ;;  %6739 = vmatprep.mubr.bf16.mxu0 %v5507_v4  ;;  %v5509_v3 = vcombine.high %v10971_v42, %v10971_v42  ;;  %v10987_v4 = vld [vmem:[%s14268_s1 + $0x850] sm:$0xff] }
 0x32d   :  { %6709 = vmatprep.subr.bf16.mxu0 %v11182_v5  ;;  %v11019_v5 = vld [vmem:[%s14268_s1 + $0x950] sm:$0xff] }
 0x32e   :  { %v5523_v7 = vrot.slane %v5509_v3, %v12260_v13  ;;  %v11128_v8 = vcombine.high %v10987_v4, %v11019_v5  ;;  %v11127_v14 = vcombine.low %v10987_v4, %v11019_v5  ;;  %v11087_v62 = vld [vmem:[%s14268_s1 + $0xb70] sm:$0xff]  ;;  %v10992_v3 = vld [vmem:[%s14268_s1 + $0x878] sm:$0xff] }
 0x32f   :  { %v11024_v4 = vld [vmem:[%s14268_s1 + $0x978] sm:$0xff]  ;;  %v11199_v5 = vcombine.low %v11055_v60, %v11087_v62 }
 0x330   :  { %v5525_v9 = vcombine.high %v5523_v7, %v5523_v7  ;;  %v5539_v23 = vrot.slane %v5523_v7, %v12260_v13  ;;  %v11056_v7 = vld [vmem:[%s14268_s1 + $0xa78] sm:$0xff]  ;;  %v11137_v10 = vcombine.low %v10992_v3, %v11024_v4 }
 0x332   :  { %v5553_v15 = vrot.slane %v5525_v9, %v12260_v13  ;;  %v5555_v36 = vcombine.high %v5539_v23, %v5539_v23  ;;  %v5588_v9 = vrot.slane %v5572_v57, %v12260_v13 }
 0x334   :  { %6710 = vmatpush1.bf16.xpose.msra.mxu0 %v11181_v17  ;;  %v10988_v17 = vld [vmem:[%s14268_s1 + $0x858] sm:$0xff]  ;;  %v5557_v25 = vcombine.high %v5553_v15, %v5553_v15 }
 0x335   :  { %6747 = vmatprep.subr.bf16.mxu0 %v11120_v21  ;;  %v11130_v20 = vcombine.high %v10988_v17, %v11020_v18  ;;  %v11052_v21 = vld [vmem:[%s14268_s1 + $0xa58] sm:$0xff]  ;;  %v11129_v24 = vcombine.low %v10988_v17, %v11020_v18 }
 0x336   :  { %v11194_v26 = vcombine.high %v11052_v21, %v11084_v22 }
 0x33b   :  { %6740 = vmatmul.mubr.bf16.vlgmr.msra.gmra.mrb[8].mxu0 %v5505_v28  ;;  %v10989_v28 = vld [vmem:[%s14268_s1 + $0x860] sm:$0xff] }
 0x33c   :  { %6748 = vmatpush1.bf16.xpose.msra.mxu0 %v11119_v29  ;;  %6779 = vmatprep.mubr.bf16.mxu0 %v5504_v30  ;;  %v11021_v29 = vld [vmem:[%s14268_s1 + $0x960] sm:$0xff]  ;;  %v11193_v30 = vcombine.low %v11052_v21, %v11084_v22 }
 0x33d   :  { %6749 = vmatprep.subr.bf16.mxu0 %v11184_v31  ;;  %v5565_v31 = vrot.slane %v10972_v27, %v12260_v13  ;;  %v11132_v32 = vcombine.high %v10989_v28, %v11021_v29  ;;  %v11131_v37 = vcombine.low %v10989_v28, %v11021_v29  ;;  %v11057_v21 = vld [vmem:[%s14268_s1 + $0xa80] sm:$0xff]  ;;  %v10994_v27 = vld [vmem:[%s14268_s1 + $0x888] sm:$0xff] }
 0x33e   :  { %v11089_v22 = vld [vmem:[%s14268_s1 + $0xb80] sm:$0xff]  ;;  %v11026_v28 = vld [vmem:[%s14268_s1 + $0x988] sm:$0xff] }
 0x33f   :  { %v5573_v33 = vcombine.high %v5565_v31, %v5565_v31  ;;  %v5581_v46 = vrot.slane %v5565_v31, %v12260_v13  ;;  %v11203_v29 = vcombine.low %v11057_v21, %v11089_v22  ;;  %v11058_v31 = vld [vmem:[%s14268_s1 + $0xa88] sm:$0xff] }
 0x344   :  { %6750 = vmatpush1.bf16.xpose.msra.mxu0 %v11183_v34  ;;  %v11053_v34 = vld [vmem:[%s14268_s1 + $0xa60] sm:$0xff] }
 0x345   :  { %6787 = vmatprep.subr.bf16.mxu0 %v11122_v35  ;;  %v11085_v35 = vld [vmem:[%s14268_s1 + $0xb60] sm:$0xff] }
 0x346   :  { %v11195_v42 = vcombine.low %v11053_v34, %v11085_v35 }
 0x34b   :  { %6780 = vmatmul.mubr.bf16.vlgmr.msra.gmra.mrb[8].mxu0 %v5490_v38  ;;  %v5595_v38 = vrot.slane %v5573_v33, %v12260_v13 }
 0x34c   :  { %6788 = vmatpush1.bf16.xpose.msra.mxu0 %v11121_v39  ;;  %6819 = vmatprep.mubr.bf16.mxu0 %v5508_v40  ;;  %v11196_v39 = vcombine.high %v11053_v34, %v11085_v35  ;;  %v10990_v40 = vld [vmem:[%s14268_s1 + $0x868] sm:$0xff]  ;;  %v11141_v34 = vcombine.low %v10994_v27, %v11026_v28 }
 0x34d   :  { %6789 = vmatprep.subr.bf16.mxu0 %v11186_v41  ;;  %v11022_v41 = vld [vmem:[%s14268_s1 + $0x968] sm:$0xff]  ;;  %v5605_v48 = vcombine.high %v5595_v38, %v5595_v38 }
 0x34e   :  { %v11134_v43 = vcombine.high %v10990_v40, %v11022_v41 }
 0x354   :  { %6790 = vmatpush1.bf16.xpose.msra.mxu0 %v11185_v45  ;;  %v11086_v45 = vld [vmem:[%s14268_s1 + $0xb68] sm:$0xff] }
 0x355   :  { %6827 = vmatprep.subr.bf16.mxu0 %v11124_v47  ;;  %v11133_v47 = vcombine.low %v10990_v40, %v11022_v41  ;;  %v11198_v49 = vcombine.high %v11054_v44, %v11086_v45  ;;  %v11197_v56 = vcombine.low %v11054_v44, %v11086_v45  ;;  %v11059_v44 = vld [vmem:[%s14268_s1 + $0xa90] sm:$0xff] }
 0x356   :  { %v11091_v45 = vld [vmem:[%s14268_s1 + $0xb90] sm:$0xff] }
 0x35b   :  { %6820 = vmatmul.mubr.bf16.vlgmr.msra.gmra.mrb[8].mxu0 %v5506_v51 }
 0x35c   :  { %6828 = vmatpush1.bf16.xpose.msra.mxu0 %v11123_v52  ;;  %6859 = vmatprep.mubr.bf16.mxu0 %v5546_v53  ;;  %v10991_v52 = vld [vmem:[%s14268_s1 + $0x870] sm:$0xff] }
 0x35d   :  { %6829 = vmatprep.subr.bf16.mxu0 %v11188_v54  ;;  %v11023_v53 = vld [vmem:[%s14268_s1 + $0x970] sm:$0xff] }
 0x364   :  { %6830 = vmatpush1.bf16.xpose.msra.mxu0 %v11187_v58  ;;  %v11136_v58 = vcombine.high %v10991_v52, %v11023_v53 }
 0x365   :  { %6867 = vmatprep.subr.bf16.mxu0 %v11126_v59  ;;  %v5574_v59 = vcombine.high %v5572_v57, %v5572_v57  ;;  %v11092_v57 = vld [vmem:[%s14268_s1 + $0xb98] sm:$0xff] }
 0x36b   :  { %6860 = vmatmul.mubr.bf16.vlgmr.msra.gmra.mrb[8].mxu0 %v5532_v63  ;;  %v5603_v63 = vcombine.high %v5581_v46, %v5581_v46 }
 0x36c   :  { %6868 = vmatpush1.bf16.xpose.msra.mxu0 %v11125_v0  ;;  %6899 = vmatprep.mubr.bf16.mxu0 %v5556_v1  ;;  %v11135_v0 = vcombine.low %v10991_v52, %v11023_v53  ;;  %v5602_v1 = vrot.slane %v5574_v59, %v12260_v13  ;;  %v11028_v52 = vld [vmem:[%s14268_s1 + $0x998] sm:$0xff]  ;;  %v11207_v53 = vcombine.low %v11059_v44, %v11091_v45 }
 0x36d   :  { %6869 = vmatprep.subr.bf16.mxu0 %v11190_v2  ;;  %v11200_v2 = vcombine.high %v11055_v60, %v11087_v62  ;;  %v11145_v59 = vcombine.low %v10996_v50, %v11028_v52 }
 0x36e   :  { %v5606_v11 = vcombine.high %v5602_v1, %v5602_v1 }
 0x374   :  { %6870 = vmatpush1.bf16.xpose.msra.mxu0 %v11189_v6  ;;  %v11138_v6 = vcombine.high %v10992_v3, %v11024_v4 }
 0x375   :  { %6907 = vmatprep.subr.bf16.mxu0 %v11128_v8  ;;  %v11088_v8 = vld [vmem:[%s14268_s1 + $0xb78] sm:$0xff] }
 0x376   :  { %v11201_v17 = vcombine.low %v11056_v7, %v11088_v8 }
 0x37b   :  { %6900 = vmatmul.mubr.bf16.vlgmr.msra.gmra.mrb[8].mxu0 %v5554_v12  ;;  %v11202_v12 = vcombine.high %v11056_v7, %v11088_v8  ;;  %v11093_v7 = vld [vmem:[%s14268_s1 + $0xba0] sm:$0xff] }
 0x37c   :  { %6908 = vmatpush1.bf16.xpose.msra.mxu0 %v11127_v14  ;;  %6939 = vmatprep.mubr.bf16.mxu0 %v5553_v15  ;;  %v10973_v14 = vld [vmem:[%s14267_s0 + $0xa0] sm:$0xff] }
 0x37d   :  { %6909 = vmatprep.subr.bf16.mxu0 %v11192_v16  ;;  %v10993_v15 = vld [vmem:[%s14268_s1 + $0x880] sm:$0xff]  ;;  %v5614_v18 = vrot.slane %v10973_v14, %v12260_v13 }
 0x37e   :  { %v11025_v16 = vld [vmem:[%s14268_s1 + $0x980] sm:$0xff] }
 0x37f   :  { %v5630_v33 = vrot.slane %v5614_v18, %v12260_v13 }
 0x384   :  { %6910 = vmatpush1.bf16.xpose.msra.mxu0 %v11191_v19  ;;  %v11140_v19 = vcombine.high %v10993_v15, %v11025_v16 }
 0x385   :  { %6947 = vmatprep.subr.bf16.mxu0 %v11130_v20  ;;  %v5622_v20 = vcombine.high %v5614_v18, %v5614_v18  ;;  %v11094_v18 = vld [vmem:[%s14268_s1 + $0xba8] sm:$0xff] }
 0x38b   :  { %6940 = vmatmul.mubr.bf16.vlgmr.msra.gmra.mrb[8].mxu0 %v5539_v23  ;;  %v5604_v23 = vcombine.high %v5588_v9, %v5588_v9 }
 0x38c   :  { %6948 = vmatpush1.bf16.xpose.msra.mxu0 %v11129_v24  ;;  %6979 = vmatprep.mubr.bf16.mxu0 %v5557_v25  ;;  %v11139_v24 = vcombine.low %v10993_v15, %v11025_v16  ;;  %v5644_v25 = vrot.slane %v5622_v20, %v12260_v13 }
 0x38d   :  { %6949 = vmatprep.subr.bf16.mxu0 %v11194_v26  ;;  %v11204_v26 = vcombine.high %v11057_v21, %v11089_v22 }
 0x38e   :  { %v5654_v35 = vcombine.high %v5644_v25, %v5644_v25 }
 0x394   :  { %6950 = vmatpush1.bf16.xpose.msra.mxu0 %v11193_v30  ;;  %v11142_v30 = vcombine.high %v10994_v27, %v11026_v28 }
 0x395   :  { %6987 = vmatprep.subr.bf16.mxu0 %v11132_v32  ;;  %v11090_v32 = vld [vmem:[%s14268_s1 + $0xb88] sm:$0xff] }
 0x396   :  { %v11205_v40 = vcombine.low %v11058_v31, %v11090_v32 }
 0x39b   :  { %6980 = vmatmul.mubr.bf16.vlgmr.msra.gmra.mrb[8].mxu0 %v5555_v36  ;;  %v11206_v36 = vcombine.high %v11058_v31, %v11090_v32  ;;  %v11095_v31 = vld [vmem:[%s14268_s1 + $0xbb0] sm:$0xff] }
 0x39c   :  { %6988 = vmatpush1.bf16.xpose.msra.mxu0 %v11131_v37  ;;  %7019 = vmatprep.mubr.bf16.mxu0 %v5595_v38  ;;  %v5607_v37 = vcombine.high %v10973_v14, %v10973_v14  ;;  %v10995_v38 = vld [vmem:[%s14268_s1 + $0x890] sm:$0xff]  ;;  %v11030_v14 = vld [vmem:[%s14268_s1 + $0x9a8] sm:$0xff] }
 0x39d   :  { %6989 = vmatprep.subr.bf16.mxu0 %v11196_v39  ;;  %v11027_v39 = vld [vmem:[%s14268_s1 + $0x990] sm:$0xff] }
 0x39e   :  { %v5621_v41 = vrot.slane %v5607_v37, %v12260_v13  ;;  %v11032_v37 = vld [vmem:[%s14268_s1 + $0x9b8] sm:$0xff] }
 0x3a4   :  { %6990 = vmatpush1.bf16.xpose.msra.mxu0 %v11195_v42  ;;  %v11144_v42 = vcombine.high %v10995_v38, %v11027_v39 }
 0x3a5   :  { %7027 = vmatprep.subr.bf16.mxu0 %v11134_v43  ;;  %v5623_v43 = vcombine.high %v5621_v41, %v5621_v41 }
 0x3ab   :  { %7020 = vmatmul.mubr.bf16.vlgmr.msra.gmra.mrb[8].mxu0 %v5581_v46  ;;  %v5652_v46 = vcombine.high %v5630_v33, %v5630_v33 }
 0x3ac   :  { %7028 = vmatpush1.bf16.xpose.msra.mxu0 %v11133_v47  ;;  %7059 = vmatprep.mubr.bf16.mxu0 %v5605_v48  ;;  %v11143_v47 = vcombine.low %v10995_v38, %v11027_v39  ;;  %v5651_v48 = vrot.slane %v5623_v43, %v12260_v13 }
 0x3ad   :  { %7029 = vmatprep.subr.bf16.mxu0 %v11198_v49  ;;  %v11208_v49 = vcombine.high %v11059_v44, %v11091_v45 }
 0x3ae   :  { %v13468_v51 = vpop.f32.mrb[4].mxu0  ;;  %v5655_v60 = vcombine.high %v5651_v48, %v5651_v48 }
 0x3af   :  { %v11544_v54 = vpop.f32.mrb[5].mxu0 }
 0x3b0   :  { %v11146_v54 = vcombine.high %v10996_v50, %v11028_v52 }
 0x3b4   :  { %7030 = vmatpush1.bf16.xpose.msra.mxu0 %v11197_v56  ;;  %v11060_v56 = vld [vmem:[%s14268_s1 + $0xa98] sm:$0xff] }
 0x3b5   :  { %7067 = vmatprep.subr.bf16.mxu0 %v11136_v58  ;;  %v5637_v58 = vrot.slane %v5621_v41, %v12260_v13  ;;  %v11210_v62 = vcombine.high %v11060_v56, %v11092_v57  ;;  %v11096_v41 = vld [vmem:[%s14268_s1 + $0xbb8] sm:$0xff] }
 0x3b7   :  { %v5653_v8 = vcombine.high %v5637_v58, %v5637_v58 }
 0x3bb   :  { %7060 = vmatmul.mubr.bf16.vlgmr.msra.gmra.mrb[8].mxu0 %v5603_v63  ;;  %v10974_v63 = vld [vmem:[%s14267_s0 + $0xa8] sm:$0xff] }
 0x3bc   :  { %7068 = vmatpush1.bf16.xpose.msra.mxu0 %v11135_v0  ;;  %7099 = vmatprep.mubr.bf16.mxu0 %v5602_v1  ;;  %v10997_v0 = vld [vmem:[%s14268_s1 + $0x8a0] sm:$0xff]  ;;  %v5663_v3 = vrot.slane %v10974_v63, %v12260_v13 }
 0x3bd   :  { %7069 = vmatprep.subr.bf16.mxu0 %v11200_v2  ;;  %v11029_v1 = vld [vmem:[%s14268_s1 + $0x9a0] sm:$0xff]  ;;  %v11209_v2 = vcombine.low %v11060_v56, %v11092_v57 }
 0x3be   :  { %v11148_v4 = vcombine.high %v10997_v0, %v11029_v1  ;;  %v11097_v56 = vld [vmem:[%s14268_s1 + $0xbc0] sm:$0xff] }
 0x3c4   :  { %7070 = vmatpush1.bf16.xpose.msra.mxu0 %v11199_v5  ;;  %v5671_v5 = vcombine.high %v5663_v3, %v5663_v3 }
 0x3c5   :  { %7107 = vmatprep.subr.bf16.mxu0 %v11138_v6  ;;  %v11061_v6 = vld [vmem:[%s14268_s1 + $0xaa0] sm:$0xff] }
 0x3c6   :  { %v11211_v15 = vcombine.low %v11061_v6, %v11093_v7 }
 0x3cb   :  { %7100 = vmatmul.mubr.bf16.vlgmr.msra.gmra.mrb[8].mxu0 %v5588_v9  ;;  %v11147_v9 = vcombine.low %v10997_v0, %v11029_v1  ;;  %v38_v0 = vld [vmem:[%s14270_s3 + $0x50] sm:$0xff] }
 0x3cc   :  { %7108 = vmatpush1.bf16.xpose.msra.mxu0 %v11137_v10  ;;  %7139 = vmatprep.mubr.bf16.mxu0 %v5606_v11  ;;  %v5693_v10 = vrot.slane %v5671_v5, %v12260_v13  ;;  %v11212_v11 = vcombine.high %v11061_v6, %v11093_v7 }
 0x3cd   :  { %7109 = vmatprep.subr.bf16.mxu0 %v11202_v12  ;;  %v10998_v12 = vld [vmem:[%s14268_s1 + $0x8a8] sm:$0xff] }
 0x3ce   :  { %v11150_v16 = vcombine.high %v10998_v12, %v11030_v14  ;;  %v11149_v20 = vcombine.low %v10998_v12, %v11030_v14  ;;  %v5703_v21 = vcombine.high %v5693_v10, %v5693_v10 }
 0x3d4   :  { %7110 = vmatpush1.bf16.xpose.msra.mxu0 %v11201_v17  ;;  %v11062_v17 = vld [vmem:[%s14268_s1 + $0xaa8] sm:$0xff] }
 0x3d5   :  { %7147 = vmatprep.subr.bf16.mxu0 %v11140_v19  ;;  %v5679_v19 = vrot.slane %v5663_v3, %v12260_v13  ;;  %v11214_v22 = vcombine.high %v11062_v17, %v11094_v18  ;;  %v11002_v3 = vld [vmem:[%s14268_s1 + $0x8c8] sm:$0xff] }
 0x3d7   :  { %v5701_v32 = vcombine.high %v5679_v19, %v5679_v19 }
 0x3db   :  { %7140 = vmatmul.mubr.bf16.vlgmr.msra.gmra.mrb[8].mxu0 %v5604_v23  ;;  %v5656_v23 = vcombine.high %v10974_v63, %v10974_v63  ;;  %v37_v63 = vld [vmem:[%s14270_s3 + $0x48] sm:$0xff] }
 0x3dc   :  { %7148 = vmatpush1.bf16.xpose.msra.mxu0 %v11139_v24  ;;  %7179 = vmatprep.mubr.bf16.mxu0 %v5644_v25  ;;  %v10999_v24 = vld [vmem:[%s14268_s1 + $0x8b0] sm:$0xff] }
 0x3dd   :  { %7149 = vmatprep.subr.bf16.mxu0 %v11204_v26  ;;  %v11031_v25 = vld [vmem:[%s14268_s1 + $0x9b0] sm:$0xff]  ;;  %v11213_v26 = vcombine.low %v11062_v17, %v11094_v18  ;;  %v5670_v27 = vrot.slane %v5656_v23, %v12260_v13 }
 0x3de   :  { %v11152_v28 = vcombine.high %v10999_v24, %v11031_v25  ;;  %v11035_v17 = vld [vmem:[%s14268_s1 + $0x9d0] sm:$0xff] }
 0x3df   :  { %v11099_v23 = vld [vmem:[%s14268_s1 + $0xbd0] sm:$0xff] }
 0x3e4   :  { %7150 = vmatpush1.bf16.xpose.msra.mxu0 %v11203_v29  ;;  %v5672_v29 = vcombine.high %v5670_v27, %v5670_v27 }
 0x3e5   :  { %7187 = vmatprep.subr.bf16.mxu0 %v11142_v30  ;;  %v11063_v30 = vld [vmem:[%s14268_s1 + $0xab0] sm:$0xff] }
 0x3e6   :  { %v11215_v38 = vcombine.low %v11063_v30, %v11095_v31 }
 0x3eb   :  { %7180 = vmatmul.mubr.bf16.vlgmr.msra.gmra.mrb[8].mxu0 %v5630_v33  ;;  %v11151_v33 = vcombine.low %v10999_v24, %v11031_v25 }
 0x3ec   :  { %7188 = vmatpush1.bf16.xpose.msra.mxu0 %v11141_v34  ;;  %7219 = vmatprep.mubr.bf16.mxu0 %v5654_v35  ;;  %v5700_v34 = vrot.slane %v5672_v29, %v12260_v13  ;;  %v11216_v35 = vcombine.high %v11063_v30, %v11095_v31  ;;  %v11036_v29 = vld [vmem:[%s14268_s1 + $0x9d8] sm:$0xff] }
 0x3ed   :  { %7189 = vmatprep.subr.bf16.mxu0 %v11206_v36  ;;  %v11000_v36 = vld [vmem:[%s14268_s1 + $0x8b8] sm:$0xff] }
 0x3ee   :  { %v11154_v39 = vcombine.high %v11000_v36, %v11032_v37  ;;  %v11153_v43 = vcombine.low %v11000_v36, %v11032_v37  ;;  %v5704_v44 = vcombine.high %v5700_v34, %v5700_v34 }
 0x3f4   :  { %7190 = vmatpush1.bf16.xpose.msra.mxu0 %v11205_v40  ;;  %v11064_v40 = vld [vmem:[%s14268_s1 + $0xab8] sm:$0xff] }
 0x3f5   :  { %7227 = vmatprep.subr.bf16.mxu0 %v11144_v42  ;;  %v5686_v42 = vrot.slane %v5670_v27, %v12260_v13  ;;  %v11218_v45 = vcombine.high %v11064_v40, %v11096_v41 }
 0x3f7   :  { %v5702_v57 = vcombine.high %v5686_v42, %v5686_v42 }
 0x3fb   :  { %7220 = vmatmul.mubr.bf16.vlgmr.msra.gmra.mrb[8].mxu0 %v5652_v46  ;;  %v10975_v46 = vld [vmem:[%s14267_s0 + $0xb0] sm:$0xff] }
 0x3fc   :  { %7228 = vmatpush1.bf16.xpose.msra.mxu0 %v11143_v47  ;;  %7259 = vmatprep.mubr.bf16.mxu0 %v5651_v48  ;;  %v11001_v47 = vld [vmem:[%s14268_s1 + $0x8c0] sm:$0xff]  ;;  %v5712_v50 = vrot.slane %v10975_v46, %v12260_v13 }
 0x3fd   :  { %7229 = vmatprep.subr.bf16.mxu0 %v11208_v49  ;;  %v11033_v48 = vld [vmem:[%s14268_s1 + $0x9c0] sm:$0xff]  ;;  %v11217_v49 = vcombine.low %v11064_v40, %v11096_v41 }
 0x3fe   :  { %v11156_v52 = vcombine.high %v11001_v47, %v11033_v48  ;;  %v11037_v40 = vld [vmem:[%s14268_s1 + $0x9e0] sm:$0xff] }
 0x404   :  { %7230 = vmatpush1.bf16.xpose.msra.mxu0 %v11207_v53  ;;  %v5720_v53 = vcombine.high %v5712_v50, %v5712_v50 }
 0x405   :  { %7267 = vmatprep.subr.bf16.mxu0 %v11146_v54  ;;  %v11065_v54 = vld [vmem:[%s14268_s1 + $0xac0] sm:$0xff] }
 0x406   :  { %v11219_v6 = vcombine.low %v11065_v54, %v11097_v56 }
 0x40b   :  { %7260 = vmatmul.mubr.bf16.vlgmr.msra.gmra.mrb[8].mxu0 %v5637_v58  ;;  %v11155_v58 = vcombine.low %v11001_v47, %v11033_v48 }
 0x40c   :  { %7268 = vmatpush1.bf16.xpose.msra.mxu0 %v11145_v59  ;;  %7299 = vmatprep.mubr.bf16.mxu0 %v5655_v60  ;;  %v5742_v59 = vrot.slane %v5720_v53, %v12260_v13  ;;  %v11220_v60 = vcombine.high %v11065_v54, %v11097_v56  ;;  %v11038_v53 = vld [vmem:[%s14268_s1 + $0x9e8] sm:$0xff] }
 0x40d   :  { %7269 = vmatprep.subr.bf16.mxu0 %v11210_v62  ;;  %v36_v62 = vld [vmem:[%s14270_s3 + $0x40] sm:$0xff] }
 0x40e   :  { %v11610_v1 = vpack.c.bf16 %v37_v63, %v36_v62  ;;  %v5752_v12 = vcombine.high %v5742_v59, %v5742_v59 }
 0x410   :  { %11611 = vmatpush3.bf16.msra.mxu1 %v11610_v1  ;;  %v11007_v1 = vld [vmem:[%s14268_s1 + $0x8f0] sm:$0xff] }
 0x411   :  { %11612 = vmatprep.subr.bf16.mxu1 %v12201_v55 }
 0x414   :  { %7270 = vmatpush1.bf16.xpose.msra.mxu0 %v11209_v2  ;;  %v39_v2 = vld [vmem:[%s14270_s3 + $0x58] sm:$0xff] }
 0x415   :  { %7307 = vmatprep.subr.bf16.mxu0 %v11148_v4  ;;  %v11034_v4 = vld [vmem:[%s14268_s1 + $0x9c8] sm:$0xff]  ;;  %v11613_v5 = vpack.c.bf16 %v39_v2, %v38_v0  ;;  %v11039_v2 = vld [vmem:[%s14268_s1 + $0x9f0] sm:$0xff] }
 0x416   :  { %v11158_v7 = vcombine.high %v11002_v3, %v11034_v4 }
 0x417   :  { %11614 = vmatpush3.bf16.msra.mxu1 %v11613_v5  ;;  %v11168_v5 = vcombine.high %v11007_v1, %v11039_v2 }
 0x41b   :  { %7300 = vmatmul.mubr.bf16.vlgmr.msra.gmra.mrb[8].mxu0 %v5653_v8  ;;  %v11066_v8 = vld [vmem:[%s14268_s1 + $0xac8] sm:$0xff] }
 0x41c   :  { %7308 = vmatpush1.bf16.xpose.msra.mxu0 %v11147_v9  ;;  %7339 = vmatprep.mubr.bf16.mxu0 %v5693_v10  ;;  %v11098_v9 = vld [vmem:[%s14268_s1 + $0xbc8] sm:$0xff]  ;;  %v5728_v10 = vrot.slane %v5712_v50, %v12260_v13 }
 0x41d   :  { %7309 = vmatprep.subr.bf16.mxu0 %v11212_v11  ;;  %v11157_v11 = vcombine.low %v11002_v3, %v11034_v4  ;;  %v11222_v14 = vcombine.high %v11066_v8, %v11098_v9  ;;  %v11221_v18 = vcombine.low %v11066_v8, %v11098_v9  ;;  %v11103_v8 = vld [vmem:[%s14268_s1 + $0xbf0] sm:$0xff] }
 0x41e   :  { %v5750_v24 = vcombine.high %v5728_v10, %v5728_v10 }
 0x424   :  { %7310 = vmatpush1.bf16.xpose.msra.mxu0 %v11211_v15  ;;  %v5705_v15 = vcombine.high %v10975_v46, %v10975_v46  ;;  %v11101_v46 = vld [vmem:[%s14268_s1 + $0xbe0] sm:$0xff] }
 0x425   :  { %7347 = vmatprep.subr.bf16.mxu0 %v11150_v16  ;;  %v11003_v16 = vld [vmem:[%s14268_s1 + $0x8d0] sm:$0xff] }
 0x426   :  { %v11159_v25 = vcombine.low %v11003_v16, %v11035_v17 }
 0x42b   :  { %7340 = vmatmul.mubr.bf16.vlgmr.msra.gmra.mrb[8].mxu0 %v5679_v19  ;;  %v5719_v19 = vrot.slane %v5705_v15, %v12260_v13  ;;  %v11040_v15 = vld [vmem:[%s14268_s1 + $0x9f8] sm:$0xff] }
 0x42c   :  { %7348 = vmatpush1.bf16.xpose.msra.mxu0 %v11149_v20  ;;  %7379 = vmatprep.mubr.bf16.mxu0 %v5703_v21  ;;  %v11160_v20 = vcombine.high %v11003_v16, %v11035_v17 }
 0x42d   :  { %7349 = vmatprep.subr.bf16.mxu0 %v11214_v22  ;;  %v5721_v21 = vcombine.high %v5719_v19, %v5719_v19  ;;  %v11067_v22 = vld [vmem:[%s14268_s1 + $0xad0] sm:$0xff] }
 0x42e   :  { %v11224_v27 = vcombine.high %v11067_v22, %v11099_v23  ;;  %v11223_v30 = vcombine.low %v11067_v22, %v11099_v23 }
 0x434   :  { %7350 = vmatpush1.bf16.xpose.msra.mxu0 %v11213_v26  ;;  %v5749_v26 = vrot.slane %v5721_v21, %v12260_v13 }
 0x435   :  { %7387 = vmatprep.subr.bf16.mxu0 %v11152_v28  ;;  %v11004_v28 = vld [vmem:[%s14268_s1 + $0x8d8] sm:$0xff] }
 0x436   :  { %v11162_v31 = vcombine.high %v11004_v28, %v11036_v29  ;;  %v5753_v36 = vcombine.high %v5749_v26, %v5749_v26 }
 0x43b   :  { %7380 = vmatmul.mubr.bf16.vlgmr.msra.gmra.mrb[8].mxu0 %v5701_v32  ;;  %v11068_v32 = vld [vmem:[%s14268_s1 + $0xad8] sm:$0xff] }
 0x43c   :  { %7388 = vmatpush1.bf16.xpose.msra.mxu0 %v11151_v33  ;;  %7419 = vmatprep.mubr.bf16.mxu0 %v5700_v34  ;;  %v11100_v33 = vld [vmem:[%s14268_s1 + $0xbd8] sm:$0xff]  ;;  %v5735_v34 = vrot.slane %v5719_v19, %v12260_v13 }
 0x43d   :  { %7389 = vmatprep.subr.bf16.mxu0 %v11216_v35  ;;  %v11161_v35 = vcombine.low %v11004_v28, %v11036_v29  ;;  %v11226_v37 = vcombine.high %v11068_v32, %v11100_v33  ;;  %v11225_v41 = vcombine.low %v11068_v32, %v11100_v33  ;;  %v11104_v19 = vld [vmem:[%s14268_s1 + $0xbf8] sm:$0xff]  ;;  %v11106_v33 = vld [vmem:[%s14269_s2 + $0x2] ss:$0 sm:$0xff] }
 0x43e   :  { %v5751_v47 = vcombine.high %v5735_v34, %v5735_v34 }
 0x444   :  { %7390 = vmatpush1.bf16.xpose.msra.mxu0 %v11215_v38  ;;  %v10976_v38 = vld [vmem:[%s14267_s0 + $0xb8] sm:$0xff] }
 0x445   :  { %7427 = vmatprep.subr.bf16.mxu0 %v11154_v39  ;;  %v11005_v39 = vld [vmem:[%s14268_s1 + $0x8e0] sm:$0xff]  ;;  %v5754_v0 = vcombine.high %v10976_v38, %v10976_v38 }
 0x446   :  { %v11163_v48 = vcombine.low %v11005_v39, %v11037_v40 }
 0x447   :  { %v5768_v4 = vrot.slane %v5754_v0, %v12260_v13  ;;  %v11342_v0 = vld [vmem:[%s14268_s1 + $0xf10] sm:$0xff] }
 0x44b   :  { %7420 = vmatmul.mubr.bf16.vlgmr.msra.gmra.mrb[8].mxu0 %v5686_v42  ;;  %v5761_v42 = vrot.slane %v10976_v38, %v12260_v13 }
 0x44c   :  { %7428 = vmatpush1.bf16.xpose.msra.mxu0 %v11153_v43  ;;  %7459 = vmatprep.mubr.bf16.mxu0 %v5704_v44  ;;  %v11164_v43 = vcombine.high %v11005_v39, %v11037_v40 }
 0x44d   :  { %7429 = vmatprep.subr.bf16.mxu0 %v11218_v45  ;;  %v5769_v44 = vcombine.high %v5761_v42, %v5761_v42  ;;  %v11069_v45 = vld [vmem:[%s14268_s1 + $0xae0] sm:$0xff] }
 0x44e   :  { %v11228_v50 = vcombine.high %v11069_v45, %v11101_v46  ;;  %v11227_v54 = vcombine.low %v11069_v45, %v11101_v46 }
 0x454   :  { %7430 = vmatpush1.bf16.xpose.msra.mxu0 %v11217_v49  ;;  %v5791_v49 = vrot.slane %v5769_v44, %v12260_v13  ;;  %v11277_v44 = vld [vmem:[%s14268_s1 + $0xd08] sm:$0xff] }
 0x455   :  { %7467 = vmatprep.subr.bf16.mxu0 %v11156_v52  ;;  %v11006_v52 = vld [vmem:[%s14268_s1 + $0x8e8] sm:$0xff] }
 0x456   :  { %v11166_v56 = vcombine.high %v11006_v52, %v11038_v53  ;;  %v5801_v62 = vcombine.high %v5791_v49, %v5791_v49 }
 0x45b   :  { %7460 = vmatmul.mubr.bf16.vlgmr.msra.gmra.mrb[8].mxu0 %v5702_v57  ;;  %v11070_v57 = vld [vmem:[%s14268_s1 + $0xae8] sm:$0xff] }
 0x45c   :  { %7468 = vmatpush1.bf16.xpose.msra.mxu0 %v11155_v58  ;;  %7499 = vmatprep.mubr.bf16.mxu0 %v5742_v59  ;;  %v11102_v58 = vld [vmem:[%s14268_s1 + $0xbe8] sm:$0xff]  ;;  %v5777_v59 = vrot.slane %v5761_v42, %v12260_v13 }
 0x45d   :  { %7469 = vmatprep.subr.bf16.mxu0 %v11220_v60  ;;  %v11165_v60 = vcombine.low %v11006_v52, %v11038_v53  ;;  %v11230_v63 = vcombine.high %v11070_v57, %v11102_v58  ;;  %v11229_v3 = vcombine.low %v11070_v57, %v11102_v58  ;;  %v11278_v57 = vld [vmem:[%s14268_s1 + $0xd10] sm:$0xff] }
 0x45e   :  { %v5799_v9 = vcombine.high %v5777_v59, %v5777_v59 }
 0x464   :  { %7470 = vmatpush1.bf16.xpose.msra.mxu0 %v11219_v6  ;;  %v5770_v6 = vcombine.high %v5768_v4, %v5768_v4 }
 0x465   :  { %7507 = vmatprep.subr.bf16.mxu0 %v11158_v7  ;;  %v11071_v7 = vld [vmem:[%s14268_s1 + $0xaf0] sm:$0xff] }
 0x466   :  { %v11231_v16 = vcombine.low %v11071_v7, %v11103_v8 }
 0x46b   :  { %7500 = vmatmul.mubr.bf16.vlgmr.msra.gmra.mrb[8].mxu0 %v5728_v10  ;;  %v11167_v10 = vcombine.low %v11007_v1, %v11039_v2 }
 0x46c   :  { %7508 = vmatpush1.bf16.xpose.msra.mxu0 %v11157_v11  ;;  %7539 = vmatprep.mubr.bf16.mxu0 %v5752_v12  ;;  %v5798_v11 = vrot.slane %v5770_v6, %v12260_v13  ;;  %v11232_v12 = vcombine.high %v11071_v7, %v11103_v8  ;;  %v11279_v6 = vld [vmem:[%s14268_s1 + $0xd18] sm:$0xff] }
 0x46d   :  { %7509 = vmatprep.subr.bf16.mxu0 %v11222_v14  ;;  %v11008_v14 = vld [vmem:[%s14268_s1 + $0x8f8] sm:$0xff] }
 0x46e   :  { %v11170_v17 = vcombine.high %v11008_v14, %v11040_v15  ;;  %v11169_v21 = vcombine.low %v11008_v14, %v11040_v15  ;;  %v5802_v22 = vcombine.high %v5798_v11, %v5798_v11 }
 0x474   :  { %7510 = vmatpush1.bf16.xpose.msra.mxu0 %v11221_v18  ;;  %v11072_v18 = vld [vmem:[%s14268_s1 + $0xaf8] sm:$0xff] }
 0x475   :  { %7547 = vmatprep.subr.bf16.mxu0 %v11160_v20  ;;  %v5784_v20 = vrot.slane %v5768_v4, %v12260_v13  ;;  %v11234_v23 = vcombine.high %v11072_v18, %v11104_v19 }
 0x47b   :  { %7540 = vmatmul.mubr.bf16.vlgmr.msra.gmra.mrb[8].mxu0 %v5750_v24  ;;  %v11233_v24 = vcombine.low %v11072_v18, %v11104_v19  ;;  %v11280_v18 = vld [vmem:[%s14268_s1 + $0xd20] sm:$0xff] }
 0x47c   :  { %7548 = vmatpush1.bf16.xpose.msra.mxu0 %v11159_v25  ;;  %7579 = vmatprep.mubr.bf16.mxu0 %v5749_v26  ;;  %v5800_v25 = vcombine.high %v5784_v20, %v5784_v20  ;;  %v11244_v26 = vld [vmem:[%s14268_s1 + $0xc00] sm:$0xff] }
 0x47d   :  { %7549 = vmatprep.subr.bf16.mxu0 %v11224_v27  ;;  %v11276_v27 = vld [vmem:[%s14268_s1 + $0xd00] sm:$0xff] }
 0x47e   :  { %v11375_v28 = vcombine.high %v11244_v26, %v11276_v27  ;;  %v11374_v29 = vcombine.low %v11244_v26, %v11276_v27 }
 0x480   :  { %9111 = vmatprep.subr.bf16.mxu1 %v11375_v28 }
 0x484   :  { %7550 = vmatpush1.bf16.xpose.msra.mxu0 %v11223_v30  ;;  %v11236_v30 = vld [vmem:[%s14267_s0 + $0xc0] sm:$0xff] }
 0x485   :  { %7587 = vmatprep.subr.bf16.mxu0 %v11162_v31  ;;  %v8022_v31 = vrot.slane %v11236_v30, %v12260_v13 }
 0x487   :  { %v8030_v32 = vcombine.high %v8022_v31, %v8022_v31 }
 0x48b   :  { %7580 = vmatmul.mubr.bf16.vlgmr.msra.gmra.mrb[8].mxu0 %v5735_v34  ;;  %v11308_v34 = vld [vmem:[%s14268_s1 + $0xe00] sm:$0xff] }
 0x48c   :  { %7588 = vmatpush1.bf16.xpose.msra.mxu0 %v11161_v35  ;;  %7619 = vmatprep.mubr.bf16.mxu0 %v5753_v36  ;;  %v11340_v35 = vld [vmem:[%s14268_s1 + $0xf00] sm:$0xff] }
 0x48d   :  { %7589 = vmatprep.subr.bf16.mxu0 %v11226_v37  ;;  %v8052_v37 = vrot.slane %v8030_v32, %v12260_v13  ;;  %v11439_v40 = vcombine.high %v11308_v34, %v11340_v35  ;;  %v11438_v45 = vcombine.low %v11308_v34, %v11340_v35  ;;  %v11345_v34 = vld [vmem:[%s14268_s1 + $0xf28] sm:$0xff] }
 0x48f   :  { %v8062_v52 = vcombine.high %v8052_v37, %v8052_v37 }
 0x494   :  { %7590 = vmatpush1.bf16.xpose.msra.mxu0 %v11225_v41 }
 0x495   :  { %7627 = vmatprep.subr.bf16.mxu0 %v11164_v43  ;;  %v11245_v43 = vld [vmem:[%s14268_s1 + $0xc08] sm:$0xff] }
 0x496   :  { %v11377_v46 = vcombine.high %v11245_v43, %v11277_v44 }
 0x49b   :  { %7620 = vmatmul.mubr.bf16.vlgmr.msra.gmra.mrb[8].mxu0 %v5751_v47  ;;  %v11309_v47 = vld [vmem:[%s14268_s1 + $0xe08] sm:$0xff] }
 0x49c   :  { %7628 = vmatpush1.bf16.xpose.msra.mxu0 %v11163_v48  ;;  %7659 = vmatprep.mubr.bf16.mxu0 %v5791_v49  ;;  %v11341_v48 = vld [vmem:[%s14268_s1 + $0xf08] sm:$0xff]  ;;  %v8038_v49 = vrot.slane %v8022_v31, %v12260_v13 }
 0x49d   :  { %7629 = vmatprep.subr.bf16.mxu0 %v11228_v50  ;;  %v11376_v50 = vcombine.low %v11245_v43, %v11277_v44  ;;  %v11441_v53 = vcombine.high %v11309_v47, %v11341_v48  ;;  %v11440_v58 = vcombine.low %v11309_v47, %v11341_v48  ;;  %v11346_v47 = vld [vmem:[%s14268_s1 + $0xf30] sm:$0xff] }
 0x49e   :  { %v8060_v1 = vcombine.high %v8038_v49, %v8038_v49 }
 0x4a4   :  { %7630 = vmatpush1.bf16.xpose.msra.mxu0 %v11227_v54  ;;  %v8015_v54 = vcombine.high %v11236_v30, %v11236_v30  ;;  %v11281_v30 = vld [vmem:[%s14268_s1 + $0xd28] sm:$0xff] }
 0x4a5   :  { %7667 = vmatprep.subr.bf16.mxu0 %v11166_v56  ;;  %v11246_v56 = vld [vmem:[%s14268_s1 + $0xc10] sm:$0xff] }
 0x4a6   :  { %v11378_v2 = vcombine.low %v11246_v56, %v11278_v57 }
 0x4ab   :  { %7660 = vmatmul.mubr.bf16.vlgmr.msra.gmra.mrb[8].mxu0 %v5777_v59  ;;  %v8029_v59 = vrot.slane %v8015_v54, %v12260_v13  ;;  %v11283_v54 = vld [vmem:[%s14268_s1 + $0xd38] sm:$0xff] }
 0x4ac   :  { %7668 = vmatpush1.bf16.xpose.msra.mxu0 %v11165_v60  ;;  %7699 = vmatprep.mubr.bf16.mxu0 %v5801_v62  ;;  %v11379_v60 = vcombine.high %v11246_v56, %v11278_v57 }
 0x4ad   :  { %7669 = vmatprep.subr.bf16.mxu0 %v11230_v63  ;;  %v8031_v62 = vcombine.high %v8029_v59, %v8029_v59  ;;  %v11310_v63 = vld [vmem:[%s14268_s1 + $0xe10] sm:$0xff] }
 0x4ae   :  { %v11443_v4 = vcombine.high %v11310_v63, %v11342_v0  ;;  %v11442_v7 = vcombine.low %v11310_v63, %v11342_v0 }
 0x4b4   :  { %7670 = vmatpush1.bf16.xpose.msra.mxu0 %v11229_v3  ;;  %v8059_v3 = vrot.slane %v8031_v62, %v12260_v13 }
 0x4b5   :  { %7707 = vmatprep.subr.bf16.mxu0 %v11168_v5  ;;  %v11247_v5 = vld [vmem:[%s14268_s1 + $0xc18] sm:$0xff] }
 0x4b6   :  { %v11381_v8 = vcombine.high %v11247_v5, %v11279_v6  ;;  %v8063_v14 = vcombine.high %v8059_v3, %v8059_v3 }
 0x4bb   :  { %7700 = vmatmul.mubr.bf16.vlgmr.msra.gmra.mrb[8].mxu0 %v5799_v9  ;;  %v11311_v9 = vld [vmem:[%s14268_s1 + $0xe18] sm:$0xff] }
 0x4bc   :  { %7708 = vmatpush1.bf16.xpose.msra.mxu0 %v11167_v10  ;;  %7739 = vmatprep.mubr.bf16.mxu0 %v5798_v11  ;;  %v11343_v10 = vld [vmem:[%s14268_s1 + $0xf18] sm:$0xff]  ;;  %v8045_v11 = vrot.slane %v8029_v59, %v12260_v13 }
 0x4bd   :  { %7709 = vmatprep.subr.bf16.mxu0 %v11232_v12  ;;  %v11380_v12 = vcombine.low %v11247_v5, %v11279_v6  ;;  %v11445_v15 = vcombine.high %v11311_v9, %v11343_v10  ;;  %v11444_v19 = vcombine.low %v11311_v9, %v11343_v10  ;;  %v11347_v59 = vld [vmem:[%s14268_s1 + $0xf38] sm:$0xff]  ;;  %v11348_v9 = vld [vmem:[%s14268_s1 + $0xf40] sm:$0xff] }
 0x4c4   :  { %7710 = vmatpush1.bf16.xpose.msra.mxu0 %v11231_v16  ;;  %v11237_v16 = vld [vmem:[%s14267_s0 + $0xc8] sm:$0xff] }
 0x4c5   :  { %7747 = vmatprep.subr.bf16.mxu0 %v11170_v17  ;;  %v11248_v17 = vld [vmem:[%s14268_s1 + $0xc20] sm:$0xff] }
 0x4c6   :  { %v11382_v26 = vcombine.low %v11248_v17, %v11280_v18 }
 0x4cb   :  { %7740 = vmatmul.mubr.bf16.vlgmr.msra.gmra.mrb[8].mxu0 %v5784_v20  ;;  %v8071_v20 = vrot.slane %v11237_v16, %v12260_v13 }
 0x4cc   :  { %7748 = vmatpush1.bf16.xpose.msra.mxu0 %v11169_v21  ;;  %7779 = vmatprep.mubr.bf16.mxu0 %v5802_v22  ;;  %v11383_v21 = vcombine.high %v11248_v17, %v11280_v18 }
 0x4cd   :  { %7749 = vmatprep.subr.bf16.mxu0 %v11234_v23  ;;  %v8079_v22 = vcombine.high %v8071_v20, %v8071_v20  ;;  %v11312_v23 = vld [vmem:[%s14268_s1 + $0xe20] sm:$0xff]  ;;  %v8087_v35 = vrot.slane %v8071_v20, %v12260_v13  ;;  %v11349_v20 = vld [vmem:[%s14268_s1 + $0xf48] sm:$0xff] }
 0x4cf   :  { %v8101_v27 = vrot.slane %v8079_v22, %v12260_v13  ;;  %v8109_v48 = vcombine.high %v8087_v35, %v8087_v35 }
 0x4d4   :  { %7750 = vmatpush1.bf16.xpose.msra.mxu0 %v11233_v24  ;;  %v11344_v24 = vld [vmem:[%s14268_s1 + $0xf20] sm:$0xff] }
 0x4d5   :  { %11621 = vmatprep.subr.bf16.mxu0 %v12201_v55  ;;  %v11447_v28 = vcombine.high %v11312_v23, %v11344_v24  ;;  %v11446_v31 = vcombine.low %v11312_v23, %v11344_v24 }
 0x4db   :  { %7780 = vmatmul.mubr.bf16.vlgmr.msra.gmra.mrb[8].mxu0 %v5800_v25  ;;  %v8061_v25 = vcombine.high %v8045_v11, %v8045_v11 }
 0x4dc   :  { %11594 = vmatprep.mubr.msk.f32.mxu0 %vm12202_vm0, %v12203_v61 }
 0x5ae   :  { %v7781_v36 = vpop.f32.mrb[8].mxu0 }
 0x5af   :  { %v11637_v38 = vadd.f32 %v11106_v33, %v7781_v36  ;;  %v7783_v39 = vpop.f32.mrb[9].mxu0  ;;  %v11313_v33 = vld [vmem:[%s14268_s1 + $0xe28] sm:$0xff] }
 0x5b0   :  { %v7784_v41 = vpop.f32.mrb[10].mxu0  ;;  %v8064_v39 = vcombine.high %v11237_v16, %v11237_v16  ;;  %v11285_v16 = vld [vmem:[%s14268_s1 + $0xd48] sm:$0xff] }
 0x5b1   :  { %v7785_v42 = vpop.f32.mrb[11].mxu0  ;;  %11565 = vmatmul.mubr.msk.f32.vlgmr.msra.gmra.mrb[4].mxu1 %vm2572_vm1, %v11637_v38  ;;  %v11449_v38 = vcombine.high %v11313_v33, %v11345_v34  ;;  %v11282_v41 = vld [vmem:[%s14268_s1 + $0xd30] sm:$0xff] }
 0x5b2   :  { %9112 = vmatpush1.bf16.xpose.msra.mxu1 %v11374_v29  ;;  %9143 = vmatprep.mubr.bf16.mxu1 %v8052_v37  ;;  %v11249_v29 = vld [vmem:[%s14268_s1 + $0xc28] sm:$0xff]  ;;  %v8111_v37 = vcombine.high %v8101_v27, %v8101_v27  ;;  %v11448_v42 = vcombine.low %v11313_v33, %v11345_v34  ;;  %v8078_v43 = vrot.slane %v8064_v39, %v12260_v13  ;;  %v11350_v33 = vld [vmem:[%s14268_s1 + $0xf50] sm:$0xff]  ;;  %v11287_v39 = vld [vmem:[%s14268_s1 + $0xd58] sm:$0xff] }
 0x5b3   :  { %9113 = vmatprep.subr.bf16.mxu1 %v11439_v40  ;;  %v11385_v32 = vcombine.high %v11249_v29, %v11281_v30  ;;  %v11384_v36 = vcombine.low %v11249_v29, %v11281_v30  ;;  %v11250_v40 = vld [vmem:[%s14268_s1 + $0xc30] sm:$0xff] }
 0x5b4   :  { %v11387_v44 = vcombine.high %v11250_v40, %v11282_v41 }
 0x5ba   :  { %9114 = vmatpush1.bf16.xpose.msra.mxu1 %v11438_v45  ;;  %v8080_v45 = vcombine.high %v8078_v43, %v8078_v43 }
 0x5bb   :  { %9151 = vmatprep.subr.bf16.mxu1 %v11377_v46  ;;  %v11314_v46 = vld [vmem:[%s14268_s1 + $0xe30] sm:$0xff] }
 0x5bc   :  { %v11450_v56 = vcombine.low %v11314_v46, %v11346_v47 }
 0x5c1   :  { %9144 = vmatmul.mubr.bf16.vlgmr.msra.gmra.mrb[8].mxu1 %v8038_v49  ;;  %v11386_v49 = vcombine.low %v11250_v40, %v11282_v41 }
 0x5c2   :  { %9152 = vmatpush1.bf16.xpose.msra.mxu1 %v11376_v50  ;;  %9183 = vmatprep.mubr.bf16.mxu1 %v8062_v52  ;;  %v8108_v50 = vrot.slane %v8080_v45, %v12260_v13  ;;  %v11451_v52 = vcombine.high %v11314_v46, %v11346_v47 }
 0x5c3   :  { %9153 = vmatprep.subr.bf16.mxu1 %v11441_v53  ;;  %v11251_v53 = vld [vmem:[%s14268_s1 + $0xc38] sm:$0xff] }
 0x5c4   :  { %v11389_v57 = vcombine.high %v11251_v53, %v11283_v54  ;;  %v11388_v62 = vcombine.low %v11251_v53, %v11283_v54  ;;  %v8112_v63 = vcombine.high %v8108_v50, %v8108_v50 }
 0x5ca   :  { %9154 = vmatpush1.bf16.xpose.msra.mxu1 %v11440_v58  ;;  %v11315_v58 = vld [vmem:[%s14268_s1 + $0xe38] sm:$0xff] }
 0x5cb   :  { %9191 = vmatprep.subr.bf16.mxu1 %v11379_v60  ;;  %v8094_v60 = vrot.slane %v8078_v43, %v12260_v13  ;;  %v11453_v0 = vcombine.high %v11315_v58, %v11347_v59  ;;  %v11351_v43 = vld [vmem:[%s14268_s1 + $0xf58] sm:$0xff] }
 0x5cd   :  { %v8110_v10 = vcombine.high %v8094_v60, %v8094_v60 }
 0x5d1   :  { %9184 = vmatmul.mubr.bf16.vlgmr.msra.gmra.mrb[8].mxu1 %v8060_v1  ;;  %v11238_v1 = vld [vmem:[%s14267_s0 + $0xd0] sm:$0xff] }
 0x5d2   :  { %9192 = vmatpush1.bf16.xpose.msra.mxu1 %v11378_v2  ;;  %9223 = vmatprep.mubr.bf16.mxu1 %v8059_v3  ;;  %v11252_v2 = vld [vmem:[%s14268_s1 + $0xc40] sm:$0xff]  ;;  %v8120_v5 = vrot.slane %v11238_v1, %v12260_v13 }
 0x5d3   :  { %9193 = vmatprep.subr.bf16.mxu1 %v11443_v4  ;;  %v11284_v3 = vld [vmem:[%s14268_s1 + $0xd40] sm:$0xff]  ;;  %v11452_v4 = vcombine.low %v11315_v58, %v11347_v59 }
 0x5d4   :  { %v11391_v6 = vcombine.high %v11252_v2, %v11284_v3  ;;  %v11352_v58 = vld [vmem:[%s14268_s1 + $0xf60] sm:$0xff] }
 0x5da   :  { %9194 = vmatpush1.bf16.xpose.msra.mxu1 %v11442_v7  ;;  %v8128_v7 = vcombine.high %v8120_v5, %v8120_v5 }
 0x5db   :  { %9231 = vmatprep.subr.bf16.mxu1 %v11381_v8  ;;  %v11316_v8 = vld [vmem:[%s14268_s1 + $0xe40] sm:$0xff] }
 0x5dc   :  { %v11454_v17 = vcombine.low %v11316_v8, %v11348_v9 }
 0x5e1   :  { %9224 = vmatmul.mubr.bf16.vlgmr.msra.gmra.mrb[8].mxu1 %v8045_v11  ;;  %v11390_v11 = vcombine.low %v11252_v2, %v11284_v3 }
 0x5e2   :  { %9232 = vmatpush1.bf16.xpose.msra.mxu1 %v11380_v12  ;;  %9263 = vmatprep.mubr.bf16.mxu1 %v8063_v14  ;;  %v8150_v12 = vrot.slane %v8128_v7, %v12260_v13  ;;  %v11455_v14 = vcombine.high %v11316_v8, %v11348_v9 }
 0x5e3   :  { %9233 = vmatprep.subr.bf16.mxu1 %v11445_v15  ;;  %v11253_v15 = vld [vmem:[%s14268_s1 + $0xc48] sm:$0xff] }
 0x5e4   :  { %v11393_v18 = vcombine.high %v11253_v15, %v11285_v16  ;;  %v11392_v22 = vcombine.low %v11253_v15, %v11285_v16  ;;  %v8160_v23 = vcombine.high %v8150_v12, %v8150_v12 }
 0x5ea   :  { %9234 = vmatpush1.bf16.xpose.msra.mxu1 %v11444_v19  ;;  %v11317_v19 = vld [vmem:[%s14268_s1 + $0xe48] sm:$0xff] }
 0x5eb   :  { %9271 = vmatprep.subr.bf16.mxu1 %v11383_v21  ;;  %v8136_v21 = vrot.slane %v8120_v5, %v12260_v13  ;;  %v11457_v24 = vcombine.high %v11317_v19, %v11349_v20  ;;  %v11353_v5 = vld [vmem:[%s14268_s1 + $0xf68] sm:$0xff] }
 0x5ed   :  { %v8158_v34 = vcombine.high %v8136_v21, %v8136_v21 }
 0x5f1   :  { %9264 = vmatmul.mubr.bf16.vlgmr.msra.gmra.mrb[8].mxu1 %v8061_v25  ;;  %v8113_v25 = vcombine.high %v11238_v1, %v11238_v1  ;;  %v11289_v1 = vld [vmem:[%s14268_s1 + $0xd68] sm:$0xff] }
 0x5f2   :  { %9272 = vmatpush1.bf16.xpose.msra.mxu1 %v11382_v26  ;;  %9303 = vmatprep.mubr.bf16.mxu1 %v8101_v27  ;;  %v11254_v26 = vld [vmem:[%s14268_s1 + $0xc50] sm:$0xff] }
 0x5f3   :  { %9273 = vmatprep.subr.bf16.mxu1 %v11447_v28  ;;  %v11286_v27 = vld [vmem:[%s14268_s1 + $0xd50] sm:$0xff]  ;;  %v11456_v28 = vcombine.low %v11317_v19, %v11349_v20  ;;  %v8127_v29 = vrot.slane %v8113_v25, %v12260_v13  ;;  %v11291_v25 = vld [vmem:[%s14268_s1 + $0xd78] sm:$0xff] }
 0x5f4   :  { %v11395_v30 = vcombine.high %v11254_v26, %v11286_v27  ;;  %v11354_v19 = vld [vmem:[%s14268_s1 + $0xf70] sm:$0xff] }
 0x5fa   :  { %9274 = vmatpush1.bf16.xpose.msra.mxu1 %v11446_v31  ;;  %v8129_v31 = vcombine.high %v8127_v29, %v8127_v29 }
 0x5fb   :  { %9311 = vmatprep.subr.bf16.mxu1 %v11385_v32  ;;  %v11318_v32 = vld [vmem:[%s14268_s1 + $0xe50] sm:$0xff] }
 0x5fc   :  { %v11458_v40 = vcombine.low %v11318_v32, %v11350_v33 }
 0x601   :  { %9304 = vmatmul.mubr.bf16.vlgmr.msra.gmra.mrb[8].mxu1 %v8087_v35  ;;  %v11394_v35 = vcombine.low %v11254_v26, %v11286_v27 }
 0x602   :  { %9312 = vmatpush1.bf16.xpose.msra.mxu1 %v11384_v36  ;;  %9343 = vmatprep.mubr.bf16.mxu1 %v8111_v37  ;;  %v8157_v36 = vrot.slane %v8129_v31, %v12260_v13  ;;  %v11459_v37 = vcombine.high %v11318_v32, %v11350_v33 }
 0x603   :  { %9313 = vmatprep.subr.bf16.mxu1 %v11449_v38  ;;  %v11255_v38 = vld [vmem:[%s14268_s1 + $0xc58] sm:$0xff] }
 0x604   :  { %v11397_v41 = vcombine.high %v11255_v38, %v11287_v39  ;;  %v11396_v45 = vcombine.low %v11255_v38, %v11287_v39  ;;  %v8161_v46 = vcombine.high %v8157_v36, %v8157_v36 }
 0x60a   :  { %9314 = vmatpush1.bf16.xpose.msra.mxu1 %v11448_v42  ;;  %v11319_v42 = vld [vmem:[%s14268_s1 + $0xe58] sm:$0xff] }
 0x60b   :  { %9351 = vmatprep.subr.bf16.mxu1 %v11387_v44  ;;  %v8143_v44 = vrot.slane %v8127_v29, %v12260_v13  ;;  %v11461_v47 = vcombine.high %v11319_v42, %v11351_v43  ;;  %v11355_v29 = vld [vmem:[%s14268_s1 + $0xf78] sm:$0xff] }
 0x60d   :  { %v8159_v59 = vcombine.high %v8143_v44, %v8143_v44 }
 0x611   :  { %9344 = vmatmul.mubr.bf16.vlgmr.msra.gmra.mrb[8].mxu1 %v8109_v48  ;;  %v11239_v48 = vld [vmem:[%s14267_s0 + $0xd8] sm:$0xff] }
 0x612   :  { %9352 = vmatpush1.bf16.xpose.msra.mxu1 %v11386_v49  ;;  %9383 = vmatprep.mubr.bf16.mxu1 %v8108_v50  ;;  %v11256_v49 = vld [vmem:[%s14268_s1 + $0xc60] sm:$0xff]  ;;  %v8169_v53 = vrot.slane %v11239_v48, %v12260_v13 }
 0x613   :  { %9353 = vmatprep.subr.bf16.mxu1 %v11451_v52  ;;  %v11288_v50 = vld [vmem:[%s14268_s1 + $0xd60] sm:$0xff]  ;;  %v11460_v52 = vcombine.low %v11319_v42, %v11351_v43 }
 0x614   :  { %v11399_v54 = vcombine.high %v11256_v49, %v11288_v50  ;;  %v11356_v42 = vld [vmem:[%s14268_s1 + $0xf80] sm:$0xff] }
 0x61a   :  { %9354 = vmatpush1.bf16.xpose.msra.mxu1 %v11450_v56  ;;  %v8177_v56 = vcombine.high %v8169_v53, %v8169_v53 }
 0x61b   :  { %9391 = vmatprep.subr.bf16.mxu1 %v11389_v57  ;;  %v11320_v57 = vld [vmem:[%s14268_s1 + $0xe60] sm:$0xff] }
 0x61c   :  { %v11462_v2 = vcombine.low %v11320_v57, %v11352_v58 }
 0x621   :  { %9384 = vmatmul.mubr.bf16.vlgmr.msra.gmra.mrb[8].mxu1 %v8094_v60  ;;  %v11398_v60 = vcombine.low %v11256_v49, %v11288_v50 }
 0x622   :  { %9392 = vmatpush1.bf16.xpose.msra.mxu1 %v11388_v62  ;;  %9423 = vmatprep.mubr.bf16.mxu1 %v8112_v63  ;;  %v8199_v62 = vrot.slane %v8177_v56, %v12260_v13  ;;  %v11463_v63 = vcombine.high %v11320_v57, %v11352_v58 }
 0x623   :  { %9393 = vmatprep.subr.bf16.mxu1 %v11453_v0  ;;  %v11257_v0 = vld [vmem:[%s14268_s1 + $0xc68] sm:$0xff] }
 0x624   :  { %v11401_v3 = vcombine.high %v11257_v0, %v11289_v1  ;;  %v11400_v7 = vcombine.low %v11257_v0, %v11289_v1  ;;  %v8209_v8 = vcombine.high %v8199_v62, %v8199_v62 }
 0x62a   :  { %9394 = vmatpush1.bf16.xpose.msra.mxu1 %v11452_v4  ;;  %v11321_v4 = vld [vmem:[%s14268_s1 + $0xe68] sm:$0xff] }
 0x62b   :  { %9431 = vmatprep.subr.bf16.mxu1 %v11391_v6  ;;  %v8185_v6 = vrot.slane %v8169_v53, %v12260_v13  ;;  %v11465_v9 = vcombine.high %v11321_v4, %v11353_v5  ;;  %v11357_v53 = vld [vmem:[%s14268_s1 + $0xf88] sm:$0xff] }
 0x62d   :  { %v8207_v20 = vcombine.high %v8185_v6, %v8185_v6 }
 0x631   :  { %9424 = vmatmul.mubr.bf16.vlgmr.msra.gmra.mrb[8].mxu1 %v8110_v10  ;;  %v8162_v10 = vcombine.high %v11239_v48, %v11239_v48  ;;  %v11293_v48 = vld [vmem:[%s14268_s1 + $0xd88] sm:$0xff] }
 0x632   :  { %9432 = vmatpush1.bf16.xpose.msra.mxu1 %v11390_v11  ;;  %9463 = vmatprep.mubr.bf16.mxu1 %v8150_v12  ;;  %v11258_v11 = vld [vmem:[%s14268_s1 + $0xc70] sm:$0xff] }
 0x633   :  { %9433 = vmatprep.subr.bf16.mxu1 %v11455_v14  ;;  %v11290_v12 = vld [vmem:[%s14268_s1 + $0xd70] sm:$0xff]  ;;  %v11464_v14 = vcombine.low %v11321_v4, %v11353_v5  ;;  %v8176_v15 = vrot.slane %v8162_v10, %v12260_v13  ;;  %v11295_v10 = vld [vmem:[%s14268_s1 + $0xd98] sm:$0xff] }
 0x634   :  { %v11403_v16 = vcombine.high %v11258_v11, %v11290_v12  ;;  %v11358_v4 = vld [vmem:[%s14268_s1 + $0xf90] sm:$0xff] }
 0x63a   :  { %9434 = vmatpush1.bf16.xpose.msra.mxu1 %v11454_v17  ;;  %v8178_v17 = vcombine.high %v8176_v15, %v8176_v15 }
 0x63b   :  { %9471 = vmatprep.subr.bf16.mxu1 %v11393_v18  ;;  %v11322_v18 = vld [vmem:[%s14268_s1 + $0xe70] sm:$0xff] }
 0x63c   :  { %v11466_v26 = vcombine.low %v11322_v18, %v11354_v19 }
 0x641   :  { %9464 = vmatmul.mubr.bf16.vlgmr.msra.gmra.mrb[8].mxu1 %v8136_v21  ;;  %v11402_v21 = vcombine.low %v11258_v11, %v11290_v12 }
 0x642   :  { %9472 = vmatpush1.bf16.xpose.msra.mxu1 %v11392_v22  ;;  %9503 = vmatprep.mubr.bf16.mxu1 %v8160_v23  ;;  %v8206_v22 = vrot.slane %v8178_v17, %v12260_v13  ;;  %v11467_v23 = vcombine.high %v11322_v18, %v11354_v19 }
 0x643   :  { %9473 = vmatprep.subr.bf16.mxu1 %v11457_v24  ;;  %v11259_v24 = vld [vmem:[%s14268_s1 + $0xc78] sm:$0xff] }
 0x644   :  { %v11405_v27 = vcombine.high %v11259_v24, %v11291_v25  ;;  %v11404_v31 = vcombine.low %v11259_v24, %v11291_v25  ;;  %v8210_v32 = vcombine.high %v8206_v22, %v8206_v22 }
 0x64a   :  { %9474 = vmatpush1.bf16.xpose.msra.mxu1 %v11456_v28  ;;  %v11323_v28 = vld [vmem:[%s14268_s1 + $0xe78] sm:$0xff] }
 0x64b   :  { %9511 = vmatprep.subr.bf16.mxu1 %v11395_v30  ;;  %v8192_v30 = vrot.slane %v8176_v15, %v12260_v13  ;;  %v11469_v33 = vcombine.high %v11323_v28, %v11355_v29  ;;  %v11359_v15 = vld [vmem:[%s14268_s1 + $0xf98] sm:$0xff] }
 0x64d   :  { %v8208_v43 = vcombine.high %v8192_v30, %v8192_v30 }
 0x651   :  { %9504 = vmatmul.mubr.bf16.vlgmr.msra.gmra.mrb[8].mxu1 %v8158_v34  ;;  %v11240_v34 = vld [vmem:[%s14267_s0 + $0xe0] sm:$0xff] }
 0x652   :  { %9512 = vmatpush1.bf16.xpose.msra.mxu1 %v11394_v35  ;;  %9543 = vmatprep.mubr.bf16.mxu1 %v8157_v36  ;;  %v11260_v35 = vld [vmem:[%s14268_s1 + $0xc80] sm:$0xff]  ;;  %v8218_v38 = vrot.slane %v11240_v34, %v12260_v13 }
 0x653   :  { %9513 = vmatprep.subr.bf16.mxu1 %v11459_v37  ;;  %v11292_v36 = vld [vmem:[%s14268_s1 + $0xd80] sm:$0xff]  ;;  %v11468_v37 = vcombine.low %v11323_v28, %v11355_v29 }
 0x654   :  { %v11407_v39 = vcombine.high %v11260_v35, %v11292_v36  ;;  %v11360_v28 = vld [vmem:[%s14268_s1 + $0xfa0] sm:$0xff] }
 0x65a   :  { %9514 = vmatpush1.bf16.xpose.msra.mxu1 %v11458_v40  ;;  %v8226_v40 = vcombine.high %v8218_v38, %v8218_v38 }
 0x65b   :  { %9551 = vmatprep.subr.bf16.mxu1 %v11397_v41  ;;  %v11324_v41 = vld [vmem:[%s14268_s1 + $0xe80] sm:$0xff] }
 0x65c   :  { %v11470_v49 = vcombine.low %v11324_v41, %v11356_v42 }
 0x661   :  { %9544 = vmatmul.mubr.bf16.vlgmr.msra.gmra.mrb[8].mxu1 %v8143_v44  ;;  %v11406_v44 = vcombine.low %v11260_v35, %v11292_v36 }
 0x662   :  { %9552 = vmatpush1.bf16.xpose.msra.mxu1 %v11396_v45  ;;  %9583 = vmatprep.mubr.bf16.mxu1 %v8161_v46  ;;  %v8248_v45 = vrot.slane %v8226_v40, %v12260_v13  ;;  %v11471_v46 = vcombine.high %v11324_v41, %v11356_v42 }
 0x663   :  { %9553 = vmatprep.subr.bf16.mxu1 %v11461_v47  ;;  %v11261_v47 = vld [vmem:[%s14268_s1 + $0xc88] sm:$0xff] }
 0x664   :  { %v11409_v50 = vcombine.high %v11261_v47, %v11293_v48  ;;  %v11408_v56 = vcombine.low %v11261_v47, %v11293_v48  ;;  %v8258_v57 = vcombine.high %v8248_v45, %v8248_v45 }
 0x66a   :  { %9554 = vmatpush1.bf16.xpose.msra.mxu1 %v11460_v52  ;;  %v11325_v52 = vld [vmem:[%s14268_s1 + $0xe88] sm:$0xff] }
 0x66b   :  { %9591 = vmatprep.subr.bf16.mxu1 %v11399_v54  ;;  %v8234_v54 = vrot.slane %v8218_v38, %v12260_v13  ;;  %v11473_v58 = vcombine.high %v11325_v52, %v11357_v53  ;;  %v11361_v38 = vld [vmem:[%s14268_s1 + $0xfa8] sm:$0xff] }
 0x66d   :  { %v8256_v5 = vcombine.high %v8234_v54, %v8234_v54 }
 0x671   :  { %9584 = vmatmul.mubr.bf16.vlgmr.msra.gmra.mrb[8].mxu1 %v8159_v59  ;;  %v8211_v59 = vcombine.high %v11240_v34, %v11240_v34  ;;  %v11297_v34 = vld [vmem:[%s14268_s1 + $0xda8] sm:$0xff] }
 0x672   :  { %9592 = vmatpush1.bf16.xpose.msra.mxu1 %v11398_v60  ;;  %9623 = vmatprep.mubr.bf16.mxu1 %v8199_v62  ;;  %v11262_v60 = vld [vmem:[%s14268_s1 + $0xc90] sm:$0xff] }
 0x673   :  { %9593 = vmatprep.subr.bf16.mxu1 %v11463_v63  ;;  %v11294_v62 = vld [vmem:[%s14268_s1 + $0xd90] sm:$0xff]  ;;  %v11472_v63 = vcombine.low %v11325_v52, %v11357_v53  ;;  %v8225_v0 = vrot.slane %v8211_v59, %v12260_v13  ;;  %v11299_v59 = vld [vmem:[%s14268_s1 + $0xdb8] sm:$0xff] }
 0x674   :  { %v11411_v1 = vcombine.high %v11262_v60, %v11294_v62  ;;  %v11362_v52 = vld [vmem:[%s14268_s1 + $0xfb0] sm:$0xff] }
 0x67a   :  { %9594 = vmatpush1.bf16.xpose.msra.mxu1 %v11462_v2  ;;  %v8227_v2 = vcombine.high %v8225_v0, %v8225_v0 }
 0x67b   :  { %9631 = vmatprep.subr.bf16.mxu1 %v11401_v3  ;;  %v11326_v3 = vld [vmem:[%s14268_s1 + $0xe90] sm:$0xff] }
 0x67c   :  { %v11474_v11 = vcombine.low %v11326_v3, %v11358_v4 }
 0x681   :  { %9624 = vmatmul.mubr.bf16.vlgmr.msra.gmra.mrb[8].mxu1 %v8185_v6  ;;  %v11410_v6 = vcombine.low %v11262_v60, %v11294_v62 }
 0x682   :  { %9632 = vmatpush1.bf16.xpose.msra.mxu1 %v11400_v7  ;;  %9663 = vmatprep.mubr.bf16.mxu1 %v8209_v8  ;;  %v8255_v7 = vrot.slane %v8227_v2, %v12260_v13  ;;  %v11475_v8 = vcombine.high %v11326_v3, %v11358_v4 }
 0x683   :  { %9633 = vmatprep.subr.bf16.mxu1 %v11465_v9  ;;  %v11263_v9 = vld [vmem:[%s14268_s1 + $0xc98] sm:$0xff] }
 0x684   :  { %v11413_v12 = vcombine.high %v11263_v9, %v11295_v10  ;;  %v11412_v17 = vcombine.low %v11263_v9, %v11295_v10  ;;  %v8259_v18 = vcombine.high %v8255_v7, %v8255_v7 }
 0x68a   :  { %9634 = vmatpush1.bf16.xpose.msra.mxu1 %v11464_v14  ;;  %v11327_v14 = vld [vmem:[%s14268_s1 + $0xe98] sm:$0xff] }
 0x68b   :  { %9671 = vmatprep.subr.bf16.mxu1 %v11403_v16  ;;  %v8241_v16 = vrot.slane %v8225_v0, %v12260_v13  ;;  %v11477_v19 = vcombine.high %v11327_v14, %v11359_v15  ;;  %v11363_v0 = vld [vmem:[%s14268_s1 + $0xfb8] sm:$0xff] }
 0x68d   :  { %v8257_v29 = vcombine.high %v8241_v16, %v8241_v16 }
 0x691   :  { %9664 = vmatmul.mubr.bf16.vlgmr.msra.gmra.mrb[8].mxu1 %v8207_v20  ;;  %v11241_v20 = vld [vmem:[%s14267_s0 + $0xe8] sm:$0xff] }
 0x692   :  { %9672 = vmatpush1.bf16.xpose.msra.mxu1 %v11402_v21  ;;  %9703 = vmatprep.mubr.bf16.mxu1 %v8206_v22  ;;  %v11264_v21 = vld [vmem:[%s14268_s1 + $0xca0] sm:$0xff]  ;;  %v8267_v24 = vrot.slane %v11241_v20, %v12260_v13 }
 0x693   :  { %9673 = vmatprep.subr.bf16.mxu1 %v11467_v23  ;;  %v11296_v22 = vld [vmem:[%s14268_s1 + $0xda0] sm:$0xff]  ;;  %v11476_v23 = vcombine.low %v11327_v14, %v11359_v15 }
 0x694   :  { %v11415_v25 = vcombine.high %v11264_v21, %v11296_v22  ;;  %v11364_v14 = vld [vmem:[%s14268_s1 + $0xfc0] sm:$0xff] }
 0x69a   :  { %9674 = vmatpush1.bf16.xpose.msra.mxu1 %v11466_v26  ;;  %v8275_v26 = vcombine.high %v8267_v24, %v8267_v24 }
 0x69b   :  { %9711 = vmatprep.subr.bf16.mxu1 %v11405_v27  ;;  %v11328_v27 = vld [vmem:[%s14268_s1 + $0xea0] sm:$0xff] }
 0x69c   :  { %v11478_v35 = vcombine.low %v11328_v27, %v11360_v28 }
 0x6a1   :  { %9704 = vmatmul.mubr.bf16.vlgmr.msra.gmra.mrb[8].mxu1 %v8192_v30  ;;  %v11414_v30 = vcombine.low %v11264_v21, %v11296_v22 }
 0x6a2   :  { %9712 = vmatpush1.bf16.xpose.msra.mxu1 %v11404_v31  ;;  %9743 = vmatprep.mubr.bf16.mxu1 %v8210_v32  ;;  %v8297_v31 = vrot.slane %v8275_v26, %v12260_v13  ;;  %v11479_v32 = vcombine.high %v11328_v27, %v11360_v28 }
 0x6a3   :  { %9713 = vmatprep.subr.bf16.mxu1 %v11469_v33  ;;  %v11265_v33 = vld [vmem:[%s14268_s1 + $0xca8] sm:$0xff] }
 0x6a4   :  { %v11417_v36 = vcombine.high %v11265_v33, %v11297_v34  ;;  %v11416_v40 = vcombine.low %v11265_v33, %v11297_v34  ;;  %v8307_v41 = vcombine.high %v8297_v31, %v8297_v31 }
 0x6aa   :  { %9714 = vmatpush1.bf16.xpose.msra.mxu1 %v11468_v37  ;;  %v11329_v37 = vld [vmem:[%s14268_s1 + $0xea8] sm:$0xff] }
 0x6ab   :  { %9751 = vmatprep.subr.bf16.mxu1 %v11407_v39  ;;  %v8283_v39 = vrot.slane %v8267_v24, %v12260_v13  ;;  %v11481_v42 = vcombine.high %v11329_v37, %v11361_v38  ;;  %v11365_v24 = vld [vmem:[%s14268_s1 + $0xfc8] sm:$0xff] }
 0x6ad   :  { %v8305_v53 = vcombine.high %v8283_v39, %v8283_v39 }
 0x6b1   :  { %9744 = vmatmul.mubr.bf16.vlgmr.msra.gmra.mrb[8].mxu1 %v8208_v43  ;;  %v8260_v43 = vcombine.high %v11241_v20, %v11241_v20  ;;  %v11301_v20 = vld [vmem:[%s14268_s1 + $0xdc8] sm:$0xff] }
 0x6b2   :  { %9752 = vmatpush1.bf16.xpose.msra.mxu1 %v11406_v44  ;;  %9783 = vmatprep.mubr.bf16.mxu1 %v8248_v45  ;;  %v11266_v44 = vld [vmem:[%s14268_s1 + $0xcb0] sm:$0xff] }
 0x6b3   :  { %9753 = vmatprep.subr.bf16.mxu1 %v11471_v46  ;;  %v11298_v45 = vld [vmem:[%s14268_s1 + $0xdb0] sm:$0xff]  ;;  %v11480_v46 = vcombine.low %v11329_v37, %v11361_v38  ;;  %v8274_v47 = vrot.slane %v8260_v43, %v12260_v13  ;;  %v11303_v43 = vld [vmem:[%s14268_s1 + $0xdd8] sm:$0xff] }
 0x6b4   :  { %v11419_v48 = vcombine.high %v11266_v44, %v11298_v45  ;;  %v11366_v37 = vld [vmem:[%s14268_s1 + $0xfd0] sm:$0xff] }
 0x6ba   :  { %9754 = vmatpush1.bf16.xpose.msra.mxu1 %v11470_v49  ;;  %v8276_v49 = vcombine.high %v8274_v47, %v8274_v47 }
 0x6bb   :  { %9791 = vmatprep.subr.bf16.mxu1 %v11409_v50  ;;  %v11330_v50 = vld [vmem:[%s14268_s1 + $0xeb0] sm:$0xff] }
 0x6bc   :  { %v11482_v60 = vcombine.low %v11330_v50, %v11362_v52 }
 0x6c1   :  { %9784 = vmatmul.mubr.bf16.vlgmr.msra.gmra.mrb[8].mxu1 %v8234_v54  ;;  %v11418_v54 = vcombine.low %v11266_v44, %v11298_v45 }
 0x6c2   :  { %9792 = vmatpush1.bf16.xpose.msra.mxu1 %v11408_v56  ;;  %9823 = vmatprep.mubr.bf16.mxu1 %v8258_v57  ;;  %v8304_v56 = vrot.slane %v8276_v49, %v12260_v13  ;;  %v11483_v57 = vcombine.high %v11330_v50, %v11362_v52 }
 0x6c3   :  { %9793 = vmatprep.subr.bf16.mxu1 %v11473_v58  ;;  %v11267_v58 = vld [vmem:[%s14268_s1 + $0xcb8] sm:$0xff] }
 0x6c4   :  { %v11421_v62 = vcombine.high %v11267_v58, %v11299_v59  ;;  %v11420_v2 = vcombine.low %v11267_v58, %v11299_v59  ;;  %v8308_v3 = vcombine.high %v8304_v56, %v8304_v56 }
 0x6ca   :  { %9794 = vmatpush1.bf16.xpose.msra.mxu1 %v11472_v63  ;;  %v11331_v63 = vld [vmem:[%s14268_s1 + $0xeb8] sm:$0xff] }
 0x6cb   :  { %9831 = vmatprep.subr.bf16.mxu1 %v11411_v1  ;;  %v8290_v1 = vrot.slane %v8274_v47, %v12260_v13  ;;  %v11485_v4 = vcombine.high %v11331_v63, %v11363_v0  ;;  %v11367_v47 = vld [vmem:[%s14268_s1 + $0xfd8] sm:$0xff] }
 0x6cd   :  { %v8306_v15 = vcombine.high %v8290_v1, %v8290_v1 }
 0x6d1   :  { %9824 = vmatmul.mubr.bf16.vlgmr.msra.gmra.mrb[8].mxu1 %v8256_v5  ;;  %v11242_v5 = vld [vmem:[%s14267_s0 + $0xf0] sm:$0xff] }
 0x6d2   :  { %9832 = vmatpush1.bf16.xpose.msra.mxu1 %v11410_v6  ;;  %9863 = vmatprep.mubr.bf16.mxu1 %v8255_v7  ;;  %v11268_v6 = vld [vmem:[%s14268_s1 + $0xcc0] sm:$0xff]  ;;  %v8316_v9 = vrot.slane %v11242_v5, %v12260_v13 }
 0x6d3   :  { %9833 = vmatprep.subr.bf16.mxu1 %v11475_v8  ;;  %v11300_v7 = vld [vmem:[%s14268_s1 + $0xdc0] sm:$0xff]  ;;  %v11484_v8 = vcombine.low %v11331_v63, %v11363_v0 }
 0x6d4   :  { %v11423_v10 = vcombine.high %v11268_v6, %v11300_v7  ;;  %v11368_v63 = vld [vmem:[%s14268_s1 + $0xfe0] sm:$0xff] }
 0x6da   :  { %9834 = vmatpush1.bf16.xpose.msra.mxu1 %v11474_v11  ;;  %v8324_v11 = vcombine.high %v8316_v9, %v8316_v9 }
 0x6db   :  { %9871 = vmatprep.subr.bf16.mxu1 %v11413_v12  ;;  %v11332_v12 = vld [vmem:[%s14268_s1 + $0xec0] sm:$0xff] }
 0x6dc   :  { %v11486_v21 = vcombine.low %v11332_v12, %v11364_v14 }
 0x6e1   :  { %9864 = vmatmul.mubr.bf16.vlgmr.msra.gmra.mrb[8].mxu1 %v8241_v16  ;;  %v11422_v16 = vcombine.low %v11268_v6, %v11300_v7 }
 0x6e2   :  { %9872 = vmatpush1.bf16.xpose.msra.mxu1 %v11412_v17  ;;  %9903 = vmatprep.mubr.bf16.mxu1 %v8259_v18  ;;  %v8346_v17 = vrot.slane %v8324_v11, %v12260_v13  ;;  %v11487_v18 = vcombine.high %v11332_v12, %v11364_v14 }
 0x6e3   :  { %9873 = vmatprep.subr.bf16.mxu1 %v11477_v19  ;;  %v11269_v19 = vld [vmem:[%s14268_s1 + $0xcc8] sm:$0xff] }
 0x6e4   :  { %v11425_v22 = vcombine.high %v11269_v19, %v11301_v20  ;;  %v11424_v26 = vcombine.low %v11269_v19, %v11301_v20  ;;  %v8356_v27 = vcombine.high %v8346_v17, %v8346_v17 }
 0x6ea   :  { %9874 = vmatpush1.bf16.xpose.msra.mxu1 %v11476_v23  ;;  %v11333_v23 = vld [vmem:[%s14268_s1 + $0xec8] sm:$0xff] }
 0x6eb   :  { %9911 = vmatprep.subr.bf16.mxu1 %v11415_v25  ;;  %v8332_v25 = vrot.slane %v8316_v9, %v12260_v13  ;;  %v11489_v28 = vcombine.high %v11333_v23, %v11365_v24  ;;  %v11369_v9 = vld [vmem:[%s14268_s1 + $0xfe8] sm:$0xff] }
 0x6ed   :  { %v8354_v38 = vcombine.high %v8332_v25, %v8332_v25 }
 0x6f1   :  { %9904 = vmatmul.mubr.bf16.vlgmr.msra.gmra.mrb[8].mxu1 %v8257_v29  ;;  %v8309_v29 = vcombine.high %v11242_v5, %v11242_v5  ;;  %v11305_v5 = vld [vmem:[%s14268_s1 + $0xde8] sm:$0xff] }
 0x6f2   :  { %9912 = vmatpush1.bf16.xpose.msra.mxu1 %v11414_v30  ;;  %9943 = vmatprep.mubr.bf16.mxu1 %v8297_v31  ;;  %v11270_v30 = vld [vmem:[%s14268_s1 + $0xcd0] sm:$0xff] }
 0x6f3   :  { %9913 = vmatprep.subr.bf16.mxu1 %v11479_v32  ;;  %v11302_v31 = vld [vmem:[%s14268_s1 + $0xdd0] sm:$0xff]  ;;  %v11488_v32 = vcombine.low %v11333_v23, %v11365_v24  ;;  %v8323_v33 = vrot.slane %v8309_v29, %v12260_v13  ;;  %v11307_v29 = vld [vmem:[%s14268_s1 + $0xdf8] sm:$0xff] }
 0x6f4   :  { %v11427_v34 = vcombine.high %v11270_v30, %v11302_v31  ;;  %v11370_v23 = vld [vmem:[%s14268_s1 + $0xff0] sm:$0xff] }
 0x6fa   :  { %9914 = vmatpush1.bf16.xpose.msra.mxu1 %v11478_v35  ;;  %v8325_v35 = vcombine.high %v8323_v33, %v8323_v33 }
 0x6fb   :  { %9951 = vmatprep.subr.bf16.mxu1 %v11417_v36  ;;  %v11334_v36 = vld [vmem:[%s14268_s1 + $0xed0] sm:$0xff] }
 0x6fc   :  { %v11490_v44 = vcombine.low %v11334_v36, %v11366_v37 }
 0x701   :  { %9944 = vmatmul.mubr.bf16.vlgmr.msra.gmra.mrb[8].mxu1 %v8283_v39  ;;  %v11426_v39 = vcombine.low %v11270_v30, %v11302_v31 }
 0x702   :  { %9952 = vmatpush1.bf16.xpose.msra.mxu1 %v11416_v40  ;;  %9983 = vmatprep.mubr.bf16.mxu1 %v8307_v41  ;;  %v8353_v40 = vrot.slane %v8325_v35, %v12260_v13  ;;  %v11491_v41 = vcombine.high %v11334_v36, %v11366_v37 }
 0x703   :  { %9953 = vmatprep.subr.bf16.mxu1 %v11481_v42  ;;  %v11271_v42 = vld [vmem:[%s14268_s1 + $0xcd8] sm:$0xff] }
 0x704   :  { %v11429_v45 = vcombine.high %v11271_v42, %v11303_v43  ;;  %v11428_v49 = vcombine.low %v11271_v42, %v11303_v43  ;;  %v8357_v50 = vcombine.high %v8353_v40, %v8353_v40  ;;  %v42_v42 = vld [vmem:[%s14270_s3 + $0x70] sm:$0xff]  ;;  %v43_v43 = vld [vmem:[%s14270_s3 + $0x78] sm:$0xff] }
 0x70a   :  { %9954 = vmatpush1.bf16.xpose.msra.mxu1 %v11480_v46  ;;  %v11335_v46 = vld [vmem:[%s14268_s1 + $0xed8] sm:$0xff] }
 0x70b   :  { %9991 = vmatprep.subr.bf16.mxu1 %v11419_v48  ;;  %v8339_v48 = vrot.slane %v8323_v33, %v12260_v13  ;;  %v11493_v52 = vcombine.high %v11335_v46, %v11367_v47  ;;  %v11371_v33 = vld [vmem:[%s14268_s1 + $0xff8] sm:$0xff] }
 0x70d   :  { %v8355_v0 = vcombine.high %v8339_v48, %v8339_v48 }
 0x711   :  { %9984 = vmatmul.mubr.bf16.vlgmr.msra.gmra.mrb[8].mxu1 %v8305_v53  ;;  %v11243_v53 = vld [vmem:[%s14267_s0 + $0xf8] sm:$0xff] }
 0x712   :  { %9992 = vmatpush1.bf16.xpose.msra.mxu1 %v11418_v54  ;;  %10023 = vmatprep.mubr.bf16.mxu1 %v8304_v56  ;;  %v11272_v54 = vld [vmem:[%s14268_s1 + $0xce0] sm:$0xff]  ;;  %v8365_v58 = vrot.slane %v11243_v53, %v12260_v13 }
 0x713   :  { %9993 = vmatprep.subr.bf16.mxu1 %v11483_v57  ;;  %v11304_v56 = vld [vmem:[%s14268_s1 + $0xde0] sm:$0xff]  ;;  %v11492_v57 = vcombine.low %v11335_v46, %v11367_v47  ;;  %v10467_v46 = vld [vmem:[%s14272_s5 + $0x8] sm:$0xff]  ;;  %v10468_v47 = vld [vmem:[%s14272_s5 + $0x10] sm:$0xff] }
 0x714   :  { %v11431_v59 = vcombine.high %v11272_v54, %v11304_v56 }
 0x71a   :  { %9994 = vmatpush1.bf16.xpose.msra.mxu1 %v11482_v60  ;;  %v8373_v60 = vcombine.high %v8365_v58, %v8365_v58 }
 0x71b   :  { %10031 = vmatprep.subr.bf16.mxu1 %v11421_v62  ;;  %v11336_v62 = vld [vmem:[%s14268_s1 + $0xee0] sm:$0xff] }
 0x71c   :  { %v11494_v6 = vcombine.low %v11336_v62, %v11368_v63 }
 0x721   :  { %10024 = vmatmul.mubr.bf16.vlgmr.msra.gmra.mrb[8].mxu1 %v8290_v1  ;;  %v11430_v1 = vcombine.low %v11272_v54, %v11304_v56  ;;  %v11373_v54 = vld [vmem:[%s14269_s2 + $0x3] ss:$0 sm:$0xff] }
 0x722   :  { %10032 = vmatpush1.bf16.xpose.msra.mxu1 %v11420_v2  ;;  %10063 = vmatprep.mubr.bf16.mxu1 %v8308_v3  ;;  %v8395_v2 = vrot.slane %v8373_v60, %v12260_v13  ;;  %v11495_v3 = vcombine.high %v11336_v62, %v11368_v63  ;;  %v10472_v62 = vld [vmem:[%s14272_s5 + $0x30] sm:$0xff]  ;;  %v10473_v63 = vld [vmem:[%s14272_s5 + $0x38] sm:$0xff] }
 0x723   :  { %10033 = vmatprep.subr.bf16.mxu1 %v11485_v4  ;;  %v11273_v4 = vld [vmem:[%s14268_s1 + $0xce8] sm:$0xff] }
 0x724   :  { %v11433_v7 = vcombine.high %v11273_v4, %v11305_v5  ;;  %v11432_v11 = vcombine.low %v11273_v4, %v11305_v5  ;;  %v8405_v12 = vcombine.high %v8395_v2, %v8395_v2 }
 0x72a   :  { %10034 = vmatpush1.bf16.xpose.msra.mxu1 %v11484_v8  ;;  %v11337_v8 = vld [vmem:[%s14268_s1 + $0xee8] sm:$0xff] }
 0x72b   :  { %10071 = vmatprep.subr.bf16.mxu1 %v11423_v10  ;;  %v8381_v10 = vrot.slane %v8365_v58, %v12260_v13  ;;  %v11497_v14 = vcombine.high %v11337_v8, %v11369_v9 }
 0x72d   :  { %v8403_v24 = vcombine.high %v8381_v10, %v8381_v10 }
 0x731   :  { %10064 = vmatmul.mubr.bf16.vlgmr.msra.gmra.mrb[8].mxu1 %v8306_v15  ;;  %v8358_v15 = vcombine.high %v11243_v53, %v11243_v53 }
 0x732   :  { %10072 = vmatpush1.bf16.xpose.msra.mxu1 %v11422_v16  ;;  %10103 = vmatprep.mubr.bf16.mxu1 %v8346_v17  ;;  %v11274_v16 = vld [vmem:[%s14268_s1 + $0xcf0] sm:$0xff] }
 0x733   :  { %10073 = vmatprep.subr.bf16.mxu1 %v11487_v18  ;;  %v11306_v17 = vld [vmem:[%s14268_s1 + $0xdf0] sm:$0xff]  ;;  %v11496_v18 = vcombine.low %v11337_v8, %v11369_v9  ;;  %v8372_v19 = vrot.slane %v8358_v15, %v12260_v13 }
 0x734   :  { %v11435_v20 = vcombine.high %v11274_v16, %v11306_v17 }
 0x73a   :  { %10074 = vmatpush1.bf16.xpose.msra.mxu1 %v11486_v21  ;;  %v8374_v21 = vcombine.high %v8372_v19, %v8372_v19 }
 0x73b   :  { %10111 = vmatprep.subr.bf16.mxu1 %v11425_v22  ;;  %v11338_v22 = vld [vmem:[%s14268_s1 + $0xef0] sm:$0xff] }
 0x73c   :  { %v11498_v30 = vcombine.low %v11338_v22, %v11370_v23 }
 0x741   :  { %10104 = vmatmul.mubr.bf16.vlgmr.msra.gmra.mrb[8].mxu1 %v8332_v25  ;;  %v11434_v25 = vcombine.low %v11274_v16, %v11306_v17 }
 0x742   :  { %10112 = vmatpush1.bf16.xpose.msra.mxu1 %v11424_v26  ;;  %10143 = vmatprep.mubr.bf16.mxu1 %v8356_v27  ;;  %v8402_v26 = vrot.slane %v8374_v21, %v12260_v13  ;;  %v11499_v27 = vcombine.high %v11338_v22, %v11370_v23 }
 0x743   :  { %10113 = vmatprep.subr.bf16.mxu1 %v11489_v28  ;;  %v11275_v28 = vld [vmem:[%s14268_s1 + $0xcf8] sm:$0xff] }
 0x744   :  { %v11437_v31 = vcombine.high %v11275_v28, %v11307_v29  ;;  %v11436_v35 = vcombine.low %v11275_v28, %v11307_v29  ;;  %v8406_v36 = vcombine.high %v8402_v26, %v8402_v26 }
 0x74a   :  { %10114 = vmatpush1.bf16.xpose.msra.mxu1 %v11488_v32  ;;  %v11339_v32 = vld [vmem:[%s14268_s1 + $0xef8] sm:$0xff] }
 0x74b   :  { %10151 = vmatprep.subr.bf16.mxu1 %v11427_v34  ;;  %v8388_v34 = vrot.slane %v8372_v19, %v12260_v13  ;;  %v11501_v37 = vcombine.high %v11339_v32, %v11371_v33 }
 0x74d   :  { %v8404_v13 = vcombine.high %v8388_v34, %v8388_v34 }
 0x751   :  { %10144 = vmatmul.mubr.bf16.vlgmr.msra.gmra.mrb[8].mxu1 %v8354_v38  ;;  %v11500_v38 = vcombine.low %v11339_v32, %v11371_v33 }
 0x752   :  { %10152 = vmatpush1.bf16.xpose.msra.mxu1 %v11426_v39  ;;  %10183 = vmatprep.mubr.bf16.mxu1 %v8353_v40  ;;  %v40_v39 = vld [vmem:[%s14270_s3 + $0x60] sm:$0xff]  ;;  %v41_v40 = vld [vmem:[%s14270_s3 + $0x68] sm:$0xff] }
 0x753   :  { %10153 = vmatprep.subr.bf16.mxu1 %v11491_v41  ;;  %v11616_v41 = vpack.c.bf16 %v41_v40, %v40_v39 }
 0x75a   :  { %10154 = vmatpush1.bf16.xpose.msra.mxu1 %v11490_v44  ;;  %v11619_v44 = vpack.c.bf16 %v43_v43, %v42_v42 }
 0x75b   :  { %10191 = vmatprep.subr.bf16.mxu1 %v11429_v45  ;;  %v10466_v45 = vld [vmem:[%s14272_s5] sm:$0xff] }
 0x761   :  { %10184 = vmatmul.mubr.bf16.vlgmr.msra.gmra.mrb[8].mxu1 %v8339_v48  ;;  %v11622_v48 = vpack.c.bf16 %v10467_v46, %v10466_v45 }
 0x762   :  { %10192 = vmatpush1.bf16.xpose.msra.mxu1 %v11428_v49  ;;  %10223 = vmatprep.mubr.bf16.mxu1 %v8357_v50  ;;  %v10470_v50 = vld [vmem:[%s14272_s5 + $0x20] sm:$0xff] }
 0x763   :  { %10193 = vmatprep.subr.bf16.mxu1 %v11493_v52  ;;  %11623 = vmatpush3.bf16.msra.mxu0 %v11622_v48  ;;  %v10471_v52 = vld [vmem:[%s14272_s5 + $0x28] sm:$0xff] }
 0x764   :  { %11624 = vmatprep.subr.bf16.mxu0 %v12201_v55  ;;  %v11628_v53 = vpack.c.bf16 %v10471_v52, %v10470_v50 }
 0x76a   :  { %10194 = vmatpush1.bf16.xpose.msra.mxu1 %v11492_v57 }
 0x76b   :  { %10231 = vmatprep.subr.bf16.mxu1 %v11431_v59 }
 0x771   :  { %10224 = vmatmul.mubr.bf16.vlgmr.msra.gmra.mrb[8].mxu1 %v8355_v0  ;;  %v10701_v0 = vld [vmem:[%s14271_s4] ss:$0 sm:$0xff] }
 0x772   :  { %10232 = vmatpush1.bf16.xpose.msra.mxu1 %v11430_v1  ;;  %10263 = vmatprep.mubr.bf16.mxu1 %v8395_v2  ;;  %v2652_v1 = vadd.f32 %v10701_v0, %v13468_v51 }
 0x773   :  { %10233 = vmatprep.subr.bf16.mxu1 %v11495_v3 }
 0x77a   :  { %10234 = vmatpush1.bf16.xpose.msra.mxu1 %v11494_v6  ;;  %v11503_v6 = vld [vmem:[%s14273_s6] ss:$0 sm:$0xff] }
 0x77b   :  { %10271 = vmatprep.subr.bf16.mxu1 %v11433_v7 }
 0x781   :  { %10264 = vmatmul.mubr.bf16.vlgmr.msra.gmra.mrb[8].mxu1 %v8381_v10 }
 0x782   :  { %10272 = vmatpush1.bf16.xpose.msra.mxu1 %v11432_v11  ;;  %10303 = vmatprep.mubr.bf16.mxu1 %v8405_v12 }
 0x783   :  { %10273 = vmatprep.subr.bf16.mxu1 %v11497_v14 }
 0x78a   :  { %10274 = vmatpush1.bf16.xpose.msra.mxu1 %v11496_v18 }
 0x78b   :  { %10311 = vmatprep.subr.bf16.mxu1 %v11435_v20 }
 0x791   :  { %10304 = vmatmul.mubr.bf16.vlgmr.msra.gmra.mrb[8].mxu1 %v8403_v24 }
 0x792   :  { %10312 = vmatpush1.bf16.xpose.msra.mxu1 %v11434_v25  ;;  %10343 = vmatprep.mubr.bf16.mxu1 %v8402_v26 }
 0x793   :  { %10313 = vmatprep.subr.bf16.mxu1 %v11499_v27 }
 0x79a   :  { %10314 = vmatpush1.bf16.xpose.msra.mxu1 %v11498_v30 }
 0x79b   :  { %10351 = vmatprep.subr.bf16.mxu1 %v11437_v31 }
 0x7a1   :  { %10344 = vmatmul.mubr.bf16.vlgmr.msra.gmra.mrb[8].mxu1 %v8388_v34 }
 0x7a2   :  { %10352 = vmatpush1.bf16.xpose.msra.mxu1 %v11436_v35  ;;  %10383 = vmatprep.mubr.bf16.mxu1 %v8406_v36 }
 0x7a3   :  { %10353 = vmatprep.subr.bf16.mxu1 %v11501_v37 }
 0x7aa   :  { %10354 = vmatpush1.bf16.xpose.msra.mxu1 %v11500_v38 }
 0x7ab   :  { %11615 = vmatprep.subr.bf16.mxu1 %v12201_v55 }
 0x7b1   :  { %10384 = vmatmul.mubr.bf16.vlgmr.msra.gmra.mrb[8].mxu1 %v8404_v13 }
 0x7b2   :  { %11617 = vmatpush3.bf16.msra.mxu1 %v11616_v41  ;;  %11575 = vmatprep.mubr.msk.f32.mxu1 %vm12202_vm0, %v12203_v61  ;;  %v10469_v61 = vld [vmem:[%s14272_s5 + $0x18] sm:$0xff]  ;;  %s10563_s5 = sshll.u32 %s12204_s16, 4  ;;  %s10564_s5 = int_to_ptr.vmem [resolvable:$true] %s10563_s5 }
 0x7b3   :  { %11618 = vmatprep.subr.bf16.mxu1 %v12201_v55  ;;  %v11625_v49 = vpack.c.bf16 %v10469_v61, %v10468_v47  ;;  %s12176_s4 = scalar_lea.vmem %s10564_s5, 32  ;;  %p12181_p1 = scmp.lt.s32.totalorder %s10564_s5, %s10564_s5 }
 0x7b4   :  { %p12177_p0 = scmp.ne.s32.totalorder %s10564_s5, %s12176_s4  ;;  %p12182_p2 = scmp.lt.s32.totalorder %s12176_s4, %s12176_s4 }
 0x7b5   :  { %11626 = vmatpush3.bf16.msra.mxu0 %v11625_v49 }
 0x7b6   :  { %11620 = vmatpush3.bf16.msra.mxu1 %v11619_v44  ;;  %11627 = vmatprep.subr.bf16.mxu0 %v12201_v55  ;;  %p12183_p3 = por %p12182_p2, %p12181_p1 }
 0x7b8   :  { %p12184_p4 = pnand %p12183_p3, %p12177_p0 }
 0x7b9   :  { %11629 = vmatpush3.bf16.msra.mxu0 %v11628_v53 }
 0x7ba   :  { %11630 = vmatprep.subr.bf16.mxu0 %v12201_v55  ;;  %v11631_v55 = vpack.c.bf16 %v10473_v63, %v10472_v62 }
 0x7bd   :  { %11632 = vmatpush3.bf16.msra.mxu0 %v11631_v55 }
 0x884   :  { %v10385_v56 = vpop.f32.mrb[8].mxu1 }
 0x885   :  { %v11638_v57 = vadd.f32 %v11373_v54, %v10385_v56  ;;  %v10387_v58 = vpop.f32.mrb[9].mxu1 }
 0x886   :  { %v10388_v59 = vpop.f32.mrb[10].mxu1 }
 0x887   :  { %v10389_v60 = vpop.f32.mrb[11].mxu1  ;;  %11576 = vmatmul.mubr.msk.f32.vlgmr.msra.gmra.mrb[4].mxu1 %vm2572_vm1, %v11638_v57 }
 0x95a   :  { %v10460_v2 = vpop.f32.mrb[4].mxu1 }
 0x95b   :  { %v11635_v3 = vadd.f32 %v10460_v2, %v2652_v1  ;;  %v11577_v4 = vpop.f32.mrb[5].mxu1 }
 0x95d   :  { %v10465_v5 = vmax.f32 %v11635_v3, 0.0 }
 0x95f   :  { %11595 = vmatmul.mubr.msk.f32.vlgmr.msra.gmra.mrb[6].mxu0 %vm10481_vm2, %v10465_v5 }
 0xa32   :  { %v10551_v7 = vpop.f32.mrb[6].mxu0 }
 0xa33   :  { %v10552_v8 = vadd.f32 %v11503_v6, %v10551_v7  ;;  %v11596_v9 = vpop.f32.mrb[7].mxu0 }
 0xa35   :  { %10556 = vst.msk [vmem:[#allocation2] sm:$0x3] %vm10555_vm3, %v10552_v8 }
 0xa36   :  { %12187 = shalt.err (!%p12184_p4)
}
 0xa37   :  { %s12188_s18 = scalar_lea.hbm %s14274_s7, 32 }
 0xa38   :  { %p12189_p5 = scmp.ne.s32.totalorder %s14274_s7, %s12188_s18  ;;  %p12192_p6 = scmp.lt.u32.totalorder %s12188_s18, %s14274_s7 }
 0xa3a   :  { %p12194_p7 = pnand %p12192_p6, %p12189_p5 }
 0xa3c   :  { %12197 = shalt.err (!%p12194_p7)
}
 0xa3d   :  { %10566 = dma.vmem_to_hbm [thread:$0]  %s10564_s5, 32, %s14274_s7, [#allocation3]  }
 0xa3e   :  { %12198 = dma.done.wait [#allocation3], 32  }
 0xa3f   :  { %12199 = vsyncadd [#allocation3], 4294967264 }
 0xa40   :  { %10570 = vsyncpa [#allocation3], 1 }

</bundles_post_ra>
